<compile_context>
chip_gen: v6e
topology: v6e:2x2x1
jax: 0.10.0
libtpu: 0.0.40
codegen_flags: <defaults>
</compile_context>

<pallas_src>
import functools

import jax
import jax.numpy as jnp
from jax.experimental import pallas as pl
from jax.experimental.pallas import tpu as pltpu


# ----------------------------------------------------------------------------
# Pallas kernels
# ----------------------------------------------------------------------------
def _conv_fused_kernel(*refs, act, fuse):
    """o = epilogue( A @ W + bias ).

    W already has the BN scale folded in, bias is the folded BN shift.
    A / W / extra are bf16; accumulation and epilogue math are fp32.
    fuse == "add_relu": o = relu(y + extra)      (ResBlock tail)
    fuse == "mul":      o = act(y) * extra       (attention-mask apply)
    """
    if fuse is None:
        a_ref, w_ref, b_ref, o_ref = refs
        e = None
    else:
        a_ref, w_ref, b_ref, e_ref, o_ref = refs
        e = e_ref[...].astype(jnp.float32)

    y = jnp.dot(a_ref[...], w_ref[...], preferred_element_type=jnp.float32)
    y = y + b_ref[...]
    if act == "relu":
        y = jnp.maximum(y, 0.0)
    elif act == "sigmoid":
        y = jax.nn.sigmoid(y)
    if fuse == "add_relu":
        y = jnp.maximum(y + e, 0.0)
    elif fuse == "mul":
        y = y * e
    o_ref[...] = y.astype(o_ref.dtype)


def _head_kernel(x_ref, p_ref, o_ref):
    """AdaptiveAvgPool2d((1,1)) -> grouped AvgPool1d (pool matrix) -> log_softmax."""
    x = x_ref[...].astype(jnp.float32)                 # (N, HW, C)
    pooled = jnp.sum(x, axis=1) * (1.0 / x.shape[1])   # (N, C) adaptive avg pool
    grp = jnp.dot(pooled, p_ref[...],                  # (N, cate) grouped average
                  preferred_element_type=jnp.float32)
    m = jnp.max(grp, axis=-1, keepdims=True)
    y = grp - m
    lse = jnp.log(jnp.sum(jnp.exp(y), axis=-1, keepdims=True))
    o_ref[...] = y - lse                               # log_softmax


# ----------------------------------------------------------------------------
# Pallas wrappers
# ----------------------------------------------------------------------------
def _round_up(x, m):
    return ((x + m - 1) // m) * m


def fused_matmul(a, w, bias, extra=None, act="none", fuse=None,
                 out_dtype=jnp.bfloat16):
    """a: (M, K) bf16 patches, w: (K, N) bf16 BN-folded weights, bias: (N,) f32,
    extra: optional (M, N) residual / mask-target tensor fused into the epilogue."""
    M, K = a.shape
    N = w.shape[1]
    Mp = _round_up(M, 8)
    if Mp != M:
        a = jnp.pad(a, ((0, Mp - M), (0, 0)))
        if extra is not None:
            extra = jnp.pad(extra, ((0, Mp - M), (0, 0)))

    # Right-size the row tile: tiny late layers (M=8/32) get a single full block,
    # the big early layers (M=512) get a 2-step "parallel" grid (megacore on v7x).
    if Mp % 256 == 0 and Mp > 256:
        tm = 256
    elif Mp % 128 == 0 and Mp > 128:
        tm = 128
    else:
        tm = Mp

    bias2 = bias.reshape(1, N).astype(jnp.float32)

    in_specs = [
        pl.BlockSpec((tm, K), lambda i: (i, 0)),
        pl.BlockSpec((K, N), lambda i: (0, 0)),
        pl.BlockSpec((1, N), lambda i: (0, 0)),
    ]
    args = [a, w, bias2]
    if extra is not None:
        in_specs.append(pl.BlockSpec((tm, N), lambda i: (i, 0)))
        args.append(extra)

    out = pl.pallas_call(
        functools.partial(_conv_fused_kernel, act=act, fuse=fuse),
        out_shape=jax.ShapeDtypeStruct((Mp, N), out_dtype),
        grid_spec=pltpu.PrefetchScalarGridSpec(
            num_scalar_prefetch=0,
            grid=(Mp // tm,),
            in_specs=in_specs,
            out_specs=pl.BlockSpec((tm, N), lambda i: (i, 0)),
        ),
        compiler_params=pltpu.CompilerParams(dimension_semantics=("parallel",)),
    )(*args)
    if Mp != M:
        out = out[:M]
    return out


# ----------------------------------------------------------------------------
# JAX glue: im2col, conv+BN+act, maxpool
# ----------------------------------------------------------------------------
def im2col(x, kh, kw, stride, pad):
    n, h, w, c = x.shape
    xp = jnp.pad(x, ((0, 0), (pad, pad), (pad, pad), (0, 0)))
    ho = (h + 2 * pad - kh) // stride + 1
    wo = (w + 2 * pad - kw) // stride + 1
    cols = []
    for i in range(kh):
        for j in range(kw):
            cols.append(xp[:, i:i + stride * ho:stride, j:j + stride * wo:stride, :])
    patches = jnp.concatenate(cols, axis=-1)           # (N, Ho, Wo, kh*kw*C)
    return patches.reshape(n * ho * wo, kh * kw * c), ho, wo


def conv_bn_act(x, w, conv_bias, bn, stride, pad, act, extra=None, fuse=None):
    """Conv2d + BatchNorm2d (eval mode, folded into W/bias) + activation, plus an
    optionally fused residual-add-ReLU or attention-mask multiply epilogue."""
    kh, kw, cin, cout = w.shape
    n = x.shape[0]
    gamma, beta, mean, var = bn
    s = gamma / jnp.sqrt(var + 1e-5)
    bias = (conv_bias - mean) * s + beta
    wm = (w.reshape(kh * kw * cin, cout) * s[None, :]).astype(jnp.bfloat16)

    if kh == 1 and kw == 1:
        # 1x1 conv: no im2col, just a (strided) spatial subsample + reshape.
        xs = x[:, ::stride, ::stride, :] if stride > 1 else x
        ho, wo = xs.shape[1], xs.shape[2]
        patches = xs.reshape(n * ho * wo, cin)
    else:
        # TODO(synk): move the kh*kw tap expansion into the kernel grid to avoid the
        # im2col HBM round trip for the 3x3 convs (needs element-offset BlockSpecs).
        patches, ho, wo = im2col(x, kh, kw, stride, pad)

    e2 = None if extra is None else extra.reshape(n * ho * wo, cout)
    out = fused_matmul(patches, wm, bias, e2, act=act, fuse=fuse)
    return out.reshape(n, ho, wo, cout)


def maxpool2x2_ceil(x):
    """MaxPool2d(kernel=2, stride=2, ceil_mode=True)."""
    n, h, w, c = x.shape
    hp = -(-h // 2) * 2
    wp = -(-w // 2) * 2
    x = jnp.pad(x, ((0, 0), (0, hp - h), (0, wp - w), (0, 0)),
                constant_values=-jnp.inf)
    x = x.reshape(n, hp // 2, 2, wp // 2, 2, c)
    return x.max(axis=(2, 4))


# ----------------------------------------------------------------------------
# Model building blocks
# ----------------------------------------------------------------------------
def res_block(x, blk):
    cout = blk["w1"].shape[-1]
    z = jnp.zeros((cout,), jnp.float32)
    left = conv_bn_act(x, blk["w1"], z, blk["bn1"], blk["stride"], 1, "relu")
    if "wsc" in blk:
        sc = conv_bn_act(x, blk["wsc"], z, blk["bnsc"], blk["stride"], 0, "none")
    else:
        sc = x
    # second conv with the residual add + ReLU fused into its epilogue
    return conv_bn_act(left, blk["w2"], z, blk["bn2"], 1, 1, "none",
                       extra=sc, fuse="add_relu")


def att_gen_apply(x, p, target):
    """Attention mask generator; the mask * target multiply is fused into the
    sigmoid conv's epilogue (no separate elementwise kernel)."""
    h = conv_bn_act(x, p["w1"], p["b1"], p["bn1"], 1, 0, "relu")
    return conv_bn_act(h, p["w2"], p["b2"], p["bn2"], 1, 1, "sigmoid",
                       extra=target, fuse="mul")


def output_layer(x, p):
    cout = p["w"].shape[-1]
    z = jnp.zeros((cout,), jnp.float32)
    return conv_bn_act(x, p["w"], z, p["bn"], 1, 1, "relu")


def single_task_net_forward(x_nchw, params, task_cate=16):
    x = jnp.transpose(x_nchw, (0, 2, 3, 1)).astype(jnp.bfloat16)   # NCHW -> NHWC

    c1 = params["conv1"]
    x = conv_bn_act(x, c1["w"], jnp.zeros((c1["w"].shape[-1],), jnp.float32),
                    c1["bn"], 3, 2, "relu")

    sb = []
    cur = x
    for blk in params["res"]:
        cur = res_block(cur, blk)
        sb.append(cur)

    # a_i = mask_i * sb[2i+1] is fused into the attention generators.
    a1 = att_gen_apply(sb[0], params["att"][0], sb[1])
    a1 = maxpool2x2_ceil(output_layer(a1, params["out"][0]))

    a2 = att_gen_apply(jnp.concatenate([sb[2], a1], axis=-1), params["att"][1], sb[3])
    a2 = maxpool2x2_ceil(output_layer(a2, params["out"][1]))

    a3 = att_gen_apply(jnp.concatenate([sb[4], a2], axis=-1), params["att"][2], sb[5])
    a3 = maxpool2x2_ceil(output_layer(a3, params["out"][2]))

    a4 = att_gen_apply(jnp.concatenate([sb[6], a3], axis=-1), params["att"][3], sb[7])

    # Head: AdaptiveAvgPool2d((1,1)) -> AvgPool1d(k=C/cate) -> log_softmax  (one kernel)
    n, h, w, c = a4.shape
    group = c // task_cate
    pool_mat = jnp.repeat(jnp.eye(task_cate, dtype=jnp.float32) / group,
                          group, axis=0)                           # (C, cate)
    x3 = a4.reshape(n, h * w, c)
    pred = pl.pallas_call(
        _head_kernel,
        out_shape=jax.ShapeDtypeStruct((n, task_cate), jnp.float32),
    )(x3, pool_mat)
    return pred


# ----------------------------------------------------------------------------
# Deterministic parameter initialization
# ----------------------------------------------------------------------------
class KeyGen:
    def __init__(self, key):
        self.key = key

    def __call__(self):
        self.key, sub = jax.random.split(self.key)
        return sub


def conv_w(key, kh, kw, cin, cout):
    return 0.1 * jax.random.normal(key, (kh, kw, cin, cout), jnp.float32)


def bn_p(key, c):
    k1, k2, k3, k4 = jax.random.split(key, 4)
    gamma = 1.0 + 0.1 * jax.random.normal(k1, (c,), jnp.float32)
    beta = 0.1 * jax.random.normal(k2, (c,), jnp.float32)
    mean = 0.1 * jax.random.normal(k3, (c,), jnp.float32)
    var = 1.0 + 0.1 * jax.random.uniform(k4, (c,), jnp.float32)
    return (gamma, beta, mean, var)


def init_params(key):
    kg = KeyGen(key)
    p = {}
    # conv1: Conv2d(1, 16, k=7, s=3, p=2, bias=False) + BN + ReLU
    p["conv1"] = dict(w=conv_w(kg(), 7, 7, 1, 16), bn=bn_p(kg(), 16))

    # ResBlocks 1..8
    res_cfg = [(16, 16, 1), (16, 16, 1), (16, 32, 2), (32, 32, 1),
               (32, 64, 2), (64, 64, 1), (64, 128, 2), (128, 128, 1)]
    p["res"] = []
    for cin, cout, s in res_cfg:
        blk = dict(stride=s,
                   w1=conv_w(kg(), 3, 3, cin, cout), bn1=bn_p(kg(), cout),
                   w2=conv_w(kg(), 3, 3, cout, cout), bn2=bn_p(kg(), cout))
        if s != 1 or cin != cout:
            blk["wsc"] = conv_w(kg(), 1, 1, cin, cout)
            blk["bnsc"] = bn_p(kg(), cout)
        p["res"].append(blk)

    # attention mask generators
    att_cfg = [(16, 8, 16), (64, 16, 32), (128, 32, 64), (256, 64, 128)]
    p["att"] = []
    for cin, mid, cout in att_cfg:
        p["att"].append(dict(
            w1=conv_w(kg(), 1, 1, cin, mid),
            b1=0.1 * jax.random.normal(kg(), (mid,), jnp.float32),
            bn1=bn_p(kg(), mid),
            w2=conv_w(kg(), 3, 3, mid, cout),
            b2=0.1 * jax.random.normal(kg(), (cout,), jnp.float32),
            bn2=bn_p(kg(), cout)))

    # output layers
    out_cfg = [(16, 32), (32, 64), (64, 128)]
    p["out"] = []
    for cin, cout in out_cfg:
        p["out"].append(dict(w=conv_w(kg(), 3, 3, cin, cout), bn=bn_p(kg(), cout)))
    return p


# ----------------------------------------------------------------------------
# Main
# ----------------------------------------------------------------------------
if __name__ == "__main__":
    key = jax.random.PRNGKey(0)
    k_params, k_x = jax.random.split(key)
    params = init_params(k_params)

    # Input: NCHW like PyTorch, 1 channel.  49x49 -> 16x16 after the stride-3 stem.
    x = jax.random.normal(k_x, (2, 1, 49, 49), jnp.float32)

    fwd = jax.jit(lambda inp: single_task_net_forward(inp, params, task_cate=16))
    pred = fwd(x)
    jax.block_until_ready(pred)

    assert pred.shape == (2, 16)
    # log_softmax rows sum (in prob space) to ~1
    assert jnp.allclose(jnp.sum(jnp.exp(pred), axis=1), 1.0, atol=1e-4)
    print("KERNEL_OK")
</pallas_src>

<mosaic_0001>
module attributes {stable_mosaic.version = 11 : i64} {
  func.func @_conv_fused_kernel(%arg0: i32, %arg1: memref<256x49xbf16, #tpu.memory_space<vmem>>, %arg2: memref<49x16xbf16, #tpu.memory_space<vmem>>, %arg3: memref<1x16xf32, #tpu.memory_space<vmem>>, %arg4: memref<256x16xbf16, #tpu.memory_space<vmem>>) attributes {dimension_semantics = [#tpu.dimension_semantics<parallel>], iteration_bounds = array<i64: 2>, scalar_prefetch = 0 : i64, scratch_operands = 0 : i64, tpu.core_type = #tpu.core_type<tc>, window_params = [{transform_indices = @transform_0, window_bounds = array<i64: 256, 49>}, {pipeline_mode = #tpu.pipeline_mode<synchronous>, transform_indices = @transform_1, window_bounds = array<i64: 49, 16>}, {pipeline_mode = #tpu.pipeline_mode<synchronous>, transform_indices = @transform_2, window_bounds = array<i64: 1, 16>}, {transform_indices = @transform_3, window_bounds = array<i64: 256, 16>}]} {
    %c0 = arith.constant 0 : index
    %c0_0 = arith.constant 0 : index
    %0 = vector.load %arg1[%c0, %c0_0] : memref<256x49xbf16, #tpu.memory_space<vmem>>, vector<256x49xbf16>
    %c0_1 = arith.constant 0 : index
    %c0_2 = arith.constant 0 : index
    %1 = vector.load %arg2[%c0_1, %c0_2] : memref<49x16xbf16, #tpu.memory_space<vmem>>, vector<49x16xbf16>
    %cst = arith.constant dense<0.000000e+00> : vector<256x16xf32>
    %2 = tpu.matmul %0, %1, %cst {dimension_numbers = #tpu.dot_dimension_numbers<[1], [0], [0], [1], [0, 0, 1, 1], [], []>} : vector<256x49xbf16>, vector<49x16xbf16>, vector<256x16xf32> -> vector<256x16xf32>
    %c0_3 = arith.constant 0 : index
    %c0_4 = arith.constant 0 : index
    %3 = vector.load %arg3[%c0_3, %c0_4] : memref<1x16xf32, #tpu.memory_space<vmem>>, vector<1x16xf32>
    %4 = vector.broadcast %3 : vector<1x16xf32> to vector<256x16xf32>
    %5 = arith.addf %2, %4 : vector<256x16xf32>
    %cst_5 = arith.constant 0.000000e+00 : f32
    %6 = vector.broadcast %cst_5 : f32 to vector<256x16xf32>
    %7 = arith.maximumf %5, %6 : vector<256x16xf32>
    %8 = arith.truncf %7 : vector<256x16xf32> to vector<256x16xbf16>
    %c0_6 = arith.constant 0 : index
    %c0_7 = arith.constant 0 : index
    %9 = vector.load %arg4[%c0_6, %c0_7] : memref<256x16xbf16, #tpu.memory_space<vmem>>, vector<256x16xbf16>
    tpu.vector_store %arg4[%c0_6, %c0_7], %8 {strides = array<i32>} : memref<256x16xbf16, #tpu.memory_space<vmem>>, vector<256x16xbf16>,
    return
  }
  func.func @transform_0(%arg0: i32) -> (i32, i32) {
    %c0_i32 = arith.constant 0 : i32
    %c0_i32_0 = arith.constant 0 : i32
    return %arg0, %c0_i32 : i32, i32
  }
  func.func @transform_1(%arg0: i32) -> (i32, i32) {
    %c0_i32 = arith.constant 0 : i32
    %c0_i32_0 = arith.constant 0 : i32
    %c0_i32_1 = arith.constant 0 : i32
    return %c0_i32, %c0_i32_0 : i32, i32
  }
  func.func @transform_2(%arg0: i32) -> (i32, i32) {
    %c0_i32 = arith.constant 0 : i32
    %c0_i32_0 = arith.constant 0 : i32
    %c0_i32_1 = arith.constant 0 : i32
    return %c0_i32, %c0_i32_0 : i32, i32
  }
  func.func @transform_3(%arg0: i32) -> (i32, i32) {
    %c0_i32 = arith.constant 0 : i32
    %c0_i32_0 = arith.constant 0 : i32
    return %arg0, %c0_i32 : i32, i32
  }
}

module attributes {stable_mosaic.version = 11 : i64} {
  func.func @_conv_fused_kernel(%arg0: i32, %arg1: memref<256x144xbf16, #tpu.memory_space<vmem>>, %arg2: memref<144x16xbf16, #tpu.memory_space<vmem>>, %arg3: memref<1x16xf32, #tpu.memory_space<vmem>>, %arg4: memref<256x16xbf16, #tpu.memory_space<vmem>>) attributes {dimension_semantics = [#tpu.dimension_semantics<parallel>], iteration_bounds = array<i64: 2>, scalar_prefetch = 0 : i64, scratch_operands = 0 : i64, tpu.core_type = #tpu.core_type<tc>, window_params = [{transform_indices = @transform_0, window_bounds = array<i64: 256, 144>}, {pipeline_mode = #tpu.pipeline_mode<synchronous>, transform_indices = @transform_1, window_bounds = array<i64: 144, 16>}, {pipeline_mode = #tpu.pipeline_mode<synchronous>, transform_indices = @transform_2, window_bounds = array<i64: 1, 16>}, {transform_indices = @transform_3, window_bounds = array<i64: 256, 16>}]} {
    %c0 = arith.constant 0 : index
    %c0_0 = arith.constant 0 : index
    %0 = vector.load %arg1[%c0, %c0_0] : memref<256x144xbf16, #tpu.memory_space<vmem>>, vector<256x144xbf16>
    %c0_1 = arith.constant 0 : index
    %c0_2 = arith.constant 0 : index
    %1 = vector.load %arg2[%c0_1, %c0_2] : memref<144x16xbf16, #tpu.memory_space<vmem>>, vector<144x16xbf16>
    %cst = arith.constant dense<0.000000e+00> : vector<256x16xf32>
    %2 = tpu.matmul %0, %1, %cst {dimension_numbers = #tpu.dot_dimension_numbers<[1], [0], [0], [1], [0, 0, 1, 1], [], []>} : vector<256x144xbf16>, vector<144x16xbf16>, vector<256x16xf32> -> vector<256x16xf32>
    %c0_3 = arith.constant 0 : index
    %c0_4 = arith.constant 0 : index
    %3 = vector.load %arg3[%c0_3, %c0_4] : memref<1x16xf32, #tpu.memory_space<vmem>>, vector<1x16xf32>
    %4 = vector.broadcast %3 : vector<1x16xf32> to vector<256x16xf32>
    %5 = arith.addf %2, %4 : vector<256x16xf32>
    %cst_5 = arith.constant 0.000000e+00 : f32
    %6 = vector.broadcast %cst_5 : f32 to vector<256x16xf32>
    %7 = arith.maximumf %5, %6 : vector<256x16xf32>
    %8 = arith.truncf %7 : vector<256x16xf32> to vector<256x16xbf16>
    %c0_6 = arith.constant 0 : index
    %c0_7 = arith.constant 0 : index
    %9 = vector.load %arg4[%c0_6, %c0_7] : memref<256x16xbf16, #tpu.memory_space<vmem>>, vector<256x16xbf16>
    tpu.vector_store %arg4[%c0_6, %c0_7], %8 {strides = array<i32>} : memref<256x16xbf16, #tpu.memory_space<vmem>>, vector<256x16xbf16>,
    return
  }
  func.func @transform_0(%arg0: i32) -> (i32, i32) {
    %c0_i32 = arith.constant 0 : i32
    %c0_i32_0 = arith.constant 0 : i32
    return %arg0, %c0_i32 : i32, i32
  }
  func.func @transform_1(%arg0: i32) -> (i32, i32) {
    %c0_i32 = arith.constant 0 : i32
    %c0_i32_0 = arith.constant 0 : i32
    %c0_i32_1 = arith.constant 0 : i32
    return %c0_i32, %c0_i32_0 : i32, i32
  }
  func.func @transform_2(%arg0: i32) -> (i32, i32) {
    %c0_i32 = arith.constant 0 : i32
    %c0_i32_0 = arith.constant 0 : i32
    %c0_i32_1 = arith.constant 0 : i32
    return %c0_i32, %c0_i32_0 : i32, i32
  }
  func.func @transform_3(%arg0: i32) -> (i32, i32) {
    %c0_i32 = arith.constant 0 : i32
    %c0_i32_0 = arith.constant 0 : i32
    return %arg0, %c0_i32 : i32, i32
  }
}

module attributes {stable_mosaic.version = 11 : i64} {
  func.func @_conv_fused_kernel(%arg0: i32, %arg1: memref<256x144xbf16, #tpu.memory_space<vmem>>, %arg2: memref<144x16xbf16, #tpu.memory_space<vmem>>, %arg3: memref<1x16xf32, #tpu.memory_space<vmem>>, %arg4: memref<256x16xbf16, #tpu.memory_space<vmem>>, %arg5: memref<256x16xbf16, #tpu.memory_space<vmem>>) attributes {dimension_semantics = [#tpu.dimension_semantics<parallel>], iteration_bounds = array<i64: 2>, scalar_prefetch = 0 : i64, scratch_operands = 0 : i64, tpu.core_type = #tpu.core_type<tc>, window_params = [{transform_indices = @transform_0, window_bounds = array<i64: 256, 144>}, {pipeline_mode = #tpu.pipeline_mode<synchronous>, transform_indices = @transform_1, window_bounds = array<i64: 144, 16>}, {pipeline_mode = #tpu.pipeline_mode<synchronous>, transform_indices = @transform_2, window_bounds = array<i64: 1, 16>}, {transform_indices = @transform_3, window_bounds = array<i64: 256, 16>}, {transform_indices = @transform_4, window_bounds = array<i64: 256, 16>}]} {
    %c0 = arith.constant 0 : index
    %c0_0 = arith.constant 0 : index
    %0 = vector.load %arg4[%c0, %c0_0] : memref<256x16xbf16, #tpu.memory_space<vmem>>, vector<256x16xbf16>
    %1 = arith.extf %0 : vector<256x16xbf16> to vector<256x16xf32>
    %c0_1 = arith.constant 0 : index
    %c0_2 = arith.constant 0 : index
    %2 = vector.load %arg1[%c0_1, %c0_2] : memref<256x144xbf16, #tpu.memory_space<vmem>>, vector<256x144xbf16>
    %c0_3 = arith.constant 0 : index
    %c0_4 = arith.constant 0 : index
    %3 = vector.load %arg2[%c0_3, %c0_4] : memref<144x16xbf16, #tpu.memory_space<vmem>>, vector<144x16xbf16>
    %cst = arith.constant dense<0.000000e+00> : vector<256x16xf32>
    %4 = tpu.matmul %2, %3, %cst {dimension_numbers = #tpu.dot_dimension_numbers<[1], [0], [0], [1], [0, 0, 1, 1], [], []>} : vector<256x144xbf16>, vector<144x16xbf16>, vector<256x16xf32> -> vector<256x16xf32>
    %c0_5 = arith.constant 0 : index
    %c0_6 = arith.constant 0 : index
    %5 = vector.load %arg3[%c0_5, %c0_6] : memref<1x16xf32, #tpu.memory_space<vmem>>, vector<1x16xf32>
    %6 = vector.broadcast %5 : vector<1x16xf32> to vector<256x16xf32>
    %7 = arith.addf %4, %6 : vector<256x16xf32>
    %8 = arith.addf %7, %1 : vector<256x16xf32>
    %cst_7 = arith.constant 0.000000e+00 : f32
    %9 = vector.broadcast %cst_7 : f32 to vector<256x16xf32>
    %10 = arith.maximumf %8, %9 : vector<256x16xf32>
    %11 = arith.truncf %10 : vector<256x16xf32> to vector<256x16xbf16>
    %c0_8 = arith.constant 0 : index
    %c0_9 = arith.constant 0 : index
    %12 = vector.load %arg5[%c0_8, %c0_9] : memref<256x16xbf16, #tpu.memory_space<vmem>>, vector<256x16xbf16>
    tpu.vector_store %arg5[%c0_8, %c0_9], %11 {strides = array<i32>} : memref<256x16xbf16, #tpu.memory_space<vmem>>, vector<256x16xbf16>,
    return
  }
  func.func @transform_0(%arg0: i32) -> (i32, i32) {
    %c0_i32 = arith.constant 0 : i32
    %c0_i32_0 = arith.constant 0 : i32
    return %arg0, %c0_i32 : i32, i32
  }
  func.func @transform_1(%arg0: i32) -> (i32, i32) {
    %c0_i32 = arith.constant 0 : i32
    %c0_i32_0 = arith.constant 0 : i32
    %c0_i32_1 = arith.constant 0 : i32
    return %c0_i32, %c0_i32_0 : i32, i32
  }
  func.func @transform_2(%arg0: i32) -> (i32, i32) {
    %c0_i32 = arith.constant 0 : i32
    %c0_i32_0 = arith.constant 0 : i32
    %c0_i32_1 = arith.constant 0 : i32
    return %c0_i32, %c0_i32_0 : i32, i32
  }
  func.func @transform_3(%arg0: i32) -> (i32, i32) {
    %c0_i32 = arith.constant 0 : i32
    %c0_i32_0 = arith.constant 0 : i32
    return %arg0, %c0_i32 : i32, i32
  }
  func.func @transform_4(%arg0: i32) -> (i32, i32) {
    %c0_i32 = arith.constant 0 : i32
    %c0_i32_0 = arith.constant 0 : i32
    return %arg0, %c0_i32 : i32, i32
  }
}

module attributes {stable_mosaic.version = 11 : i64} {
  func.func @_conv_fused_kernel(%arg0: i32, %arg1: memref<128x144xbf16, #tpu.memory_space<vmem>>, %arg2: memref<144x32xbf16, #tpu.memory_space<vmem>>, %arg3: memref<1x32xf32, #tpu.memory_space<vmem>>, %arg4: memref<128x32xbf16, #tpu.memory_space<vmem>>) attributes {dimension_semantics = [#tpu.dimension_semantics<parallel>], iteration_bounds = array<i64: 1>, scalar_prefetch = 0 : i64, scratch_operands = 0 : i64, tpu.core_type = #tpu.core_type<tc>, window_params = [{transform_indices = @transform_0, window_bounds = array<i64: 128, 144>}, {pipeline_mode = #tpu.pipeline_mode<synchronous>, transform_indices = @transform_1, window_bounds = array<i64: 144, 32>}, {pipeline_mode = #tpu.pipeline_mode<synchronous>, transform_indices = @transform_2, window_bounds = array<i64: 1, 32>}, {transform_indices = @transform_3, window_bounds = array<i64: 128, 32>}]} {
    %c0 = arith.constant 0 : index
    %c0_0 = arith.constant 0 : index
    %0 = vector.load %arg1[%c0, %c0_0] : memref<128x144xbf16, #tpu.memory_space<vmem>>, vector<128x144xbf16>
    %c0_1 = arith.constant 0 : index
    %c0_2 = arith.constant 0 : index
    %1 = vector.load %arg2[%c0_1, %c0_2] : memref<144x32xbf16, #tpu.memory_space<vmem>>, vector<144x32xbf16>
    %cst = arith.constant dense<0.000000e+00> : vector<128x32xf32>
    %2 = tpu.matmul %0, %1, %cst {dimension_numbers = #tpu.dot_dimension_numbers<[1], [0], [0], [1], [0, 0, 1, 1], [], []>} : vector<128x144xbf16>, vector<144x32xbf16>, vector<128x32xf32> -> vector<128x32xf32>
    %c0_3 = arith.constant 0 : index
    %c0_4 = arith.constant 0 : index
    %3 = vector.load %arg3[%c0_3, %c0_4] : memref<1x32xf32, #tpu.memory_space<vmem>>, vector<1x32xf32>
    %4 = vector.broadcast %3 : vector<1x32xf32> to vector<128x32xf32>
    %5 = arith.addf %2, %4 : vector<128x32xf32>
    %cst_5 = arith.constant 0.000000e+00 : f32
    %6 = vector.broadcast %cst_5 : f32 to vector<128x32xf32>
    %7 = arith.maximumf %5, %6 : vector<128x32xf32>
    %8 = arith.truncf %7 : vector<128x32xf32> to vector<128x32xbf16>
    %c0_6 = arith.constant 0 : index
    %c0_7 = arith.constant 0 : index
    %9 = vector.load %arg4[%c0_6, %c0_7] : memref<128x32xbf16, #tpu.memory_space<vmem>>, vector<128x32xbf16>
    tpu.vector_store %arg4[%c0_6, %c0_7], %8 {strides = array<i32>} : memref<128x32xbf16, #tpu.memory_space<vmem>>, vector<128x32xbf16>,
    return
  }
  func.func @transform_0(%arg0: i32) -> (i32, i32) {
    %c0_i32 = arith.constant 0 : i32
    %c0_i32_0 = arith.constant 0 : i32
    return %arg0, %c0_i32 : i32, i32
  }
  func.func @transform_1(%arg0: i32) -> (i32, i32) {
    %c0_i32 = arith.constant 0 : i32
    %c0_i32_0 = arith.constant 0 : i32
    %c0_i32_1 = arith.constant 0 : i32
    return %c0_i32, %c0_i32_0 : i32, i32
  }
  func.func @transform_2(%arg0: i32) -> (i32, i32) {
    %c0_i32 = arith.constant 0 : i32
    %c0_i32_0 = arith.constant 0 : i32
    %c0_i32_1 = arith.constant 0 : i32
    return %c0_i32, %c0_i32_0 : i32, i32
  }
  func.func @transform_3(%arg0: i32) -> (i32, i32) {
    %c0_i32 = arith.constant 0 : i32
    %c0_i32_0 = arith.constant 0 : i32
    return %arg0, %c0_i32 : i32, i32
  }
}

module attributes {stable_mosaic.version = 11 : i64} {
  func.func @_conv_fused_kernel(%arg0: i32, %arg1: memref<128x16xbf16, #tpu.memory_space<vmem>>, %arg2: memref<16x32xbf16, #tpu.memory_space<vmem>>, %arg3: memref<1x32xf32, #tpu.memory_space<vmem>>, %arg4: memref<128x32xbf16, #tpu.memory_space<vmem>>) attributes {dimension_semantics = [#tpu.dimension_semantics<parallel>], iteration_bounds = array<i64: 1>, scalar_prefetch = 0 : i64, scratch_operands = 0 : i64, tpu.core_type = #tpu.core_type<tc>, window_params = [{transform_indices = @transform_0, window_bounds = array<i64: 128, 16>}, {pipeline_mode = #tpu.pipeline_mode<synchronous>, transform_indices = @transform_1, window_bounds = array<i64: 16, 32>}, {pipeline_mode = #tpu.pipeline_mode<synchronous>, transform_indices = @transform_2, window_bounds = array<i64: 1, 32>}, {transform_indices = @transform_3, window_bounds = array<i64: 128, 32>}]} {
    %c0 = arith.constant 0 : index
    %c0_0 = arith.constant 0 : index
    %0 = vector.load %arg1[%c0, %c0_0] : memref<128x16xbf16, #tpu.memory_space<vmem>>, vector<128x16xbf16>
    %c0_1 = arith.constant 0 : index
    %c0_2 = arith.constant 0 : index
    %1 = vector.load %arg2[%c0_1, %c0_2] : memref<16x32xbf16, #tpu.memory_space<vmem>>, vector<16x32xbf16>
    %cst = arith.constant dense<0.000000e+00> : vector<128x32xf32>
    %2 = tpu.matmul %0, %1, %cst {dimension_numbers = #tpu.dot_dimension_numbers<[1], [0], [0], [1], [0, 0, 1, 1], [], []>} : vector<128x16xbf16>, vector<16x32xbf16>, vector<128x32xf32> -> vector<128x32xf32>
    %c0_3 = arith.constant 0 : index
    %c0_4 = arith.constant 0 : index
    %3 = vector.load %arg3[%c0_3, %c0_4] : memref<1x32xf32, #tpu.memory_space<vmem>>, vector<1x32xf32>
    %4 = vector.broadcast %3 : vector<1x32xf32> to vector<128x32xf32>
    %5 = arith.addf %2, %4 : vector<128x32xf32>
    %6 = arith.truncf %5 : vector<128x32xf32> to vector<128x32xbf16>
    %c0_5 = arith.constant 0 : index
    %c0_6 = arith.constant 0 : index
    %7 = vector.load %arg4[%c0_5, %c0_6] : memref<128x32xbf16, #tpu.memory_space<vmem>>, vector<128x32xbf16>
    tpu.vector_store %arg4[%c0_5, %c0_6], %6 {strides = array<i32>} : memref<128x32xbf16, #tpu.memory_space<vmem>>, vector<128x32xbf16>,
    return
  }
  func.func @transform_0(%arg0: i32) -> (i32, i32) {
    %c0_i32 = arith.constant 0 : i32
    %c0_i32_0 = arith.constant 0 : i32
    return %arg0, %c0_i32 : i32, i32
  }
  func.func @transform_1(%arg0: i32) -> (i32, i32) {
    %c0_i32 = arith.constant 0 : i32
    %c0_i32_0 = arith.constant 0 : i32
    %c0_i32_1 = arith.constant 0 : i32
    return %c0_i32, %c0_i32_0 : i32, i32
  }
  func.func @transform_2(%arg0: i32) -> (i32, i32) {
    %c0_i32 = arith.constant 0 : i32
    %c0_i32_0 = arith.constant 0 : i32
    %c0_i32_1 = arith.constant 0 : i32
    return %c0_i32, %c0_i32_0 : i32, i32
  }
  func.func @transform_3(%arg0: i32) -> (i32, i32) {
    %c0_i32 = arith.constant 0 : i32
    %c0_i32_0 = arith.constant 0 : i32
    return %arg0, %c0_i32 : i32, i32
  }
}

module attributes {stable_mosaic.version = 11 : i64} {
  func.func @_conv_fused_kernel(%arg0: i32, %arg1: memref<128x288xbf16, #tpu.memory_space<vmem>>, %arg2: memref<288x32xbf16, #tpu.memory_space<vmem>>, %arg3: memref<1x32xf32, #tpu.memory_space<vmem>>, %arg4: memref<128x32xbf16, #tpu.memory_space<vmem>>, %arg5: memref<128x32xbf16, #tpu.memory_space<vmem>>) attributes {dimension_semantics = [#tpu.dimension_semantics<parallel>], iteration_bounds = array<i64: 1>, scalar_prefetch = 0 : i64, scratch_operands = 0 : i64, tpu.core_type = #tpu.core_type<tc>, window_params = [{transform_indices = @transform_0, window_bounds = array<i64: 128, 288>}, {pipeline_mode = #tpu.pipeline_mode<synchronous>, transform_indices = @transform_1, window_bounds = array<i64: 288, 32>}, {pipeline_mode = #tpu.pipeline_mode<synchronous>, transform_indices = @transform_2, window_bounds = array<i64: 1, 32>}, {transform_indices = @transform_3, window_bounds = array<i64: 128, 32>}, {transform_indices = @transform_4, window_bounds = array<i64: 128, 32>}]} {
    %c0 = arith.constant 0 : index
    %c0_0 = arith.constant 0 : index
    %0 = vector.load %arg4[%c0, %c0_0] : memref<128x32xbf16, #tpu.memory_space<vmem>>, vector<128x32xbf16>
    %1 = arith.extf %0 : vector<128x32xbf16> to vector<128x32xf32>
    %c0_1 = arith.constant 0 : index
    %c0_2 = arith.constant 0 : index
    %2 = vector.load %arg1[%c0_1, %c0_2] : memref<128x288xbf16, #tpu.memory_space<vmem>>, vector<128x288xbf16>
    %c0_3 = arith.constant 0 : index
    %c0_4 = arith.constant 0 : index
    %3 = vector.load %arg2[%c0_3, %c0_4] : memref<288x32xbf16, #tpu.memory_space<vmem>>, vector<288x32xbf16>
    %cst = arith.constant dense<0.000000e+00> : vector<128x32xf32>
    %4 = tpu.matmul %2, %3, %cst {dimension_numbers = #tpu.dot_dimension_numbers<[1], [0], [0], [1], [0, 0, 1, 1], [], []>} : vector<128x288xbf16>, vector<288x32xbf16>, vector<128x32xf32> -> vector<128x32xf32>
    %c0_5 = arith.constant 0 : index
    %c0_6 = arith.constant 0 : index
    %5 = vector.load %arg3[%c0_5, %c0_6] : memref<1x32xf32, #tpu.memory_space<vmem>>, vector<1x32xf32>
    %6 = vector.broadcast %5 : vector<1x32xf32> to vector<128x32xf32>
    %7 = arith.addf %4, %6 : vector<128x32xf32>
    %8 = arith.addf %7, %1 : vector<128x32xf32>
    %cst_7 = arith.constant 0.000000e+00 : f32
    %9 = vector.broadcast %cst_7 : f32 to vector<128x32xf32>
    %10 = arith.maximumf %8, %9 : vector<128x32xf32>
    %11 = arith.truncf %10 : vector<128x32xf32> to vector<128x32xbf16>
    %c0_8 = arith.constant 0 : index
    %c0_9 = arith.constant 0 : index
    %12 = vector.load %arg5[%c0_8, %c0_9] : memref<128x32xbf16, #tpu.memory_space<vmem>>, vector<128x32xbf16>
    tpu.vector_store %arg5[%c0_8, %c0_9], %11 {strides = array<i32>} : memref<128x32xbf16, #tpu.memory_space<vmem>>, vector<128x32xbf16>,
    return
  }
  func.func @transform_0(%arg0: i32) -> (i32, i32) {
    %c0_i32 = arith.constant 0 : i32
    %c0_i32_0 = arith.constant 0 : i32
    return %arg0, %c0_i32 : i32, i32
  }
  func.func @transform_1(%arg0: i32) -> (i32, i32) {
    %c0_i32 = arith.constant 0 : i32
    %c0_i32_0 = arith.constant 0 : i32
    %c0_i32_1 = arith.constant 0 : i32
    return %c0_i32, %c0_i32_0 : i32, i32
  }
  func.func @transform_2(%arg0: i32) -> (i32, i32) {
    %c0_i32 = arith.constant 0 : i32
    %c0_i32_0 = arith.constant 0 : i32
    %c0_i32_1 = arith.constant 0 : i32
    return %c0_i32, %c0_i32_0 : i32, i32
  }
  func.func @transform_3(%arg0: i32) -> (i32, i32) {
    %c0_i32 = arith.constant 0 : i32
    %c0_i32_0 = arith.constant 0 : i32
    return %arg0, %c0_i32 : i32, i32
  }
  func.func @transform_4(%arg0: i32) -> (i32, i32) {
    %c0_i32 = arith.constant 0 : i32
    %c0_i32_0 = arith.constant 0 : i32
    return %arg0, %c0_i32 : i32, i32
  }
}

module attributes {stable_mosaic.version = 11 : i64} {
  func.func @_conv_fused_kernel(%arg0: i32, %arg1: memref<128x288xbf16, #tpu.memory_space<vmem>>, %arg2: memref<288x32xbf16, #tpu.memory_space<vmem>>, %arg3: memref<1x32xf32, #tpu.memory_space<vmem>>, %arg4: memref<128x32xbf16, #tpu.memory_space<vmem>>) attributes {dimension_semantics = [#tpu.dimension_semantics<parallel>], iteration_bounds = array<i64: 1>, scalar_prefetch = 0 : i64, scratch_operands = 0 : i64, tpu.core_type = #tpu.core_type<tc>, window_params = [{transform_indices = @transform_0, window_bounds = array<i64: 128, 288>}, {pipeline_mode = #tpu.pipeline_mode<synchronous>, transform_indices = @transform_1, window_bounds = array<i64: 288, 32>}, {pipeline_mode = #tpu.pipeline_mode<synchronous>, transform_indices = @transform_2, window_bounds = array<i64: 1, 32>}, {transform_indices = @transform_3, window_bounds = array<i64: 128, 32>}]} {
    %c0 = arith.constant 0 : index
    %c0_0 = arith.constant 0 : index
    %0 = vector.load %arg1[%c0, %c0_0] : memref<128x288xbf16, #tpu.memory_space<vmem>>, vector<128x288xbf16>
    %c0_1 = arith.constant 0 : index
    %c0_2 = arith.constant 0 : index
    %1 = vector.load %arg2[%c0_1, %c0_2] : memref<288x32xbf16, #tpu.memory_space<vmem>>, vector<288x32xbf16>
    %cst = arith.constant dense<0.000000e+00> : vector<128x32xf32>
    %2 = tpu.matmul %0, %1, %cst {dimension_numbers = #tpu.dot_dimension_numbers<[1], [0], [0], [1], [0, 0, 1, 1], [], []>} : vector<128x288xbf16>, vector<288x32xbf16>, vector<128x32xf32> -> vector<128x32xf32>
    %c0_3 = arith.constant 0 : index
    %c0_4 = arith.constant 0 : index
    %3 = vector.load %arg3[%c0_3, %c0_4] : memref<1x32xf32, #tpu.memory_space<vmem>>, vector<1x32xf32>
    %4 = vector.broadcast %3 : vector<1x32xf32> to vector<128x32xf32>
    %5 = arith.addf %2, %4 : vector<128x32xf32>
    %cst_5 = arith.constant 0.000000e+00 : f32
    %6 = vector.broadcast %cst_5 : f32 to vector<128x32xf32>
    %7 = arith.maximumf %5, %6 : vector<128x32xf32>
    %8 = arith.truncf %7 : vector<128x32xf32> to vector<128x32xbf16>
    %c0_6 = arith.constant 0 : index
    %c0_7 = arith.constant 0 : index
    %9 = vector.load %arg4[%c0_6, %c0_7] : memref<128x32xbf16, #tpu.memory_space<vmem>>, vector<128x32xbf16>
    tpu.vector_store %arg4[%c0_6, %c0_7], %8 {strides = array<i32>} : memref<128x32xbf16, #tpu.memory_space<vmem>>, vector<128x32xbf16>,
    return
  }
  func.func @transform_0(%arg0: i32) -> (i32, i32) {
    %c0_i32 = arith.constant 0 : i32
    %c0_i32_0 = arith.constant 0 : i32
    return %arg0, %c0_i32 : i32, i32
  }
  func.func @transform_1(%arg0: i32) -> (i32, i32) {
    %c0_i32 = arith.constant 0 : i32
    %c0_i32_0 = arith.constant 0 : i32
    %c0_i32_1 = arith.constant 0 : i32
    return %c0_i32, %c0_i32_0 : i32, i32
  }
  func.func @transform_2(%arg0: i32) -> (i32, i32) {
    %c0_i32 = arith.constant 0 : i32
    %c0_i32_0 = arith.constant 0 : i32
    %c0_i32_1 = arith.constant 0 : i32
    return %c0_i32, %c0_i32_0 : i32, i32
  }
  func.func @transform_3(%arg0: i32) -> (i32, i32) {
    %c0_i32 = arith.constant 0 : i32
    %c0_i32_0 = arith.constant 0 : i32
    return %arg0, %c0_i32 : i32, i32
  }
}

module attributes {stable_mosaic.version = 11 : i64} {
  func.func @_conv_fused_kernel(%arg0: i32, %arg1: memref<32x288xbf16, #tpu.memory_space<vmem>>, %arg2: memref<288x64xbf16, #tpu.memory_space<vmem>>, %arg3: memref<1x64xf32, #tpu.memory_space<vmem>>, %arg4: memref<32x64xbf16, #tpu.memory_space<vmem>>) attributes {dimension_semantics = [#tpu.dimension_semantics<parallel>], iteration_bounds = array<i64: 1>, scalar_prefetch = 0 : i64, scratch_operands = 0 : i64, tpu.core_type = #tpu.core_type<tc>, window_params = [{transform_indices = @transform_0, window_bounds = array<i64: 32, 288>}, {pipeline_mode = #tpu.pipeline_mode<synchronous>, transform_indices = @transform_1, window_bounds = array<i64: 288, 64>}, {pipeline_mode = #tpu.pipeline_mode<synchronous>, transform_indices = @transform_2, window_bounds = array<i64: 1, 64>}, {transform_indices = @transform_3, window_bounds = array<i64: 32, 64>}]} {
    %c0 = arith.constant 0 : index
    %c0_0 = arith.constant 0 : index
    %0 = vector.load %arg1[%c0, %c0_0] : memref<32x288xbf16, #tpu.memory_space<vmem>>, vector<32x288xbf16>
    %c0_1 = arith.constant 0 : index
    %c0_2 = arith.constant 0 : index
    %1 = vector.load %arg2[%c0_1, %c0_2] : memref<288x64xbf16, #tpu.memory_space<vmem>>, vector<288x64xbf16>
    %cst = arith.constant dense<0.000000e+00> : vector<32x64xf32>
    %2 = tpu.matmul %0, %1, %cst {dimension_numbers = #tpu.dot_dimension_numbers<[1], [0], [0], [1], [0, 0, 1, 1], [], []>} : vector<32x288xbf16>, vector<288x64xbf16>, vector<32x64xf32> -> vector<32x64xf32>
    %c0_3 = arith.constant 0 : index
    %c0_4 = arith.constant 0 : index
    %3 = vector.load %arg3[%c0_3, %c0_4] : memref<1x64xf32, #tpu.memory_space<vmem>>, vector<1x64xf32>
    %4 = vector.broadcast %3 : vector<1x64xf32> to vector<32x64xf32>
    %5 = arith.addf %2, %4 : vector<32x64xf32>
    %cst_5 = arith.constant 0.000000e+00 : f32
    %6 = vector.broadcast %cst_5 : f32 to vector<32x64xf32>
    %7 = arith.maximumf %5, %6 : vector<32x64xf32>
    %8 = arith.truncf %7 : vector<32x64xf32> to vector<32x64xbf16>
    %c0_6 = arith.constant 0 : index
    %c0_7 = arith.constant 0 : index
    %9 = vector.load %arg4[%c0_6, %c0_7] : memref<32x64xbf16, #tpu.memory_space<vmem>>, vector<32x64xbf16>
    tpu.vector_store %arg4[%c0_6, %c0_7], %8 {strides = array<i32>} : memref<32x64xbf16, #tpu.memory_space<vmem>>, vector<32x64xbf16>,
    return
  }
  func.func @transform_0(%arg0: i32) -> (i32, i32) {
    %c0_i32 = arith.constant 0 : i32
    %c0_i32_0 = arith.constant 0 : i32
    return %arg0, %c0_i32 : i32, i32
  }
  func.func @transform_1(%arg0: i32) -> (i32, i32) {
    %c0_i32 = arith.constant 0 : i32
    %c0_i32_0 = arith.constant 0 : i32
    %c0_i32_1 = arith.constant 0 : i32
    return %c0_i32, %c0_i32_0 : i32, i32
  }
  func.func @transform_2(%arg0: i32) -> (i32, i32) {
    %c0_i32 = arith.constant 0 : i32
    %c0_i32_0 = arith.constant 0 : i32
    %c0_i32_1 = arith.constant 0 : i32
    return %c0_i32, %c0_i32_0 : i32, i32
  }
  func.func @transform_3(%arg0: i32) -> (i32, i32) {
    %c0_i32 = arith.constant 0 : i32
    %c0_i32_0 = arith.constant 0 : i32
    return %arg0, %c0_i32 : i32, i32
  }
}

module attributes {stable_mosaic.version = 11 : i64} {
  func.func @_conv_fused_kernel(%arg0: i32, %arg1: memref<32x32xbf16, #tpu.memory_space<vmem>>, %arg2: memref<32x64xbf16, #tpu.memory_space<vmem>>, %arg3: memref<1x64xf32, #tpu.memory_space<vmem>>, %arg4: memref<32x64xbf16, #tpu.memory_space<vmem>>) attributes {dimension_semantics = [#tpu.dimension_semantics<parallel>], iteration_bounds = array<i64: 1>, scalar_prefetch = 0 : i64, scratch_operands = 0 : i64, tpu.core_type = #tpu.core_type<tc>, window_params = [{transform_indices = @transform_0, window_bounds = array<i64: 32, 32>}, {pipeline_mode = #tpu.pipeline_mode<synchronous>, transform_indices = @transform_1, window_bounds = array<i64: 32, 64>}, {pipeline_mode = #tpu.pipeline_mode<synchronous>, transform_indices = @transform_2, window_bounds = array<i64: 1, 64>}, {transform_indices = @transform_3, window_bounds = array<i64: 32, 64>}]} {
    %c0 = arith.constant 0 : index
    %c0_0 = arith.constant 0 : index
    %0 = vector.load %arg1[%c0, %c0_0] : memref<32x32xbf16, #tpu.memory_space<vmem>>, vector<32x32xbf16>
    %c0_1 = arith.constant 0 : index
    %c0_2 = arith.constant 0 : index
    %1 = vector.load %arg2[%c0_1, %c0_2] : memref<32x64xbf16, #tpu.memory_space<vmem>>, vector<32x64xbf16>
    %cst = arith.constant dense<0.000000e+00> : vector<32x64xf32>
    %2 = tpu.matmul %0, %1, %cst {dimension_numbers = #tpu.dot_dimension_numbers<[1], [0], [0], [1], [0, 0, 1, 1], [], []>} : vector<32x32xbf16>, vector<32x64xbf16>, vector<32x64xf32> -> vector<32x64xf32>
    %c0_3 = arith.constant 0 : index
    %c0_4 = arith.constant 0 : index
    %3 = vector.load %arg3[%c0_3, %c0_4] : memref<1x64xf32, #tpu.memory_space<vmem>>, vector<1x64xf32>
    %4 = vector.broadcast %3 : vector<1x64xf32> to vector<32x64xf32>
    %5 = arith.addf %2, %4 : vector<32x64xf32>
    %6 = arith.truncf %5 : vector<32x64xf32> to vector<32x64xbf16>
    %c0_5 = arith.constant 0 : index
    %c0_6 = arith.constant 0 : index
    %7 = vector.load %arg4[%c0_5, %c0_6] : memref<32x64xbf16, #tpu.memory_space<vmem>>, vector<32x64xbf16>
    tpu.vector_store %arg4[%c0_5, %c0_6], %6 {strides = array<i32>} : memref<32x64xbf16, #tpu.memory_space<vmem>>, vector<32x64xbf16>,
    return
  }
  func.func @transform_0(%arg0: i32) -> (i32, i32) {
    %c0_i32 = arith.constant 0 : i32
    %c0_i32_0 = arith.constant 0 : i32
    return %arg0, %c0_i32 : i32, i32
  }
  func.func @transform_1(%arg0: i32) -> (i32, i32) {
    %c0_i32 = arith.constant 0 : i32
    %c0_i32_0 = arith.constant 0 : i32
    %c0_i32_1 = arith.constant 0 : i32
    return %c0_i32, %c0_i32_0 : i32, i32
  }
  func.func @transform_2(%arg0: i32) -> (i32, i32) {
    %c0_i32 = arith.constant 0 : i32
    %c0_i32_0 = arith.constant 0 : i32
    %c0_i32_1 = arith.constant 0 : i32
    return %c0_i32, %c0_i32_0 : i32, i32
  }
  func.func @transform_3(%arg0: i32) -> (i32, i32) {
    %c0_i32 = arith.constant 0 : i32
    %c0_i32_0 = arith.constant 0 : i32
    return %arg0, %c0_i32 : i32, i32
  }
}

module attributes {stable_mosaic.version = 11 : i64} {
  func.func @_conv_fused_kernel(%arg0: i32, %arg1: memref<32x576xbf16, #tpu.memory_space<vmem>>, %arg2: memref<576x64xbf16, #tpu.memory_space<vmem>>, %arg3: memref<1x64xf32, #tpu.memory_space<vmem>>, %arg4: memref<32x64xbf16, #tpu.memory_space<vmem>>, %arg5: memref<32x64xbf16, #tpu.memory_space<vmem>>) attributes {dimension_semantics = [#tpu.dimension_semantics<parallel>], iteration_bounds = array<i64: 1>, scalar_prefetch = 0 : i64, scratch_operands = 0 : i64, tpu.core_type = #tpu.core_type<tc>, window_params = [{transform_indices = @transform_0, window_bounds = array<i64: 32, 576>}, {pipeline_mode = #tpu.pipeline_mode<synchronous>, transform_indices = @transform_1, window_bounds = array<i64: 576, 64>}, {pipeline_mode = #tpu.pipeline_mode<synchronous>, transform_indices = @transform_2, window_bounds = array<i64: 1, 64>}, {transform_indices = @transform_3, window_bounds = array<i64: 32, 64>}, {transform_indices = @transform_4, window_bounds = array<i64: 32, 64>}]} {
    %c0 = arith.constant 0 : index
    %c0_0 = arith.constant 0 : index
    %0 = vector.load %arg4[%c0, %c0_0] : memref<32x64xbf16, #tpu.memory_space<vmem>>, vector<32x64xbf16>
    %1 = arith.extf %0 : vector<32x64xbf16> to vector<32x64xf32>
    %c0_1 = arith.constant 0 : index
    %c0_2 = arith.constant 0 : index
    %2 = vector.load %arg1[%c0_1, %c0_2] : memref<32x576xbf16, #tpu.memory_space<vmem>>, vector<32x576xbf16>
    %c0_3 = arith.constant 0 : index
    %c0_4 = arith.constant 0 : index
    %3 = vector.load %arg2[%c0_3, %c0_4] : memref<576x64xbf16, #tpu.memory_space<vmem>>, vector<576x64xbf16>
    %cst = arith.constant dense<0.000000e+00> : vector<32x64xf32>
    %4 = tpu.matmul %2, %3, %cst {dimension_numbers = #tpu.dot_dimension_numbers<[1], [0], [0], [1], [0, 0, 1, 1], [], []>} : vector<32x576xbf16>, vector<576x64xbf16>, vector<32x64xf32> -> vector<32x64xf32>
    %c0_5 = arith.constant 0 : index
    %c0_6 = arith.constant 0 : index
    %5 = vector.load %arg3[%c0_5, %c0_6] : memref<1x64xf32, #tpu.memory_space<vmem>>, vector<1x64xf32>
    %6 = vector.broadcast %5 : vector<1x64xf32> to vector<32x64xf32>
    %7 = arith.addf %4, %6 : vector<32x64xf32>
    %8 = arith.addf %7, %1 : vector<32x64xf32>
    %cst_7 = arith.constant 0.000000e+00 : f32
    %9 = vector.broadcast %cst_7 : f32 to vector<32x64xf32>
    %10 = arith.maximumf %8, %9 : vector<32x64xf32>
    %11 = arith.truncf %10 : vector<32x64xf32> to vector<32x64xbf16>
    %c0_8 = arith.constant 0 : index
    %c0_9 = arith.constant 0 : index
    %12 = vector.load %arg5[%c0_8, %c0_9] : memref<32x64xbf16, #tpu.memory_space<vmem>>, vector<32x64xbf16>
    tpu.vector_store %arg5[%c0_8, %c0_9], %11 {strides = array<i32>} : memref<32x64xbf16, #tpu.memory_space<vmem>>, vector<32x64xbf16>,
    return
  }
  func.func @transform_0(%arg0: i32) -> (i32, i32) {
    %c0_i32 = arith.constant 0 : i32
    %c0_i32_0 = arith.constant 0 : i32
    return %arg0, %c0_i32 : i32, i32
  }
  func.func @transform_1(%arg0: i32) -> (i32, i32) {
    %c0_i32 = arith.constant 0 : i32
    %c0_i32_0 = arith.constant 0 : i32
    %c0_i32_1 = arith.constant 0 : i32
    return %c0_i32, %c0_i32_0 : i32, i32
  }
  func.func @transform_2(%arg0: i32) -> (i32, i32) {
    %c0_i32 = arith.constant 0 : i32
    %c0_i32_0 = arith.constant 0 : i32
    %c0_i32_1 = arith.constant 0 : i32
    return %c0_i32, %c0_i32_0 : i32, i32
  }
  func.func @transform_3(%arg0: i32) -> (i32, i32) {
    %c0_i32 = arith.constant 0 : i32
    %c0_i32_0 = arith.constant 0 : i32
    return %arg0, %c0_i32 : i32, i32
  }
  func.func @transform_4(%arg0: i32) -> (i32, i32) {
    %c0_i32 = arith.constant 0 : i32
    %c0_i32_0 = arith.constant 0 : i32
    return %arg0, %c0_i32 : i32, i32
  }
}

module attributes {stable_mosaic.version = 11 : i64} {
  func.func @_conv_fused_kernel(%arg0: i32, %arg1: memref<32x576xbf16, #tpu.memory_space<vmem>>, %arg2: memref<576x64xbf16, #tpu.memory_space<vmem>>, %arg3: memref<1x64xf32, #tpu.memory_space<vmem>>, %arg4: memref<32x64xbf16, #tpu.memory_space<vmem>>) attributes {dimension_semantics = [#tpu.dimension_semantics<parallel>], iteration_bounds = array<i64: 1>, scalar_prefetch = 0 : i64, scratch_operands = 0 : i64, tpu.core_type = #tpu.core_type<tc>, window_params = [{transform_indices = @transform_0, window_bounds = array<i64: 32, 576>}, {pipeline_mode = #tpu.pipeline_mode<synchronous>, transform_indices = @transform_1, window_bounds = array<i64: 576, 64>}, {pipeline_mode = #tpu.pipeline_mode<synchronous>, transform_indices = @transform_2, window_bounds = array<i64: 1, 64>}, {transform_indices = @transform_3, window_bounds = array<i64: 32, 64>}]} {
    %c0 = arith.constant 0 : index
    %c0_0 = arith.constant 0 : index
    %0 = vector.load %arg1[%c0, %c0_0] : memref<32x576xbf16, #tpu.memory_space<vmem>>, vector<32x576xbf16>
    %c0_1 = arith.constant 0 : index
    %c0_2 = arith.constant 0 : index
    %1 = vector.load %arg2[%c0_1, %c0_2] : memref<576x64xbf16, #tpu.memory_space<vmem>>, vector<576x64xbf16>
    %cst = arith.constant dense<0.000000e+00> : vector<32x64xf32>
    %2 = tpu.matmul %0, %1, %cst {dimension_numbers = #tpu.dot_dimension_numbers<[1], [0], [0], [1], [0, 0, 1, 1], [], []>} : vector<32x576xbf16>, vector<576x64xbf16>, vector<32x64xf32> -> vector<32x64xf32>
    %c0_3 = arith.constant 0 : index
    %c0_4 = arith.constant 0 : index
    %3 = vector.load %arg3[%c0_3, %c0_4] : memref<1x64xf32, #tpu.memory_space<vmem>>, vector<1x64xf32>
    %4 = vector.broadcast %3 : vector<1x64xf32> to vector<32x64xf32>
    %5 = arith.addf %2, %4 : vector<32x64xf32>
    %cst_5 = arith.constant 0.000000e+00 : f32
    %6 = vector.broadcast %cst_5 : f32 to vector<32x64xf32>
    %7 = arith.maximumf %5, %6 : vector<32x64xf32>
    %8 = arith.truncf %7 : vector<32x64xf32> to vector<32x64xbf16>
    %c0_6 = arith.constant 0 : index
    %c0_7 = arith.constant 0 : index
    %9 = vector.load %arg4[%c0_6, %c0_7] : memref<32x64xbf16, #tpu.memory_space<vmem>>, vector<32x64xbf16>
    tpu.vector_store %arg4[%c0_6, %c0_7], %8 {strides = array<i32>} : memref<32x64xbf16, #tpu.memory_space<vmem>>, vector<32x64xbf16>,
    return
  }
  func.func @transform_0(%arg0: i32) -> (i32, i32) {
    %c0_i32 = arith.constant 0 : i32
    %c0_i32_0 = arith.constant 0 : i32
    return %arg0, %c0_i32 : i32, i32
  }
  func.func @transform_1(%arg0: i32) -> (i32, i32) {
    %c0_i32 = arith.constant 0 : i32
    %c0_i32_0 = arith.constant 0 : i32
    %c0_i32_1 = arith.constant 0 : i32
    return %c0_i32, %c0_i32_0 : i32, i32
  }
  func.func @transform_2(%arg0: i32) -> (i32, i32) {
    %c0_i32 = arith.constant 0 : i32
    %c0_i32_0 = arith.constant 0 : i32
    %c0_i32_1 = arith.constant 0 : i32
    return %c0_i32, %c0_i32_0 : i32, i32
  }
  func.func @transform_3(%arg0: i32) -> (i32, i32) {
    %c0_i32 = arith.constant 0 : i32
    %c0_i32_0 = arith.constant 0 : i32
    return %arg0, %c0_i32 : i32, i32
  }
}

module attributes {stable_mosaic.version = 11 : i64} {
  func.func @_conv_fused_kernel(%arg0: i32, %arg1: memref<8x576xbf16, #tpu.memory_space<vmem>>, %arg2: memref<576x128xbf16, #tpu.memory_space<vmem>>, %arg3: memref<1x128xf32, #tpu.memory_space<vmem>>, %arg4: memref<8x128xbf16, #tpu.memory_space<vmem>>) attributes {dimension_semantics = [#tpu.dimension_semantics<parallel>], iteration_bounds = array<i64: 1>, scalar_prefetch = 0 : i64, scratch_operands = 0 : i64, tpu.core_type = #tpu.core_type<tc>, window_params = [{transform_indices = @transform_0, window_bounds = array<i64: 8, 576>}, {pipeline_mode = #tpu.pipeline_mode<synchronous>, transform_indices = @transform_1, window_bounds = array<i64: 576, 128>}, {pipeline_mode = #tpu.pipeline_mode<synchronous>, transform_indices = @transform_2, window_bounds = array<i64: 1, 128>}, {transform_indices = @transform_3, window_bounds = array<i64: 8, 128>}]} {
    %c0 = arith.constant 0 : index
    %c0_0 = arith.constant 0 : index
    %0 = vector.load %arg1[%c0, %c0_0] : memref<8x576xbf16, #tpu.memory_space<vmem>>, vector<8x576xbf16>
    %c0_1 = arith.constant 0 : index
    %c0_2 = arith.constant 0 : index
    %1 = vector.load %arg2[%c0_1, %c0_2] : memref<576x128xbf16, #tpu.memory_space<vmem>>, vector<576x128xbf16>
    %cst = arith.constant dense<0.000000e+00> : vector<8x128xf32>
    %2 = tpu.matmul %0, %1, %cst {dimension_numbers = #tpu.dot_dimension_numbers<[1], [0], [0], [1], [0, 0, 1, 1], [], []>} : vector<8x576xbf16>, vector<576x128xbf16>, vector<8x128xf32> -> vector<8x128xf32>
    %c0_3 = arith.constant 0 : index
    %c0_4 = arith.constant 0 : index
    %3 = vector.load %arg3[%c0_3, %c0_4] : memref<1x128xf32, #tpu.memory_space<vmem>>, vector<1x128xf32>
    %4 = vector.broadcast %3 : vector<1x128xf32> to vector<8x128xf32>
    %5 = arith.addf %2, %4 : vector<8x128xf32>
    %cst_5 = arith.constant 0.000000e+00 : f32
    %6 = vector.broadcast %cst_5 : f32 to vector<8x128xf32>
    %7 = arith.maximumf %5, %6 : vector<8x128xf32>
    %8 = arith.truncf %7 : vector<8x128xf32> to vector<8x128xbf16>
    %c0_6 = arith.constant 0 : index
    %c0_7 = arith.constant 0 : index
    %9 = vector.load %arg4[%c0_6, %c0_7] : memref<8x128xbf16, #tpu.memory_space<vmem>>, vector<8x128xbf16>
    tpu.vector_store %arg4[%c0_6, %c0_7], %8 {strides = array<i32>} : memref<8x128xbf16, #tpu.memory_space<vmem>>, vector<8x128xbf16>,
    return
  }
  func.func @transform_0(%arg0: i32) -> (i32, i32) {
    %c0_i32 = arith.constant 0 : i32
    %c0_i32_0 = arith.constant 0 : i32
    return %arg0, %c0_i32 : i32, i32
  }
  func.func @transform_1(%arg0: i32) -> (i32, i32) {
    %c0_i32 = arith.constant 0 : i32
    %c0_i32_0 = arith.constant 0 : i32
    %c0_i32_1 = arith.constant 0 : i32
    return %c0_i32, %c0_i32_0 : i32, i32
  }
  func.func @transform_2(%arg0: i32) -> (i32, i32) {
    %c0_i32 = arith.constant 0 : i32
    %c0_i32_0 = arith.constant 0 : i32
    %c0_i32_1 = arith.constant 0 : i32
    return %c0_i32, %c0_i32_0 : i32, i32
  }
  func.func @transform_3(%arg0: i32) -> (i32, i32) {
    %c0_i32 = arith.constant 0 : i32
    %c0_i32_0 = arith.constant 0 : i32
    return %arg0, %c0_i32 : i32, i32
  }
}

module attributes {stable_mosaic.version = 11 : i64} {
  func.func @_conv_fused_kernel(%arg0: i32, %arg1: memref<8x64xbf16, #tpu.memory_space<vmem>>, %arg2: memref<64x128xbf16, #tpu.memory_space<vmem>>, %arg3: memref<1x128xf32, #tpu.memory_space<vmem>>, %arg4: memref<8x128xbf16, #tpu.memory_space<vmem>>) attributes {dimension_semantics = [#tpu.dimension_semantics<parallel>], iteration_bounds = array<i64: 1>, scalar_prefetch = 0 : i64, scratch_operands = 0 : i64, tpu.core_type = #tpu.core_type<tc>, window_params = [{transform_indices = @transform_0, window_bounds = array<i64: 8, 64>}, {pipeline_mode = #tpu.pipeline_mode<synchronous>, transform_indices = @transform_1, window_bounds = array<i64: 64, 128>}, {pipeline_mode = #tpu.pipeline_mode<synchronous>, transform_indices = @transform_2, window_bounds = array<i64: 1, 128>}, {transform_indices = @transform_3, window_bounds = array<i64: 8, 128>}]} {
    %c0 = arith.constant 0 : index
    %c0_0 = arith.constant 0 : index
    %0 = vector.load %arg1[%c0, %c0_0] : memref<8x64xbf16, #tpu.memory_space<vmem>>, vector<8x64xbf16>
    %c0_1 = arith.constant 0 : index
    %c0_2 = arith.constant 0 : index
    %1 = vector.load %arg2[%c0_1, %c0_2] : memref<64x128xbf16, #tpu.memory_space<vmem>>, vector<64x128xbf16>
    %cst = arith.constant dense<0.000000e+00> : vector<8x128xf32>
    %2 = tpu.matmul %0, %1, %cst {dimension_numbers = #tpu.dot_dimension_numbers<[1], [0], [0], [1], [0, 0, 1, 1], [], []>} : vector<8x64xbf16>, vector<64x128xbf16>, vector<8x128xf32> -> vector<8x128xf32>
    %c0_3 = arith.constant 0 : index
    %c0_4 = arith.constant 0 : index
    %3 = vector.load %arg3[%c0_3, %c0_4] : memref<1x128xf32, #tpu.memory_space<vmem>>, vector<1x128xf32>
    %4 = vector.broadcast %3 : vector<1x128xf32> to vector<8x128xf32>
    %5 = arith.addf %2, %4 : vector<8x128xf32>
    %6 = arith.truncf %5 : vector<8x128xf32> to vector<8x128xbf16>
    %c0_5 = arith.constant 0 : index
    %c0_6 = arith.constant 0 : index
    %7 = vector.load %arg4[%c0_5, %c0_6] : memref<8x128xbf16, #tpu.memory_space<vmem>>, vector<8x128xbf16>
    tpu.vector_store %arg4[%c0_5, %c0_6], %6 {strides = array<i32>} : memref<8x128xbf16, #tpu.memory_space<vmem>>, vector<8x128xbf16>,
    return
  }
  func.func @transform_0(%arg0: i32) -> (i32, i32) {
    %c0_i32 = arith.constant 0 : i32
    %c0_i32_0 = arith.constant 0 : i32
    return %arg0, %c0_i32 : i32, i32
  }
  func.func @transform_1(%arg0: i32) -> (i32, i32) {
    %c0_i32 = arith.constant 0 : i32
    %c0_i32_0 = arith.constant 0 : i32
    %c0_i32_1 = arith.constant 0 : i32
    return %c0_i32, %c0_i32_0 : i32, i32
  }
  func.func @transform_2(%arg0: i32) -> (i32, i32) {
    %c0_i32 = arith.constant 0 : i32
    %c0_i32_0 = arith.constant 0 : i32
    %c0_i32_1 = arith.constant 0 : i32
    return %c0_i32, %c0_i32_0 : i32, i32
  }
  func.func @transform_3(%arg0: i32) -> (i32, i32) {
    %c0_i32 = arith.constant 0 : i32
    %c0_i32_0 = arith.constant 0 : i32
    return %arg0, %c0_i32 : i32, i32
  }
}

module attributes {stable_mosaic.version = 11 : i64} {
  func.func @_conv_fused_kernel(%arg0: i32, %arg1: memref<8x1152xbf16, #tpu.memory_space<vmem>>, %arg2: memref<1152x128xbf16, #tpu.memory_space<vmem>>, %arg3: memref<1x128xf32, #tpu.memory_space<vmem>>, %arg4: memref<8x128xbf16, #tpu.memory_space<vmem>>) attributes {dimension_semantics = [#tpu.dimension_semantics<parallel>], iteration_bounds = array<i64: 1>, scalar_prefetch = 0 : i64, scratch_operands = 0 : i64, tpu.core_type = #tpu.core_type<tc>, window_params = [{transform_indices = @transform_0, window_bounds = array<i64: 8, 1152>}, {pipeline_mode = #tpu.pipeline_mode<synchronous>, transform_indices = @transform_1, window_bounds = array<i64: 1152, 128>}, {pipeline_mode = #tpu.pipeline_mode<synchronous>, transform_indices = @transform_2, window_bounds = array<i64: 1, 128>}, {transform_indices = @transform_3, window_bounds = array<i64: 8, 128>}]} {
    %c0 = arith.constant 0 : index
    %c0_0 = arith.constant 0 : index
    %0 = vector.load %arg1[%c0, %c0_0] : memref<8x1152xbf16, #tpu.memory_space<vmem>>, vector<8x1152xbf16>
    %c0_1 = arith.constant 0 : index
    %c0_2 = arith.constant 0 : index
    %1 = vector.load %arg2[%c0_1, %c0_2] : memref<1152x128xbf16, #tpu.memory_space<vmem>>, vector<1152x128xbf16>
    %cst = arith.constant dense<0.000000e+00> : vector<8x128xf32>
    %2 = tpu.matmul %0, %1, %cst {dimension_numbers = #tpu.dot_dimension_numbers<[1], [0], [0], [1], [0, 0, 1, 1], [], []>} : vector<8x1152xbf16>, vector<1152x128xbf16>, vector<8x128xf32> -> vector<8x128xf32>
    %c0_3 = arith.constant 0 : index
    %c0_4 = arith.constant 0 : index
    %3 = vector.load %arg3[%c0_3, %c0_4] : memref<1x128xf32, #tpu.memory_space<vmem>>, vector<1x128xf32>
    %4 = vector.broadcast %3 : vector<1x128xf32> to vector<8x128xf32>
    %5 = arith.addf %2, %4 : vector<8x128xf32>
    %cst_5 = arith.constant 0.000000e+00 : f32
    %6 = vector.broadcast %cst_5 : f32 to vector<8x128xf32>
    %7 = arith.maximumf %5, %6 : vector<8x128xf32>
    %8 = arith.truncf %7 : vector<8x128xf32> to vector<8x128xbf16>
    %c0_6 = arith.constant 0 : index
    %c0_7 = arith.constant 0 : index
    %9 = vector.load %arg4[%c0_6, %c0_7] : memref<8x128xbf16, #tpu.memory_space<vmem>>, vector<8x128xbf16>
    tpu.vector_store %arg4[%c0_6, %c0_7], %8 {strides = array<i32>} : memref<8x128xbf16, #tpu.memory_space<vmem>>, vector<8x128xbf16>,
    return
  }
  func.func @transform_0(%arg0: i32) -> (i32, i32) {
    %c0_i32 = arith.constant 0 : i32
    %c0_i32_0 = arith.constant 0 : i32
    return %arg0, %c0_i32 : i32, i32
  }
  func.func @transform_1(%arg0: i32) -> (i32, i32) {
    %c0_i32 = arith.constant 0 : i32
    %c0_i32_0 = arith.constant 0 : i32
    %c0_i32_1 = arith.constant 0 : i32
    return %c0_i32, %c0_i32_0 : i32, i32
  }
  func.func @transform_2(%arg0: i32) -> (i32, i32) {
    %c0_i32 = arith.constant 0 : i32
    %c0_i32_0 = arith.constant 0 : i32
    %c0_i32_1 = arith.constant 0 : i32
    return %c0_i32, %c0_i32_0 : i32, i32
  }
  func.func @transform_3(%arg0: i32) -> (i32, i32) {
    %c0_i32 = arith.constant 0 : i32
    %c0_i32_0 = arith.constant 0 : i32
    return %arg0, %c0_i32 : i32, i32
  }
}

module attributes {stable_mosaic.version = 11 : i64} {
  func.func @_conv_fused_kernel(%arg0: i32, %arg1: memref<8x1152xbf16, #tpu.memory_space<vmem>>, %arg2: memref<1152x128xbf16, #tpu.memory_space<vmem>>, %arg3: memref<1x128xf32, #tpu.memory_space<vmem>>, %arg4: memref<8x128xbf16, #tpu.memory_space<vmem>>, %arg5: memref<8x128xbf16, #tpu.memory_space<vmem>>) attributes {dimension_semantics = [#tpu.dimension_semantics<parallel>], iteration_bounds = array<i64: 1>, scalar_prefetch = 0 : i64, scratch_operands = 0 : i64, tpu.core_type = #tpu.core_type<tc>, window_params = [{transform_indices = @transform_0, window_bounds = array<i64: 8, 1152>}, {pipeline_mode = #tpu.pipeline_mode<synchronous>, transform_indices = @transform_1, window_bounds = array<i64: 1152, 128>}, {pipeline_mode = #tpu.pipeline_mode<synchronous>, transform_indices = @transform_2, window_bounds = array<i64: 1, 128>}, {transform_indices = @transform_3, window_bounds = array<i64: 8, 128>}, {transform_indices = @transform_4, window_bounds = array<i64: 8, 128>}]} {
    %c0 = arith.constant 0 : index
    %c0_0 = arith.constant 0 : index
    %0 = vector.load %arg4[%c0, %c0_0] : memref<8x128xbf16, #tpu.memory_space<vmem>>, vector<8x128xbf16>
    %1 = arith.extf %0 : vector<8x128xbf16> to vector<8x128xf32>
    %c0_1 = arith.constant 0 : index
    %c0_2 = arith.constant 0 : index
    %2 = vector.load %arg1[%c0_1, %c0_2] : memref<8x1152xbf16, #tpu.memory_space<vmem>>, vector<8x1152xbf16>
    %c0_3 = arith.constant 0 : index
    %c0_4 = arith.constant 0 : index
    %3 = vector.load %arg2[%c0_3, %c0_4] : memref<1152x128xbf16, #tpu.memory_space<vmem>>, vector<1152x128xbf16>
    %cst = arith.constant dense<0.000000e+00> : vector<8x128xf32>
    %4 = tpu.matmul %2, %3, %cst {dimension_numbers = #tpu.dot_dimension_numbers<[1], [0], [0], [1], [0, 0, 1, 1], [], []>} : vector<8x1152xbf16>, vector<1152x128xbf16>, vector<8x128xf32> -> vector<8x128xf32>
    %c0_5 = arith.constant 0 : index
    %c0_6 = arith.constant 0 : index
    %5 = vector.load %arg3[%c0_5, %c0_6] : memref<1x128xf32, #tpu.memory_space<vmem>>, vector<1x128xf32>
    %6 = vector.broadcast %5 : vector<1x128xf32> to vector<8x128xf32>
    %7 = arith.addf %4, %6 : vector<8x128xf32>
    %8 = arith.addf %7, %1 : vector<8x128xf32>
    %cst_7 = arith.constant 0.000000e+00 : f32
    %9 = vector.broadcast %cst_7 : f32 to vector<8x128xf32>
    %10 = arith.maximumf %8, %9 : vector<8x128xf32>
    %11 = arith.truncf %10 : vector<8x128xf32> to vector<8x128xbf16>
    %c0_8 = arith.constant 0 : index
    %c0_9 = arith.constant 0 : index
    %12 = vector.load %arg5[%c0_8, %c0_9] : memref<8x128xbf16, #tpu.memory_space<vmem>>, vector<8x128xbf16>
    tpu.vector_store %arg5[%c0_8, %c0_9], %11 {strides = array<i32>} : memref<8x128xbf16, #tpu.memory_space<vmem>>, vector<8x128xbf16>,
    return
  }
  func.func @transform_0(%arg0: i32) -> (i32, i32) {
    %c0_i32 = arith.constant 0 : i32
    %c0_i32_0 = arith.constant 0 : i32
    return %arg0, %c0_i32 : i32, i32
  }
  func.func @transform_1(%arg0: i32) -> (i32, i32) {
    %c0_i32 = arith.constant 0 : i32
    %c0_i32_0 = arith.constant 0 : i32
    %c0_i32_1 = arith.constant 0 : i32
    return %c0_i32, %c0_i32_0 : i32, i32
  }
  func.func @transform_2(%arg0: i32) -> (i32, i32) {
    %c0_i32 = arith.constant 0 : i32
    %c0_i32_0 = arith.constant 0 : i32
    %c0_i32_1 = arith.constant 0 : i32
    return %c0_i32, %c0_i32_0 : i32, i32
  }
  func.func @transform_3(%arg0: i32) -> (i32, i32) {
    %c0_i32 = arith.constant 0 : i32
    %c0_i32_0 = arith.constant 0 : i32
    return %arg0, %c0_i32 : i32, i32
  }
  func.func @transform_4(%arg0: i32) -> (i32, i32) {
    %c0_i32 = arith.constant 0 : i32
    %c0_i32_0 = arith.constant 0 : i32
    return %arg0, %c0_i32 : i32, i32
  }
}

module attributes {stable_mosaic.version = 11 : i64} {
  func.func @_conv_fused_kernel(%arg0: i32, %arg1: memref<256x16xbf16, #tpu.memory_space<vmem>>, %arg2: memref<16x8xbf16, #tpu.memory_space<vmem>>, %arg3: memref<1x8xf32, #tpu.memory_space<vmem>>, %arg4: memref<256x8xbf16, #tpu.memory_space<vmem>>) attributes {dimension_semantics = [#tpu.dimension_semantics<parallel>], iteration_bounds = array<i64: 2>, scalar_prefetch = 0 : i64, scratch_operands = 0 : i64, tpu.core_type = #tpu.core_type<tc>, window_params = [{transform_indices = @transform_0, window_bounds = array<i64: 256, 16>}, {pipeline_mode = #tpu.pipeline_mode<synchronous>, transform_indices = @transform_1, window_bounds = array<i64: 16, 8>}, {pipeline_mode = #tpu.pipeline_mode<synchronous>, transform_indices = @transform_2, window_bounds = array<i64: 1, 8>}, {transform_indices = @transform_3, window_bounds = array<i64: 256, 8>}]} {
    %c0 = arith.constant 0 : index
    %c0_0 = arith.constant 0 : index
    %0 = vector.load %arg1[%c0, %c0_0] : memref<256x16xbf16, #tpu.memory_space<vmem>>, vector<256x16xbf16>
    %c0_1 = arith.constant 0 : index
    %c0_2 = arith.constant 0 : index
    %1 = vector.load %arg2[%c0_1, %c0_2] : memref<16x8xbf16, #tpu.memory_space<vmem>>, vector<16x8xbf16>
    %cst = arith.constant dense<0.000000e+00> : vector<256x8xf32>
    %2 = tpu.matmul %0, %1, %cst {dimension_numbers = #tpu.dot_dimension_numbers<[1], [0], [0], [1], [0, 0, 1, 1], [], []>} : vector<256x16xbf16>, vector<16x8xbf16>, vector<256x8xf32> -> vector<256x8xf32>
    %c0_3 = arith.constant 0 : index
    %c0_4 = arith.constant 0 : index
    %3 = vector.load %arg3[%c0_3, %c0_4] : memref<1x8xf32, #tpu.memory_space<vmem>>, vector<1x8xf32>
    %4 = vector.broadcast %3 : vector<1x8xf32> to vector<256x8xf32>
    %5 = arith.addf %2, %4 : vector<256x8xf32>
    %cst_5 = arith.constant 0.000000e+00 : f32
    %6 = vector.broadcast %cst_5 : f32 to vector<256x8xf32>
    %7 = arith.maximumf %5, %6 : vector<256x8xf32>
    %8 = arith.truncf %7 : vector<256x8xf32> to vector<256x8xbf16>
    %c0_6 = arith.constant 0 : index
    %c0_7 = arith.constant 0 : index
    %9 = vector.load %arg4[%c0_6, %c0_7] : memref<256x8xbf16, #tpu.memory_space<vmem>>, vector<256x8xbf16>
    tpu.vector_store %arg4[%c0_6, %c0_7], %8 {strides = array<i32>} : memref<256x8xbf16, #tpu.memory_space<vmem>>, vector<256x8xbf16>,
    return
  }
  func.func @transform_0(%arg0: i32) -> (i32, i32) {
    %c0_i32 = arith.constant 0 : i32
    %c0_i32_0 = arith.constant 0 : i32
    return %arg0, %c0_i32 : i32, i32
  }
  func.func @transform_1(%arg0: i32) -> (i32, i32) {
    %c0_i32 = arith.constant 0 : i32
    %c0_i32_0 = arith.constant 0 : i32
    %c0_i32_1 = arith.constant 0 : i32
    return %c0_i32, %c0_i32_0 : i32, i32
  }
  func.func @transform_2(%arg0: i32) -> (i32, i32) {
    %c0_i32 = arith.constant 0 : i32
    %c0_i32_0 = arith.constant 0 : i32
    %c0_i32_1 = arith.constant 0 : i32
    return %c0_i32, %c0_i32_0 : i32, i32
  }
  func.func @transform_3(%arg0: i32) -> (i32, i32) {
    %c0_i32 = arith.constant 0 : i32
    %c0_i32_0 = arith.constant 0 : i32
    return %arg0, %c0_i32 : i32, i32
  }
}

module attributes {stable_mosaic.version = 11 : i64} {
  func.func @_conv_fused_kernel(%arg0: i32, %arg1: memref<256x72xbf16, #tpu.memory_space<vmem>>, %arg2: memref<72x16xbf16, #tpu.memory_space<vmem>>, %arg3: memref<1x16xf32, #tpu.memory_space<vmem>>, %arg4: memref<256x16xbf16, #tpu.memory_space<vmem>>, %arg5: memref<256x16xbf16, #tpu.memory_space<vmem>>) attributes {dimension_semantics = [#tpu.dimension_semantics<parallel>], iteration_bounds = array<i64: 2>, scalar_prefetch = 0 : i64, scratch_operands = 0 : i64, tpu.core_type = #tpu.core_type<tc>, window_params = [{transform_indices = @transform_0, window_bounds = array<i64: 256, 72>}, {pipeline_mode = #tpu.pipeline_mode<synchronous>, transform_indices = @transform_1, window_bounds = array<i64: 72, 16>}, {pipeline_mode = #tpu.pipeline_mode<synchronous>, transform_indices = @transform_2, window_bounds = array<i64: 1, 16>}, {transform_indices = @transform_3, window_bounds = array<i64: 256, 16>}, {transform_indices = @transform_4, window_bounds = array<i64: 256, 16>}]} {
    %c0 = arith.constant 0 : index
    %c0_0 = arith.constant 0 : index
    %0 = vector.load %arg4[%c0, %c0_0] : memref<256x16xbf16, #tpu.memory_space<vmem>>, vector<256x16xbf16>
    %1 = arith.extf %0 : vector<256x16xbf16> to vector<256x16xf32>
    %c0_1 = arith.constant 0 : index
    %c0_2 = arith.constant 0 : index
    %2 = vector.load %arg1[%c0_1, %c0_2] : memref<256x72xbf16, #tpu.memory_space<vmem>>, vector<256x72xbf16>
    %c0_3 = arith.constant 0 : index
    %c0_4 = arith.constant 0 : index
    %3 = vector.load %arg2[%c0_3, %c0_4] : memref<72x16xbf16, #tpu.memory_space<vmem>>, vector<72x16xbf16>
    %cst = arith.constant dense<0.000000e+00> : vector<256x16xf32>
    %4 = tpu.matmul %2, %3, %cst {dimension_numbers = #tpu.dot_dimension_numbers<[1], [0], [0], [1], [0, 0, 1, 1], [], []>} : vector<256x72xbf16>, vector<72x16xbf16>, vector<256x16xf32> -> vector<256x16xf32>
    %c0_5 = arith.constant 0 : index
    %c0_6 = arith.constant 0 : index
    %5 = vector.load %arg3[%c0_5, %c0_6] : memref<1x16xf32, #tpu.memory_space<vmem>>, vector<1x16xf32>
    %6 = vector.broadcast %5 : vector<1x16xf32> to vector<256x16xf32>
    %7 = arith.addf %4, %6 : vector<256x16xf32>
    %8 = arith.negf %7 : vector<256x16xf32>
    %9 = math.exp %8 : vector<256x16xf32>
    %cst_7 = arith.constant 1.000000e+00 : f32
    %10 = vector.broadcast %cst_7 : f32 to vector<256x16xf32>
    %11 = arith.addf %10, %9 : vector<256x16xf32>
    %12 = arith.divf %10, %11 : vector<256x16xf32>
    %13 = arith.mulf %12, %1 : vector<256x16xf32>
    %14 = arith.truncf %13 : vector<256x16xf32> to vector<256x16xbf16>
    %c0_8 = arith.constant 0 : index
    %c0_9 = arith.constant 0 : index
    %15 = vector.load %arg5[%c0_8, %c0_9] : memref<256x16xbf16, #tpu.memory_space<vmem>>, vector<256x16xbf16>
    tpu.vector_store %arg5[%c0_8, %c0_9], %14 {strides = array<i32>} : memref<256x16xbf16, #tpu.memory_space<vmem>>, vector<256x16xbf16>,
    return
  }
  func.func @transform_0(%arg0: i32) -> (i32, i32) {
    %c0_i32 = arith.constant 0 : i32
    %c0_i32_0 = arith.constant 0 : i32
    return %arg0, %c0_i32 : i32, i32
  }
  func.func @transform_1(%arg0: i32) -> (i32, i32) {
    %c0_i32 = arith.constant 0 : i32
    %c0_i32_0 = arith.constant 0 : i32
    %c0_i32_1 = arith.constant 0 : i32
    return %c0_i32, %c0_i32_0 : i32, i32
  }
  func.func @transform_2(%arg0: i32) -> (i32, i32) {
    %c0_i32 = arith.constant 0 : i32
    %c0_i32_0 = arith.constant 0 : i32
    %c0_i32_1 = arith.constant 0 : i32
    return %c0_i32, %c0_i32_0 : i32, i32
  }
  func.func @transform_3(%arg0: i32) -> (i32, i32) {
    %c0_i32 = arith.constant 0 : i32
    %c0_i32_0 = arith.constant 0 : i32
    return %arg0, %c0_i32 : i32, i32
  }
  func.func @transform_4(%arg0: i32) -> (i32, i32) {
    %c0_i32 = arith.constant 0 : i32
    %c0_i32_0 = arith.constant 0 : i32
    return %arg0, %c0_i32 : i32, i32
  }
}

module attributes {stable_mosaic.version = 11 : i64} {
  func.func @_conv_fused_kernel(%arg0: i32, %arg1: memref<256x144xbf16, #tpu.memory_space<vmem>>, %arg2: memref<144x32xbf16, #tpu.memory_space<vmem>>, %arg3: memref<1x32xf32, #tpu.memory_space<vmem>>, %arg4: memref<256x32xbf16, #tpu.memory_space<vmem>>) attributes {dimension_semantics = [#tpu.dimension_semantics<parallel>], iteration_bounds = array<i64: 2>, scalar_prefetch = 0 : i64, scratch_operands = 0 : i64, tpu.core_type = #tpu.core_type<tc>, window_params = [{transform_indices = @transform_0, window_bounds = array<i64: 256, 144>}, {pipeline_mode = #tpu.pipeline_mode<synchronous>, transform_indices = @transform_1, window_bounds = array<i64: 144, 32>}, {pipeline_mode = #tpu.pipeline_mode<synchronous>, transform_indices = @transform_2, window_bounds = array<i64: 1, 32>}, {transform_indices = @transform_3, window_bounds = array<i64: 256, 32>}]} {
    %c0 = arith.constant 0 : index
    %c0_0 = arith.constant 0 : index
    %0 = vector.load %arg1[%c0, %c0_0] : memref<256x144xbf16, #tpu.memory_space<vmem>>, vector<256x144xbf16>
    %c0_1 = arith.constant 0 : index
    %c0_2 = arith.constant 0 : index
    %1 = vector.load %arg2[%c0_1, %c0_2] : memref<144x32xbf16, #tpu.memory_space<vmem>>, vector<144x32xbf16>
    %cst = arith.constant dense<0.000000e+00> : vector<256x32xf32>
    %2 = tpu.matmul %0, %1, %cst {dimension_numbers = #tpu.dot_dimension_numbers<[1], [0], [0], [1], [0, 0, 1, 1], [], []>} : vector<256x144xbf16>, vector<144x32xbf16>, vector<256x32xf32> -> vector<256x32xf32>
    %c0_3 = arith.constant 0 : index
    %c0_4 = arith.constant 0 : index
    %3 = vector.load %arg3[%c0_3, %c0_4] : memref<1x32xf32, #tpu.memory_space<vmem>>, vector<1x32xf32>
    %4 = vector.broadcast %3 : vector<1x32xf32> to vector<256x32xf32>
    %5 = arith.addf %2, %4 : vector<256x32xf32>
    %cst_5 = arith.constant 0.000000e+00 : f32
    %6 = vector.broadcast %cst_5 : f32 to vector<256x32xf32>
    %7 = arith.maximumf %5, %6 : vector<256x32xf32>
    %8 = arith.truncf %7 : vector<256x32xf32> to vector<256x32xbf16>
    %c0_6 = arith.constant 0 : index
    %c0_7 = arith.constant 0 : index
    %9 = vector.load %arg4[%c0_6, %c0_7] : memref<256x32xbf16, #tpu.memory_space<vmem>>, vector<256x32xbf16>
    tpu.vector_store %arg4[%c0_6, %c0_7], %8 {strides = array<i32>} : memref<256x32xbf16, #tpu.memory_space<vmem>>, vector<256x32xbf16>,
    return
  }
  func.func @transform_0(%arg0: i32) -> (i32, i32) {
    %c0_i32 = arith.constant 0 : i32
    %c0_i32_0 = arith.constant 0 : i32
    return %arg0, %c0_i32 : i32, i32
  }
  func.func @transform_1(%arg0: i32) -> (i32, i32) {
    %c0_i32 = arith.constant 0 : i32
    %c0_i32_0 = arith.constant 0 : i32
    %c0_i32_1 = arith.constant 0 : i32
    return %c0_i32, %c0_i32_0 : i32, i32
  }
  func.func @transform_2(%arg0: i32) -> (i32, i32) {
    %c0_i32 = arith.constant 0 : i32
    %c0_i32_0 = arith.constant 0 : i32
    %c0_i32_1 = arith.constant 0 : i32
    return %c0_i32, %c0_i32_0 : i32, i32
  }
  func.func @transform_3(%arg0: i32) -> (i32, i32) {
    %c0_i32 = arith.constant 0 : i32
    %c0_i32_0 = arith.constant 0 : i32
    return %arg0, %c0_i32 : i32, i32
  }
}

module attributes {stable_mosaic.version = 11 : i64} {
  func.func @_conv_fused_kernel(%arg0: i32, %arg1: memref<128x64xbf16, #tpu.memory_space<vmem>>, %arg2: memref<64x16xbf16, #tpu.memory_space<vmem>>, %arg3: memref<1x16xf32, #tpu.memory_space<vmem>>, %arg4: memref<128x16xbf16, #tpu.memory_space<vmem>>) attributes {dimension_semantics = [#tpu.dimension_semantics<parallel>], iteration_bounds = array<i64: 1>, scalar_prefetch = 0 : i64, scratch_operands = 0 : i64, tpu.core_type = #tpu.core_type<tc>, window_params = [{transform_indices = @transform_0, window_bounds = array<i64: 128, 64>}, {pipeline_mode = #tpu.pipeline_mode<synchronous>, transform_indices = @transform_1, window_bounds = array<i64: 64, 16>}, {pipeline_mode = #tpu.pipeline_mode<synchronous>, transform_indices = @transform_2, window_bounds = array<i64: 1, 16>}, {transform_indices = @transform_3, window_bounds = array<i64: 128, 16>}]} {
    %c0 = arith.constant 0 : index
    %c0_0 = arith.constant 0 : index
    %0 = vector.load %arg1[%c0, %c0_0] : memref<128x64xbf16, #tpu.memory_space<vmem>>, vector<128x64xbf16>
    %c0_1 = arith.constant 0 : index
    %c0_2 = arith.constant 0 : index
    %1 = vector.load %arg2[%c0_1, %c0_2] : memref<64x16xbf16, #tpu.memory_space<vmem>>, vector<64x16xbf16>
    %cst = arith.constant dense<0.000000e+00> : vector<128x16xf32>
    %2 = tpu.matmul %0, %1, %cst {dimension_numbers = #tpu.dot_dimension_numbers<[1], [0], [0], [1], [0, 0, 1, 1], [], []>} : vector<128x64xbf16>, vector<64x16xbf16>, vector<128x16xf32> -> vector<128x16xf32>
    %c0_3 = arith.constant 0 : index
    %c0_4 = arith.constant 0 : index
    %3 = vector.load %arg3[%c0_3, %c0_4] : memref<1x16xf32, #tpu.memory_space<vmem>>, vector<1x16xf32>
    %4 = vector.broadcast %3 : vector<1x16xf32> to vector<128x16xf32>
    %5 = arith.addf %2, %4 : vector<128x16xf32>
    %cst_5 = arith.constant 0.000000e+00 : f32
    %6 = vector.broadcast %cst_5 : f32 to vector<128x16xf32>
    %7 = arith.maximumf %5, %6 : vector<128x16xf32>
    %8 = arith.truncf %7 : vector<128x16xf32> to vector<128x16xbf16>
    %c0_6 = arith.constant 0 : index
    %c0_7 = arith.constant 0 : index
    %9 = vector.load %arg4[%c0_6, %c0_7] : memref<128x16xbf16, #tpu.memory_space<vmem>>, vector<128x16xbf16>
    tpu.vector_store %arg4[%c0_6, %c0_7], %8 {strides = array<i32>} : memref<128x16xbf16, #tpu.memory_space<vmem>>, vector<128x16xbf16>,
    return
  }
  func.func @transform_0(%arg0: i32) -> (i32, i32) {
    %c0_i32 = arith.constant 0 : i32
    %c0_i32_0 = arith.constant 0 : i32
    return %arg0, %c0_i32 : i32, i32
  }
  func.func @transform_1(%arg0: i32) -> (i32, i32) {
    %c0_i32 = arith.constant 0 : i32
    %c0_i32_0 = arith.constant 0 : i32
    %c0_i32_1 = arith.constant 0 : i32
    return %c0_i32, %c0_i32_0 : i32, i32
  }
  func.func @transform_2(%arg0: i32) -> (i32, i32) {
    %c0_i32 = arith.constant 0 : i32
    %c0_i32_0 = arith.constant 0 : i32
    %c0_i32_1 = arith.constant 0 : i32
    return %c0_i32, %c0_i32_0 : i32, i32
  }
  func.func @transform_3(%arg0: i32) -> (i32, i32) {
    %c0_i32 = arith.constant 0 : i32
    %c0_i32_0 = arith.constant 0 : i32
    return %arg0, %c0_i32 : i32, i32
  }
}

module attributes {stable_mosaic.version = 11 : i64} {
  func.func @_conv_fused_kernel(%arg0: i32, %arg1: memref<128x288xbf16, #tpu.memory_space<vmem>>, %arg2: memref<288x64xbf16, #tpu.memory_space<vmem>>, %arg3: memref<1x64xf32, #tpu.memory_space<vmem>>, %arg4: memref<128x64xbf16, #tpu.memory_space<vmem>>) attributes {dimension_semantics = [#tpu.dimension_semantics<parallel>], iteration_bounds = array<i64: 1>, scalar_prefetch = 0 : i64, scratch_operands = 0 : i64, tpu.core_type = #tpu.core_type<tc>, window_params = [{transform_indices = @transform_0, window_bounds = array<i64: 128, 288>}, {pipeline_mode = #tpu.pipeline_mode<synchronous>, transform_indices = @transform_1, window_bounds = array<i64: 288, 64>}, {pipeline_mode = #tpu.pipeline_mode<synchronous>, transform_indices = @transform_2, window_bounds = array<i64: 1, 64>}, {transform_indices = @transform_3, window_bounds = array<i64: 128, 64>}]} {
    %c0 = arith.constant 0 : index
    %c0_0 = arith.constant 0 : index
    %0 = vector.load %arg1[%c0, %c0_0] : memref<128x288xbf16, #tpu.memory_space<vmem>>, vector<128x288xbf16>
    %c0_1 = arith.constant 0 : index
    %c0_2 = arith.constant 0 : index
    %1 = vector.load %arg2[%c0_1, %c0_2] : memref<288x64xbf16, #tpu.memory_space<vmem>>, vector<288x64xbf16>
    %cst = arith.constant dense<0.000000e+00> : vector<128x64xf32>
    %2 = tpu.matmul %0, %1, %cst {dimension_numbers = #tpu.dot_dimension_numbers<[1], [0], [0], [1], [0, 0, 1, 1], [], []>} : vector<128x288xbf16>, vector<288x64xbf16>, vector<128x64xf32> -> vector<128x64xf32>
    %c0_3 = arith.constant 0 : index
    %c0_4 = arith.constant 0 : index
    %3 = vector.load %arg3[%c0_3, %c0_4] : memref<1x64xf32, #tpu.memory_space<vmem>>, vector<1x64xf32>
    %4 = vector.broadcast %3 : vector<1x64xf32> to vector<128x64xf32>
    %5 = arith.addf %2, %4 : vector<128x64xf32>
    %cst_5 = arith.constant 0.000000e+00 : f32
    %6 = vector.broadcast %cst_5 : f32 to vector<128x64xf32>
    %7 = arith.maximumf %5, %6 : vector<128x64xf32>
    %8 = arith.truncf %7 : vector<128x64xf32> to vector<128x64xbf16>
    %c0_6 = arith.constant 0 : index
    %c0_7 = arith.constant 0 : index
    %9 = vector.load %arg4[%c0_6, %c0_7] : memref<128x64xbf16, #tpu.memory_space<vmem>>, vector<128x64xbf16>
    tpu.vector_store %arg4[%c0_6, %c0_7], %8 {strides = array<i32>} : memref<128x64xbf16, #tpu.memory_space<vmem>>, vector<128x64xbf16>,
    return
  }
  func.func @transform_0(%arg0: i32) -> (i32, i32) {
    %c0_i32 = arith.constant 0 : i32
    %c0_i32_0 = arith.constant 0 : i32
    return %arg0, %c0_i32 : i32, i32
  }
  func.func @transform_1(%arg0: i32) -> (i32, i32) {
    %c0_i32 = arith.constant 0 : i32
    %c0_i32_0 = arith.constant 0 : i32
    %c0_i32_1 = arith.constant 0 : i32
    return %c0_i32, %c0_i32_0 : i32, i32
  }
  func.func @transform_2(%arg0: i32) -> (i32, i32) {
    %c0_i32 = arith.constant 0 : i32
    %c0_i32_0 = arith.constant 0 : i32
    %c0_i32_1 = arith.constant 0 : i32
    return %c0_i32, %c0_i32_0 : i32, i32
  }
  func.func @transform_3(%arg0: i32) -> (i32, i32) {
    %c0_i32 = arith.constant 0 : i32
    %c0_i32_0 = arith.constant 0 : i32
    return %arg0, %c0_i32 : i32, i32
  }
}

module attributes {stable_mosaic.version = 11 : i64} {
  func.func @_conv_fused_kernel(%arg0: i32, %arg1: memref<128x144xbf16, #tpu.memory_space<vmem>>, %arg2: memref<144x32xbf16, #tpu.memory_space<vmem>>, %arg3: memref<1x32xf32, #tpu.memory_space<vmem>>, %arg4: memref<128x32xbf16, #tpu.memory_space<vmem>>, %arg5: memref<128x32xbf16, #tpu.memory_space<vmem>>) attributes {dimension_semantics = [#tpu.dimension_semantics<parallel>], iteration_bounds = array<i64: 1>, scalar_prefetch = 0 : i64, scratch_operands = 0 : i64, tpu.core_type = #tpu.core_type<tc>, window_params = [{transform_indices = @transform_0, window_bounds = array<i64: 128, 144>}, {pipeline_mode = #tpu.pipeline_mode<synchronous>, transform_indices = @transform_1, window_bounds = array<i64: 144, 32>}, {pipeline_mode = #tpu.pipeline_mode<synchronous>, transform_indices = @transform_2, window_bounds = array<i64: 1, 32>}, {transform_indices = @transform_3, window_bounds = array<i64: 128, 32>}, {transform_indices = @transform_4, window_bounds = array<i64: 128, 32>}]} {
    %c0 = arith.constant 0 : index
    %c0_0 = arith.constant 0 : index
    %0 = vector.load %arg4[%c0, %c0_0] : memref<128x32xbf16, #tpu.memory_space<vmem>>, vector<128x32xbf16>
    %1 = arith.extf %0 : vector<128x32xbf16> to vector<128x32xf32>
    %c0_1 = arith.constant 0 : index
    %c0_2 = arith.constant 0 : index
    %2 = vector.load %arg1[%c0_1, %c0_2] : memref<128x144xbf16, #tpu.memory_space<vmem>>, vector<128x144xbf16>
    %c0_3 = arith.constant 0 : index
    %c0_4 = arith.constant 0 : index
    %3 = vector.load %arg2[%c0_3, %c0_4] : memref<144x32xbf16, #tpu.memory_space<vmem>>, vector<144x32xbf16>
    %cst = arith.constant dense<0.000000e+00> : vector<128x32xf32>
    %4 = tpu.matmul %2, %3, %cst {dimension_numbers = #tpu.dot_dimension_numbers<[1], [0], [0], [1], [0, 0, 1, 1], [], []>} : vector<128x144xbf16>, vector<144x32xbf16>, vector<128x32xf32> -> vector<128x32xf32>
    %c0_5 = arith.constant 0 : index
    %c0_6 = arith.constant 0 : index
    %5 = vector.load %arg3[%c0_5, %c0_6] : memref<1x32xf32, #tpu.memory_space<vmem>>, vector<1x32xf32>
    %6 = vector.broadcast %5 : vector<1x32xf32> to vector<128x32xf32>
    %7 = arith.addf %4, %6 : vector<128x32xf32>
    %8 = arith.negf %7 : vector<128x32xf32>
    %9 = math.exp %8 : vector<128x32xf32>
    %cst_7 = arith.constant 1.000000e+00 : f32
    %10 = vector.broadcast %cst_7 : f32 to vector<128x32xf32>
    %11 = arith.addf %10, %9 : vector<128x32xf32>
    %12 = arith.divf %10, %11 : vector<128x32xf32>
    %13 = arith.mulf %12, %1 : vector<128x32xf32>
    %14 = arith.truncf %13 : vector<128x32xf32> to vector<128x32xbf16>
    %c0_8 = arith.constant 0 : index
    %c0_9 = arith.constant 0 : index
    %15 = vector.load %arg5[%c0_8, %c0_9] : memref<128x32xbf16, #tpu.memory_space<vmem>>, vector<128x32xbf16>
    tpu.vector_store %arg5[%c0_8, %c0_9], %14 {strides = array<i32>} : memref<128x32xbf16, #tpu.memory_space<vmem>>, vector<128x32xbf16>,
    return
  }
  func.func @transform_0(%arg0: i32) -> (i32, i32) {
    %c0_i32 = arith.constant 0 : i32
    %c0_i32_0 = arith.constant 0 : i32
    return %arg0, %c0_i32 : i32, i32
  }
  func.func @transform_1(%arg0: i32) -> (i32, i32) {
    %c0_i32 = arith.constant 0 : i32
    %c0_i32_0 = arith.constant 0 : i32
    %c0_i32_1 = arith.constant 0 : i32
    return %c0_i32, %c0_i32_0 : i32, i32
  }
  func.func @transform_2(%arg0: i32) -> (i32, i32) {
    %c0_i32 = arith.constant 0 : i32
    %c0_i32_0 = arith.constant 0 : i32
    %c0_i32_1 = arith.constant 0 : i32
    return %c0_i32, %c0_i32_0 : i32, i32
  }
  func.func @transform_3(%arg0: i32) -> (i32, i32) {
    %c0_i32 = arith.constant 0 : i32
    %c0_i32_0 = arith.constant 0 : i32
    return %arg0, %c0_i32 : i32, i32
  }
  func.func @transform_4(%arg0: i32) -> (i32, i32) {
    %c0_i32 = arith.constant 0 : i32
    %c0_i32_0 = arith.constant 0 : i32
    return %arg0, %c0_i32 : i32, i32
  }
}

module attributes {stable_mosaic.version = 11 : i64} {
  func.func @_conv_fused_kernel(%arg0: i32, %arg1: memref<32x128xbf16, #tpu.memory_space<vmem>>, %arg2: memref<128x32xbf16, #tpu.memory_space<vmem>>, %arg3: memref<1x32xf32, #tpu.memory_space<vmem>>, %arg4: memref<32x32xbf16, #tpu.memory_space<vmem>>) attributes {dimension_semantics = [#tpu.dimension_semantics<parallel>], iteration_bounds = array<i64: 1>, scalar_prefetch = 0 : i64, scratch_operands = 0 : i64, tpu.core_type = #tpu.core_type<tc>, window_params = [{transform_indices = @transform_0, window_bounds = array<i64: 32, 128>}, {pipeline_mode = #tpu.pipeline_mode<synchronous>, transform_indices = @transform_1, window_bounds = array<i64: 128, 32>}, {pipeline_mode = #tpu.pipeline_mode<synchronous>, transform_indices = @transform_2, window_bounds = array<i64: 1, 32>}, {transform_indices = @transform_3, window_bounds = array<i64: 32, 32>}]} {
    %c0 = arith.constant 0 : index
    %c0_0 = arith.constant 0 : index
    %0 = vector.load %arg1[%c0, %c0_0] : memref<32x128xbf16, #tpu.memory_space<vmem>>, vector<32x128xbf16>
    %c0_1 = arith.constant 0 : index
    %c0_2 = arith.constant 0 : index
    %1 = vector.load %arg2[%c0_1, %c0_2] : memref<128x32xbf16, #tpu.memory_space<vmem>>, vector<128x32xbf16>
    %cst = arith.constant dense<0.000000e+00> : vector<32x32xf32>
    %2 = tpu.matmul %0, %1, %cst {dimension_numbers = #tpu.dot_dimension_numbers<[1], [0], [0], [1], [0, 0, 1, 1], [], []>} : vector<32x128xbf16>, vector<128x32xbf16>, vector<32x32xf32> -> vector<32x32xf32>
    %c0_3 = arith.constant 0 : index
    %c0_4 = arith.constant 0 : index
    %3 = vector.load %arg3[%c0_3, %c0_4] : memref<1x32xf32, #tpu.memory_space<vmem>>, vector<1x32xf32>
    %4 = vector.broadcast %3 : vector<1x32xf32> to vector<32x32xf32>
    %5 = arith.addf %2, %4 : vector<32x32xf32>
    %cst_5 = arith.constant 0.000000e+00 : f32
    %6 = vector.broadcast %cst_5 : f32 to vector<32x32xf32>
    %7 = arith.maximumf %5, %6 : vector<32x32xf32>
    %8 = arith.truncf %7 : vector<32x32xf32> to vector<32x32xbf16>
    %c0_6 = arith.constant 0 : index
    %c0_7 = arith.constant 0 : index
    %9 = vector.load %arg4[%c0_6, %c0_7] : memref<32x32xbf16, #tpu.memory_space<vmem>>, vector<32x32xbf16>
    tpu.vector_store %arg4[%c0_6, %c0_7], %8 {strides = array<i32>} : memref<32x32xbf16, #tpu.memory_space<vmem>>, vector<32x32xbf16>,
    return
  }
  func.func @transform_0(%arg0: i32) -> (i32, i32) {
    %c0_i32 = arith.constant 0 : i32
    %c0_i32_0 = arith.constant 0 : i32
    return %arg0, %c0_i32 : i32, i32
  }
  func.func @transform_1(%arg0: i32) -> (i32, i32) {
    %c0_i32 = arith.constant 0 : i32
    %c0_i32_0 = arith.constant 0 : i32
    %c0_i32_1 = arith.constant 0 : i32
    return %c0_i32, %c0_i32_0 : i32, i32
  }
  func.func @transform_2(%arg0: i32) -> (i32, i32) {
    %c0_i32 = arith.constant 0 : i32
    %c0_i32_0 = arith.constant 0 : i32
    %c0_i32_1 = arith.constant 0 : i32
    return %c0_i32, %c0_i32_0 : i32, i32
  }
  func.func @transform_3(%arg0: i32) -> (i32, i32) {
    %c0_i32 = arith.constant 0 : i32
    %c0_i32_0 = arith.constant 0 : i32
    return %arg0, %c0_i32 : i32, i32
  }
}

module attributes {stable_mosaic.version = 11 : i64} {
  func.func @_conv_fused_kernel(%arg0: i32, %arg1: memref<32x288xbf16, #tpu.memory_space<vmem>>, %arg2: memref<288x64xbf16, #tpu.memory_space<vmem>>, %arg3: memref<1x64xf32, #tpu.memory_space<vmem>>, %arg4: memref<32x64xbf16, #tpu.memory_space<vmem>>, %arg5: memref<32x64xbf16, #tpu.memory_space<vmem>>) attributes {dimension_semantics = [#tpu.dimension_semantics<parallel>], iteration_bounds = array<i64: 1>, scalar_prefetch = 0 : i64, scratch_operands = 0 : i64, tpu.core_type = #tpu.core_type<tc>, window_params = [{transform_indices = @transform_0, window_bounds = array<i64: 32, 288>}, {pipeline_mode = #tpu.pipeline_mode<synchronous>, transform_indices = @transform_1, window_bounds = array<i64: 288, 64>}, {pipeline_mode = #tpu.pipeline_mode<synchronous>, transform_indices = @transform_2, window_bounds = array<i64: 1, 64>}, {transform_indices = @transform_3, window_bounds = array<i64: 32, 64>}, {transform_indices = @transform_4, window_bounds = array<i64: 32, 64>}]} {
    %c0 = arith.constant 0 : index
    %c0_0 = arith.constant 0 : index
    %0 = vector.load %arg4[%c0, %c0_0] : memref<32x64xbf16, #tpu.memory_space<vmem>>, vector<32x64xbf16>
    %1 = arith.extf %0 : vector<32x64xbf16> to vector<32x64xf32>
    %c0_1 = arith.constant 0 : index
    %c0_2 = arith.constant 0 : index
    %2 = vector.load %arg1[%c0_1, %c0_2] : memref<32x288xbf16, #tpu.memory_space<vmem>>, vector<32x288xbf16>
    %c0_3 = arith.constant 0 : index
    %c0_4 = arith.constant 0 : index
    %3 = vector.load %arg2[%c0_3, %c0_4] : memref<288x64xbf16, #tpu.memory_space<vmem>>, vector<288x64xbf16>
    %cst = arith.constant dense<0.000000e+00> : vector<32x64xf32>
    %4 = tpu.matmul %2, %3, %cst {dimension_numbers = #tpu.dot_dimension_numbers<[1], [0], [0], [1], [0, 0, 1, 1], [], []>} : vector<32x288xbf16>, vector<288x64xbf16>, vector<32x64xf32> -> vector<32x64xf32>
    %c0_5 = arith.constant 0 : index
    %c0_6 = arith.constant 0 : index
    %5 = vector.load %arg3[%c0_5, %c0_6] : memref<1x64xf32, #tpu.memory_space<vmem>>, vector<1x64xf32>
    %6 = vector.broadcast %5 : vector<1x64xf32> to vector<32x64xf32>
    %7 = arith.addf %4, %6 : vector<32x64xf32>
    %8 = arith.negf %7 : vector<32x64xf32>
    %9 = math.exp %8 : vector<32x64xf32>
    %cst_7 = arith.constant 1.000000e+00 : f32
    %10 = vector.broadcast %cst_7 : f32 to vector<32x64xf32>
    %11 = arith.addf %10, %9 : vector<32x64xf32>
    %12 = arith.divf %10, %11 : vector<32x64xf32>
    %13 = arith.mulf %12, %1 : vector<32x64xf32>
    %14 = arith.truncf %13 : vector<32x64xf32> to vector<32x64xbf16>
    %c0_8 = arith.constant 0 : index
    %c0_9 = arith.constant 0 : index
    %15 = vector.load %arg5[%c0_8, %c0_9] : memref<32x64xbf16, #tpu.memory_space<vmem>>, vector<32x64xbf16>
    tpu.vector_store %arg5[%c0_8, %c0_9], %14 {strides = array<i32>} : memref<32x64xbf16, #tpu.memory_space<vmem>>, vector<32x64xbf16>,
    return
  }
  func.func @transform_0(%arg0: i32) -> (i32, i32) {
    %c0_i32 = arith.constant 0 : i32
    %c0_i32_0 = arith.constant 0 : i32
    return %arg0, %c0_i32 : i32, i32
  }
  func.func @transform_1(%arg0: i32) -> (i32, i32) {
    %c0_i32 = arith.constant 0 : i32
    %c0_i32_0 = arith.constant 0 : i32
    %c0_i32_1 = arith.constant 0 : i32
    return %c0_i32, %c0_i32_0 : i32, i32
  }
  func.func @transform_2(%arg0: i32) -> (i32, i32) {
    %c0_i32 = arith.constant 0 : i32
    %c0_i32_0 = arith.constant 0 : i32
    %c0_i32_1 = arith.constant 0 : i32
    return %c0_i32, %c0_i32_0 : i32, i32
  }
  func.func @transform_3(%arg0: i32) -> (i32, i32) {
    %c0_i32 = arith.constant 0 : i32
    %c0_i32_0 = arith.constant 0 : i32
    return %arg0, %c0_i32 : i32, i32
  }
  func.func @transform_4(%arg0: i32) -> (i32, i32) {
    %c0_i32 = arith.constant 0 : i32
    %c0_i32_0 = arith.constant 0 : i32
    return %arg0, %c0_i32 : i32, i32
  }
}

module attributes {stable_mosaic.version = 11 : i64} {
  func.func @_conv_fused_kernel(%arg0: i32, %arg1: memref<32x576xbf16, #tpu.memory_space<vmem>>, %arg2: memref<576x128xbf16, #tpu.memory_space<vmem>>, %arg3: memref<1x128xf32, #tpu.memory_space<vmem>>, %arg4: memref<32x128xbf16, #tpu.memory_space<vmem>>) attributes {dimension_semantics = [#tpu.dimension_semantics<parallel>], iteration_bounds = array<i64: 1>, scalar_prefetch = 0 : i64, scratch_operands = 0 : i64, tpu.core_type = #tpu.core_type<tc>, window_params = [{transform_indices = @transform_0, window_bounds = array<i64: 32, 576>}, {pipeline_mode = #tpu.pipeline_mode<synchronous>, transform_indices = @transform_1, window_bounds = array<i64: 576, 128>}, {pipeline_mode = #tpu.pipeline_mode<synchronous>, transform_indices = @transform_2, window_bounds = array<i64: 1, 128>}, {transform_indices = @transform_3, window_bounds = array<i64: 32, 128>}]} {
    %c0 = arith.constant 0 : index
    %c0_0 = arith.constant 0 : index
    %0 = vector.load %arg1[%c0, %c0_0] : memref<32x576xbf16, #tpu.memory_space<vmem>>, vector<32x576xbf16>
    %c0_1 = arith.constant 0 : index
    %c0_2 = arith.constant 0 : index
    %1 = vector.load %arg2[%c0_1, %c0_2] : memref<576x128xbf16, #tpu.memory_space<vmem>>, vector<576x128xbf16>
    %cst = arith.constant dense<0.000000e+00> : vector<32x128xf32>
    %2 = tpu.matmul %0, %1, %cst {dimension_numbers = #tpu.dot_dimension_numbers<[1], [0], [0], [1], [0, 0, 1, 1], [], []>} : vector<32x576xbf16>, vector<576x128xbf16>, vector<32x128xf32> -> vector<32x128xf32>
    %c0_3 = arith.constant 0 : index
    %c0_4 = arith.constant 0 : index
    %3 = vector.load %arg3[%c0_3, %c0_4] : memref<1x128xf32, #tpu.memory_space<vmem>>, vector<1x128xf32>
    %4 = vector.broadcast %3 : vector<1x128xf32> to vector<32x128xf32>
    %5 = arith.addf %2, %4 : vector<32x128xf32>
    %cst_5 = arith.constant 0.000000e+00 : f32
    %6 = vector.broadcast %cst_5 : f32 to vector<32x128xf32>
    %7 = arith.maximumf %5, %6 : vector<32x128xf32>
    %8 = arith.truncf %7 : vector<32x128xf32> to vector<32x128xbf16>
    %c0_6 = arith.constant 0 : index
    %c0_7 = arith.constant 0 : index
    %9 = vector.load %arg4[%c0_6, %c0_7] : memref<32x128xbf16, #tpu.memory_space<vmem>>, vector<32x128xbf16>
    tpu.vector_store %arg4[%c0_6, %c0_7], %8 {strides = array<i32>} : memref<32x128xbf16, #tpu.memory_space<vmem>>, vector<32x128xbf16>,
    return
  }
  func.func @transform_0(%arg0: i32) -> (i32, i32) {
    %c0_i32 = arith.constant 0 : i32
    %c0_i32_0 = arith.constant 0 : i32
    return %arg0, %c0_i32 : i32, i32
  }
  func.func @transform_1(%arg0: i32) -> (i32, i32) {
    %c0_i32 = arith.constant 0 : i32
    %c0_i32_0 = arith.constant 0 : i32
    %c0_i32_1 = arith.constant 0 : i32
    return %c0_i32, %c0_i32_0 : i32, i32
  }
  func.func @transform_2(%arg0: i32) -> (i32, i32) {
    %c0_i32 = arith.constant 0 : i32
    %c0_i32_0 = arith.constant 0 : i32
    %c0_i32_1 = arith.constant 0 : i32
    return %c0_i32, %c0_i32_0 : i32, i32
  }
  func.func @transform_3(%arg0: i32) -> (i32, i32) {
    %c0_i32 = arith.constant 0 : i32
    %c0_i32_0 = arith.constant 0 : i32
    return %arg0, %c0_i32 : i32, i32
  }
}

module attributes {stable_mosaic.version = 11 : i64} {
  func.func @_conv_fused_kernel(%arg0: i32, %arg1: memref<8x256xbf16, #tpu.memory_space<vmem>>, %arg2: memref<256x64xbf16, #tpu.memory_space<vmem>>, %arg3: memref<1x64xf32, #tpu.memory_space<vmem>>, %arg4: memref<8x64xbf16, #tpu.memory_space<vmem>>) attributes {dimension_semantics = [#tpu.dimension_semantics<parallel>], iteration_bounds = array<i64: 1>, scalar_prefetch = 0 : i64, scratch_operands = 0 : i64, tpu.core_type = #tpu.core_type<tc>, window_params = [{transform_indices = @transform_0, window_bounds = array<i64: 8, 256>}, {pipeline_mode = #tpu.pipeline_mode<synchronous>, transform_indices = @transform_1, window_bounds = array<i64: 256, 64>}, {pipeline_mode = #tpu.pipeline_mode<synchronous>, transform_indices = @transform_2, window_bounds = array<i64: 1, 64>}, {transform_indices = @transform_3, window_bounds = array<i64: 8, 64>}]} {
    %c0 = arith.constant 0 : index
    %c0_0 = arith.constant 0 : index
    %0 = vector.load %arg1[%c0, %c0_0] : memref<8x256xbf16, #tpu.memory_space<vmem>>, vector<8x256xbf16>
    %c0_1 = arith.constant 0 : index
    %c0_2 = arith.constant 0 : index
    %1 = vector.load %arg2[%c0_1, %c0_2] : memref<256x64xbf16, #tpu.memory_space<vmem>>, vector<256x64xbf16>
    %cst = arith.constant dense<0.000000e+00> : vector<8x64xf32>
    %2 = tpu.matmul %0, %1, %cst {dimension_numbers = #tpu.dot_dimension_numbers<[1], [0], [0], [1], [0, 0, 1, 1], [], []>} : vector<8x256xbf16>, vector<256x64xbf16>, vector<8x64xf32> -> vector<8x64xf32>
    %c0_3 = arith.constant 0 : index
    %c0_4 = arith.constant 0 : index
    %3 = vector.load %arg3[%c0_3, %c0_4] : memref<1x64xf32, #tpu.memory_space<vmem>>, vector<1x64xf32>
    %4 = vector.broadcast %3 : vector<1x64xf32> to vector<8x64xf32>
    %5 = arith.addf %2, %4 : vector<8x64xf32>
    %cst_5 = arith.constant 0.000000e+00 : f32
    %6 = vector.broadcast %cst_5 : f32 to vector<8x64xf32>
    %7 = arith.maximumf %5, %6 : vector<8x64xf32>
    %8 = arith.truncf %7 : vector<8x64xf32> to vector<8x64xbf16>
    %c0_6 = arith.constant 0 : index
    %c0_7 = arith.constant 0 : index
    %9 = vector.load %arg4[%c0_6, %c0_7] : memref<8x64xbf16, #tpu.memory_space<vmem>>, vector<8x64xbf16>
    tpu.vector_store %arg4[%c0_6, %c0_7], %8 {strides = array<i32>} : memref<8x64xbf16, #tpu.memory_space<vmem>>, vector<8x64xbf16>,
    return
  }
  func.func @transform_0(%arg0: i32) -> (i32, i32) {
    %c0_i32 = arith.constant 0 : i32
    %c0_i32_0 = arith.constant 0 : i32
    return %arg0, %c0_i32 : i32, i32
  }
  func.func @transform_1(%arg0: i32) -> (i32, i32) {
    %c0_i32 = arith.constant 0 : i32
    %c0_i32_0 = arith.constant 0 : i32
    %c0_i32_1 = arith.constant 0 : i32
    return %c0_i32, %c0_i32_0 : i32, i32
  }
  func.func @transform_2(%arg0: i32) -> (i32, i32) {
    %c0_i32 = arith.constant 0 : i32
    %c0_i32_0 = arith.constant 0 : i32
    %c0_i32_1 = arith.constant 0 : i32
    return %c0_i32, %c0_i32_0 : i32, i32
  }
  func.func @transform_3(%arg0: i32) -> (i32, i32) {
    %c0_i32 = arith.constant 0 : i32
    %c0_i32_0 = arith.constant 0 : i32
    return %arg0, %c0_i32 : i32, i32
  }
}

module attributes {stable_mosaic.version = 11 : i64} {
  func.func @_conv_fused_kernel(%arg0: i32, %arg1: memref<8x576xbf16, #tpu.memory_space<vmem>>, %arg2: memref<576x128xbf16, #tpu.memory_space<vmem>>, %arg3: memref<1x128xf32, #tpu.memory_space<vmem>>, %arg4: memref<8x128xbf16, #tpu.memory_space<vmem>>, %arg5: memref<8x128xbf16, #tpu.memory_space<vmem>>) attributes {dimension_semantics = [#tpu.dimension_semantics<parallel>], iteration_bounds = array<i64: 1>, scalar_prefetch = 0 : i64, scratch_operands = 0 : i64, tpu.core_type = #tpu.core_type<tc>, window_params = [{transform_indices = @transform_0, window_bounds = array<i64: 8, 576>}, {pipeline_mode = #tpu.pipeline_mode<synchronous>, transform_indices = @transform_1, window_bounds = array<i64: 576, 128>}, {pipeline_mode = #tpu.pipeline_mode<synchronous>, transform_indices = @transform_2, window_bounds = array<i64: 1, 128>}, {transform_indices = @transform_3, window_bounds = array<i64: 8, 128>}, {transform_indices = @transform_4, window_bounds = array<i64: 8, 128>}]} {
    %c0 = arith.constant 0 : index
    %c0_0 = arith.constant 0 : index
    %0 = vector.load %arg4[%c0, %c0_0] : memref<8x128xbf16, #tpu.memory_space<vmem>>, vector<8x128xbf16>
    %1 = arith.extf %0 : vector<8x128xbf16> to vector<8x128xf32>
    %c0_1 = arith.constant 0 : index
    %c0_2 = arith.constant 0 : index
    %2 = vector.load %arg1[%c0_1, %c0_2] : memref<8x576xbf16, #tpu.memory_space<vmem>>, vector<8x576xbf16>
    %c0_3 = arith.constant 0 : index
    %c0_4 = arith.constant 0 : index
    %3 = vector.load %arg2[%c0_3, %c0_4] : memref<576x128xbf16, #tpu.memory_space<vmem>>, vector<576x128xbf16>
    %cst = arith.constant dense<0.000000e+00> : vector<8x128xf32>
    %4 = tpu.matmul %2, %3, %cst {dimension_numbers = #tpu.dot_dimension_numbers<[1], [0], [0], [1], [0, 0, 1, 1], [], []>} : vector<8x576xbf16>, vector<576x128xbf16>, vector<8x128xf32> -> vector<8x128xf32>
    %c0_5 = arith.constant 0 : index
    %c0_6 = arith.constant 0 : index
    %5 = vector.load %arg3[%c0_5, %c0_6] : memref<1x128xf32, #tpu.memory_space<vmem>>, vector<1x128xf32>
    %6 = vector.broadcast %5 : vector<1x128xf32> to vector<8x128xf32>
    %7 = arith.addf %4, %6 : vector<8x128xf32>
    %8 = arith.negf %7 : vector<8x128xf32>
    %9 = math.exp %8 : vector<8x128xf32>
    %cst_7 = arith.constant 1.000000e+00 : f32
    %10 = vector.broadcast %cst_7 : f32 to vector<8x128xf32>
    %11 = arith.addf %10, %9 : vector<8x128xf32>
    %12 = arith.divf %10, %11 : vector<8x128xf32>
    %13 = arith.mulf %12, %1 : vector<8x128xf32>
    %14 = arith.truncf %13 : vector<8x128xf32> to vector<8x128xbf16>
    %c0_8 = arith.constant 0 : index
    %c0_9 = arith.constant 0 : index
    %15 = vector.load %arg5[%c0_8, %c0_9] : memref<8x128xbf16, #tpu.memory_space<vmem>>, vector<8x128xbf16>
    tpu.vector_store %arg5[%c0_8, %c0_9], %14 {strides = array<i32>} : memref<8x128xbf16, #tpu.memory_space<vmem>>, vector<8x128xbf16>,
    return
  }
  func.func @transform_0(%arg0: i32) -> (i32, i32) {
    %c0_i32 = arith.constant 0 : i32
    %c0_i32_0 = arith.constant 0 : i32
    return %arg0, %c0_i32 : i32, i32
  }
  func.func @transform_1(%arg0: i32) -> (i32, i32) {
    %c0_i32 = arith.constant 0 : i32
    %c0_i32_0 = arith.constant 0 : i32
    %c0_i32_1 = arith.constant 0 : i32
    return %c0_i32, %c0_i32_0 : i32, i32
  }
  func.func @transform_2(%arg0: i32) -> (i32, i32) {
    %c0_i32 = arith.constant 0 : i32
    %c0_i32_0 = arith.constant 0 : i32
    %c0_i32_1 = arith.constant 0 : i32
    return %c0_i32, %c0_i32_0 : i32, i32
  }
  func.func @transform_3(%arg0: i32) -> (i32, i32) {
    %c0_i32 = arith.constant 0 : i32
    %c0_i32_0 = arith.constant 0 : i32
    return %arg0, %c0_i32 : i32, i32
  }
  func.func @transform_4(%arg0: i32) -> (i32, i32) {
    %c0_i32 = arith.constant 0 : i32
    %c0_i32_0 = arith.constant 0 : i32
    return %arg0, %c0_i32 : i32, i32
  }
}

module attributes {stable_mosaic.version = 11 : i64} {
  func.func @_head_kernel(%arg0: memref<2x4x128xbf16, #tpu.memory_space<vmem>>, %arg1: memref<128x16xf32, #tpu.memory_space<vmem>>, %arg2: memref<2x16xf32, #tpu.memory_space<vmem>>) attributes {dimension_semantics = [], scalar_prefetch = 0 : i64, scratch_operands = 0 : i64, tpu.core_type = #tpu.core_type<tc>} {
    %c0 = arith.constant 0 : index
    %c0_0 = arith.constant 0 : index
    %c0_1 = arith.constant 0 : index
    %0 = vector.load %arg0[%c0, %c0_0, %c0_1] : memref<2x4x128xbf16, #tpu.memory_space<vmem>>, vector<2x4x128xbf16>
    %1 = arith.extf %0 : vector<2x4x128xbf16> to vector<2x4x128xf32>
    %cst = arith.constant dense<0.000000e+00> : vector<2x128xf32>
    %2 = vector.multi_reduction <add>, %1, %cst [1] : vector<2x4x128xf32> to vector<2x128xf32>
    %cst_2 = arith.constant 2.500000e-01 : f32
    %3 = vector.broadcast %cst_2 : f32 to vector<2x128xf32>
    %4 = arith.mulf %2, %3 : vector<2x128xf32>
    %c0_3 = arith.constant 0 : index
    %c0_4 = arith.constant 0 : index
    %5 = vector.load %arg1[%c0_3, %c0_4] : memref<128x16xf32, #tpu.memory_space<vmem>>, vector<128x16xf32>
    %cst_5 = arith.constant dense<0.000000e+00> : vector<2x16xf32>
    %6 = tpu.matmul %4, %5, %cst_5 {dimension_numbers = #tpu.dot_dimension_numbers<[1], [0], [0], [1], [0, 0, 1, 1], [], []>} : vector<2x128xf32>, vector<128x16xf32>, vector<2x16xf32> -> vector<2x16xf32>
    %cst_6 = arith.constant dense<0xFF800000> : vector<2xf32>
    %7 = vector.multi_reduction <maximumf>, %6, %cst_6 [1] : vector<2x16xf32> to vector<2xf32>
    %8 = vector.shape_cast %7 : vector<2xf32> to vector<2x1xf32>
    %9 = vector.broadcast %8 : vector<2x1xf32> to vector<2x16xf32>
    %10 = arith.subf %6, %9 : vector<2x16xf32>
    %11 = math.exp %10 : vector<2x16xf32>
    %cst_7 = arith.constant dense<0.000000e+00> : vector<2xf32>
    %12 = vector.multi_reduction <add>, %11, %cst_7 [1] : vector<2x16xf32> to vector<2xf32>
    %13 = vector.shape_cast %12 : vector<2xf32> to vector<2x1xf32>
    %14 = math.log %13 : vector<2x1xf32>
    %15 = vector.broadcast %14 : vector<2x1xf32> to vector<2x16xf32>
    %16 = arith.subf %10, %15 : vector<2x16xf32>
    %c0_8 = arith.constant 0 : index
    %c0_9 = arith.constant 0 : index
    %17 = vector.load %arg2[%c0_8, %c0_9] : memref<2x16xf32, #tpu.memory_space<vmem>>, vector<2x16xf32>
    tpu.vector_store %arg2[%c0_8, %c0_9], %16 {strides = array<i32>} : memref<2x16xf32, #tpu.memory_space<vmem>>, vector<2x16xf32>,
    return
  }
}

</mosaic_0001>

<bundles_post_ra>
// kernel: _lambda_.32
= control target key start
LH: loop header
LB: loop body
LE: loop exit
PB: predicated region body
PF: predicated region fallthrough
CT: control target
= control target key end

     0   :  { %s1025_s12 = smov 0   ;;  %s1198_s0 = inlined_call_operand.vmem [shape: bf16[512,49], index: 0, kind: input, shape index: {}]   ;;  %s1199_s1 = inlined_call_operand.vmem [shape: bf16[49,16], index: 1, kind: input, shape index: {}]   ;;  %s1200_s2 = inlined_call_operand.vmem [shape: f32[1,16], index: 2, kind: input, shape index: {}]   ;;  %s1201_s3 = inlined_call_operand.vmem [shape: bf16[512,16], index: 3, kind: output, shape index: {}]  }
   0x1 LB: > { %s787_s13 = sadd.s32 4294967295, %s1002_s12   ;;  %p791_p0 = scmp.ge.s32.totalorder %s1002_s12, 1  ;;  %s1002_s12 = sphi %s1025_s12, %s13_s12  }
   0x2   : > { %p138_p1 = scmp.lt.s32.totalorder %s1002_s12, 3 }
   0x4   : > { %p139_p2 = pnand %p791_p0, %p138_p1 }
   0x5   : > { %s792_s18 = sshll.u32 (!%p139_p2), %s787_s13, 5 }
   0x6   : > { %142 = sbr.rel (%p139_p2) target bundleno = 262 (0x106), region = 32  ;;  %p163_p3 = scmp.lt.s32.totalorder (!%p139_p2), %s792_s18, 63 }
   0xb   : > { %v976_v0 = vld [vmem:[%s1199_s1 + $0x18] ss:$0 sps:$4 sm:$0x11]   ;;  %vm371_vm0 = vcmask 1040384   ;;  %v1004_v1 = vmov 0   ;;  %v977_v4 = vld [vmem:[%s1199_s1 + $0x10] sm:$0xff]  }
   0xc   : > { %v373_v2 = vsel %vm371_vm0, 65535, %v1004_v1  ;;  %s1203_s18 = smov (!%p163_p3, %s792_s18), 63  ;;  %v978_v5 = vld [vmem:[%s1199_s1 + $0x8] sm:$0xff]   ;;  %v979_v6 = vld [vmem:[%s1199_s1] sm:$0xff]   ;;  %vm322_vm1 = vcmask 400384   ;;  %vm698_vm2 = vcmask 125952  }
   0xd   : > { %v375_v3 = vand.u32 %v976_v0, %v373_v2  ;;  %s793_s21 = sshll.u32 %s1203_s18, 2  ;;  %v1090_v23 = vld [vmem:[%s1200_s2] ss:$0 sm:$0xff] }
   0xe   : > { %s1053_s26 = scalar_lea.vmem %s1198_s0, %s793_s21  ;;  %s1101_s4 = scalar_lea.vmem %s1201_s3, %s793_s21 }
   0xf   : > { %919 = vmatprep.subr.bf16.mxu0 %v375_v3  ;;  %959 = vmatprep.subr.bf16.mxu1 %v375_v3  ;;  %v980_v7 = vld [vmem:[%s1053_s26] sm:$0xff]   ;;  %v982_v9 = vld [vmem:[%s1053_s26 + $0x8] sm:$0xff]   ;;  %v984_v11 = vld [vmem:[%s1053_s26 + $0x10] sm:$0xff]  }
  0x10   : > { %920 = vmatpush3.bf16.msra.mxu0 %v375_v3  ;;  %963 = vmatpush3.bf16.msra.mxu1 %v375_v3  ;;  %v981_v8 = vld [vmem:[%s1053_s26 + $0x40] sm:$0xff]   ;;  %v983_v10 = vld [vmem:[%s1053_s26 + $0x48] sm:$0xff]   ;;  %v985_v12 = vld [vmem:[%s1053_s26 + $0x50] sm:$0xff]  }
  0x11   : > { %921 = vmatprep.subr.bf16.mxu0 %v977_v4  ;;  %960 = vmatprep.subr.bf16.mxu1 %v977_v4  ;;  %v986_v13 = vld [vmem:[%s1053_s26 + $0x18] sm:$0xff]   ;;  %v988_v15 = vld [vmem:[%s1053_s26 + $0x20] sm:$0xff]   ;;  %v990_v17 = vld [vmem:[%s1053_s26 + $0x28] sm:$0xff]  }
  0x12   : > { %927 = vmatprep.mubr.msk.bf16.mxu0 %vm322_vm1, %v980_v7  ;;  %943 = vmatprep.mubr.msk.bf16.mxu1 %vm322_vm1, %v981_v8  ;;  %v987_v14 = vld [vmem:[%s1053_s26 + $0x58] sm:$0xff]   ;;  %v989_v16 = vld [vmem:[%s1053_s26 + $0x60] sm:$0xff]   ;;  %v991_v18 = vld [vmem:[%s1053_s26 + $0x68] sm:$0xff]  }
  0x13   : > { %v992_v19 = vld [vmem:[%s1053_s26 + $0x30] sm:$0xff]   ;;  %v994_v21 = vld [vmem:[%s1053_s26 + $0x38] sm:$0xff]  }
  0x14   : > { %922 = vmatpush3.bf16.msra.mxu0 %v977_v4  ;;  %964 = vmatpush3.bf16.msra.mxu1 %v977_v4  ;;  %v993_v20 = vld [vmem:[%s1053_s26 + $0x70] sm:$0xff]   ;;  %v995_v22 = vld [vmem:[%s1053_s26 + $0x78] sm:$0xff]  }
  0x15   : > { %923 = vmatprep.subr.bf16.mxu0 %v978_v5  ;;  %961 = vmatprep.subr.bf16.mxu1 %v978_v5 }
  0x18   : > { %924 = vmatpush3.bf16.msra.mxu0 %v978_v5  ;;  %965 = vmatpush3.bf16.msra.mxu1 %v978_v5 }
  0x19   : > { %925 = vmatprep.subr.bf16.mxu0 %v979_v6  ;;  %962 = vmatprep.subr.bf16.mxu1 %v979_v6 }
  0x1c   : > { %926 = vmatpush3.bf16.msra.mxu0 %v979_v6  ;;  %966 = vmatpush3.bf16.msra.mxu1 %v979_v6 }
  0x1f   : > { %928 = vmatmul.mubr.msk.bf16.vlgmr.msra.gmra.mxu0 %vm322_vm1, %v982_v9  ;;  %944 = vmatmul.mubr.msk.bf16.vlgmr.msra.gmra.mxu1 %vm322_vm1, %v983_v10 }
  0x20   : > { %931 = vmatprep.mubr.msk.bf16.mxu0 %vm322_vm1, %v984_v11  ;;  %947 = vmatprep.mubr.msk.bf16.mxu1 %vm322_vm1, %v985_v12 }
  0x27   : > { %932 = vmatmul.mubr.msk.bf16.gmra.mxu0 %vm322_vm1, %v986_v13  ;;  %948 = vmatmul.mubr.msk.bf16.gmra.mxu1 %vm322_vm1, %v987_v14 }
  0x28   : > { %935 = vmatprep.mubr.msk.bf16.mxu0 %vm322_vm1, %v988_v15  ;;  %951 = vmatprep.mubr.msk.bf16.mxu1 %vm322_vm1, %v989_v16 }
  0x2f   : > { %936 = vmatmul.mubr.msk.bf16.gmra.mxu0 %vm322_vm1, %v990_v17  ;;  %952 = vmatmul.mubr.msk.bf16.gmra.mxu1 %vm322_vm1, %v991_v18 }
  0x30   : > { %939 = vmatprep.mubr.msk.bf16.mxu0 %vm322_vm1, %v992_v19  ;;  %955 = vmatprep.mubr.msk.bf16.mxu1 %vm322_vm1, %v993_v20 }
  0x37   : > { %940 = vmatmul.mubr.msk.bf16.gmra.mxu0 %vm322_vm1, %v994_v21  ;;  %956 = vmatmul.mubr.msk.bf16.gmra.mxu1 %vm322_vm1, %v995_v22 }
  0xdf   : > { %v929_v24 = vpop.f32.mrf.mxu0  ;;  %v945_v25 = vpop.f32.mrf.mxu1 }
  0xe0   : > { %v420_v26 = vadd.f32 %v929_v24, %v1090_v23  ;;  %v484_v27 = vadd.f32 %v945_v25, %v1090_v23 }
  0xe1   : > { %v411_v28 = vpop.f32.mrf.mxu0  ;;  %v475_v29 = vpop.f32.mrf.mxu1 }
  0xe2   : > { %v540_v30 = vmax.f32 %v420_v26, 0.0  ;;  %v556_v31 = vmax.f32 %v484_v27, 0.0  ;;  %v412_v32 = vadd.f32 %v1090_v23, %v411_v28  ;;  %v476_v33 = vadd.f32 %v1090_v23, %v475_v29 }
  0xe3   : > { %v930_v34 = vpop.f32.mrf.mxu0  ;;  %v946_v35 = vpop.f32.mrf.mxu1 }
  0xe4   : > { %v869_v36 = vpack.c.bf16 %v540_v30, %v540_v30  ;;  %v885_v37 = vpack.c.bf16 %v556_v31, %v556_v31  ;;  %v538_v38 = vmax.f32 %v412_v32, 0.0  ;;  %v554_v39 = vmax.f32 %v476_v33, 0.0 }
  0xe5   : > { %v423_v40 = vadd.f32 %v930_v34, %v1090_v23  ;;  %v487_v41 = vadd.f32 %v946_v35, %v1090_v23  ;;  %v414_v42 = vpop.f32.mrf.mxu0  ;;  %v478_v43 = vpop.f32.mrf.mxu1 }
  0xe6   : > { %701 = vst.msk [vmem:[%s1101_s4 + $0x8] sm:$0xf] %vm698_vm2, %v869_v36  ;;  %717 = vst.msk [vmem:[%s1101_s4 + $0x48] sm:$0xf] %vm698_vm2, %v885_v37  ;;  %v867_v44 = vpack.c.bf16 %v538_v38, %v538_v38  ;;  %v883_v45 = vpack.c.bf16 %v554_v39, %v554_v39  ;;  %v415_v46 = vadd.f32 %v1090_v23, %v414_v42 }
  0xe7   : > { %v479_v47 = vadd.f32 %v1090_v23, %v478_v43  ;;  %v541_v48 = vmax.f32 %v423_v40, 0.0  ;;  %v557_v49 = vmax.f32 %v487_v41, 0.0  ;;  %v933_v50 = vpop.f32.mrf.mxu0  ;;  %v949_v51 = vpop.f32.mrf.mxu1 }
  0xe8   : > { %699 = vst.msk [vmem:[%s1101_s4] sm:$0xf] %vm698_vm2, %v867_v44  ;;  %715 = vst.msk [vmem:[%s1101_s4 + $0x40] sm:$0xf] %vm698_vm2, %v883_v45  ;;  %v539_v52 = vmax.f32 %v415_v46, 0.0  ;;  %v436_v54 = vadd.f32 %v933_v50, %v1090_v23  ;;  %v500_v55 = vadd.f32 %v949_v51, %v1090_v23 }
  0xe9   : > { %v555_v53 = vmax.f32 %v479_v47, 0.0  ;;  %v870_v56 = vpack.c.bf16 %v541_v48, %v541_v48  ;;  %v886_v57 = vpack.c.bf16 %v557_v49, %v557_v49  ;;  %v427_v58 = vpop.f32.mrf.mxu0  ;;  %v491_v59 = vpop.f32.mrf.mxu1 }
  0xea   : > { %v868_v60 = vpack.c.bf16 %v539_v52, %v539_v52  ;;  %v544_v62 = vmax.f32 %v436_v54, 0.0  ;;  %v560_v63 = vmax.f32 %v500_v55, 0.0  ;;  %v428_v0 = vadd.f32 %v1090_v23, %v427_v58 }
  0xeb   : > { %v884_v61 = vpack.c.bf16 %v555_v53, %v555_v53  ;;  %702 = vst.msk [vmem:[%s1101_s4 + $0xc] sm:$0xf] %vm698_vm2, %v870_v56  ;;  %718 = vst.msk [vmem:[%s1101_s4 + $0x4c] sm:$0xf] %vm698_vm2, %v886_v57  ;;  %v492_v1 = vadd.f32 %v1090_v23, %v491_v59  ;;  %v934_v2 = vpop.f32.mrf.mxu0  ;;  %v950_v3 = vpop.f32.mrf.mxu1 }
  0xec   : > { %700 = vst.msk [vmem:[%s1101_s4 + $0x4] sm:$0xf] %vm698_vm2, %v868_v60  ;;  %v873_v4 = vpack.c.bf16 %v544_v62, %v544_v62  ;;  %v889_v5 = vpack.c.bf16 %v560_v63, %v560_v63  ;;  %v439_v6 = vadd.f32 %v934_v2, %v1090_v23  ;;  %v503_v7 = vadd.f32 %v950_v3, %v1090_v23 }
  0xed   : > { %716 = vst.msk [vmem:[%s1101_s4 + $0x44] sm:$0xf] %vm698_vm2, %v884_v61  ;;  %v542_v8 = vmax.f32 %v428_v0, 0.0  ;;  %v558_v9 = vmax.f32 %v492_v1, 0.0  ;;  %v430_v10 = vpop.f32.mrf.mxu0  ;;  %v494_v11 = vpop.f32.mrf.mxu1 }
  0xee   : > { %705 = vst.msk [vmem:[%s1101_s4 + $0x18] sm:$0xf] %vm698_vm2, %v873_v4  ;;  %721 = vst.msk [vmem:[%s1101_s4 + $0x58] sm:$0xf] %vm698_vm2, %v889_v5  ;;  %v545_v12 = vmax.f32 %v439_v6, 0.0  ;;  %v561_v13 = vmax.f32 %v503_v7, 0.0  ;;  %v431_v14 = vadd.f32 %v1090_v23, %v430_v10  ;;  %v495_v15 = vadd.f32 %v1090_v23, %v494_v11 }
  0xef   : > { %v871_v16 = vpack.c.bf16 %v542_v8, %v542_v8  ;;  %v887_v17 = vpack.c.bf16 %v558_v9, %v558_v9  ;;  %v937_v18 = vpop.f32.mrf.mxu0  ;;  %v953_v19 = vpop.f32.mrf.mxu1 }
  0xf0   : > { %v874_v20 = vpack.c.bf16 %v545_v12, %v545_v12  ;;  %v890_v21 = vpack.c.bf16 %v561_v13, %v561_v13  ;;  %v543_v22 = vmax.f32 %v431_v14, 0.0  ;;  %v559_v24 = vmax.f32 %v495_v15, 0.0 }
  0xf1   : > { %703 = vst.msk [vmem:[%s1101_s4 + $0x10] sm:$0xf] %vm698_vm2, %v871_v16  ;;  %719 = vst.msk [vmem:[%s1101_s4 + $0x50] sm:$0xf] %vm698_vm2, %v887_v17  ;;  %v452_v25 = vadd.f32 %v937_v18, %v1090_v23  ;;  %v516_v26 = vadd.f32 %v953_v19, %v1090_v23  ;;  %v443_v27 = vpop.f32.mrf.mxu0  ;;  %v507_v28 = vpop.f32.mrf.mxu1 }
  0xf2   : > { %706 = vst.msk [vmem:[%s1101_s4 + $0x1c] sm:$0xf] %vm698_vm2, %v874_v20  ;;  %722 = vst.msk [vmem:[%s1101_s4 + $0x5c] sm:$0xf] %vm698_vm2, %v890_v21  ;;  %v872_v29 = vpack.c.bf16 %v543_v22, %v543_v22  ;;  %v888_v30 = vpack.c.bf16 %v559_v24, %v559_v24  ;;  %v444_v31 = vadd.f32 %v1090_v23, %v443_v27 }
  0xf3   : > { %v508_v32 = vadd.f32 %v1090_v23, %v507_v28  ;;  %v548_v33 = vmax.f32 %v452_v25, 0.0  ;;  %v564_v34 = vmax.f32 %v516_v26, 0.0  ;;  %v938_v35 = vpop.f32.mrf.mxu0  ;;  %v954_v36 = vpop.f32.mrf.mxu1 }
  0xf4   : > { %704 = vst.msk [vmem:[%s1101_s4 + $0x14] sm:$0xf] %vm698_vm2, %v872_v29  ;;  %720 = vst.msk [vmem:[%s1101_s4 + $0x54] sm:$0xf] %vm698_vm2, %v888_v30  ;;  %v546_v37 = vmax.f32 %v444_v31, 0.0  ;;  %v455_v39 = vadd.f32 %v938_v35, %v1090_v23  ;;  %v519_v40 = vadd.f32 %v954_v36, %v1090_v23 }
  0xf5   : > { %v562_v38 = vmax.f32 %v508_v32, 0.0  ;;  %v877_v41 = vpack.c.bf16 %v548_v33, %v548_v33  ;;  %v893_v42 = vpack.c.bf16 %v564_v34, %v564_v34  ;;  %v446_v43 = vpop.f32.mrf.mxu0  ;;  %v510_v44 = vpop.f32.mrf.mxu1 }
  0xf6   : > { %v875_v45 = vpack.c.bf16 %v546_v37, %v546_v37  ;;  %v549_v47 = vmax.f32 %v455_v39, 0.0  ;;  %v565_v48 = vmax.f32 %v519_v40, 0.0  ;;  %v447_v49 = vadd.f32 %v1090_v23, %v446_v43 }
  0xf7   : > { %v891_v46 = vpack.c.bf16 %v562_v38, %v562_v38  ;;  %709 = vst.msk [vmem:[%s1101_s4 + $0x28] sm:$0xf] %vm698_vm2, %v877_v41  ;;  %725 = vst.msk [vmem:[%s1101_s4 + $0x68] sm:$0xf] %vm698_vm2, %v893_v42  ;;  %v511_v50 = vadd.f32 %v1090_v23, %v510_v44  ;;  %v941_v51 = vpop.f32.mrf.mxu0  ;;  %v957_v52 = vpop.f32.mrf.mxu1 }
  0xf8   : > { %707 = vst.msk [vmem:[%s1101_s4 + $0x20] sm:$0xf] %vm698_vm2, %v875_v45  ;;  %v878_v53 = vpack.c.bf16 %v549_v47, %v549_v47  ;;  %v894_v54 = vpack.c.bf16 %v565_v48, %v565_v48  ;;  %v468_v55 = vadd.f32 %v941_v51, %v1090_v23  ;;  %v532_v56 = vadd.f32 %v957_v52, %v1090_v23 }
  0xf9   : > { %723 = vst.msk [vmem:[%s1101_s4 + $0x60] sm:$0xf] %vm698_vm2, %v891_v46  ;;  %v547_v57 = vmax.f32 %v447_v49, 0.0  ;;  %v563_v58 = vmax.f32 %v511_v50, 0.0  ;;  %v459_v59 = vpop.f32.mrf.mxu0  ;;  %v523_v60 = vpop.f32.mrf.mxu1 }
  0xfa   : > { %710 = vst.msk [vmem:[%s1101_s4 + $0x2c] sm:$0xf] %vm698_vm2, %v878_v53  ;;  %726 = vst.msk [vmem:[%s1101_s4 + $0x6c] sm:$0xf] %vm698_vm2, %v894_v54  ;;  %v552_v61 = vmax.f32 %v468_v55, 0.0  ;;  %v568_v62 = vmax.f32 %v532_v56, 0.0  ;;  %v460_v63 = vadd.f32 %v1090_v23, %v459_v59  ;;  %v524_v0 = vadd.f32 %v1090_v23, %v523_v60 }
  0xfb   : > { %v876_v1 = vpack.c.bf16 %v547_v57, %v547_v57  ;;  %v892_v2 = vpack.c.bf16 %v563_v58, %v563_v58  ;;  %v942_v3 = vpop.f32.mrf.mxu0  ;;  %v958_v4 = vpop.f32.mrf.mxu1 }
  0xfc   : > { %v881_v5 = vpack.c.bf16 %v552_v61, %v552_v61  ;;  %v897_v6 = vpack.c.bf16 %v568_v62, %v568_v62  ;;  %v550_v7 = vmax.f32 %v460_v63, 0.0  ;;  %v566_v8 = vmax.f32 %v524_v0, 0.0 }
  0xfd   : > { %708 = vst.msk [vmem:[%s1101_s4 + $0x24] sm:$0xf] %vm698_vm2, %v876_v1  ;;  %724 = vst.msk [vmem:[%s1101_s4 + $0x64] sm:$0xf] %vm698_vm2, %v892_v2  ;;  %v471_v9 = vadd.f32 %v942_v3, %v1090_v23  ;;  %v535_v10 = vadd.f32 %v958_v4, %v1090_v23  ;;  %v462_v11 = vpop.f32.mrf.mxu0  ;;  %v526_v12 = vpop.f32.mrf.mxu1 }
  0xfe   : > { %713 = vst.msk [vmem:[%s1101_s4 + $0x38] sm:$0xf] %vm698_vm2, %v881_v5  ;;  %729 = vst.msk [vmem:[%s1101_s4 + $0x78] sm:$0xf] %vm698_vm2, %v897_v6  ;;  %v879_v13 = vpack.c.bf16 %v550_v7, %v550_v7  ;;  %v895_v14 = vpack.c.bf16 %v566_v8, %v566_v8  ;;  %v463_v15 = vadd.f32 %v1090_v23, %v462_v11 }
  0xff   : > { %v527_v16 = vadd.f32 %v1090_v23, %v526_v12  ;;  %v553_v17 = vmax.f32 %v471_v9, 0.0  ;;  %v569_v18 = vmax.f32 %v535_v10, 0.0 }
 0x100   : > { %711 = vst.msk [vmem:[%s1101_s4 + $0x30] sm:$0xf] %vm698_vm2, %v879_v13  ;;  %727 = vst.msk [vmem:[%s1101_s4 + $0x70] sm:$0xf] %vm698_vm2, %v895_v14  ;;  %v551_v19 = vmax.f32 %v463_v15, 0.0 }
 0x101   : > { %v567_v20 = vmax.f32 %v527_v16, 0.0  ;;  %v882_v21 = vpack.c.bf16 %v553_v17, %v553_v17  ;;  %v898_v22 = vpack.c.bf16 %v569_v18, %v569_v18 }
 0x102   : > { %v880_v24 = vpack.c.bf16 %v551_v19, %v551_v19 }
 0x103   : > { %v896_v25 = vpack.c.bf16 %v567_v20, %v567_v20  ;;  %714 = vst.msk [vmem:[%s1101_s4 + $0x3c] sm:$0xf] %vm698_vm2, %v882_v21  ;;  %730 = vst.msk [vmem:[%s1101_s4 + $0x7c] sm:$0xf] %vm698_vm2, %v898_v22 }
 0x104   : > { %712 = vst.msk [vmem:[%s1101_s4 + $0x34] sm:$0xf] %vm698_vm2, %v880_v24 }
 0x105   : > { %728 = vst.msk [vmem:[%s1101_s4 + $0x74] sm:$0xf] %vm698_vm2, %v896_v25 }
 0x106 PF: > { %s13_s12 = sadd.s32 1, %s1002_s12  }
 0x107   : > { %p10_p4 = scmp.ge.s32.totalorder %s13_s12, 4  }
 0x109   :  { %12 = sbr.rel (!%p10_p4) target bundleno = 1 (0x1), region = 62 }

// kernel: _lambda_.33
= control target key start
LH: loop header
LB: loop body
LE: loop exit
PB: predicated region body
PF: predicated region fallthrough
CT: control target
= control target key end

     0   :  { %s1140_s12 = smov 0   ;;  %s1341_s0 = inlined_call_operand.vmem [shape: bf16[512,144], index: 0, kind: input, shape index: {}]   ;;  %s1342_s1 = inlined_call_operand.vmem [shape: bf16[144,16], index: 1, kind: input, shape index: {}]   ;;  %s1343_s2 = inlined_call_operand.vmem [shape: f32[1,16], index: 2, kind: input, shape index: {}]   ;;  %s1344_s3 = inlined_call_operand.vmem [shape: bf16[512,16], index: 3, kind: output, shape index: {}]  }
   0x1 LB: > { %s892_s13 = sadd.s32 4294967295, %s1117_s12   ;;  %p896_p0 = scmp.ge.s32.totalorder %s1117_s12, 1  ;;  %s1117_s12 = sphi %s1140_s12, %s13_s12  }
   0x2   : > { %p139_p1 = scmp.lt.s32.totalorder %s1117_s12, 3 }
   0x4   : > { %p140_p2 = pnand %p896_p0, %p139_p1 }
   0x5   : > { %s897_s16 = sshll.u32 (!%p140_p2), %s892_s13, 5 }
   0x6   : > { %143 = sbr.rel (%p140_p2) target bundleno = 308 (0x134), region = 32  ;;  %p165_p3 = scmp.lt.s32.totalorder (!%p140_p2), %s897_s16, 63 }
   0xb   : > { %v1054_v0 = vld [vmem:[%s1342_s1 + $0x38] sm:$0xff]   ;;  %v1119_v1 = vmov 0   ;;  %v1055_v2 = vld [vmem:[%s1342_s1 + $0x30] sm:$0xff]   ;;  %s1346_s16 = smov (!%p165_p3, %s897_s16), 63  ;;  %v1056_v3 = vld [vmem:[%s1342_s1 + $0x28] sm:$0xff]   ;;  %vm433_vm0 = vcmask 130048  }
   0xc   : > { %482 = vmatprep.subr.bf16.mxu0 %v1119_v1  ;;  %1027 = vmatprep.subr.bf16.mxu1 %v1119_v1  ;;  %s994_s21 = sshll.u32 %s1346_s16, 3  ;;  %v1057_v4 = vld [vmem:[%s1342_s1 + $0x20] sm:$0xff]   ;;  %v1058_v7 = vld [vmem:[%s1342_s1 + $0x18] sm:$0xff]   ;;  %v1059_v8 = vld [vmem:[%s1342_s1 + $0x10] sm:$0xff]   ;;  %s901_s13 = sshll.u32 %s1346_s16, 2  ;;  %vm803_vm1 = vcmask 125952  }
   0xd   : > { %483 = vmatpush1.bf16.msra.mxu0 %v1054_v0  ;;  %1036 = vmatpush1.bf16.msra.mxu1 %v1054_v0  ;;  %s1163_s24 = scalar_lea.vmem %s1341_s0, %s994_s21  ;;  %v1060_v9 = vld [vmem:[%s1342_s1 + $0x8] sm:$0xff]   ;;  %v1061_v10 = vld [vmem:[%s1342_s1] sm:$0xff]   ;;  %s1242_s17 = scalar_lea.vmem %s1344_s3, %s901_s13 }
   0xe   : > { %484 = vmatprep.subr.bf16.mxu0 %v1119_v1  ;;  %1028 = vmatprep.subr.bf16.mxu1 %v1119_v1  ;;  %v1065_v5 = vld [vmem:[%s1163_s24 + $0x4] ss:$8 sps:$4 sm:$0xff]   ;;  %v1063_v12 = vld [vmem:[%s1163_s24] ss:$8 sps:$4 sm:$0xff]   ;;  %v1069_v14 = vld [vmem:[%s1163_s24 + $0x14] ss:$8 sps:$4 sm:$0xff]  }
   0xf   : > { %v1068_v6 = vld [vmem:[%s1163_s24 + $0x84] ss:$8 sps:$4 sm:$0xff]   ;;  %944 = vmatprep.mubr.msk.bf16.mxu0 %vm433_vm0, %v1065_v5  ;;  %v1066_v13 = vld [vmem:[%s1163_s24 + $0x80] ss:$8 sps:$4 sm:$0xff]   ;;  %v1071_v15 = vld [vmem:[%s1163_s24 + $0x94] ss:$8 sps:$4 sm:$0xff]  }
  0x10   : > { %952 = vmatprep.mubr.msk.bf16.mxu1 %vm433_vm0, %v1068_v6  ;;  %v1062_v11 = vld [vmem:[%s1342_s1 + $0x40] sm:$0xff]   ;;  %v1073_v16 = vld [vmem:[%s1163_s24 + $0x10] ss:$8 sps:$4 sm:$0xff]   ;;  %v1081_v22 = vld [vmem:[%s1163_s24 + $0x34] ss:$8 sps:$4 sm:$0xff]  }
  0x11   : > { %485 = vmatpush1.bf16.msra.mxu0 %v1055_v2  ;;  %1037 = vmatpush1.bf16.msra.mxu1 %v1055_v2  ;;  %v1074_v17 = vld [vmem:[%s1163_s24 + $0x90] ss:$8 sps:$4 sm:$0xff]   ;;  %v1075_v18 = vld [vmem:[%s1163_s24 + $0x24] ss:$8 sps:$4 sm:$0xff]   ;;  %v1079_v20 = vld [vmem:[%s1163_s24 + $0x20] ss:$8 sps:$4 sm:$0xff]  }
  0x12   : > { %486 = vmatprep.subr.bf16.mxu0 %v1119_v1  ;;  %1029 = vmatprep.subr.bf16.mxu1 %v1119_v1  ;;  %v1077_v19 = vld [vmem:[%s1163_s24 + $0xa4] ss:$8 sps:$4 sm:$0xff]   ;;  %v1080_v21 = vld [vmem:[%s1163_s24 + $0xa0] ss:$8 sps:$4 sm:$0xff]   ;;  %v1083_v23 = vld [vmem:[%s1163_s24 + $0xb4] ss:$8 sps:$4 sm:$0xff]  }
  0x13   : > { %v1085_v24 = vld [vmem:[%s1163_s24 + $0x30] ss:$8 sps:$4 sm:$0xff]   ;;  %v1087_v26 = vld [vmem:[%s1163_s24 + $0x44] ss:$8 sps:$4 sm:$0xff]   ;;  %v1091_v28 = vld [vmem:[%s1163_s24 + $0x40] ss:$8 sps:$4 sm:$0xff]  }
  0x14   : > { %v1086_v25 = vld [vmem:[%s1163_s24 + $0xb0] ss:$8 sps:$4 sm:$0xff]   ;;  %v1089_v27 = vld [vmem:[%s1163_s24 + $0xc4] ss:$8 sps:$4 sm:$0xff]   ;;  %v1092_v29 = vld [vmem:[%s1163_s24 + $0xc0] ss:$8 sps:$4 sm:$0xff]  }
  0x15   : > { %487 = vmatpush1.bf16.msra.mxu0 %v1056_v3  ;;  %1038 = vmatpush1.bf16.msra.mxu1 %v1056_v3  ;;  %v1093_v30 = vld [vmem:[%s1163_s24 + $0x54] ss:$8 sps:$4 sm:$0xff]   ;;  %v1097_v32 = vld [vmem:[%s1163_s24 + $0x50] ss:$8 sps:$4 sm:$0xff]   ;;  %v1099_v34 = vld [vmem:[%s1163_s24 + $0x64] ss:$8 sps:$4 sm:$0xff]  }
  0x16   : > { %488 = vmatprep.subr.bf16.mxu0 %v1119_v1  ;;  %1030 = vmatprep.subr.bf16.mxu1 %v1119_v1  ;;  %v1095_v31 = vld [vmem:[%s1163_s24 + $0xd4] ss:$8 sps:$4 sm:$0xff]   ;;  %v1098_v33 = vld [vmem:[%s1163_s24 + $0xd0] ss:$8 sps:$4 sm:$0xff]   ;;  %v1101_v35 = vld [vmem:[%s1163_s24 + $0xe4] ss:$8 sps:$4 sm:$0xff]  }
  0x17   : > { %v1103_v36 = vld [vmem:[%s1163_s24 + $0x60] ss:$8 sps:$4 sm:$0xff]   ;;  %v1105_v38 = vld [vmem:[%s1163_s24 + $0x74] ss:$8 sps:$4 sm:$0xff]   ;;  %v1109_v40 = vld [vmem:[%s1163_s24 + $0x70] ss:$8 sps:$4 sm:$0xff]  }
  0x18   : > { %v1104_v37 = vld [vmem:[%s1163_s24 + $0xe0] ss:$8 sps:$4 sm:$0xff]   ;;  %v1107_v39 = vld [vmem:[%s1163_s24 + $0xf4] ss:$8 sps:$4 sm:$0xff]   ;;  %v1110_v41 = vld [vmem:[%s1163_s24 + $0xf0] ss:$8 sps:$4 sm:$0xff]  }
  0x19   : > { %489 = vmatpush1.bf16.msra.mxu0 %v1057_v4  ;;  %1039 = vmatpush1.bf16.msra.mxu1 %v1057_v4  ;;  %v1234_v42 = vld [vmem:[%s1343_s2] ss:$0 sm:$0xff] }
  0x1a   : > { %490 = vmatprep.subr.bf16.mxu0 %v1119_v1  ;;  %1031 = vmatprep.subr.bf16.mxu1 %v1119_v1 }
  0x1d   : > { %491 = vmatpush1.bf16.msra.mxu0 %v1058_v7  ;;  %1040 = vmatpush1.bf16.msra.mxu1 %v1058_v7 }
  0x1e   : > { %492 = vmatprep.subr.bf16.mxu0 %v1119_v1  ;;  %1032 = vmatprep.subr.bf16.mxu1 %v1119_v1 }
  0x21   : > { %493 = vmatpush1.bf16.msra.mxu0 %v1059_v8  ;;  %1041 = vmatpush1.bf16.msra.mxu1 %v1059_v8 }
  0x22   : > { %494 = vmatprep.subr.bf16.mxu0 %v1119_v1  ;;  %1033 = vmatprep.subr.bf16.mxu1 %v1119_v1 }
  0x25   : > { %495 = vmatpush1.bf16.msra.mxu0 %v1060_v9  ;;  %1042 = vmatpush1.bf16.msra.mxu1 %v1060_v9 }
  0x26   : > { %496 = vmatprep.subr.bf16.mxu0 %v1119_v1  ;;  %1034 = vmatprep.subr.bf16.mxu1 %v1119_v1 }
  0x29   : > { %497 = vmatpush1.bf16.msra.mxu0 %v1061_v10  ;;  %1043 = vmatpush1.bf16.msra.mxu1 %v1061_v10 }
  0x2a   : > { %512 = vmatprep.subr.bf16.mxu0 %v1119_v1  ;;  %1035 = vmatprep.subr.bf16.mxu1 %v1119_v1 }
  0x2d   : > { %513 = vmatpush2.bf16.msra.mxu0 %v1062_v11  ;;  %1044 = vmatpush2.bf16.msra.mxu1 %v1062_v11 }
  0x30   : > { %515 = vmatmul.mubr.bf16.vlgmr.msra.gmra.mxu0 %v1063_v12  ;;  %579 = vmatmul.mubr.bf16.vlgmr.msra.gmra.mxu1 %v1066_v13 }
  0x31   : > { %945 = vmatprep.mubr.msk.bf16.mxu0 %vm433_vm0, %v1069_v14  ;;  %953 = vmatprep.mubr.msk.bf16.mxu1 %vm433_vm0, %v1071_v15 }
  0x38   : > { %523 = vmatmul.mubr.bf16.gmra.mxu0 %v1073_v16  ;;  %587 = vmatmul.mubr.bf16.gmra.mxu1 %v1074_v17 }
  0x39   : > { %946 = vmatprep.mubr.msk.bf16.mxu0 %vm433_vm0, %v1075_v18  ;;  %954 = vmatprep.mubr.msk.bf16.mxu1 %vm433_vm0, %v1077_v19 }
  0x40   : > { %531 = vmatmul.mubr.bf16.gmra.mxu0 %v1079_v20  ;;  %595 = vmatmul.mubr.bf16.gmra.mxu1 %v1080_v21 }
  0x41   : > { %947 = vmatprep.mubr.msk.bf16.mxu0 %vm433_vm0, %v1081_v22  ;;  %955 = vmatprep.mubr.msk.bf16.mxu1 %vm433_vm0, %v1083_v23 }
  0x48   : > { %539 = vmatmul.mubr.bf16.gmra.mxu0 %v1085_v24  ;;  %603 = vmatmul.mubr.bf16.gmra.mxu1 %v1086_v25 }
  0x49   : > { %948 = vmatprep.mubr.msk.bf16.mxu0 %vm433_vm0, %v1087_v26  ;;  %956 = vmatprep.mubr.msk.bf16.mxu1 %vm433_vm0, %v1089_v27 }
  0x50   : > { %547 = vmatmul.mubr.bf16.gmra.mxu0 %v1091_v28  ;;  %611 = vmatmul.mubr.bf16.gmra.mxu1 %v1092_v29 }
  0x51   : > { %949 = vmatprep.mubr.msk.bf16.mxu0 %vm433_vm0, %v1093_v30  ;;  %957 = vmatprep.mubr.msk.bf16.mxu1 %vm433_vm0, %v1095_v31 }
  0x58   : > { %555 = vmatmul.mubr.bf16.gmra.mxu0 %v1097_v32  ;;  %619 = vmatmul.mubr.bf16.gmra.mxu1 %v1098_v33 }
  0x59   : > { %950 = vmatprep.mubr.msk.bf16.mxu0 %vm433_vm0, %v1099_v34  ;;  %958 = vmatprep.mubr.msk.bf16.mxu1 %vm433_vm0, %v1101_v35 }
  0x60   : > { %563 = vmatmul.mubr.bf16.gmra.mxu0 %v1103_v36  ;;  %627 = vmatmul.mubr.bf16.gmra.mxu1 %v1104_v37 }
  0x61   : > { %951 = vmatprep.mubr.msk.bf16.mxu0 %vm433_vm0, %v1105_v38  ;;  %959 = vmatprep.mubr.msk.bf16.mxu1 %vm433_vm0, %v1107_v39 }
  0x68   : > { %571 = vmatmul.mubr.bf16.gmra.mxu0 %v1109_v40  ;;  %635 = vmatmul.mubr.bf16.gmra.mxu1 %v1110_v41 }
  0xf0   : > { %v516_v43 = vpop.f32.mrf.mxu0  ;;  %v580_v44 = vpop.f32.mrf.mxu1 }
  0xf1   : > { %v517_v45 = vadd.f32 %v1234_v42, %v516_v43  ;;  %v581_v46 = vadd.f32 %v1234_v42, %v580_v44 }
  0xf2   : > { %v518_v47 = vpop.f32.mrf.mxu0  ;;  %v582_v48 = vpop.f32.mrf.mxu1 }
  0xf3   : > { %v643_v49 = vmax.f32 %v517_v45, 0.0  ;;  %v659_v50 = vmax.f32 %v581_v46, 0.0 }
  0xf4   : > { %v519_v51 = vpop.f32.mrf.mxu0  ;;  %v583_v52 = vpop.f32.mrf.mxu1 }
  0xf5   : > { %v995_v53 = vpack.c.bf16 %v643_v49, %v643_v49  ;;  %v1011_v54 = vpack.c.bf16 %v659_v50, %v659_v50  ;;  %v520_v55 = vadd.f32 %v1234_v42, %v519_v51  ;;  %v584_v56 = vadd.f32 %v1234_v42, %v583_v52 }
  0xf6   : > { %v521_v57 = vpop.f32.mrf.mxu0  ;;  %v585_v58 = vpop.f32.mrf.mxu1 }
  0xf7   : > { %804 = vst.msk [vmem:[%s1242_s17] sm:$0xf] %vm803_vm1, %v995_v53  ;;  %820 = vst.msk [vmem:[%s1242_s17 + $0x40] sm:$0xf] %vm803_vm1, %v1011_v54  ;;  %v644_v59 = vmax.f32 %v520_v55, 0.0  ;;  %v660_v60 = vmax.f32 %v584_v56, 0.0 }
  0xf8   : > { %v524_v61 = vpop.f32.mrf.mxu0  ;;  %v588_v62 = vpop.f32.mrf.mxu1 }
  0xf9   : > { %v996_v63 = vpack.c.bf16 %v644_v59, %v644_v59  ;;  %v1012_v0 = vpack.c.bf16 %v660_v60, %v660_v60  ;;  %v525_v1 = vadd.f32 %v1234_v42, %v524_v61  ;;  %v589_v2 = vadd.f32 %v1234_v42, %v588_v62 }
  0xfa   : > { %v526_v3 = vpop.f32.mrf.mxu0  ;;  %v590_v4 = vpop.f32.mrf.mxu1 }
  0xfb   : > { %805 = vst.msk [vmem:[%s1242_s17 + $0x4] sm:$0xf] %vm803_vm1, %v996_v63  ;;  %821 = vst.msk [vmem:[%s1242_s17 + $0x44] sm:$0xf] %vm803_vm1, %v1012_v0  ;;  %v645_v5 = vmax.f32 %v525_v1, 0.0  ;;  %v661_v6 = vmax.f32 %v589_v2, 0.0 }
  0xfc   : > { %v527_v7 = vpop.f32.mrf.mxu0  ;;  %v591_v8 = vpop.f32.mrf.mxu1 }
  0xfd   : > { %v997_v9 = vpack.c.bf16 %v645_v5, %v645_v5  ;;  %v1013_v10 = vpack.c.bf16 %v661_v6, %v661_v6  ;;  %v528_v11 = vadd.f32 %v1234_v42, %v527_v7  ;;  %v592_v12 = vadd.f32 %v1234_v42, %v591_v8 }
  0xfe   : > { %v529_v13 = vpop.f32.mrf.mxu0  ;;  %v593_v14 = vpop.f32.mrf.mxu1 }
  0xff   : > { %806 = vst.msk [vmem:[%s1242_s17 + $0x8] sm:$0xf] %vm803_vm1, %v997_v9  ;;  %822 = vst.msk [vmem:[%s1242_s17 + $0x48] sm:$0xf] %vm803_vm1, %v1013_v10  ;;  %v646_v15 = vmax.f32 %v528_v11, 0.0  ;;  %v662_v16 = vmax.f32 %v592_v12, 0.0 }
 0x100   : > { %v532_v17 = vpop.f32.mrf.mxu0  ;;  %v596_v18 = vpop.f32.mrf.mxu1 }
 0x101   : > { %v998_v19 = vpack.c.bf16 %v646_v15, %v646_v15  ;;  %v1014_v20 = vpack.c.bf16 %v662_v16, %v662_v16  ;;  %v533_v21 = vadd.f32 %v1234_v42, %v532_v17  ;;  %v597_v22 = vadd.f32 %v1234_v42, %v596_v18 }
 0x102   : > { %v534_v23 = vpop.f32.mrf.mxu0  ;;  %v598_v24 = vpop.f32.mrf.mxu1 }
 0x103   : > { %807 = vst.msk [vmem:[%s1242_s17 + $0xc] sm:$0xf] %vm803_vm1, %v998_v19  ;;  %823 = vst.msk [vmem:[%s1242_s17 + $0x4c] sm:$0xf] %vm803_vm1, %v1014_v20  ;;  %v647_v25 = vmax.f32 %v533_v21, 0.0  ;;  %v663_v26 = vmax.f32 %v597_v22, 0.0 }
 0x104   : > { %v535_v27 = vpop.f32.mrf.mxu0  ;;  %v599_v28 = vpop.f32.mrf.mxu1 }
 0x105   : > { %v999_v29 = vpack.c.bf16 %v647_v25, %v647_v25  ;;  %v1015_v30 = vpack.c.bf16 %v663_v26, %v663_v26  ;;  %v536_v31 = vadd.f32 %v1234_v42, %v535_v27  ;;  %v600_v32 = vadd.f32 %v1234_v42, %v599_v28 }
 0x106   : > { %v537_v33 = vpop.f32.mrf.mxu0  ;;  %v601_v34 = vpop.f32.mrf.mxu1 }
 0x107   : > { %808 = vst.msk [vmem:[%s1242_s17 + $0x10] sm:$0xf] %vm803_vm1, %v999_v29  ;;  %824 = vst.msk [vmem:[%s1242_s17 + $0x50] sm:$0xf] %vm803_vm1, %v1015_v30  ;;  %v648_v35 = vmax.f32 %v536_v31, 0.0  ;;  %v664_v36 = vmax.f32 %v600_v32, 0.0 }
 0x108   : > { %v540_v37 = vpop.f32.mrf.mxu0  ;;  %v604_v38 = vpop.f32.mrf.mxu1 }
 0x109   : > { %v1000_v39 = vpack.c.bf16 %v648_v35, %v648_v35  ;;  %v1016_v40 = vpack.c.bf16 %v664_v36, %v664_v36  ;;  %v541_v41 = vadd.f32 %v1234_v42, %v540_v37  ;;  %v605_v43 = vadd.f32 %v1234_v42, %v604_v38 }
 0x10a   : > { %v542_v44 = vpop.f32.mrf.mxu0  ;;  %v606_v45 = vpop.f32.mrf.mxu1 }
 0x10b   : > { %809 = vst.msk [vmem:[%s1242_s17 + $0x14] sm:$0xf] %vm803_vm1, %v1000_v39  ;;  %825 = vst.msk [vmem:[%s1242_s17 + $0x54] sm:$0xf] %vm803_vm1, %v1016_v40  ;;  %v649_v46 = vmax.f32 %v541_v41, 0.0  ;;  %v665_v47 = vmax.f32 %v605_v43, 0.0 }
 0x10c   : > { %v543_v48 = vpop.f32.mrf.mxu0  ;;  %v607_v49 = vpop.f32.mrf.mxu1 }
 0x10d   : > { %v1001_v50 = vpack.c.bf16 %v649_v46, %v649_v46  ;;  %v1017_v51 = vpack.c.bf16 %v665_v47, %v665_v47  ;;  %v544_v52 = vadd.f32 %v1234_v42, %v543_v48  ;;  %v608_v53 = vadd.f32 %v1234_v42, %v607_v49 }
 0x10e   : > { %v545_v54 = vpop.f32.mrf.mxu0  ;;  %v609_v55 = vpop.f32.mrf.mxu1 }
 0x10f   : > { %810 = vst.msk [vmem:[%s1242_s17 + $0x18] sm:$0xf] %vm803_vm1, %v1001_v50  ;;  %826 = vst.msk [vmem:[%s1242_s17 + $0x58] sm:$0xf] %vm803_vm1, %v1017_v51  ;;  %v650_v56 = vmax.f32 %v544_v52, 0.0  ;;  %v666_v57 = vmax.f32 %v608_v53, 0.0 }
 0x110   : > { %v548_v58 = vpop.f32.mrf.mxu0  ;;  %v612_v59 = vpop.f32.mrf.mxu1 }
 0x111   : > { %v1002_v60 = vpack.c.bf16 %v650_v56, %v650_v56  ;;  %v1018_v61 = vpack.c.bf16 %v666_v57, %v666_v57  ;;  %v549_v62 = vadd.f32 %v1234_v42, %v548_v58  ;;  %v613_v63 = vadd.f32 %v1234_v42, %v612_v59 }
 0x112   : > { %v550_v0 = vpop.f32.mrf.mxu0  ;;  %v614_v1 = vpop.f32.mrf.mxu1 }
 0x113   : > { %811 = vst.msk [vmem:[%s1242_s17 + $0x1c] sm:$0xf] %vm803_vm1, %v1002_v60  ;;  %827 = vst.msk [vmem:[%s1242_s17 + $0x5c] sm:$0xf] %vm803_vm1, %v1018_v61  ;;  %v651_v2 = vmax.f32 %v549_v62, 0.0  ;;  %v667_v3 = vmax.f32 %v613_v63, 0.0 }
 0x114   : > { %v551_v4 = vpop.f32.mrf.mxu0  ;;  %v615_v5 = vpop.f32.mrf.mxu1 }
 0x115   : > { %v1003_v6 = vpack.c.bf16 %v651_v2, %v651_v2  ;;  %v1019_v7 = vpack.c.bf16 %v667_v3, %v667_v3  ;;  %v552_v8 = vadd.f32 %v1234_v42, %v551_v4  ;;  %v616_v9 = vadd.f32 %v1234_v42, %v615_v5 }
 0x116   : > { %v553_v10 = vpop.f32.mrf.mxu0  ;;  %v617_v11 = vpop.f32.mrf.mxu1 }
 0x117   : > { %812 = vst.msk [vmem:[%s1242_s17 + $0x20] sm:$0xf] %vm803_vm1, %v1003_v6  ;;  %828 = vst.msk [vmem:[%s1242_s17 + $0x60] sm:$0xf] %vm803_vm1, %v1019_v7  ;;  %v652_v12 = vmax.f32 %v552_v8, 0.0  ;;  %v668_v13 = vmax.f32 %v616_v9, 0.0 }
 0x118   : > { %v556_v14 = vpop.f32.mrf.mxu0  ;;  %v620_v15 = vpop.f32.mrf.mxu1 }
 0x119   : > { %v1004_v16 = vpack.c.bf16 %v652_v12, %v652_v12  ;;  %v1020_v17 = vpack.c.bf16 %v668_v13, %v668_v13  ;;  %v557_v18 = vadd.f32 %v1234_v42, %v556_v14  ;;  %v621_v19 = vadd.f32 %v1234_v42, %v620_v15 }
 0x11a   : > { %v558_v20 = vpop.f32.mrf.mxu0  ;;  %v622_v21 = vpop.f32.mrf.mxu1 }
 0x11b   : > { %813 = vst.msk [vmem:[%s1242_s17 + $0x24] sm:$0xf] %vm803_vm1, %v1004_v16  ;;  %829 = vst.msk [vmem:[%s1242_s17 + $0x64] sm:$0xf] %vm803_vm1, %v1020_v17  ;;  %v653_v22 = vmax.f32 %v557_v18, 0.0  ;;  %v669_v23 = vmax.f32 %v621_v19, 0.0 }
 0x11c   : > { %v559_v24 = vpop.f32.mrf.mxu0  ;;  %v623_v25 = vpop.f32.mrf.mxu1 }
 0x11d   : > { %v1005_v26 = vpack.c.bf16 %v653_v22, %v653_v22  ;;  %v1021_v27 = vpack.c.bf16 %v669_v23, %v669_v23  ;;  %v560_v28 = vadd.f32 %v1234_v42, %v559_v24  ;;  %v624_v29 = vadd.f32 %v1234_v42, %v623_v25 }
 0x11e   : > { %v561_v30 = vpop.f32.mrf.mxu0  ;;  %v625_v31 = vpop.f32.mrf.mxu1 }
 0x11f   : > { %814 = vst.msk [vmem:[%s1242_s17 + $0x28] sm:$0xf] %vm803_vm1, %v1005_v26  ;;  %830 = vst.msk [vmem:[%s1242_s17 + $0x68] sm:$0xf] %vm803_vm1, %v1021_v27  ;;  %v654_v32 = vmax.f32 %v560_v28, 0.0  ;;  %v670_v33 = vmax.f32 %v624_v29, 0.0 }
 0x120   : > { %v564_v34 = vpop.f32.mrf.mxu0  ;;  %v628_v35 = vpop.f32.mrf.mxu1 }
 0x121   : > { %v1006_v36 = vpack.c.bf16 %v654_v32, %v654_v32  ;;  %v1022_v37 = vpack.c.bf16 %v670_v33, %v670_v33  ;;  %v565_v38 = vadd.f32 %v1234_v42, %v564_v34  ;;  %v629_v39 = vadd.f32 %v1234_v42, %v628_v35 }
 0x122   : > { %v566_v40 = vpop.f32.mrf.mxu0  ;;  %v630_v41 = vpop.f32.mrf.mxu1 }
 0x123   : > { %815 = vst.msk [vmem:[%s1242_s17 + $0x2c] sm:$0xf] %vm803_vm1, %v1006_v36  ;;  %831 = vst.msk [vmem:[%s1242_s17 + $0x6c] sm:$0xf] %vm803_vm1, %v1022_v37  ;;  %v655_v43 = vmax.f32 %v565_v38, 0.0  ;;  %v671_v44 = vmax.f32 %v629_v39, 0.0 }
 0x124   : > { %v567_v45 = vpop.f32.mrf.mxu0  ;;  %v631_v46 = vpop.f32.mrf.mxu1 }
 0x125   : > { %v1007_v47 = vpack.c.bf16 %v655_v43, %v655_v43  ;;  %v1023_v48 = vpack.c.bf16 %v671_v44, %v671_v44  ;;  %v568_v49 = vadd.f32 %v1234_v42, %v567_v45  ;;  %v632_v50 = vadd.f32 %v1234_v42, %v631_v46 }
 0x126   : > { %v569_v51 = vpop.f32.mrf.mxu0  ;;  %v633_v52 = vpop.f32.mrf.mxu1 }
 0x127   : > { %816 = vst.msk [vmem:[%s1242_s17 + $0x30] sm:$0xf] %vm803_vm1, %v1007_v47  ;;  %832 = vst.msk [vmem:[%s1242_s17 + $0x70] sm:$0xf] %vm803_vm1, %v1023_v48  ;;  %v656_v53 = vmax.f32 %v568_v49, 0.0  ;;  %v672_v54 = vmax.f32 %v632_v50, 0.0 }
 0x128   : > { %v572_v55 = vpop.f32.mrf.mxu0  ;;  %v636_v56 = vpop.f32.mrf.mxu1 }
 0x129   : > { %v1008_v57 = vpack.c.bf16 %v656_v53, %v656_v53  ;;  %v1024_v58 = vpack.c.bf16 %v672_v54, %v672_v54  ;;  %v573_v59 = vadd.f32 %v1234_v42, %v572_v55  ;;  %v637_v60 = vadd.f32 %v1234_v42, %v636_v56 }
 0x12a   : > { %v574_v61 = vpop.f32.mrf.mxu0  ;;  %v638_v62 = vpop.f32.mrf.mxu1 }
 0x12b   : > { %817 = vst.msk [vmem:[%s1242_s17 + $0x34] sm:$0xf] %vm803_vm1, %v1008_v57  ;;  %833 = vst.msk [vmem:[%s1242_s17 + $0x74] sm:$0xf] %vm803_vm1, %v1024_v58  ;;  %v657_v63 = vmax.f32 %v573_v59, 0.0  ;;  %v673_v0 = vmax.f32 %v637_v60, 0.0 }
 0x12c   : > { %v575_v1 = vpop.f32.mrf.mxu0  ;;  %v639_v2 = vpop.f32.mrf.mxu1 }
 0x12d   : > { %v1009_v3 = vpack.c.bf16 %v657_v63, %v657_v63  ;;  %v1025_v4 = vpack.c.bf16 %v673_v0, %v673_v0  ;;  %v576_v5 = vadd.f32 %v1234_v42, %v575_v1  ;;  %v640_v6 = vadd.f32 %v1234_v42, %v639_v2 }
 0x12e   : > { %v577_v7 = vpop.f32.mrf.mxu0  ;;  %v641_v8 = vpop.f32.mrf.mxu1 }
 0x12f   : > { %818 = vst.msk [vmem:[%s1242_s17 + $0x38] sm:$0xf] %vm803_vm1, %v1009_v3  ;;  %834 = vst.msk [vmem:[%s1242_s17 + $0x78] sm:$0xf] %vm803_vm1, %v1025_v4  ;;  %v658_v9 = vmax.f32 %v576_v5, 0.0  ;;  %v674_v10 = vmax.f32 %v640_v6, 0.0 }
 0x131   : > { %v1010_v11 = vpack.c.bf16 %v658_v9, %v658_v9  ;;  %v1026_v12 = vpack.c.bf16 %v674_v10, %v674_v10 }
 0x133   : > { %819 = vst.msk [vmem:[%s1242_s17 + $0x3c] sm:$0xf] %vm803_vm1, %v1010_v11  ;;  %835 = vst.msk [vmem:[%s1242_s17 + $0x7c] sm:$0xf] %vm803_vm1, %v1026_v12 }
 0x134 PF: > { %s13_s12 = sadd.s32 1, %s1117_s12  }
 0x135   : > { %p10_p4 = scmp.ge.s32.totalorder %s13_s12, 4  }
 0x137   :  { %12 = sbr.rel (!%p10_p4) target bundleno = 1 (0x1), region = 62 }

// kernel: _lambda_.34
= control target key start
LH: loop header
LB: loop body
LE: loop exit
PB: predicated region body
PF: predicated region fallthrough
CT: control target
= control target key end

     0   :  { %s1383_s15 = smov 0   ;;  %s1605_s0 = inlined_call_operand.vmem [shape: bf16[512,144], index: 0, kind: input, shape index: {}]   ;;  %s1606_s1 = inlined_call_operand.vmem [shape: bf16[144,16], index: 1, kind: input, shape index: {}]   ;;  %s1607_s2 = inlined_call_operand.vmem [shape: f32[1,16], index: 2, kind: input, shape index: {}]   ;;  %s1608_s3 = inlined_call_operand.vmem [shape: bf16[512,16], index: 3, kind: input, shape index: {}]   ;;  %s1609_s4 = inlined_call_operand.vmem [shape: bf16[512,16], index: 4, kind: output, shape index: {}]  }
   0x1 LB: > { %s1049_s16 = sadd.s32 4294967295, %s1355_s15   ;;  %p1053_p0 = scmp.ge.s32.totalorder %s1355_s15, 1  ;;  %s1355_s15 = sphi %s1383_s15, %s14_s15  }
   0x2   : > { %p175_p1 = scmp.lt.s32.totalorder %s1355_s15, 3 }
   0x4   : > { %p176_p2 = pnand %p1053_p0, %p175_p1 }
   0x5   : > { %s1054_s19 = sshll.u32 (!%p176_p2), %s1049_s16, 5 }
   0x6   : > { %179 = sbr.rel (%p176_p2) target bundleno = 310 (0x136), region = 36  ;;  %p208_p3 = scmp.lt.s32.totalorder (!%p176_p2), %s1054_s19, 63 }
   0xb   : > { %v1292_v0 = vld [vmem:[%s1606_s1 + $0x38] sm:$0xff]   ;;  %v1357_v1 = vmov 0   ;;  %v1293_v2 = vld [vmem:[%s1606_s1 + $0x30] sm:$0xff]   ;;  %s1611_s19 = smov (!%p208_p3, %s1054_s19), 63  ;;  %v1294_v3 = vld [vmem:[%s1606_s1 + $0x28] sm:$0xff]   ;;  %vm546_vm0 = vcmask 130048  }
   0xc   : > { %595 = vmatprep.subr.bf16.mxu0 %v1357_v1  ;;  %1265 = vmatprep.subr.bf16.mxu1 %v1357_v1  ;;  %s1153_s24 = sshll.u32 %s1611_s19, 3  ;;  %v1295_v4 = vld [vmem:[%s1606_s1 + $0x20] sm:$0xff]   ;;  %v1296_v7 = vld [vmem:[%s1606_s1 + $0x18] sm:$0xff]   ;;  %v1297_v8 = vld [vmem:[%s1606_s1 + $0x10] sm:$0xff]   ;;  %s1058_s14 = sshll.u32 %s1611_s19, 2  ;;  %vm948_vm1 = vcmask 125952  }
   0xd   : > { %596 = vmatpush1.bf16.msra.mxu0 %v1292_v0  ;;  %1274 = vmatpush1.bf16.msra.mxu1 %v1292_v0  ;;  %s1406_s27 = scalar_lea.vmem %s1605_s0, %s1153_s24  ;;  %v1298_v9 = vld [vmem:[%s1606_s1 + $0x8] sm:$0xff]   ;;  %v1299_v10 = vld [vmem:[%s1606_s1] sm:$0xff]   ;;  %s1478_s18 = scalar_lea.vmem %s1608_s3, %s1058_s14 }
   0xe   : > { %597 = vmatprep.subr.bf16.mxu0 %v1357_v1  ;;  %1266 = vmatprep.subr.bf16.mxu1 %v1357_v1  ;;  %v1303_v5 = vld [vmem:[%s1406_s27 + $0x4] ss:$8 sps:$4 sm:$0xff]   ;;  %v1301_v12 = vld [vmem:[%s1406_s27] ss:$8 sps:$4 sm:$0xff]   ;;  %v1307_v14 = vld [vmem:[%s1406_s27 + $0x14] ss:$8 sps:$4 sm:$0xff]   ;;  %s1496_s23 = scalar_lea.vmem %s1609_s4, %s1058_s14 }
   0xf   : > { %v1306_v6 = vld [vmem:[%s1406_s27 + $0x84] ss:$8 sps:$4 sm:$0xff]   ;;  %1103 = vmatprep.mubr.msk.bf16.mxu0 %vm546_vm0, %v1303_v5  ;;  %v1304_v13 = vld [vmem:[%s1406_s27 + $0x80] ss:$8 sps:$4 sm:$0xff]   ;;  %v1309_v15 = vld [vmem:[%s1406_s27 + $0x94] ss:$8 sps:$4 sm:$0xff]  }
  0x10   : > { %1111 = vmatprep.mubr.msk.bf16.mxu1 %vm546_vm0, %v1306_v6  ;;  %v1300_v11 = vld [vmem:[%s1606_s1 + $0x40] sm:$0xff]   ;;  %v1311_v16 = vld [vmem:[%s1406_s27 + $0x10] ss:$8 sps:$4 sm:$0xff]   ;;  %v1319_v22 = vld [vmem:[%s1406_s27 + $0x34] ss:$8 sps:$4 sm:$0xff]  }
  0x11   : > { %598 = vmatpush1.bf16.msra.mxu0 %v1293_v2  ;;  %1275 = vmatpush1.bf16.msra.mxu1 %v1293_v2  ;;  %v1312_v17 = vld [vmem:[%s1406_s27 + $0x90] ss:$8 sps:$4 sm:$0xff]   ;;  %v1313_v18 = vld [vmem:[%s1406_s27 + $0x24] ss:$8 sps:$4 sm:$0xff]   ;;  %v1317_v20 = vld [vmem:[%s1406_s27 + $0x20] ss:$8 sps:$4 sm:$0xff]  }
  0x12   : > { %599 = vmatprep.subr.bf16.mxu0 %v1357_v1  ;;  %1267 = vmatprep.subr.bf16.mxu1 %v1357_v1  ;;  %v1315_v19 = vld [vmem:[%s1406_s27 + $0xa4] ss:$8 sps:$4 sm:$0xff]   ;;  %v1318_v21 = vld [vmem:[%s1406_s27 + $0xa0] ss:$8 sps:$4 sm:$0xff]   ;;  %v1321_v23 = vld [vmem:[%s1406_s27 + $0xb4] ss:$8 sps:$4 sm:$0xff]  }
  0x13   : > { %v1323_v24 = vld [vmem:[%s1406_s27 + $0x30] ss:$8 sps:$4 sm:$0xff]   ;;  %v1325_v26 = vld [vmem:[%s1406_s27 + $0x44] ss:$8 sps:$4 sm:$0xff]   ;;  %v1329_v28 = vld [vmem:[%s1406_s27 + $0x40] ss:$8 sps:$4 sm:$0xff]  }
  0x14   : > { %v1324_v25 = vld [vmem:[%s1406_s27 + $0xb0] ss:$8 sps:$4 sm:$0xff]   ;;  %v1327_v27 = vld [vmem:[%s1406_s27 + $0xc4] ss:$8 sps:$4 sm:$0xff]   ;;  %v1330_v29 = vld [vmem:[%s1406_s27 + $0xc0] ss:$8 sps:$4 sm:$0xff]  }
  0x15   : > { %600 = vmatpush1.bf16.msra.mxu0 %v1294_v3  ;;  %1276 = vmatpush1.bf16.msra.mxu1 %v1294_v3  ;;  %v1331_v30 = vld [vmem:[%s1406_s27 + $0x54] ss:$8 sps:$4 sm:$0xff]   ;;  %v1335_v32 = vld [vmem:[%s1406_s27 + $0x50] ss:$8 sps:$4 sm:$0xff]   ;;  %v1337_v34 = vld [vmem:[%s1406_s27 + $0x64] ss:$8 sps:$4 sm:$0xff]  }
  0x16   : > { %601 = vmatprep.subr.bf16.mxu0 %v1357_v1  ;;  %1268 = vmatprep.subr.bf16.mxu1 %v1357_v1  ;;  %v1333_v31 = vld [vmem:[%s1406_s27 + $0xd4] ss:$8 sps:$4 sm:$0xff]   ;;  %v1336_v33 = vld [vmem:[%s1406_s27 + $0xd0] ss:$8 sps:$4 sm:$0xff]   ;;  %v1339_v35 = vld [vmem:[%s1406_s27 + $0xe4] ss:$8 sps:$4 sm:$0xff]  }
  0x17   : > { %v1341_v36 = vld [vmem:[%s1406_s27 + $0x60] ss:$8 sps:$4 sm:$0xff]   ;;  %v1343_v38 = vld [vmem:[%s1406_s27 + $0x74] ss:$8 sps:$4 sm:$0xff]   ;;  %v1347_v40 = vld [vmem:[%s1406_s27 + $0x70] ss:$8 sps:$4 sm:$0xff]  }
  0x18   : > { %v1342_v37 = vld [vmem:[%s1406_s27 + $0xe0] ss:$8 sps:$4 sm:$0xff]   ;;  %v1345_v39 = vld [vmem:[%s1406_s27 + $0xf4] ss:$8 sps:$4 sm:$0xff]   ;;  %v1348_v41 = vld [vmem:[%s1406_s27 + $0xf0] ss:$8 sps:$4 sm:$0xff]  }
  0x19   : > { %602 = vmatpush1.bf16.msra.mxu0 %v1295_v4  ;;  %1277 = vmatpush1.bf16.msra.mxu1 %v1295_v4  ;;  %v1187_v42 = vld [vmem:[%s1478_s18] sm:$0xff]   ;;  %v1250_v57 = vld [vmem:[%s1478_s18 + $0x8] sm:$0xff]  }
  0x1a   : > { %603 = vmatprep.subr.bf16.mxu0 %v1357_v1  ;;  %1269 = vmatprep.subr.bf16.mxu1 %v1357_v1  ;;  %v1257_v43 = vld [vmem:[%s1478_s18 + $0x40] sm:$0xff]   ;;  %v1188_v45 = vunpack.c.l.bf16 %v1187_v42  ;;  %v1189_v55 = vunpack.c.h.bf16 %v1187_v42  ;;  %v1258_v58 = vld [vmem:[%s1478_s18 + $0x48] sm:$0xff]   ;;  %v1192_v3 = vunpack.c.l.bf16 %v1250_v57 }
  0x1b   : > { %v1485_v44 = vld [vmem:[%s1607_s2] ss:$0 sm:$0xff]  ;;  %v1220_v46 = vunpack.c.l.bf16 %v1257_v43  ;;  %v1221_v56 = vunpack.c.h.bf16 %v1257_v43  ;;  %v1224_v4 = vunpack.c.l.bf16 %v1258_v58 }
  0x1d   : > { %604 = vmatpush1.bf16.msra.mxu0 %v1296_v7  ;;  %1278 = vmatpush1.bf16.msra.mxu1 %v1296_v7 }
  0x1e   : > { %605 = vmatprep.subr.bf16.mxu0 %v1357_v1  ;;  %1270 = vmatprep.subr.bf16.mxu1 %v1357_v1 }
  0x21   : > { %606 = vmatpush1.bf16.msra.mxu0 %v1297_v8  ;;  %1279 = vmatpush1.bf16.msra.mxu1 %v1297_v8 }
  0x22   : > { %607 = vmatprep.subr.bf16.mxu0 %v1357_v1  ;;  %1271 = vmatprep.subr.bf16.mxu1 %v1357_v1 }
  0x25   : > { %608 = vmatpush1.bf16.msra.mxu0 %v1298_v9  ;;  %1280 = vmatpush1.bf16.msra.mxu1 %v1298_v9 }
  0x26   : > { %609 = vmatprep.subr.bf16.mxu0 %v1357_v1  ;;  %1272 = vmatprep.subr.bf16.mxu1 %v1357_v1 }
  0x29   : > { %610 = vmatpush1.bf16.msra.mxu0 %v1299_v10  ;;  %1281 = vmatpush1.bf16.msra.mxu1 %v1299_v10 }
  0x2a   : > { %625 = vmatprep.subr.bf16.mxu0 %v1357_v1  ;;  %1273 = vmatprep.subr.bf16.mxu1 %v1357_v1 }
  0x2d   : > { %626 = vmatpush2.bf16.msra.mxu0 %v1300_v11  ;;  %1282 = vmatpush2.bf16.msra.mxu1 %v1300_v11 }
  0x30   : > { %628 = vmatmul.mubr.bf16.vlgmr.msra.gmra.mxu0 %v1301_v12  ;;  %692 = vmatmul.mubr.bf16.vlgmr.msra.gmra.mxu1 %v1304_v13 }
  0x31   : > { %1104 = vmatprep.mubr.msk.bf16.mxu0 %vm546_vm0, %v1307_v14  ;;  %1112 = vmatprep.mubr.msk.bf16.mxu1 %vm546_vm0, %v1309_v15 }
  0x38   : > { %636 = vmatmul.mubr.bf16.gmra.mxu0 %v1311_v16  ;;  %700 = vmatmul.mubr.bf16.gmra.mxu1 %v1312_v17  ;;  %v1193_v17 = vunpack.c.h.bf16 %v1250_v57 }
  0x39   : > { %1105 = vmatprep.mubr.msk.bf16.mxu0 %vm546_vm0, %v1313_v18  ;;  %1113 = vmatprep.mubr.msk.bf16.mxu1 %vm546_vm0, %v1315_v19  ;;  %v1225_v18 = vunpack.c.h.bf16 %v1258_v58 }
  0x40   : > { %644 = vmatmul.mubr.bf16.gmra.mxu0 %v1317_v20  ;;  %708 = vmatmul.mubr.bf16.gmra.mxu1 %v1318_v21 }
  0x41   : > { %1106 = vmatprep.mubr.msk.bf16.mxu0 %vm546_vm0, %v1319_v22  ;;  %1114 = vmatprep.mubr.msk.bf16.mxu1 %vm546_vm0, %v1321_v23  ;;  %v1251_v23 = vld [vmem:[%s1478_s18 + $0x10] sm:$0xff]  }
  0x48   : > { %652 = vmatmul.mubr.bf16.gmra.mxu0 %v1323_v24  ;;  %716 = vmatmul.mubr.bf16.gmra.mxu1 %v1324_v25  ;;  %v1259_v24 = vld [vmem:[%s1478_s18 + $0x50] sm:$0xff]  }
  0x49   : > { %1107 = vmatprep.mubr.msk.bf16.mxu0 %vm546_vm0, %v1325_v26  ;;  %1115 = vmatprep.mubr.msk.bf16.mxu1 %vm546_vm0, %v1327_v27 }
  0x50   : > { %660 = vmatmul.mubr.bf16.gmra.mxu0 %v1329_v28  ;;  %724 = vmatmul.mubr.bf16.gmra.mxu1 %v1330_v29 }
  0x51   : > { %1108 = vmatprep.mubr.msk.bf16.mxu0 %vm546_vm0, %v1331_v30  ;;  %1116 = vmatprep.mubr.msk.bf16.mxu1 %vm546_vm0, %v1333_v31 }
  0x58   : > { %668 = vmatmul.mubr.bf16.gmra.mxu0 %v1335_v32  ;;  %732 = vmatmul.mubr.bf16.gmra.mxu1 %v1336_v33  ;;  %v1196_v33 = vunpack.c.l.bf16 %v1251_v23 }
  0x59   : > { %1109 = vmatprep.mubr.msk.bf16.mxu0 %vm546_vm0, %v1337_v34  ;;  %1117 = vmatprep.mubr.msk.bf16.mxu1 %vm546_vm0, %v1339_v35  ;;  %v1228_v34 = vunpack.c.l.bf16 %v1259_v24 }
  0x60   : > { %676 = vmatmul.mubr.bf16.gmra.mxu0 %v1341_v36  ;;  %740 = vmatmul.mubr.bf16.gmra.mxu1 %v1342_v37 }
  0x61   : > { %1110 = vmatprep.mubr.msk.bf16.mxu0 %vm546_vm0, %v1343_v38  ;;  %1118 = vmatprep.mubr.msk.bf16.mxu1 %vm546_vm0, %v1345_v39 }
  0x68   : > { %684 = vmatmul.mubr.bf16.gmra.mxu0 %v1347_v40  ;;  %748 = vmatmul.mubr.bf16.gmra.mxu1 %v1348_v41 }
  0xf0   : > { %v629_v47 = vpop.f32.mrf.mxu0  ;;  %v693_v48 = vpop.f32.mrf.mxu1 }
  0xf1   : > { %v630_v49 = vadd.f32 %v1485_v44, %v629_v47  ;;  %v694_v50 = vadd.f32 %v1485_v44, %v693_v48  ;;  %v1197_v48 = vunpack.c.h.bf16 %v1251_v23 }
  0xf2   : > { %v631_v51 = vpop.f32.mrf.mxu0  ;;  %v695_v52 = vpop.f32.mrf.mxu1 }
  0xf3   : > { %v756_v53 = vadd.f32 %v1188_v45, %v630_v49  ;;  %v772_v54 = vadd.f32 %v1220_v46, %v694_v50  ;;  %v1229_v49 = vunpack.c.h.bf16 %v1259_v24 }
  0xf4   : > { %v632_v59 = vpop.f32.mrf.mxu0  ;;  %v696_v60 = vpop.f32.mrf.mxu1 }
  0xf5   : > { %v788_v61 = vmax.f32 %v756_v53, 0.0  ;;  %v804_v62 = vmax.f32 %v772_v54, 0.0  ;;  %v633_v63 = vadd.f32 %v1485_v44, %v632_v59  ;;  %v697_v0 = vadd.f32 %v1485_v44, %v696_v60  ;;  %v1252_v54 = vld [vmem:[%s1478_s18 + $0x18] sm:$0xff]  }
  0xf6   : > { %v634_v1 = vpop.f32.mrf.mxu0  ;;  %v698_v2 = vpop.f32.mrf.mxu1 }
  0xf7   : > { %v1154_v5 = vpack.c.bf16 %v788_v61, %v788_v61  ;;  %v1170_v6 = vpack.c.bf16 %v804_v62, %v804_v62  ;;  %v757_v7 = vadd.f32 %v1189_v55, %v633_v63  ;;  %v773_v8 = vadd.f32 %v1221_v56, %v697_v0  ;;  %v1260_v55 = vld [vmem:[%s1478_s18 + $0x58] sm:$0xff]  }
  0xf8   : > { %v637_v9 = vpop.f32.mrf.mxu0  ;;  %v701_v10 = vpop.f32.mrf.mxu1  ;;  %v1200_v0 = vunpack.c.l.bf16 %v1252_v54  ;;  %v1232_v1 = vunpack.c.l.bf16 %v1260_v55 }
  0xf9   : > { %949 = vst.msk [vmem:[%s1496_s23] sm:$0xf] %vm948_vm1, %v1154_v5  ;;  %965 = vst.msk [vmem:[%s1496_s23 + $0x40] sm:$0xf] %vm948_vm1, %v1170_v6  ;;  %v789_v11 = vmax.f32 %v757_v7, 0.0  ;;  %v805_v12 = vmax.f32 %v773_v8, 0.0  ;;  %v638_v13 = vadd.f32 %v1485_v44, %v637_v9  ;;  %v702_v14 = vadd.f32 %v1485_v44, %v701_v10 }
  0xfa   : > { %v639_v15 = vpop.f32.mrf.mxu0  ;;  %v703_v16 = vpop.f32.mrf.mxu1 }
  0xfb   : > { %v1155_v19 = vpack.c.bf16 %v789_v11, %v789_v11  ;;  %v1171_v20 = vpack.c.bf16 %v805_v12, %v805_v12  ;;  %v758_v21 = vadd.f32 %v1192_v3, %v638_v13  ;;  %v774_v22 = vadd.f32 %v1224_v4, %v702_v14 }
  0xfc   : > { %v640_v25 = vpop.f32.mrf.mxu0  ;;  %v704_v26 = vpop.f32.mrf.mxu1  ;;  %v1201_v14 = vunpack.c.h.bf16 %v1252_v54  ;;  %v1233_v15 = vunpack.c.h.bf16 %v1260_v55 }
  0xfd   : > { %950 = vst.msk [vmem:[%s1496_s23 + $0x4] sm:$0xf] %vm948_vm1, %v1155_v19  ;;  %966 = vst.msk [vmem:[%s1496_s23 + $0x44] sm:$0xf] %vm948_vm1, %v1171_v20  ;;  %v790_v27 = vmax.f32 %v758_v21, 0.0  ;;  %v806_v28 = vmax.f32 %v774_v22, 0.0  ;;  %v641_v29 = vadd.f32 %v1485_v44, %v640_v25  ;;  %v705_v30 = vadd.f32 %v1485_v44, %v704_v26 }
  0xfe   : > { %v642_v31 = vpop.f32.mrf.mxu0  ;;  %v706_v32 = vpop.f32.mrf.mxu1  ;;  %v1253_v20 = vld [vmem:[%s1478_s18 + $0x20] sm:$0xff]  }
  0xff   : > { %v1156_v35 = vpack.c.bf16 %v790_v27, %v790_v27  ;;  %v1172_v36 = vpack.c.bf16 %v806_v28, %v806_v28  ;;  %v759_v37 = vadd.f32 %v1193_v17, %v641_v29  ;;  %v775_v38 = vadd.f32 %v1225_v18, %v705_v30  ;;  %v1261_v21 = vld [vmem:[%s1478_s18 + $0x60] sm:$0xff]  }
 0x100   : > { %v645_v39 = vpop.f32.mrf.mxu0  ;;  %v709_v40 = vpop.f32.mrf.mxu1  ;;  %v1204_v30 = vunpack.c.l.bf16 %v1253_v20  ;;  %v1236_v31 = vunpack.c.l.bf16 %v1261_v21 }
 0x101   : > { %951 = vst.msk [vmem:[%s1496_s23 + $0x8] sm:$0xf] %vm948_vm1, %v1156_v35  ;;  %967 = vst.msk [vmem:[%s1496_s23 + $0x48] sm:$0xf] %vm948_vm1, %v1172_v36  ;;  %v791_v41 = vmax.f32 %v759_v37, 0.0  ;;  %v807_v42 = vmax.f32 %v775_v38, 0.0  ;;  %v646_v43 = vadd.f32 %v1485_v44, %v645_v39  ;;  %v710_v45 = vadd.f32 %v1485_v44, %v709_v40 }
 0x102   : > { %v647_v46 = vpop.f32.mrf.mxu0  ;;  %v711_v47 = vpop.f32.mrf.mxu1 }
 0x103   : > { %v1157_v50 = vpack.c.bf16 %v791_v41, %v791_v41  ;;  %v1173_v51 = vpack.c.bf16 %v807_v42, %v807_v42  ;;  %v760_v52 = vadd.f32 %v1196_v33, %v646_v43  ;;  %v776_v53 = vadd.f32 %v1228_v34, %v710_v45 }
 0x104   : > { %v648_v56 = vpop.f32.mrf.mxu0  ;;  %v712_v57 = vpop.f32.mrf.mxu1  ;;  %v1205_v45 = vunpack.c.h.bf16 %v1253_v20  ;;  %v1237_v46 = vunpack.c.h.bf16 %v1261_v21 }
 0x105   : > { %952 = vst.msk [vmem:[%s1496_s23 + $0xc] sm:$0xf] %vm948_vm1, %v1157_v50  ;;  %968 = vst.msk [vmem:[%s1496_s23 + $0x4c] sm:$0xf] %vm948_vm1, %v1173_v51  ;;  %v792_v58 = vmax.f32 %v760_v52, 0.0  ;;  %v808_v59 = vmax.f32 %v776_v53, 0.0  ;;  %v649_v60 = vadd.f32 %v1485_v44, %v648_v56  ;;  %v713_v61 = vadd.f32 %v1485_v44, %v712_v57 }
 0x106   : > { %v650_v62 = vpop.f32.mrf.mxu0  ;;  %v714_v63 = vpop.f32.mrf.mxu1  ;;  %v1254_v51 = vld [vmem:[%s1478_s18 + $0x28] sm:$0xff]  }
 0x107   : > { %v1158_v2 = vpack.c.bf16 %v792_v58, %v792_v58  ;;  %v1174_v3 = vpack.c.bf16 %v808_v59, %v808_v59  ;;  %v761_v4 = vadd.f32 %v1197_v48, %v649_v60  ;;  %v777_v5 = vadd.f32 %v1229_v49, %v713_v61  ;;  %v1262_v52 = vld [vmem:[%s1478_s18 + $0x68] sm:$0xff]  }
 0x108   : > { %v653_v6 = vpop.f32.mrf.mxu0  ;;  %v717_v7 = vpop.f32.mrf.mxu1  ;;  %v1208_v61 = vunpack.c.l.bf16 %v1254_v51  ;;  %v1240_v62 = vunpack.c.l.bf16 %v1262_v52 }
 0x109   : > { %953 = vst.msk [vmem:[%s1496_s23 + $0x10] sm:$0xf] %vm948_vm1, %v1158_v2  ;;  %969 = vst.msk [vmem:[%s1496_s23 + $0x50] sm:$0xf] %vm948_vm1, %v1174_v3  ;;  %v793_v8 = vmax.f32 %v761_v4, 0.0  ;;  %v809_v9 = vmax.f32 %v777_v5, 0.0  ;;  %v654_v10 = vadd.f32 %v1485_v44, %v653_v6  ;;  %v718_v11 = vadd.f32 %v1485_v44, %v717_v7 }
 0x10a   : > { %v655_v12 = vpop.f32.mrf.mxu0  ;;  %v719_v13 = vpop.f32.mrf.mxu1 }
 0x10b   : > { %v1159_v16 = vpack.c.bf16 %v793_v8, %v793_v8  ;;  %v1175_v17 = vpack.c.bf16 %v809_v9, %v809_v9  ;;  %v762_v18 = vadd.f32 %v1200_v0, %v654_v10  ;;  %v778_v19 = vadd.f32 %v1232_v1, %v718_v11 }
 0x10c   : > { %v656_v22 = vpop.f32.mrf.mxu0  ;;  %v720_v23 = vpop.f32.mrf.mxu1  ;;  %v1209_v11 = vunpack.c.h.bf16 %v1254_v51  ;;  %v1241_v12 = vunpack.c.h.bf16 %v1262_v52 }
 0x10d   : > { %954 = vst.msk [vmem:[%s1496_s23 + $0x14] sm:$0xf] %vm948_vm1, %v1159_v16  ;;  %970 = vst.msk [vmem:[%s1496_s23 + $0x54] sm:$0xf] %vm948_vm1, %v1175_v17  ;;  %v794_v24 = vmax.f32 %v762_v18, 0.0  ;;  %v810_v25 = vmax.f32 %v778_v19, 0.0  ;;  %v657_v26 = vadd.f32 %v1485_v44, %v656_v22  ;;  %v721_v27 = vadd.f32 %v1485_v44, %v720_v23 }
 0x10e   : > { %v658_v28 = vpop.f32.mrf.mxu0  ;;  %v722_v29 = vpop.f32.mrf.mxu1  ;;  %v1255_v17 = vld [vmem:[%s1478_s18 + $0x30] sm:$0xff]  }
 0x10f   : > { %v1160_v32 = vpack.c.bf16 %v794_v24, %v794_v24  ;;  %v1176_v33 = vpack.c.bf16 %v810_v25, %v810_v25  ;;  %v763_v34 = vadd.f32 %v1201_v14, %v657_v26  ;;  %v779_v35 = vadd.f32 %v1233_v15, %v721_v27  ;;  %v1263_v18 = vld [vmem:[%s1478_s18 + $0x70] sm:$0xff]  }
 0x110   : > { %v661_v36 = vpop.f32.mrf.mxu0  ;;  %v725_v37 = vpop.f32.mrf.mxu1  ;;  %v1212_v27 = vunpack.c.l.bf16 %v1255_v17  ;;  %v1244_v28 = vunpack.c.l.bf16 %v1263_v18 }
 0x111   : > { %955 = vst.msk [vmem:[%s1496_s23 + $0x18] sm:$0xf] %vm948_vm1, %v1160_v32  ;;  %971 = vst.msk [vmem:[%s1496_s23 + $0x58] sm:$0xf] %vm948_vm1, %v1176_v33  ;;  %v795_v38 = vmax.f32 %v763_v34, 0.0  ;;  %v811_v39 = vmax.f32 %v779_v35, 0.0  ;;  %v662_v40 = vadd.f32 %v1485_v44, %v661_v36  ;;  %v726_v41 = vadd.f32 %v1485_v44, %v725_v37 }
 0x112   : > { %v663_v42 = vpop.f32.mrf.mxu0  ;;  %v727_v43 = vpop.f32.mrf.mxu1 }
 0x113   : > { %v1161_v47 = vpack.c.bf16 %v795_v38, %v795_v38  ;;  %v1177_v48 = vpack.c.bf16 %v811_v39, %v811_v39  ;;  %v764_v49 = vadd.f32 %v1204_v30, %v662_v40  ;;  %v780_v50 = vadd.f32 %v1236_v31, %v726_v41 }
 0x114   : > { %v664_v53 = vpop.f32.mrf.mxu0  ;;  %v728_v54 = vpop.f32.mrf.mxu1  ;;  %v1213_v41 = vunpack.c.h.bf16 %v1255_v17  ;;  %v1245_v42 = vunpack.c.h.bf16 %v1263_v18 }
 0x115   : > { %956 = vst.msk [vmem:[%s1496_s23 + $0x1c] sm:$0xf] %vm948_vm1, %v1161_v47  ;;  %972 = vst.msk [vmem:[%s1496_s23 + $0x5c] sm:$0xf] %vm948_vm1, %v1177_v48  ;;  %v796_v55 = vmax.f32 %v764_v49, 0.0  ;;  %v812_v56 = vmax.f32 %v780_v50, 0.0  ;;  %v665_v57 = vadd.f32 %v1485_v44, %v664_v53  ;;  %v729_v58 = vadd.f32 %v1485_v44, %v728_v54 }
 0x116   : > { %v666_v59 = vpop.f32.mrf.mxu0  ;;  %v730_v60 = vpop.f32.mrf.mxu1  ;;  %v1256_v48 = vld [vmem:[%s1478_s18 + $0x38] sm:$0xff]  }
 0x117   : > { %v1162_v63 = vpack.c.bf16 %v796_v55, %v796_v55  ;;  %v1178_v0 = vpack.c.bf16 %v812_v56, %v812_v56  ;;  %v765_v1 = vadd.f32 %v1205_v45, %v665_v57  ;;  %v781_v2 = vadd.f32 %v1237_v46, %v729_v58  ;;  %v1264_v49 = vld [vmem:[%s1478_s18 + $0x78] sm:$0xff]  }
 0x118   : > { %v669_v3 = vpop.f32.mrf.mxu0  ;;  %v733_v4 = vpop.f32.mrf.mxu1  ;;  %v1216_v58 = vunpack.c.l.bf16 %v1256_v48  ;;  %v1248_v59 = vunpack.c.l.bf16 %v1264_v49 }
 0x119   : > { %957 = vst.msk [vmem:[%s1496_s23 + $0x20] sm:$0xf] %vm948_vm1, %v1162_v63  ;;  %973 = vst.msk [vmem:[%s1496_s23 + $0x60] sm:$0xf] %vm948_vm1, %v1178_v0  ;;  %v797_v5 = vmax.f32 %v765_v1, 0.0  ;;  %v813_v6 = vmax.f32 %v781_v2, 0.0  ;;  %v670_v7 = vadd.f32 %v1485_v44, %v669_v3  ;;  %v734_v8 = vadd.f32 %v1485_v44, %v733_v4 }
 0x11a   : > { %v671_v9 = vpop.f32.mrf.mxu0  ;;  %v735_v10 = vpop.f32.mrf.mxu1 }
 0x11b   : > { %v1163_v13 = vpack.c.bf16 %v797_v5, %v797_v5  ;;  %v1179_v14 = vpack.c.bf16 %v813_v6, %v813_v6  ;;  %v766_v15 = vadd.f32 %v1208_v61, %v670_v7  ;;  %v782_v16 = vadd.f32 %v1240_v62, %v734_v8 }
 0x11c   : > { %v672_v19 = vpop.f32.mrf.mxu0  ;;  %v736_v20 = vpop.f32.mrf.mxu1  ;;  %v1217_v8 = vunpack.c.h.bf16 %v1256_v48  ;;  %v1249_v9 = vunpack.c.h.bf16 %v1264_v49 }
 0x11d   : > { %958 = vst.msk [vmem:[%s1496_s23 + $0x24] sm:$0xf] %vm948_vm1, %v1163_v13  ;;  %974 = vst.msk [vmem:[%s1496_s23 + $0x64] sm:$0xf] %vm948_vm1, %v1179_v14  ;;  %v798_v21 = vmax.f32 %v766_v15, 0.0  ;;  %v814_v22 = vmax.f32 %v782_v16, 0.0  ;;  %v673_v23 = vadd.f32 %v1485_v44, %v672_v19  ;;  %v737_v24 = vadd.f32 %v1485_v44, %v736_v20 }
 0x11e   : > { %v674_v25 = vpop.f32.mrf.mxu0  ;;  %v738_v26 = vpop.f32.mrf.mxu1 }
 0x11f   : > { %v1164_v29 = vpack.c.bf16 %v798_v21, %v798_v21  ;;  %v1180_v30 = vpack.c.bf16 %v814_v22, %v814_v22  ;;  %v767_v31 = vadd.f32 %v1209_v11, %v673_v23  ;;  %v783_v32 = vadd.f32 %v1241_v12, %v737_v24 }
 0x120   : > { %v677_v33 = vpop.f32.mrf.mxu0  ;;  %v741_v34 = vpop.f32.mrf.mxu1 }
 0x121   : > { %959 = vst.msk [vmem:[%s1496_s23 + $0x28] sm:$0xf] %vm948_vm1, %v1164_v29  ;;  %975 = vst.msk [vmem:[%s1496_s23 + $0x68] sm:$0xf] %vm948_vm1, %v1180_v30  ;;  %v799_v35 = vmax.f32 %v767_v31, 0.0  ;;  %v815_v36 = vmax.f32 %v783_v32, 0.0  ;;  %v678_v37 = vadd.f32 %v1485_v44, %v677_v33  ;;  %v742_v38 = vadd.f32 %v1485_v44, %v741_v34 }
 0x122   : > { %v679_v39 = vpop.f32.mrf.mxu0  ;;  %v743_v40 = vpop.f32.mrf.mxu1 }
 0x123   : > { %v1165_v43 = vpack.c.bf16 %v799_v35, %v799_v35  ;;  %v1181_v45 = vpack.c.bf16 %v815_v36, %v815_v36  ;;  %v768_v46 = vadd.f32 %v1212_v27, %v678_v37  ;;  %v784_v47 = vadd.f32 %v1244_v28, %v742_v38 }
 0x124   : > { %v680_v50 = vpop.f32.mrf.mxu0  ;;  %v744_v51 = vpop.f32.mrf.mxu1 }
 0x125   : > { %960 = vst.msk [vmem:[%s1496_s23 + $0x2c] sm:$0xf] %vm948_vm1, %v1165_v43  ;;  %976 = vst.msk [vmem:[%s1496_s23 + $0x6c] sm:$0xf] %vm948_vm1, %v1181_v45  ;;  %v800_v52 = vmax.f32 %v768_v46, 0.0  ;;  %v816_v53 = vmax.f32 %v784_v47, 0.0  ;;  %v681_v54 = vadd.f32 %v1485_v44, %v680_v50  ;;  %v745_v55 = vadd.f32 %v1485_v44, %v744_v51 }
 0x126   : > { %v682_v56 = vpop.f32.mrf.mxu0  ;;  %v746_v57 = vpop.f32.mrf.mxu1 }
 0x127   : > { %v1166_v60 = vpack.c.bf16 %v800_v52, %v800_v52  ;;  %v1182_v61 = vpack.c.bf16 %v816_v53, %v816_v53  ;;  %v769_v62 = vadd.f32 %v1213_v41, %v681_v54  ;;  %v785_v63 = vadd.f32 %v1245_v42, %v745_v55 }
 0x128   : > { %v685_v0 = vpop.f32.mrf.mxu0  ;;  %v749_v1 = vpop.f32.mrf.mxu1 }
 0x129   : > { %961 = vst.msk [vmem:[%s1496_s23 + $0x30] sm:$0xf] %vm948_vm1, %v1166_v60  ;;  %977 = vst.msk [vmem:[%s1496_s23 + $0x70] sm:$0xf] %vm948_vm1, %v1182_v61  ;;  %v801_v2 = vmax.f32 %v769_v62, 0.0  ;;  %v817_v3 = vmax.f32 %v785_v63, 0.0  ;;  %v686_v4 = vadd.f32 %v1485_v44, %v685_v0  ;;  %v750_v5 = vadd.f32 %v1485_v44, %v749_v1 }
 0x12a   : > { %v687_v6 = vpop.f32.mrf.mxu0  ;;  %v751_v7 = vpop.f32.mrf.mxu1 }
 0x12b   : > { %v1167_v10 = vpack.c.bf16 %v801_v2, %v801_v2  ;;  %v1183_v11 = vpack.c.bf16 %v817_v3, %v817_v3  ;;  %v770_v12 = vadd.f32 %v1216_v58, %v686_v4  ;;  %v786_v13 = vadd.f32 %v1248_v59, %v750_v5 }
 0x12c   : > { %v688_v14 = vpop.f32.mrf.mxu0  ;;  %v752_v15 = vpop.f32.mrf.mxu1 }
 0x12d   : > { %962 = vst.msk [vmem:[%s1496_s23 + $0x34] sm:$0xf] %vm948_vm1, %v1167_v10  ;;  %978 = vst.msk [vmem:[%s1496_s23 + $0x74] sm:$0xf] %vm948_vm1, %v1183_v11  ;;  %v802_v16 = vmax.f32 %v770_v12, 0.0  ;;  %v818_v17 = vmax.f32 %v786_v13, 0.0  ;;  %v689_v18 = vadd.f32 %v1485_v44, %v688_v14  ;;  %v753_v19 = vadd.f32 %v1485_v44, %v752_v15 }
 0x12e   : > { %v690_v20 = vpop.f32.mrf.mxu0  ;;  %v754_v21 = vpop.f32.mrf.mxu1 }
 0x12f   : > { %v1168_v22 = vpack.c.bf16 %v802_v16, %v802_v16  ;;  %v1184_v23 = vpack.c.bf16 %v818_v17, %v818_v17  ;;  %v771_v24 = vadd.f32 %v1217_v8, %v689_v18  ;;  %v787_v25 = vadd.f32 %v1249_v9, %v753_v19 }
 0x131   : > { %963 = vst.msk [vmem:[%s1496_s23 + $0x38] sm:$0xf] %vm948_vm1, %v1168_v22  ;;  %979 = vst.msk [vmem:[%s1496_s23 + $0x78] sm:$0xf] %vm948_vm1, %v1184_v23  ;;  %v803_v26 = vmax.f32 %v771_v24, 0.0  ;;  %v819_v27 = vmax.f32 %v787_v25, 0.0 }
 0x133   : > { %v1169_v28 = vpack.c.bf16 %v803_v26, %v803_v26  ;;  %v1185_v29 = vpack.c.bf16 %v819_v27, %v819_v27 }
 0x135   : > { %964 = vst.msk [vmem:[%s1496_s23 + $0x3c] sm:$0xf] %vm948_vm1, %v1169_v28  ;;  %980 = vst.msk [vmem:[%s1496_s23 + $0x7c] sm:$0xf] %vm948_vm1, %v1185_v29 }
 0x136 PF: > { %s14_s15 = sadd.s32 1, %s1355_s15  }
 0x137   : > { %p11_p4 = scmp.ge.s32.totalorder %s14_s15, 4  }
 0x139   :  { %13 = sbr.rel (!%p11_p4) target bundleno = 1 (0x1), region = 69 }

// kernel: _lambda_.37
= control target key start
LH: loop header
LB: loop body
LE: loop exit
PB: predicated region body
PF: predicated region fallthrough
CT: control target
= control target key end

     0   :  { %v523_v0 = vmov 0   ;;  %vm182_vm0 = vcmask 130048   ;;  %vm384_vm1 = vcmask 257024   ;;  %s712_s1 = inlined_call_operand.vmem [shape: bf16[144,32], index: 1, kind: input, shape index: {}]   ;;  %s713_s0 = inlined_call_operand.vmem [shape: bf16[128,144], index: 0, kind: input, shape index: {}]   ;;  %s714_s2 = inlined_call_operand.vmem [shape: f32[1,32], index: 2, kind: input, shape index: {}]   ;;  %s715_s3 = inlined_call_operand.vmem [shape: bf16[128,32], index: 3, kind: output, shape index: {}]  }
   0x1   :  { %207 = vmatprep.subr.bf16.mxu0 %v523_v0  ;;  %471 = vmatprep.subr.bf16.mxu1 %v523_v0  ;;  %v490_v1 = vld [vmem:[%s712_s1 + $0x38] sm:$0xff]   ;;  %v491_v2 = vld [vmem:[%s712_s1 + $0x30] sm:$0xff]   ;;  %v492_v3 = vld [vmem:[%s712_s1 + $0x28] sm:$0xff]  }
   0x2   :  { %208 = vmatpush1.bf16.msra.mxu0 %v490_v1  ;;  %480 = vmatpush1.bf16.msra.mxu1 %v490_v1  ;;  %v493_v4 = vld [vmem:[%s712_s1 + $0x20] sm:$0xff]   ;;  %v494_v7 = vld [vmem:[%s712_s1 + $0x18] sm:$0xff]   ;;  %v495_v8 = vld [vmem:[%s712_s1 + $0x10] sm:$0xff]  }
   0x3   :  { %209 = vmatprep.subr.bf16.mxu0 %v523_v0  ;;  %472 = vmatprep.subr.bf16.mxu1 %v523_v0  ;;  %v501_v5 = vld [vmem:[%s713_s0 + $0x4] ss:$8 sps:$4 sm:$0xff]   ;;  %v499_v12 = vld [vmem:[%s713_s0] ss:$8 sps:$4 sm:$0xff]   ;;  %v505_v14 = vld [vmem:[%s713_s0 + $0x14] ss:$8 sps:$4 sm:$0xff]  }
   0x4   :  { %v504_v6 = vld [vmem:[%s713_s0 + $0x44] ss:$8 sps:$4 sm:$0xff]   ;;  %431 = vmatprep.mubr.msk.bf16.mxu0 %vm182_vm0, %v501_v5  ;;  %v502_v13 = vld [vmem:[%s713_s0 + $0x40] ss:$8 sps:$4 sm:$0xff]   ;;  %v507_v15 = vld [vmem:[%s713_s0 + $0x54] ss:$8 sps:$4 sm:$0xff]  }
   0x5   :  { %435 = vmatprep.mubr.msk.bf16.mxu1 %vm182_vm0, %v504_v6  ;;  %v496_v9 = vld [vmem:[%s712_s1 + $0x8] sm:$0xff]   ;;  %v497_v10 = vld [vmem:[%s712_s1] sm:$0xff]   ;;  %v509_v16 = vld [vmem:[%s713_s0 + $0x10] ss:$8 sps:$4 sm:$0xff]  }
   0x6   :  { %210 = vmatpush1.bf16.msra.mxu0 %v491_v2  ;;  %481 = vmatpush1.bf16.msra.mxu1 %v491_v2  ;;  %v498_v11 = vld [vmem:[%s712_s1 + $0x40] sm:$0xff]   ;;  %v510_v17 = vld [vmem:[%s713_s0 + $0x50] ss:$8 sps:$4 sm:$0xff]   ;;  %v517_v22 = vld [vmem:[%s713_s0 + $0x34] ss:$8 sps:$4 sm:$0xff]  }
   0x7   :  { %211 = vmatprep.subr.bf16.mxu0 %v523_v0  ;;  %473 = vmatprep.subr.bf16.mxu1 %v523_v0  ;;  %v511_v18 = vld [vmem:[%s713_s0 + $0x24] ss:$8 sps:$4 sm:$0xff]   ;;  %v515_v20 = vld [vmem:[%s713_s0 + $0x20] ss:$8 sps:$4 sm:$0xff]   ;;  %v519_v23 = vld [vmem:[%s713_s0 + $0x74] ss:$8 sps:$4 sm:$0xff]  }
   0x8   :  { %v513_v19 = vld [vmem:[%s713_s0 + $0x64] ss:$8 sps:$4 sm:$0xff]   ;;  %v516_v21 = vld [vmem:[%s713_s0 + $0x60] ss:$8 sps:$4 sm:$0xff]   ;;  %v521_v24 = vld [vmem:[%s713_s0 + $0x30] ss:$8 sps:$4 sm:$0xff]  }
   0x9   :  { %v522_v25 = vld [vmem:[%s713_s0 + $0x70] ss:$8 sps:$4 sm:$0xff]   ;;  %v630_v26 = vld [vmem:[%s714_s2] ss:$0 sm:$0xff] }
   0xa   :  { %212 = vmatpush1.bf16.msra.mxu0 %v492_v3  ;;  %482 = vmatpush1.bf16.msra.mxu1 %v492_v3 }
   0xb   :  { %213 = vmatprep.subr.bf16.mxu0 %v523_v0  ;;  %474 = vmatprep.subr.bf16.mxu1 %v523_v0 }
   0xe   :  { %214 = vmatpush1.bf16.msra.mxu0 %v493_v4  ;;  %483 = vmatpush1.bf16.msra.mxu1 %v493_v4 }
   0xf   :  { %215 = vmatprep.subr.bf16.mxu0 %v523_v0  ;;  %475 = vmatprep.subr.bf16.mxu1 %v523_v0 }
  0x12   :  { %216 = vmatpush1.bf16.msra.mxu0 %v494_v7  ;;  %484 = vmatpush1.bf16.msra.mxu1 %v494_v7 }
  0x13   :  { %217 = vmatprep.subr.bf16.mxu0 %v523_v0  ;;  %476 = vmatprep.subr.bf16.mxu1 %v523_v0 }
  0x16   :  { %218 = vmatpush1.bf16.msra.mxu0 %v495_v8  ;;  %485 = vmatpush1.bf16.msra.mxu1 %v495_v8 }
  0x17   :  { %219 = vmatprep.subr.bf16.mxu0 %v523_v0  ;;  %477 = vmatprep.subr.bf16.mxu1 %v523_v0 }
  0x1a   :  { %220 = vmatpush1.bf16.msra.mxu0 %v496_v9  ;;  %486 = vmatpush1.bf16.msra.mxu1 %v496_v9 }
  0x1b   :  { %221 = vmatprep.subr.bf16.mxu0 %v523_v0  ;;  %478 = vmatprep.subr.bf16.mxu1 %v523_v0 }
  0x1e   :  { %222 = vmatpush1.bf16.msra.mxu0 %v497_v10  ;;  %487 = vmatpush1.bf16.msra.mxu1 %v497_v10 }
  0x1f   :  { %237 = vmatprep.subr.bf16.mxu0 %v523_v0  ;;  %479 = vmatprep.subr.bf16.mxu1 %v523_v0 }
  0x22   :  { %238 = vmatpush2.bf16.msra.mxu0 %v498_v11  ;;  %488 = vmatpush2.bf16.msra.mxu1 %v498_v11 }
  0x25   :  { %240 = vmatmul.mubr.bf16.vlgmr.msra.gmra.mxu0 %v499_v12  ;;  %272 = vmatmul.mubr.bf16.vlgmr.msra.gmra.mxu1 %v502_v13 }
  0x26   :  { %432 = vmatprep.mubr.msk.bf16.mxu0 %vm182_vm0, %v505_v14  ;;  %436 = vmatprep.mubr.msk.bf16.mxu1 %vm182_vm0, %v507_v15 }
  0x2d   :  { %248 = vmatmul.mubr.bf16.gmra.mxu0 %v509_v16  ;;  %280 = vmatmul.mubr.bf16.gmra.mxu1 %v510_v17 }
  0x2e   :  { %433 = vmatprep.mubr.msk.bf16.mxu0 %vm182_vm0, %v511_v18  ;;  %437 = vmatprep.mubr.msk.bf16.mxu1 %vm182_vm0, %v513_v19 }
  0x35   :  { %256 = vmatmul.mubr.bf16.gmra.mxu0 %v515_v20  ;;  %288 = vmatmul.mubr.bf16.gmra.mxu1 %v516_v21 }
  0x36   :  { %434 = vmatprep.mubr.msk.bf16.mxu0 %vm182_vm0, %v517_v22  ;;  %438 = vmatprep.mubr.msk.bf16.mxu1 %vm182_vm0, %v519_v23 }
  0x3d   :  { %264 = vmatmul.mubr.bf16.gmra.mxu0 %v521_v24  ;;  %296 = vmatmul.mubr.bf16.gmra.mxu1 %v522_v25 }
  0xe5   :  { %v241_v27 = vpop.f32.mrf.mxu0  ;;  %v273_v28 = vpop.f32.mrf.mxu1 }
  0xe6   :  { %v242_v29 = vadd.f32 %v630_v26, %v241_v27  ;;  %v274_v30 = vadd.f32 %v630_v26, %v273_v28 }
  0xe7   :  { %v243_v31 = vpop.f32.mrf.mxu0  ;;  %v275_v32 = vpop.f32.mrf.mxu1 }
  0xe8   :  { %v304_v33 = vmax.f32 %v242_v29, 0.0  ;;  %v312_v34 = vmax.f32 %v274_v30, 0.0 }
  0xe9   :  { %v244_v35 = vpop.f32.mrf.mxu0  ;;  %v276_v36 = vpop.f32.mrf.mxu1 }
  0xea   :  { %v455_v37 = vpack.c.bf16 %v304_v33, %v304_v33  ;;  %v463_v38 = vpack.c.bf16 %v312_v34, %v312_v34  ;;  %v245_v39 = vadd.f32 %v630_v26, %v244_v35  ;;  %v277_v40 = vadd.f32 %v630_v26, %v276_v36 }
  0xeb   :  { %v246_v41 = vpop.f32.mrf.mxu0  ;;  %v278_v42 = vpop.f32.mrf.mxu1 }
  0xec   :  { %385 = vst.msk [vmem:[%s715_s3] sm:$0xf] %vm384_vm1, %v455_v37  ;;  %393 = vst.msk [vmem:[%s715_s3 + $0x20] sm:$0xf] %vm384_vm1, %v463_v38  ;;  %v305_v43 = vmax.f32 %v245_v39, 0.0  ;;  %v313_v44 = vmax.f32 %v277_v40, 0.0 }
  0xed   :  { %v249_v45 = vpop.f32.mrf.mxu0  ;;  %v281_v46 = vpop.f32.mrf.mxu1 }
  0xee   :  { %v456_v47 = vpack.c.bf16 %v305_v43, %v305_v43  ;;  %v464_v48 = vpack.c.bf16 %v313_v44, %v313_v44  ;;  %v250_v49 = vadd.f32 %v630_v26, %v249_v45  ;;  %v282_v50 = vadd.f32 %v630_v26, %v281_v46 }
  0xef   :  { %v251_v51 = vpop.f32.mrf.mxu0  ;;  %v283_v52 = vpop.f32.mrf.mxu1 }
  0xf0   :  { %386 = vst.msk [vmem:[%s715_s3 + $0x4] sm:$0xf] %vm384_vm1, %v456_v47  ;;  %394 = vst.msk [vmem:[%s715_s3 + $0x24] sm:$0xf] %vm384_vm1, %v464_v48  ;;  %v306_v53 = vmax.f32 %v250_v49, 0.0  ;;  %v314_v54 = vmax.f32 %v282_v50, 0.0 }
  0xf1   :  { %v252_v55 = vpop.f32.mrf.mxu0  ;;  %v284_v56 = vpop.f32.mrf.mxu1 }
  0xf2   :  { %v457_v57 = vpack.c.bf16 %v306_v53, %v306_v53  ;;  %v465_v58 = vpack.c.bf16 %v314_v54, %v314_v54  ;;  %v253_v59 = vadd.f32 %v630_v26, %v252_v55  ;;  %v285_v60 = vadd.f32 %v630_v26, %v284_v56 }
  0xf3   :  { %v254_v61 = vpop.f32.mrf.mxu0  ;;  %v286_v62 = vpop.f32.mrf.mxu1 }
  0xf4   :  { %387 = vst.msk [vmem:[%s715_s3 + $0x8] sm:$0xf] %vm384_vm1, %v457_v57  ;;  %395 = vst.msk [vmem:[%s715_s3 + $0x28] sm:$0xf] %vm384_vm1, %v465_v58  ;;  %v307_v63 = vmax.f32 %v253_v59, 0.0  ;;  %v315_v0 = vmax.f32 %v285_v60, 0.0 }
  0xf5   :  { %v257_v1 = vpop.f32.mrf.mxu0  ;;  %v289_v2 = vpop.f32.mrf.mxu1 }
  0xf6   :  { %v458_v3 = vpack.c.bf16 %v307_v63, %v307_v63  ;;  %v466_v4 = vpack.c.bf16 %v315_v0, %v315_v0  ;;  %v258_v5 = vadd.f32 %v630_v26, %v257_v1  ;;  %v290_v6 = vadd.f32 %v630_v26, %v289_v2 }
  0xf7   :  { %v259_v7 = vpop.f32.mrf.mxu0  ;;  %v291_v8 = vpop.f32.mrf.mxu1 }
  0xf8   :  { %388 = vst.msk [vmem:[%s715_s3 + $0xc] sm:$0xf] %vm384_vm1, %v458_v3  ;;  %396 = vst.msk [vmem:[%s715_s3 + $0x2c] sm:$0xf] %vm384_vm1, %v466_v4  ;;  %v308_v9 = vmax.f32 %v258_v5, 0.0  ;;  %v316_v10 = vmax.f32 %v290_v6, 0.0 }
  0xf9   :  { %v260_v11 = vpop.f32.mrf.mxu0  ;;  %v292_v12 = vpop.f32.mrf.mxu1 }
  0xfa   :  { %v459_v13 = vpack.c.bf16 %v308_v9, %v308_v9  ;;  %v467_v14 = vpack.c.bf16 %v316_v10, %v316_v10  ;;  %v261_v15 = vadd.f32 %v630_v26, %v260_v11  ;;  %v293_v16 = vadd.f32 %v630_v26, %v292_v12 }
  0xfb   :  { %v262_v17 = vpop.f32.mrf.mxu0  ;;  %v294_v18 = vpop.f32.mrf.mxu1 }
  0xfc   :  { %389 = vst.msk [vmem:[%s715_s3 + $0x10] sm:$0xf] %vm384_vm1, %v459_v13  ;;  %397 = vst.msk [vmem:[%s715_s3 + $0x30] sm:$0xf] %vm384_vm1, %v467_v14  ;;  %v309_v19 = vmax.f32 %v261_v15, 0.0  ;;  %v317_v20 = vmax.f32 %v293_v16, 0.0 }
  0xfd   :  { %v265_v21 = vpop.f32.mrf.mxu0  ;;  %v297_v22 = vpop.f32.mrf.mxu1 }
  0xfe   :  { %v460_v23 = vpack.c.bf16 %v309_v19, %v309_v19  ;;  %v468_v24 = vpack.c.bf16 %v317_v20, %v317_v20  ;;  %v266_v25 = vadd.f32 %v630_v26, %v265_v21  ;;  %v298_v27 = vadd.f32 %v630_v26, %v297_v22 }
  0xff   :  { %v267_v28 = vpop.f32.mrf.mxu0  ;;  %v299_v29 = vpop.f32.mrf.mxu1 }
 0x100   :  { %390 = vst.msk [vmem:[%s715_s3 + $0x14] sm:$0xf] %vm384_vm1, %v460_v23  ;;  %398 = vst.msk [vmem:[%s715_s3 + $0x34] sm:$0xf] %vm384_vm1, %v468_v24  ;;  %v310_v30 = vmax.f32 %v266_v25, 0.0  ;;  %v318_v31 = vmax.f32 %v298_v27, 0.0 }
 0x101   :  { %v268_v32 = vpop.f32.mrf.mxu0  ;;  %v300_v33 = vpop.f32.mrf.mxu1 }
 0x102   :  { %v461_v34 = vpack.c.bf16 %v310_v30, %v310_v30  ;;  %v469_v35 = vpack.c.bf16 %v318_v31, %v318_v31  ;;  %v269_v36 = vadd.f32 %v630_v26, %v268_v32  ;;  %v301_v37 = vadd.f32 %v630_v26, %v300_v33 }
 0x103   :  { %v270_v38 = vpop.f32.mrf.mxu0  ;;  %v302_v39 = vpop.f32.mrf.mxu1 }
 0x104   :  { %391 = vst.msk [vmem:[%s715_s3 + $0x18] sm:$0xf] %vm384_vm1, %v461_v34  ;;  %399 = vst.msk [vmem:[%s715_s3 + $0x38] sm:$0xf] %vm384_vm1, %v469_v35  ;;  %v311_v40 = vmax.f32 %v269_v36, 0.0  ;;  %v319_v41 = vmax.f32 %v301_v37, 0.0 }
 0x106   :  { %v462_v42 = vpack.c.bf16 %v311_v40, %v311_v40  ;;  %v470_v43 = vpack.c.bf16 %v319_v41, %v319_v41 }
 0x108   :  { %392 = vst.msk [vmem:[%s715_s3 + $0x1c] sm:$0xf] %vm384_vm1, %v462_v42  ;;  %400 = vst.msk [vmem:[%s715_s3 + $0x3c] sm:$0xf] %vm384_vm1, %v470_v43 }

// kernel: _lambda_.38
= control target key start
LH: loop header
LB: loop body
LE: loop exit
PB: predicated region body
PF: predicated region fallthrough
CT: control target
= control target key end

     0   :  { %vm86_vm0 = vcmask 130048   ;;  %vm272_vm1 = vcmask 257024   ;;  %s503_s1 = inlined_call_operand.vmem [shape: bf16[16,32], index: 1, kind: input, shape index: {}]   ;;  %s504_s0 = inlined_call_operand.vmem [shape: bf16[128,16], index: 0, kind: input, shape index: {}]   ;;  %s505_s2 = inlined_call_operand.vmem [shape: f32[1,32], index: 2, kind: input, shape index: {}]   ;;  %s506_s3 = inlined_call_operand.vmem [shape: bf16[128,32], index: 3, kind: output, shape index: {}]  }
   0x1   :  { %v372_v0 = vld [vmem:[%s503_s1] sm:$0xff]   ;;  %v375_v3 = vld [vmem:[%s504_s0 + $0x8] sm:$0xff]   ;;  %v377_v5 = vld [vmem:[%s504_s0 + $0x10] sm:$0xff]  }
   0x2   :  { %v373_v1 = vld [vmem:[%s504_s0] sm:$0xff]   ;;  %352 = vmatprep.subr.bf16.mxu0 %v372_v0  ;;  %370 = vmatprep.subr.bf16.mxu1 %v372_v0  ;;  %v376_v4 = vld [vmem:[%s504_s0 + $0x28] sm:$0xff]   ;;  %v378_v6 = vld [vmem:[%s504_s0 + $0x30] sm:$0xff]  }
   0x3   :  { %v374_v2 = vld [vmem:[%s504_s0 + $0x20] sm:$0xff]   ;;  %353 = vmatpush3.bf16.msra.mxu0 %v372_v0  ;;  %371 = vmatpush3.bf16.msra.mxu1 %v372_v0  ;;  %v379_v7 = vld [vmem:[%s504_s0 + $0x18] sm:$0xff]  }
   0x4   :  { %354 = vmatprep.mubr.msk.bf16.mxu0 %vm86_vm0, %v373_v1  ;;  %362 = vmatprep.mubr.msk.bf16.mxu1 %vm86_vm0, %v374_v2  ;;  %v380_v8 = vld [vmem:[%s504_s0 + $0x38] sm:$0xff]   ;;  %v293_v9 = vld [vmem:[%s505_s2] ss:$0 sm:$0xff] }
   0x6   :  { %355 = vmatmul.mubr.msk.bf16.vlgmr.msra.gmra.mxu0 %vm86_vm0, %v375_v3  ;;  %363 = vmatmul.mubr.msk.bf16.vlgmr.msra.gmra.mxu1 %vm86_vm0, %v376_v4 }
   0x7   :  { %358 = vmatprep.mubr.msk.bf16.mxu0 %vm86_vm0, %v377_v5  ;;  %366 = vmatprep.mubr.msk.bf16.mxu1 %vm86_vm0, %v378_v6 }
   0xe   :  { %359 = vmatmul.mubr.msk.bf16.gmra.mxu0 %vm86_vm0, %v379_v7  ;;  %367 = vmatmul.mubr.msk.bf16.gmra.mxu1 %vm86_vm0, %v380_v8 }
  0xc6   :  { %v356_v10 = vpop.f32.mrf.mxu0  ;;  %v364_v11 = vpop.f32.mrf.mxu1 }
  0xc7   :  { %v154_v12 = vadd.f32 %v356_v10, %v293_v9  ;;  %v186_v13 = vadd.f32 %v364_v11, %v293_v9 }
  0xc8   :  { %v145_v14 = vpop.f32.mrf.mxu0  ;;  %v177_v15 = vpop.f32.mrf.mxu1 }
  0xc9   :  { %v329_v16 = vpack.c.bf16 %v154_v12, %v154_v12  ;;  %v337_v17 = vpack.c.bf16 %v186_v13, %v186_v13  ;;  %v146_v18 = vadd.f32 %v293_v9, %v145_v14  ;;  %v178_v19 = vadd.f32 %v293_v9, %v177_v15 }
  0xca   :  { %v357_v20 = vpop.f32.mrf.mxu0  ;;  %v365_v21 = vpop.f32.mrf.mxu1 }
  0xcb   :  { %275 = vst.msk [vmem:[%s506_s3 + $0x8] sm:$0xf] %vm272_vm1, %v329_v16  ;;  %283 = vst.msk [vmem:[%s506_s3 + $0x28] sm:$0xf] %vm272_vm1, %v337_v17  ;;  %v327_v22 = vpack.c.bf16 %v146_v18, %v146_v18  ;;  %v335_v23 = vpack.c.bf16 %v178_v19, %v178_v19  ;;  %v157_v24 = vadd.f32 %v357_v20, %v293_v9 }
  0xcc   :  { %v189_v25 = vadd.f32 %v365_v21, %v293_v9  ;;  %v148_v26 = vpop.f32.mrf.mxu0  ;;  %v180_v27 = vpop.f32.mrf.mxu1 }
  0xcd   :  { %273 = vst.msk [vmem:[%s506_s3] sm:$0xf] %vm272_vm1, %v327_v22  ;;  %281 = vst.msk [vmem:[%s506_s3 + $0x20] sm:$0xf] %vm272_vm1, %v335_v23  ;;  %v330_v28 = vpack.c.bf16 %v157_v24, %v157_v24  ;;  %v149_v30 = vadd.f32 %v293_v9, %v148_v26  ;;  %v181_v31 = vadd.f32 %v293_v9, %v180_v27 }
  0xce   :  { %v338_v29 = vpack.c.bf16 %v189_v25, %v189_v25  ;;  %v360_v32 = vpop.f32.mrf.mxu0  ;;  %v368_v33 = vpop.f32.mrf.mxu1 }
  0xcf   :  { %276 = vst.msk [vmem:[%s506_s3 + $0xc] sm:$0xf] %vm272_vm1, %v330_v28  ;;  %v328_v34 = vpack.c.bf16 %v149_v30, %v149_v30  ;;  %v336_v35 = vpack.c.bf16 %v181_v31, %v181_v31  ;;  %v170_v36 = vadd.f32 %v360_v32, %v293_v9  ;;  %v202_v37 = vadd.f32 %v368_v33, %v293_v9 }
  0xd0   :  { %284 = vst.msk [vmem:[%s506_s3 + $0x2c] sm:$0xf] %vm272_vm1, %v338_v29  ;;  %v161_v38 = vpop.f32.mrf.mxu0  ;;  %v193_v39 = vpop.f32.mrf.mxu1 }
  0xd1   :  { %274 = vst.msk [vmem:[%s506_s3 + $0x4] sm:$0xf] %vm272_vm1, %v328_v34  ;;  %282 = vst.msk [vmem:[%s506_s3 + $0x24] sm:$0xf] %vm272_vm1, %v336_v35  ;;  %v333_v40 = vpack.c.bf16 %v170_v36, %v170_v36  ;;  %v341_v41 = vpack.c.bf16 %v202_v37, %v202_v37  ;;  %v162_v42 = vadd.f32 %v293_v9, %v161_v38 }
  0xd2   :  { %v194_v43 = vadd.f32 %v293_v9, %v193_v39  ;;  %v361_v44 = vpop.f32.mrf.mxu0  ;;  %v369_v45 = vpop.f32.mrf.mxu1 }
  0xd3   :  { %279 = vst.msk [vmem:[%s506_s3 + $0x18] sm:$0xf] %vm272_vm1, %v333_v40  ;;  %287 = vst.msk [vmem:[%s506_s3 + $0x38] sm:$0xf] %vm272_vm1, %v341_v41  ;;  %v331_v46 = vpack.c.bf16 %v162_v42, %v162_v42  ;;  %v173_v48 = vadd.f32 %v361_v44, %v293_v9  ;;  %v205_v49 = vadd.f32 %v369_v45, %v293_v9 }
  0xd4   :  { %v339_v47 = vpack.c.bf16 %v194_v43, %v194_v43  ;;  %v164_v50 = vpop.f32.mrf.mxu0  ;;  %v196_v51 = vpop.f32.mrf.mxu1 }
  0xd5   :  { %277 = vst.msk [vmem:[%s506_s3 + $0x10] sm:$0xf] %vm272_vm1, %v331_v46  ;;  %v334_v52 = vpack.c.bf16 %v173_v48, %v173_v48  ;;  %v342_v53 = vpack.c.bf16 %v205_v49, %v205_v49  ;;  %v165_v54 = vadd.f32 %v293_v9, %v164_v50  ;;  %v197_v55 = vadd.f32 %v293_v9, %v196_v51 }
  0xd6   :  { %285 = vst.msk [vmem:[%s506_s3 + $0x30] sm:$0xf] %vm272_vm1, %v339_v47 }
  0xd7   :  { %280 = vst.msk [vmem:[%s506_s3 + $0x1c] sm:$0xf] %vm272_vm1, %v334_v52  ;;  %288 = vst.msk [vmem:[%s506_s3 + $0x3c] sm:$0xf] %vm272_vm1, %v342_v53  ;;  %v332_v56 = vpack.c.bf16 %v165_v54, %v165_v54  ;;  %v340_v57 = vpack.c.bf16 %v197_v55, %v197_v55 }
  0xd9   :  { %278 = vst.msk [vmem:[%s506_s3 + $0x14] sm:$0xf] %vm272_vm1, %v332_v56  ;;  %286 = vst.msk [vmem:[%s506_s3 + $0x34] sm:$0xf] %vm272_vm1, %v340_v57 }

// kernel: _lambda_.39
= control target key start
LH: loop header
LB: loop body
LE: loop exit
PB: predicated region body
PF: predicated region fallthrough
CT: control target
= control target key end

     0   :  { %vm353_vm0 = vcmask 261120   ;;  %vm668_vm1 = vcmask 257024   ;;  %s1269_s1 = inlined_call_operand.vmem [shape: bf16[288,32], index: 1, kind: input, shape index: {}]   ;;  %s1270_s0 = inlined_call_operand.vmem [shape: bf16[128,288], index: 0, kind: input, shape index: {}]   ;;  %s1271_s3 = inlined_call_operand.vmem [shape: bf16[128,32], index: 3, kind: input, shape index: {}]   ;;  %s1272_s2 = inlined_call_operand.vmem [shape: f32[1,32], index: 2, kind: input, shape index: {}]   ;;  %s1273_s4 = inlined_call_operand.vmem [shape: bf16[128,32], index: 4, kind: output, shape index: {}]  }
   0x1   :  { %v921_v0 = vld [vmem:[%s1269_s1 + $0x78] sm:$0xff]   ;;  %v923_v2 = vld [vmem:[%s1269_s1 + $0x70] sm:$0xff]   ;;  %v925_v4 = vld [vmem:[%s1269_s1 + $0x68] sm:$0xff]  }
   0x2   :  { %v922_v1 = vld [vmem:[%s1269_s1 + $0x38] sm:$0xff]   ;;  %811 = vmatprep.subr.bf16.mxu0 %v921_v0  ;;  %905 = vmatprep.subr.bf16.mxu1 %v921_v0  ;;  %v924_v3 = vld [vmem:[%s1269_s1 + $0x30] sm:$0xff]   ;;  %v926_v5 = vld [vmem:[%s1269_s1 + $0x28] sm:$0xff]  }
   0x3   :  { %812 = vmatpush3.bf16.msra.mxu0 %v922_v1  ;;  %913 = vmatpush3.bf16.msra.mxu1 %v922_v1  ;;  %v927_v6 = vld [vmem:[%s1269_s1 + $0x60] sm:$0xff]   ;;  %v929_v8 = vld [vmem:[%s1269_s1 + $0x58] sm:$0xff]   ;;  %v931_v10 = vld [vmem:[%s1269_s1 + $0x50] sm:$0xff]  }
   0x4   :  { %813 = vmatprep.subr.bf16.mxu0 %v923_v2  ;;  %906 = vmatprep.subr.bf16.mxu1 %v923_v2  ;;  %v928_v7 = vld [vmem:[%s1269_s1 + $0x20] sm:$0xff]   ;;  %v930_v9 = vld [vmem:[%s1269_s1 + $0x18] sm:$0xff]   ;;  %v932_v13 = vld [vmem:[%s1269_s1 + $0x10] sm:$0xff]  }
   0x5   :  { %v939_v11 = vld [vmem:[%s1270_s0 + $0x4] ss:$12 sps:$4 sm:$0xff]   ;;  %v942_v12 = vld [vmem:[%s1270_s0 + $0x94] ss:$12 sps:$4 sm:$0xff]   ;;  %v933_v14 = vld [vmem:[%s1269_s1 + $0x48] sm:$0xff]  }
   0x6   :  { %410 = vmatprep.mubr.bf16.mxu0 %v939_v11  ;;  %458 = vmatprep.mubr.bf16.mxu1 %v942_v12  ;;  %v934_v15 = vld [vmem:[%s1269_s1 + $0x8] sm:$0xff]   ;;  %v935_v16 = vld [vmem:[%s1269_s1 + $0x40] sm:$0xff]   ;;  %v940_v20 = vld [vmem:[%s1270_s0 + $0x90] ss:$12 sps:$4 sm:$0xff]  }
   0x7   :  { %814 = vmatpush3.bf16.msra.mxu0 %v924_v3  ;;  %914 = vmatpush3.bf16.msra.mxu1 %v924_v3  ;;  %v936_v17 = vld [vmem:[%s1269_s1] sm:$0xff]   ;;  %v943_v19 = vld [vmem:[%s1269_s1 + $0x88] sm:$0xff]   ;;  %v954_v28 = vld [vmem:[%s1270_s0 + $0x30] ss:$12 sps:$4 sm:$0xff]  }
   0x8   :  { %815 = vmatprep.subr.bf16.mxu0 %v925_v4  ;;  %907 = vmatprep.subr.bf16.mxu1 %v925_v4  ;;  %v937_v18 = vld [vmem:[%s1270_s0] ss:$12 sps:$4 sm:$0xff]   ;;  %v944_v21 = vld [vmem:[%s1270_s0 + $0x1c] ss:$12 sps:$4 sm:$0xff]   ;;  %v948_v24 = vld [vmem:[%s1270_s0 + $0x18] ss:$12 sps:$4 sm:$0xff]  }
   0x9   :  { %v946_v22 = vld [vmem:[%s1270_s0 + $0xac] ss:$12 sps:$4 sm:$0xff]   ;;  %v950_v23 = vld [vmem:[%s1269_s1 + $0x80] sm:$0xff]   ;;  %v949_v25 = vld [vmem:[%s1270_s0 + $0xa8] ss:$12 sps:$4 sm:$0xff]  }
   0xa   :  { %v951_v26 = vld [vmem:[%s1270_s0 + $0x34] ss:$12 sps:$4 sm:$0xff]   ;;  %v956_v30 = vld [vmem:[%s1270_s0 + $0x4c] ss:$12 sps:$4 sm:$0xff]   ;;  %v960_v33 = vld [vmem:[%s1270_s0 + $0x50] ss:$12 sps:$4 sm:$0xff]  }
   0xb   :  { %816 = vmatpush3.bf16.msra.mxu0 %v926_v5  ;;  %915 = vmatpush3.bf16.msra.mxu1 %v926_v5  ;;  %v953_v27 = vld [vmem:[%s1270_s0 + $0x8] ss:$12 sps:$4 sm:$0xff]   ;;  %v955_v29 = vld [vmem:[%s1270_s0 + $0x20] ss:$12 sps:$4 sm:$0xff]   ;;  %v958_v31 = vld [vmem:[%s1270_s0 + $0x38] ss:$12 sps:$4 sm:$0xff]  }
   0xc   :  { %817 = vmatprep.subr.bf16.mxu0 %v927_v6  ;;  %908 = vmatprep.subr.bf16.mxu1 %v927_v6  ;;  %v959_v32 = vld [vmem:[%s1270_s0 + $0x48] ss:$12 sps:$4 sm:$0xff]   ;;  %v961_v34 = vld [vmem:[%s1270_s0 + $0x64] ss:$12 sps:$4 sm:$0xff]   ;;  %v964_v36 = vld [vmem:[%s1270_s0 + $0x60] ss:$12 sps:$4 sm:$0xff]  }
   0xd   :  { %v963_v35 = vld [vmem:[%s1270_s0 + $0x68] ss:$12 sps:$4 sm:$0xff]   ;;  %v965_v37 = vld [vmem:[%s1270_s0 + $0x80] ss:$12 sps:$4 sm:$0xff]   ;;  %v968_v39 = vld [vmem:[%s1270_s0 + $0x98] ss:$12 sps:$4 sm:$0xff]  }
   0xe   :  { %v966_v38 = vld [vmem:[%s1270_s0 + $0x7c] ss:$12 sps:$4 sm:$0xff]   ;;  %v969_v40 = vld [vmem:[%s1270_s0 + $0x78] ss:$12 sps:$4 sm:$0xff]   ;;  %v1152_v61 = vld [vmem:[%s1272_s2] ss:$0 sm:$0xff] }
   0xf   :  { %818 = vmatpush3.bf16.msra.mxu0 %v928_v7  ;;  %916 = vmatpush3.bf16.msra.mxu1 %v928_v7  ;;  %v970_v41 = vld [vmem:[%s1270_s0 + $0xb0] ss:$12 sps:$4 sm:$0xff]   ;;  %v804_v57 = vld [vmem:[%s1271_s3 + $0x8] sm:$0xff]   ;;  %v773_v62 = vld [vmem:[%s1271_s3] sm:$0xff]  }
  0x10   :  { %819 = vmatprep.subr.bf16.mxu0 %v929_v8  ;;  %909 = vmatprep.subr.bf16.mxu1 %v929_v8  ;;  %v778_v0 = vunpack.c.l.bf16 %v804_v57  ;;  %v774_v5 = vunpack.c.l.bf16 %v773_v62  ;;  %v779_v12 = vunpack.c.h.bf16 %v804_v57 }
  0x13   :  { %820 = vmatpush3.bf16.msra.mxu0 %v930_v9  ;;  %917 = vmatpush3.bf16.msra.mxu1 %v930_v9 }
  0x14   :  { %821 = vmatprep.subr.bf16.mxu0 %v931_v10  ;;  %910 = vmatprep.subr.bf16.mxu1 %v931_v10 }
  0x17   :  { %822 = vmatpush3.bf16.msra.mxu0 %v932_v13  ;;  %918 = vmatpush3.bf16.msra.mxu1 %v932_v13 }
  0x18   :  { %823 = vmatprep.subr.bf16.mxu0 %v933_v14  ;;  %911 = vmatprep.subr.bf16.mxu1 %v933_v14 }
  0x1b   :  { %824 = vmatpush3.bf16.msra.mxu0 %v934_v15  ;;  %919 = vmatpush3.bf16.msra.mxu1 %v934_v15 }
  0x1c   :  { %825 = vmatprep.subr.bf16.mxu0 %v935_v16  ;;  %912 = vmatprep.subr.bf16.mxu1 %v935_v16 }
  0x1f   :  { %826 = vmatpush3.bf16.msra.mxu0 %v936_v17  ;;  %920 = vmatpush3.bf16.msra.mxu1 %v936_v17 }
  0x20   :  { %885 = vmatprep.subr.bf16.mxu1 %v943_v19 }
  0x22   :  { %411 = vmatmul.mubr.bf16.vlgmr.msra.gmra.mxu0 %v937_v18  ;;  %459 = vmatmul.mubr.bf16.vlgmr.msra.gmra.mxu1 %v940_v20  ;;  %v805_v20 = vld [vmem:[%s1271_s3 + $0x10] sm:$0xff]  }
  0x23   :  { %886 = vmatpush3.bf16.msra.mxu1 %v943_v19  ;;  %418 = vmatprep.mubr.bf16.mxu0 %v944_v21 }
  0x24   :  { %466 = vmatprep.mubr.bf16.mxu1 %v946_v22  ;;  %887 = vmatprep.subr.bf16.mxu1 %v950_v23  ;;  %v775_v22 = vunpack.c.h.bf16 %v773_v62 }
  0x27   :  { %888 = vmatpush3.bf16.msra.mxu1 %v950_v23 }
  0x2a   :  { %419 = vmatmul.mubr.bf16.gmra.mxu0 %v948_v24  ;;  %467 = vmatmul.mubr.bf16.gmra.mxu1 %v949_v25 }
  0x2b   :  { %426 = vmatprep.mubr.bf16.mxu0 %v951_v26  ;;  %889 = vmatprep.mubr.msk.bf16.mxu1 %vm353_vm0, %v953_v27 }
  0x32   :  { %427 = vmatmul.mubr.bf16.gmra.mxu0 %v954_v28  ;;  %890 = vmatmul.mubr.msk.bf16.vlgmr.msra.gmra.mxu1 %vm353_vm0, %v955_v29 }
  0x33   :  { %434 = vmatprep.mubr.bf16.mxu0 %v956_v30  ;;  %893 = vmatprep.mubr.msk.bf16.mxu1 %vm353_vm0, %v958_v31  ;;  %v782_v31 = vunpack.c.l.bf16 %v805_v20 }
  0x3a   :  { %435 = vmatmul.mubr.bf16.gmra.mxu0 %v959_v32  ;;  %894 = vmatmul.mubr.msk.bf16.gmra.mxu1 %vm353_vm0, %v960_v33 }
  0x3b   :  { %442 = vmatprep.mubr.bf16.mxu0 %v961_v34  ;;  %897 = vmatprep.mubr.msk.bf16.mxu1 %vm353_vm0, %v963_v35  ;;  %v806_v35 = vld [vmem:[%s1271_s3 + $0x18] sm:$0xff]  }
  0x42   :  { %443 = vmatmul.mubr.bf16.gmra.mxu0 %v964_v36  ;;  %898 = vmatmul.mubr.msk.bf16.gmra.mxu1 %vm353_vm0, %v965_v37 }
  0x43   :  { %450 = vmatprep.mubr.bf16.mxu0 %v966_v38  ;;  %901 = vmatprep.mubr.msk.bf16.mxu1 %vm353_vm0, %v968_v39 }
  0x4a   :  { %451 = vmatmul.mubr.bf16.gmra.mxu0 %v969_v40  ;;  %902 = vmatmul.mubr.msk.bf16.gmra.mxu1 %vm353_vm0, %v970_v41 }
  0xe2   :  { %v827_v42 = vpop.f32.mrf.mxu0  ;;  %v1130_v43 = vpop.f32.mrf.mxu1 }
  0xe4   :  { %v828_v44 = vpop.f32.mrf.mxu0  ;;  %v1132_v45 = vpop.f32.mrf.mxu1 }
  0xe5   :  { %v829_v58 = vadd.f32 %v828_v44, %v827_v42 }
  0xe6   :  { %v830_v46 = vpop.f32.mrf.mxu0  ;;  %v1134_v47 = vpop.f32.mrf.mxu1 }
  0xe7   :  { %v413_v6 = vadd.f32 %v829_v58, %v1152_v61 }
  0xe8   :  { %v831_v48 = vpop.f32.mrf.mxu0  ;;  %v1136_v49 = vpop.f32.mrf.mxu1 }
  0xe9   :  { %v832_v7 = vadd.f32 %v831_v48, %v830_v46  ;;  %v786_v46 = vunpack.c.l.bf16 %v806_v35 }
  0xea   :  { %v833_v50 = vpop.f32.mrf.mxu0  ;;  %v1138_v51 = vpop.f32.mrf.mxu1 }
  0xeb   :  { %v416_v23 = vadd.f32 %v832_v7, %v1152_v61 }
  0xec   :  { %v834_v52 = vpop.f32.mrf.mxu0  ;;  %v1140_v53 = vpop.f32.mrf.mxu1 }
  0xed   :  { %v835_v54 = vadd.f32 %v834_v52, %v833_v50 }
  0xee   :  { %v836_v55 = vpop.f32.mrf.mxu0  ;;  %v1142_v56 = vpop.f32.mrf.mxu1 }
  0xef   :  { %v421_v1 = vadd.f32 %v835_v54, %v1152_v61 }
  0xf0   :  { %v837_v59 = vpop.f32.mrf.mxu0  ;;  %v1147_v60 = vpop.f32.mrf.mxu1 }
  0xf1   :  { %v838_v63 = vadd.f32 %v837_v59, %v836_v55  ;;  %v783_v55 = vunpack.c.h.bf16 %v805_v20 }
  0xf2   :  { %v839_v2 = vpop.f32.mrf.mxu0  ;;  %v891_v3 = vpop.f32.mrf.mxu1 }
  0xf3   :  { %v518_v4 = vadd.f32 %v891_v3, %v421_v1  ;;  %v424_v13 = vadd.f32 %v838_v63, %v1152_v61  ;;  %v787_v3 = vunpack.c.h.bf16 %v806_v35 }
  0xf4   :  { %v840_v8 = vpop.f32.mrf.mxu0  ;;  %v509_v9 = vpop.f32.mrf.mxu1 }
  0xf5   :  { %v574_v10 = vadd.f32 %v778_v0, %v518_v4  ;;  %v510_v11 = vadd.f32 %v509_v9, %v413_v6  ;;  %v841_v17 = vadd.f32 %v840_v8, %v839_v2 }
  0xf6   :  { %v842_v14 = vpop.f32.mrf.mxu0  ;;  %v892_v15 = vpop.f32.mrf.mxu1 }
  0xf7   :  { %v590_v16 = vmax.f32 %v574_v10, 0.0  ;;  %v572_v18 = vadd.f32 %v774_v5, %v510_v11  ;;  %v521_v19 = vadd.f32 %v892_v15, %v424_v13  ;;  %v429_v36 = vadd.f32 %v841_v17, %v1152_v61  ;;  %v807_v10 = vld [vmem:[%s1271_s3 + $0x20] sm:$0xff]  }
  0xf8   :  { %v843_v21 = vpop.f32.mrf.mxu0  ;;  %v512_v24 = vpop.f32.mrf.mxu1  ;;  %v871_v11 = vadd.f32 %v1140_v53, %v1138_v51 }
  0xf9   :  { %v758_v25 = vpack.c.bf16 %v590_v16, %v590_v16  ;;  %v588_v26 = vmax.f32 %v572_v18, 0.0  ;;  %v575_v27 = vadd.f32 %v779_v12, %v521_v19  ;;  %v513_v28 = vadd.f32 %v512_v24, %v416_v23  ;;  %v810_v18 = vld [vmem:[%s1271_s3 + $0x38] sm:$0xff]  }
  0xfa   :  { %v845_v29 = vpop.f32.mrf.mxu0  ;;  %v895_v30 = vpop.f32.mrf.mxu1  ;;  %v844_v34 = vadd.f32 %v843_v21, %v842_v14  ;;  %v790_v19 = vunpack.c.l.bf16 %v807_v10  ;;  %v865_v24 = vadd.f32 %v1132_v45, %v1130_v43  ;;  %v809_v43 = vld [vmem:[%s1271_s3 + $0x30] sm:$0xff]   ;;  %v874_v45 = vadd.f32 %v1147_v60, %v1142_v56 }
  0xfb   :  { %671 = vst.msk [vmem:[%s1273_s4 + $0x8] sm:$0xf] %vm668_vm1, %v758_v25  ;;  %v756_v32 = vpack.c.bf16 %v588_v26, %v588_v26  ;;  %v591_v33 = vmax.f32 %v575_v27, 0.0  ;;  %v573_v37 = vadd.f32 %v775_v22, %v513_v28  ;;  %v802_v27 = vunpack.c.l.bf16 %v810_v18 }
  0xfc   :  { %v846_v38 = vpop.f32.mrf.mxu0  ;;  %v525_v39 = vpop.f32.mrf.mxu1  ;;  %v432_v57 = vadd.f32 %v844_v34, %v1152_v61 }
  0xfd   :  { %669 = vst.msk [vmem:[%s1273_s4] sm:$0xf] %vm668_vm1, %v756_v32  ;;  %v759_v40 = vpack.c.bf16 %v591_v33, %v591_v33  ;;  %v847_v41 = vadd.f32 %v846_v38, %v845_v29  ;;  %v526_v42 = vadd.f32 %v525_v39, %v429_v36  ;;  %v589_v44 = vmax.f32 %v573_v37, 0.0  ;;  %v808_v39 = vld [vmem:[%s1271_s3 + $0x28] sm:$0xff]  }
  0xfe   :  { %v848_v48 = vpop.f32.mrf.mxu0  ;;  %v896_v50 = vpop.f32.mrf.mxu1  ;;  %v791_v32 = vunpack.c.h.bf16 %v807_v10 }
  0xff   :  { %672 = vst.msk [vmem:[%s1273_s4 + $0xc] sm:$0xf] %vm668_vm1, %v759_v40  ;;  %v437_v52 = vadd.f32 %v847_v41, %v1152_v61  ;;  %v576_v54 = vadd.f32 %v782_v31, %v526_v42  ;;  %v757_v58 = vpack.c.bf16 %v589_v44, %v589_v44  ;;  %v469_v31 = vadd.f32 %v871_v11, %v1152_v61 }
 0x100   :  { %v849_v59 = vpop.f32.mrf.mxu0  ;;  %v528_v62 = vpop.f32.mrf.mxu1  ;;  %v868_v40 = vadd.f32 %v1136_v49, %v1134_v47  ;;  %v798_v42 = vunpack.c.l.bf16 %v809_v43  ;;  %v461_v44 = vadd.f32 %v865_v24, %v1152_v61  ;;  %v472_v47 = vadd.f32 %v874_v45, %v1152_v61 }
 0x101   :  { %v534_v63 = vadd.f32 %v895_v30, %v437_v52  ;;  %v592_v0 = vmax.f32 %v576_v54, 0.0  ;;  %v850_v1 = vadd.f32 %v849_v59, %v848_v48  ;;  %v529_v2 = vadd.f32 %v528_v62, %v432_v57  ;;  %670 = vst.msk [vmem:[%s1273_s4 + $0x4] sm:$0xf] %vm668_vm1, %v757_v58 }
 0x102   :  { %v851_v4 = vpop.f32.mrf.mxu0  ;;  %v1186_v5 = vpop.f32.mrf.mxu1  ;;  %v794_v52 = vunpack.c.l.bf16 %v808_v39  ;;  %v803_v57 = vunpack.c.h.bf16 %v810_v18 }
 0x103   :  { %v578_v6 = vadd.f32 %v786_v46, %v534_v63  ;;  %v760_v7 = vpack.c.bf16 %v592_v0, %v592_v0  ;;  %v440_v8 = vadd.f32 %v850_v1, %v1152_v61  ;;  %v577_v9 = vadd.f32 %v783_v55, %v529_v2 }
 0x104   :  { %v852_v12 = vpop.f32.mrf.mxu0  ;;  %v541_v13 = vpop.f32.mrf.mxu1 }
 0x105   :  { %v594_v14 = vmax.f32 %v578_v6, 0.0  ;;  %673 = vst.msk [vmem:[%s1273_s4 + $0x10] sm:$0xf] %vm668_vm1, %v760_v7  ;;  %v537_v15 = vadd.f32 %v896_v50, %v440_v8  ;;  %v593_v16 = vmax.f32 %v577_v9, 0.0  ;;  %v853_v17 = vadd.f32 %v852_v12, %v851_v4 }
 0x106   :  { %v854_v20 = vpop.f32.mrf.mxu0  ;;  %v1201_v21 = vpop.f32.mrf.mxu1  ;;  %v464_v4 = vadd.f32 %v868_v40, %v1152_v61 }
 0x107   :  { %v762_v51 = vpack.c.bf16 %v594_v14, %v594_v14  ;;  %v579_v53 = vadd.f32 %v787_v3, %v537_v15  ;;  %v761_v22 = vpack.c.bf16 %v593_v16, %v593_v16  ;;  %v445_v23 = vadd.f32 %v853_v17, %v1152_v61 }
 0x108   :  { %v855_v25 = vpop.f32.mrf.mxu0  ;;  %v544_v26 = vpop.f32.mrf.mxu1  ;;  %v799_v3 = vunpack.c.h.bf16 %v809_v43  ;;  %v795_v16 = vunpack.c.h.bf16 %v808_v39 }
 0x109   :  { %675 = vst.msk [vmem:[%s1273_s4 + $0x18] sm:$0xf] %vm668_vm1, %v762_v51  ;;  %v595_v28 = vmax.f32 %v579_v53, 0.0  ;;  %674 = vst.msk [vmem:[%s1273_s4 + $0x14] sm:$0xf] %vm668_vm1, %v761_v22  ;;  %v542_v29 = vadd.f32 %v541_v13, %v445_v23  ;;  %v856_v30 = vadd.f32 %v855_v25, %v854_v20 }
 0x10a   :  { %v857_v33 = vpop.f32.mrf.mxu0  ;;  %v903_v34 = vpop.f32.mrf.mxu1 }
 0x10b   :  { %v763_v35 = vpack.c.bf16 %v595_v28, %v595_v28  ;;  %v580_v36 = vadd.f32 %v790_v19, %v542_v29  ;;  %v448_v37 = vadd.f32 %v856_v30, %v1152_v61  ;;  %v566_v38 = vadd.f32 %v903_v34, %v469_v31 }
 0x10c   :  { %v858_v41 = vpop.f32.mrf.mxu0  ;;  %v557_v56 = vpop.f32.mrf.mxu1 }
 0x10d   :  { %676 = vst.msk [vmem:[%s1273_s4 + $0x1c] sm:$0xf] %vm668_vm1, %v763_v35  ;;  %v596_v60 = vmax.f32 %v580_v36, 0.0  ;;  %v545_v46 = vadd.f32 %v544_v26, %v448_v37  ;;  %v586_v48 = vadd.f32 %v802_v27, %v566_v38  ;;  %v859_v50 = vadd.f32 %v858_v41, %v857_v33 }
 0x10e   :  { %v558_v54 = vadd.f32 %v557_v56, %v461_v44  ;;  %v860_v55 = vpop.f32.mrf.mxu0  ;;  %v904_v49 = vpop.f32.mrf.mxu1 }
 0x10f   :  { %v764_v58 = vpack.c.bf16 %v596_v60, %v596_v60  ;;  %v581_v59 = vadd.f32 %v791_v32, %v545_v46  ;;  %v602_v62 = vmax.f32 %v586_v48, 0.0  ;;  %v453_v63 = vadd.f32 %v859_v50, %v1152_v61 }
 0x110   :  { %v584_v0 = vadd.f32 %v798_v42, %v558_v54  ;;  %v569_v1 = vadd.f32 %v904_v49, %v472_v47  ;;  %v861_v2 = vpop.f32.mrf.mxu0  ;;  %v560_v6 = vpop.f32.mrf.mxu1 }
 0x111   :  { %677 = vst.msk [vmem:[%s1273_s4 + $0x20] sm:$0xf] %vm668_vm1, %v764_v58  ;;  %v597_v7 = vmax.f32 %v581_v59, 0.0  ;;  %v770_v8 = vpack.c.bf16 %v602_v62, %v602_v62  ;;  %v550_v9 = vadd.f32 %v1186_v5, %v453_v63  ;;  %v862_v10 = vadd.f32 %v861_v2, %v860_v55 }
 0x112   :  { %v600_v11 = vmax.f32 %v584_v0, 0.0  ;;  %v587_v12 = vadd.f32 %v803_v57, %v569_v1  ;;  %v561_v13 = vadd.f32 %v560_v6, %v464_v4 }
 0x113   :  { %v765_v14 = vpack.c.bf16 %v597_v7, %v597_v7  ;;  %683 = vst.msk [vmem:[%s1273_s4 + $0x38] sm:$0xf] %vm668_vm1, %v770_v8  ;;  %v582_v15 = vadd.f32 %v794_v52, %v550_v9  ;;  %v456_v17 = vadd.f32 %v862_v10, %v1152_v61 }
 0x114   :  { %v768_v18 = vpack.c.bf16 %v600_v11, %v600_v11  ;;  %v603_v19 = vmax.f32 %v587_v12, 0.0  ;;  %v585_v20 = vadd.f32 %v799_v3, %v561_v13 }
 0x115   :  { %678 = vst.msk [vmem:[%s1273_s4 + $0x24] sm:$0xf] %vm668_vm1, %v765_v14  ;;  %v598_v5 = vmax.f32 %v582_v15, 0.0  ;;  %v553_v51 = vadd.f32 %v1201_v21, %v456_v17 }
 0x116   :  { %681 = vst.msk [vmem:[%s1273_s4 + $0x30] sm:$0xf] %vm668_vm1, %v768_v18  ;;  %v771_v53 = vpack.c.bf16 %v603_v19, %v603_v19  ;;  %v601_v22 = vmax.f32 %v585_v20, 0.0 }
 0x117   :  { %v766_v23 = vpack.c.bf16 %v598_v5, %v598_v5  ;;  %v583_v61 = vadd.f32 %v795_v16, %v553_v51 }
 0x118   :  { %684 = vst.msk [vmem:[%s1273_s4 + $0x3c] sm:$0xf] %vm668_vm1, %v771_v53  ;;  %v769_v24 = vpack.c.bf16 %v601_v22, %v601_v22 }
 0x119   :  { %679 = vst.msk [vmem:[%s1273_s4 + $0x28] sm:$0xf] %vm668_vm1, %v766_v23  ;;  %v599_v21 = vmax.f32 %v583_v61, 0.0 }
 0x11a   :  { %682 = vst.msk [vmem:[%s1273_s4 + $0x34] sm:$0xf] %vm668_vm1, %v769_v24 }
 0x11b   :  { %v767_v25 = vpack.c.bf16 %v599_v21, %v599_v21 }
 0x11d   :  { %680 = vst.msk [vmem:[%s1273_s4 + $0x2c] sm:$0xf] %vm668_vm1, %v767_v25 }

// kernel: _lambda_.40
= control target key start
LH: loop header
LB: loop body
LE: loop exit
PB: predicated region body
PF: predicated region fallthrough
CT: control target
= control target key end

     0   :  { %vm318_vm0 = vcmask 261120   ;;  %vm617_vm1 = vcmask 257024   ;;  %s1144_s1 = inlined_call_operand.vmem [shape: bf16[288,32], index: 1, kind: input, shape index: {}]   ;;  %s1145_s0 = inlined_call_operand.vmem [shape: bf16[128,288], index: 0, kind: input, shape index: {}]   ;;  %s1146_s2 = inlined_call_operand.vmem [shape: f32[1,32], index: 2, kind: input, shape index: {}]   ;;  %s1147_s3 = inlined_call_operand.vmem [shape: bf16[128,32], index: 3, kind: output, shape index: {}]  }
   0x1   :  { %v831_v0 = vld [vmem:[%s1144_s1 + $0x78] sm:$0xff]   ;;  %v833_v2 = vld [vmem:[%s1144_s1 + $0x70] sm:$0xff]   ;;  %v835_v4 = vld [vmem:[%s1144_s1 + $0x68] sm:$0xff]  }
   0x2   :  { %v832_v1 = vld [vmem:[%s1144_s1 + $0x38] sm:$0xff]   ;;  %721 = vmatprep.subr.bf16.mxu0 %v831_v0  ;;  %815 = vmatprep.subr.bf16.mxu1 %v831_v0  ;;  %v834_v3 = vld [vmem:[%s1144_s1 + $0x30] sm:$0xff]   ;;  %v836_v5 = vld [vmem:[%s1144_s1 + $0x28] sm:$0xff]  }
   0x3   :  { %722 = vmatpush3.bf16.msra.mxu0 %v832_v1  ;;  %823 = vmatpush3.bf16.msra.mxu1 %v832_v1  ;;  %v837_v6 = vld [vmem:[%s1144_s1 + $0x60] sm:$0xff]   ;;  %v839_v8 = vld [vmem:[%s1144_s1 + $0x58] sm:$0xff]   ;;  %v841_v10 = vld [vmem:[%s1144_s1 + $0x50] sm:$0xff]  }
   0x4   :  { %723 = vmatprep.subr.bf16.mxu0 %v833_v2  ;;  %816 = vmatprep.subr.bf16.mxu1 %v833_v2  ;;  %v838_v7 = vld [vmem:[%s1144_s1 + $0x20] sm:$0xff]   ;;  %v840_v9 = vld [vmem:[%s1144_s1 + $0x18] sm:$0xff]   ;;  %v842_v13 = vld [vmem:[%s1144_s1 + $0x10] sm:$0xff]  }
   0x5   :  { %v849_v11 = vld [vmem:[%s1145_s0 + $0x4] ss:$12 sps:$4 sm:$0xff]   ;;  %v852_v12 = vld [vmem:[%s1145_s0 + $0x94] ss:$12 sps:$4 sm:$0xff]   ;;  %v843_v14 = vld [vmem:[%s1144_s1 + $0x48] sm:$0xff]  }
   0x6   :  { %375 = vmatprep.mubr.bf16.mxu0 %v849_v11  ;;  %423 = vmatprep.mubr.bf16.mxu1 %v852_v12  ;;  %v844_v15 = vld [vmem:[%s1144_s1 + $0x8] sm:$0xff]   ;;  %v845_v16 = vld [vmem:[%s1144_s1 + $0x40] sm:$0xff]   ;;  %v850_v20 = vld [vmem:[%s1145_s0 + $0x90] ss:$12 sps:$4 sm:$0xff]  }
   0x7   :  { %724 = vmatpush3.bf16.msra.mxu0 %v834_v3  ;;  %824 = vmatpush3.bf16.msra.mxu1 %v834_v3  ;;  %v846_v17 = vld [vmem:[%s1144_s1] sm:$0xff]   ;;  %v853_v19 = vld [vmem:[%s1144_s1 + $0x88] sm:$0xff]   ;;  %v864_v28 = vld [vmem:[%s1145_s0 + $0x30] ss:$12 sps:$4 sm:$0xff]  }
   0x8   :  { %725 = vmatprep.subr.bf16.mxu0 %v835_v4  ;;  %817 = vmatprep.subr.bf16.mxu1 %v835_v4  ;;  %v847_v18 = vld [vmem:[%s1145_s0] ss:$12 sps:$4 sm:$0xff]   ;;  %v854_v21 = vld [vmem:[%s1145_s0 + $0x1c] ss:$12 sps:$4 sm:$0xff]   ;;  %v858_v24 = vld [vmem:[%s1145_s0 + $0x18] ss:$12 sps:$4 sm:$0xff]  }
   0x9   :  { %v856_v22 = vld [vmem:[%s1145_s0 + $0xac] ss:$12 sps:$4 sm:$0xff]   ;;  %v860_v23 = vld [vmem:[%s1144_s1 + $0x80] sm:$0xff]   ;;  %v859_v25 = vld [vmem:[%s1145_s0 + $0xa8] ss:$12 sps:$4 sm:$0xff]  }
   0xa   :  { %v861_v26 = vld [vmem:[%s1145_s0 + $0x34] ss:$12 sps:$4 sm:$0xff]   ;;  %v866_v30 = vld [vmem:[%s1145_s0 + $0x4c] ss:$12 sps:$4 sm:$0xff]   ;;  %v870_v33 = vld [vmem:[%s1145_s0 + $0x50] ss:$12 sps:$4 sm:$0xff]  }
   0xb   :  { %726 = vmatpush3.bf16.msra.mxu0 %v836_v5  ;;  %825 = vmatpush3.bf16.msra.mxu1 %v836_v5  ;;  %v863_v27 = vld [vmem:[%s1145_s0 + $0x8] ss:$12 sps:$4 sm:$0xff]   ;;  %v865_v29 = vld [vmem:[%s1145_s0 + $0x20] ss:$12 sps:$4 sm:$0xff]   ;;  %v868_v31 = vld [vmem:[%s1145_s0 + $0x38] ss:$12 sps:$4 sm:$0xff]  }
   0xc   :  { %727 = vmatprep.subr.bf16.mxu0 %v837_v6  ;;  %818 = vmatprep.subr.bf16.mxu1 %v837_v6  ;;  %v869_v32 = vld [vmem:[%s1145_s0 + $0x48] ss:$12 sps:$4 sm:$0xff]   ;;  %v871_v34 = vld [vmem:[%s1145_s0 + $0x64] ss:$12 sps:$4 sm:$0xff]   ;;  %v874_v36 = vld [vmem:[%s1145_s0 + $0x60] ss:$12 sps:$4 sm:$0xff]  }
   0xd   :  { %v873_v35 = vld [vmem:[%s1145_s0 + $0x68] ss:$12 sps:$4 sm:$0xff]   ;;  %v875_v37 = vld [vmem:[%s1145_s0 + $0x80] ss:$12 sps:$4 sm:$0xff]   ;;  %v878_v39 = vld [vmem:[%s1145_s0 + $0x98] ss:$12 sps:$4 sm:$0xff]  }
   0xe   :  { %v876_v38 = vld [vmem:[%s1145_s0 + $0x7c] ss:$12 sps:$4 sm:$0xff]   ;;  %v879_v40 = vld [vmem:[%s1145_s0 + $0x78] ss:$12 sps:$4 sm:$0xff]   ;;  %v1054_v60 = vld [vmem:[%s1146_s2] ss:$0 sm:$0xff] }
   0xf   :  { %728 = vmatpush3.bf16.msra.mxu0 %v838_v7  ;;  %826 = vmatpush3.bf16.msra.mxu1 %v838_v7  ;;  %v880_v41 = vld [vmem:[%s1145_s0 + $0xb0] ss:$12 sps:$4 sm:$0xff]  }
  0x10   :  { %729 = vmatprep.subr.bf16.mxu0 %v839_v8  ;;  %819 = vmatprep.subr.bf16.mxu1 %v839_v8 }
  0x13   :  { %730 = vmatpush3.bf16.msra.mxu0 %v840_v9  ;;  %827 = vmatpush3.bf16.msra.mxu1 %v840_v9 }
  0x14   :  { %731 = vmatprep.subr.bf16.mxu0 %v841_v10  ;;  %820 = vmatprep.subr.bf16.mxu1 %v841_v10 }
  0x17   :  { %732 = vmatpush3.bf16.msra.mxu0 %v842_v13  ;;  %828 = vmatpush3.bf16.msra.mxu1 %v842_v13 }
  0x18   :  { %733 = vmatprep.subr.bf16.mxu0 %v843_v14  ;;  %821 = vmatprep.subr.bf16.mxu1 %v843_v14 }
  0x1b   :  { %734 = vmatpush3.bf16.msra.mxu0 %v844_v15  ;;  %829 = vmatpush3.bf16.msra.mxu1 %v844_v15 }
  0x1c   :  { %735 = vmatprep.subr.bf16.mxu0 %v845_v16  ;;  %822 = vmatprep.subr.bf16.mxu1 %v845_v16 }
  0x1f   :  { %736 = vmatpush3.bf16.msra.mxu0 %v846_v17  ;;  %830 = vmatpush3.bf16.msra.mxu1 %v846_v17 }
  0x20   :  { %795 = vmatprep.subr.bf16.mxu1 %v853_v19 }
  0x22   :  { %376 = vmatmul.mubr.bf16.vlgmr.msra.gmra.mxu0 %v847_v18  ;;  %424 = vmatmul.mubr.bf16.vlgmr.msra.gmra.mxu1 %v850_v20 }
  0x23   :  { %796 = vmatpush3.bf16.msra.mxu1 %v853_v19  ;;  %383 = vmatprep.mubr.bf16.mxu0 %v854_v21 }
  0x24   :  { %431 = vmatprep.mubr.bf16.mxu1 %v856_v22  ;;  %797 = vmatprep.subr.bf16.mxu1 %v860_v23 }
  0x27   :  { %798 = vmatpush3.bf16.msra.mxu1 %v860_v23 }
  0x2a   :  { %384 = vmatmul.mubr.bf16.gmra.mxu0 %v858_v24  ;;  %432 = vmatmul.mubr.bf16.gmra.mxu1 %v859_v25 }
  0x2b   :  { %391 = vmatprep.mubr.bf16.mxu0 %v861_v26  ;;  %799 = vmatprep.mubr.msk.bf16.mxu1 %vm318_vm0, %v863_v27 }
  0x32   :  { %392 = vmatmul.mubr.bf16.gmra.mxu0 %v864_v28  ;;  %800 = vmatmul.mubr.msk.bf16.vlgmr.msra.gmra.mxu1 %vm318_vm0, %v865_v29 }
  0x33   :  { %399 = vmatprep.mubr.bf16.mxu0 %v866_v30  ;;  %803 = vmatprep.mubr.msk.bf16.mxu1 %vm318_vm0, %v868_v31 }
  0x3a   :  { %400 = vmatmul.mubr.bf16.gmra.mxu0 %v869_v32  ;;  %804 = vmatmul.mubr.msk.bf16.gmra.mxu1 %vm318_vm0, %v870_v33 }
  0x3b   :  { %407 = vmatprep.mubr.bf16.mxu0 %v871_v34  ;;  %807 = vmatprep.mubr.msk.bf16.mxu1 %vm318_vm0, %v873_v35 }
  0x42   :  { %408 = vmatmul.mubr.bf16.gmra.mxu0 %v874_v36  ;;  %808 = vmatmul.mubr.msk.bf16.gmra.mxu1 %vm318_vm0, %v875_v37 }
  0x43   :  { %415 = vmatprep.mubr.bf16.mxu0 %v876_v38  ;;  %811 = vmatprep.mubr.msk.bf16.mxu1 %vm318_vm0, %v878_v39 }
  0x4a   :  { %416 = vmatmul.mubr.bf16.gmra.mxu0 %v879_v40  ;;  %812 = vmatmul.mubr.msk.bf16.gmra.mxu1 %vm318_vm0, %v880_v41 }
  0xe2   :  { %v737_v42 = vpop.f32.mrf.mxu0  ;;  %v1035_v43 = vpop.f32.mrf.mxu1 }
  0xe4   :  { %v738_v44 = vpop.f32.mrf.mxu0  ;;  %v1037_v45 = vpop.f32.mrf.mxu1 }
  0xe5   :  { %v739_v57 = vadd.f32 %v738_v44, %v737_v42 }
  0xe6   :  { %v740_v46 = vpop.f32.mrf.mxu0  ;;  %v1039_v47 = vpop.f32.mrf.mxu1 }
  0xe7   :  { %v378_v3 = vadd.f32 %v739_v57, %v1054_v60 }
  0xe8   :  { %v741_v48 = vpop.f32.mrf.mxu0  ;;  %v1041_v49 = vpop.f32.mrf.mxu1 }
  0xe9   :  { %v742_v63 = vadd.f32 %v741_v48, %v740_v46 }
  0xea   :  { %v743_v50 = vpop.f32.mrf.mxu0  ;;  %v1043_v51 = vpop.f32.mrf.mxu1 }
  0xeb   :  { %v381_v11 = vadd.f32 %v742_v63, %v1054_v60 }
  0xec   :  { %v744_v52 = vpop.f32.mrf.mxu0  ;;  %v1045_v53 = vpop.f32.mrf.mxu1 }
  0xed   :  { %v745_v54 = vadd.f32 %v744_v52, %v743_v50 }
  0xee   :  { %v746_v55 = vpop.f32.mrf.mxu0  ;;  %v1047_v56 = vpop.f32.mrf.mxu1 }
  0xef   :  { %v386_v62 = vadd.f32 %v745_v54, %v1054_v60  ;;  %v781_v54 = vadd.f32 %v1045_v53, %v1043_v51  ;;  %v775_v53 = vadd.f32 %v1037_v45, %v1035_v43 }
  0xf0   :  { %v747_v58 = vpop.f32.mrf.mxu0  ;;  %v1049_v59 = vpop.f32.mrf.mxu1 }
  0xf1   :  { %v748_v61 = vadd.f32 %v747_v58, %v746_v55 }
  0xf2   :  { %v749_v0 = vpop.f32.mrf.mxu0  ;;  %v801_v1 = vpop.f32.mrf.mxu1 }
  0xf3   :  { %v483_v2 = vadd.f32 %v801_v1, %v386_v62  ;;  %v389_v8 = vadd.f32 %v748_v61, %v1054_v60 }
  0xf4   :  { %v750_v4 = vpop.f32.mrf.mxu0  ;;  %v474_v5 = vpop.f32.mrf.mxu1 }
  0xf5   :  { %v539_v6 = vmax.f32 %v483_v2, 0.0  ;;  %v475_v7 = vadd.f32 %v474_v5, %v378_v3  ;;  %v751_v13 = vadd.f32 %v750_v4, %v749_v0  ;;  %v784_v3 = vadd.f32 %v1049_v59, %v1047_v56 }
  0xf6   :  { %v752_v9 = vpop.f32.mrf.mxu0  ;;  %v802_v10 = vpop.f32.mrf.mxu1  ;;  %v778_v56 = vadd.f32 %v1041_v49, %v1039_v47 }
  0xf7   :  { %v707_v12 = vpack.c.bf16 %v539_v6, %v539_v6  ;;  %v537_v14 = vmax.f32 %v475_v7, 0.0  ;;  %v486_v15 = vadd.f32 %v802_v10, %v389_v8  ;;  %v394_v26 = vadd.f32 %v751_v13, %v1054_v60 }
  0xf8   :  { %v753_v16 = vpop.f32.mrf.mxu0  ;;  %v477_v17 = vpop.f32.mrf.mxu1  ;;  %v426_v13 = vadd.f32 %v775_v53, %v1054_v60 }
  0xf9   :  { %620 = vst.msk [vmem:[%s1147_s3 + $0x8] sm:$0xf] %vm617_vm1, %v707_v12  ;;  %v705_v18 = vpack.c.bf16 %v537_v14, %v537_v14  ;;  %v540_v19 = vmax.f32 %v486_v15, 0.0  ;;  %v478_v20 = vadd.f32 %v477_v17, %v381_v11  ;;  %v754_v24 = vadd.f32 %v753_v16, %v752_v9 }
  0xfa   :  { %v755_v21 = vpop.f32.mrf.mxu0  ;;  %v805_v22 = vpop.f32.mrf.mxu1  ;;  %v434_v9 = vadd.f32 %v781_v54, %v1054_v60  ;;  %v437_v15 = vadd.f32 %v784_v3, %v1054_v60 }
  0xfb   :  { %618 = vst.msk [vmem:[%s1147_s3] sm:$0xf] %vm617_vm1, %v705_v18  ;;  %v708_v23 = vpack.c.bf16 %v540_v19, %v540_v19  ;;  %v538_v25 = vmax.f32 %v478_v20, 0.0  ;;  %v397_v36 = vadd.f32 %v754_v24, %v1054_v60 }
  0xfc   :  { %v756_v27 = vpop.f32.mrf.mxu0  ;;  %v490_v28 = vpop.f32.mrf.mxu1 }
  0xfd   :  { %621 = vst.msk [vmem:[%s1147_s3 + $0xc] sm:$0xf] %vm617_vm1, %v708_v23  ;;  %v706_v29 = vpack.c.bf16 %v538_v25, %v538_v25  ;;  %v757_v30 = vadd.f32 %v756_v27, %v755_v21  ;;  %v491_v31 = vadd.f32 %v490_v28, %v394_v26  ;;  %v429_v27 = vadd.f32 %v778_v56, %v1054_v60 }
  0xfe   :  { %v758_v32 = vpop.f32.mrf.mxu0  ;;  %v806_v33 = vpop.f32.mrf.mxu1 }
  0xff   :  { %619 = vst.msk [vmem:[%s1147_s3 + $0x4] sm:$0xf] %vm617_vm1, %v706_v29  ;;  %v402_v34 = vadd.f32 %v757_v30, %v1054_v60  ;;  %v541_v35 = vmax.f32 %v491_v31, 0.0 }
 0x100   :  { %v759_v37 = vpop.f32.mrf.mxu0  ;;  %v493_v38 = vpop.f32.mrf.mxu1 }
 0x101   :  { %v499_v39 = vadd.f32 %v805_v22, %v402_v34  ;;  %v709_v40 = vpack.c.bf16 %v541_v35, %v541_v35  ;;  %v760_v41 = vadd.f32 %v759_v37, %v758_v32  ;;  %v494_v42 = vadd.f32 %v493_v38, %v397_v36 }
 0x102   :  { %v761_v44 = vpop.f32.mrf.mxu0  ;;  %v809_v46 = vpop.f32.mrf.mxu1 }
 0x103   :  { %v543_v48 = vmax.f32 %v499_v39, 0.0  ;;  %622 = vst.msk [vmem:[%s1147_s3 + $0x10] sm:$0xf] %vm617_vm1, %v709_v40  ;;  %v405_v50 = vadd.f32 %v760_v41, %v1054_v60  ;;  %v542_v52 = vmax.f32 %v494_v42, 0.0 }
 0x104   :  { %v762_v55 = vpop.f32.mrf.mxu0  ;;  %v506_v57 = vpop.f32.mrf.mxu1 }
 0x105   :  { %v711_v58 = vpack.c.bf16 %v543_v48, %v543_v48  ;;  %v502_v61 = vadd.f32 %v806_v33, %v405_v50  ;;  %v710_v62 = vpack.c.bf16 %v542_v52, %v542_v52  ;;  %v763_v63 = vadd.f32 %v762_v55, %v761_v44 }
 0x106   :  { %v764_v0 = vpop.f32.mrf.mxu0  ;;  %v810_v1 = vpop.f32.mrf.mxu1 }
 0x107   :  { %624 = vst.msk [vmem:[%s1147_s3 + $0x18] sm:$0xf] %vm617_vm1, %v711_v58  ;;  %v544_v2 = vmax.f32 %v502_v61, 0.0  ;;  %623 = vst.msk [vmem:[%s1147_s3 + $0x14] sm:$0xf] %vm617_vm1, %v710_v62  ;;  %v410_v51 = vadd.f32 %v763_v63, %v1054_v60 }
 0x108   :  { %v765_v4 = vpop.f32.mrf.mxu0  ;;  %v509_v5 = vpop.f32.mrf.mxu1 }
 0x109   :  { %v712_v6 = vpack.c.bf16 %v544_v2, %v544_v2  ;;  %v507_v7 = vadd.f32 %v506_v57, %v410_v51  ;;  %v766_v8 = vadd.f32 %v765_v4, %v764_v0 }
 0x10a   :  { %v767_v10 = vpop.f32.mrf.mxu0  ;;  %v813_v11 = vpop.f32.mrf.mxu1 }
 0x10b   :  { %625 = vst.msk [vmem:[%s1147_s3 + $0x1c] sm:$0xf] %vm617_vm1, %v712_v6  ;;  %v545_v12 = vmax.f32 %v507_v7, 0.0  ;;  %v413_v43 = vadd.f32 %v766_v8, %v1054_v60  ;;  %v531_v45 = vadd.f32 %v813_v11, %v434_v9 }
 0x10c   :  { %v768_v59 = vpop.f32.mrf.mxu0  ;;  %v522_v14 = vpop.f32.mrf.mxu1 }
 0x10d   :  { %v713_v16 = vpack.c.bf16 %v545_v12, %v545_v12  ;;  %v510_v17 = vadd.f32 %v509_v5, %v413_v43  ;;  %v551_v18 = vmax.f32 %v531_v45, 0.0  ;;  %v769_v19 = vadd.f32 %v768_v59, %v767_v10 }
 0x10e   :  { %v523_v20 = vadd.f32 %v522_v14, %v426_v13  ;;  %v770_v21 = vpop.f32.mrf.mxu0  ;;  %v814_v22 = vpop.f32.mrf.mxu1 }
 0x10f   :  { %626 = vst.msk [vmem:[%s1147_s3 + $0x20] sm:$0xf] %vm617_vm1, %v713_v16  ;;  %v546_v23 = vmax.f32 %v510_v17, 0.0  ;;  %v719_v47 = vpack.c.bf16 %v551_v18, %v551_v18  ;;  %v418_v49 = vadd.f32 %v769_v19, %v1054_v60  ;;  %v534_v24 = vadd.f32 %v814_v22, %v437_v15 }
 0x110   :  { %v549_v25 = vmax.f32 %v523_v20, 0.0  ;;  %v771_v26 = vpop.f32.mrf.mxu0  ;;  %v525_v28 = vpop.f32.mrf.mxu1 }
 0x111   :  { %v714_v29 = vpack.c.bf16 %v546_v23, %v546_v23  ;;  %632 = vst.msk [vmem:[%s1147_s3 + $0x38] sm:$0xf] %vm617_vm1, %v719_v47  ;;  %v515_v30 = vadd.f32 %v809_v46, %v418_v49  ;;  %v552_v31 = vmax.f32 %v534_v24, 0.0  ;;  %v772_v32 = vadd.f32 %v771_v26, %v770_v21 }
 0x112   :  { %v717_v33 = vpack.c.bf16 %v549_v25, %v549_v25  ;;  %v526_v34 = vadd.f32 %v525_v28, %v429_v27 }
 0x113   :  { %627 = vst.msk [vmem:[%s1147_s3 + $0x24] sm:$0xf] %vm617_vm1, %v714_v29  ;;  %v547_v35 = vmax.f32 %v515_v30, 0.0  ;;  %v720_v36 = vpack.c.bf16 %v552_v31, %v552_v31  ;;  %v421_v37 = vadd.f32 %v772_v32, %v1054_v60 }
 0x114   :  { %630 = vst.msk [vmem:[%s1147_s3 + $0x30] sm:$0xf] %vm617_vm1, %v717_v33  ;;  %v550_v38 = vmax.f32 %v526_v34, 0.0 }
 0x115   :  { %v715_v39 = vpack.c.bf16 %v547_v35, %v547_v35  ;;  %633 = vst.msk [vmem:[%s1147_s3 + $0x3c] sm:$0xf] %vm617_vm1, %v720_v36  ;;  %v518_v40 = vadd.f32 %v810_v1, %v421_v37 }
 0x116   :  { %v718_v41 = vpack.c.bf16 %v550_v38, %v550_v38 }
 0x117   :  { %628 = vst.msk [vmem:[%s1147_s3 + $0x28] sm:$0xf] %vm617_vm1, %v715_v39  ;;  %v548_v60 = vmax.f32 %v518_v40, 0.0 }
 0x118   :  { %631 = vst.msk [vmem:[%s1147_s3 + $0x34] sm:$0xf] %vm617_vm1, %v718_v41 }
 0x119   :  { %v716_v42 = vpack.c.bf16 %v548_v60, %v548_v60 }
 0x11b   :  { %629 = vst.msk [vmem:[%s1147_s3 + $0x2c] sm:$0xf] %vm617_vm1, %v716_v42 }

// kernel: _lambda_.42
= control target key start
LH: loop header
LB: loop body
LE: loop exit
PB: predicated region body
PF: predicated region fallthrough
CT: control target
= control target key end

     0   :  { %vm204_vm0 = vcmask 261120   ;;  %vm329_vm1 = vcmask 519168   ;;  %s550_s1 = inlined_call_operand.vmem [shape: bf16[288,64], index: 1, kind: input, shape index: {}]   ;;  %s551_s0 = inlined_call_operand.vmem [shape: bf16[32,288], index: 0, kind: input, shape index: {}]   ;;  %s552_s2 = inlined_call_operand.vmem [shape: f32[1,64], index: 2, kind: input, shape index: {}]   ;;  %s553_s3 = inlined_call_operand.vmem [shape: bf16[32,64], index: 3, kind: output, shape index: {}]  }
   0x1   :  { %v413_v0 = vld [vmem:[%s550_s1 + $0x78] sm:$0xff]   ;;  %v415_v2 = vld [vmem:[%s550_s1 + $0x70] sm:$0xff]   ;;  %v417_v4 = vld [vmem:[%s550_s1 + $0x68] sm:$0xff]  }
   0x2   :  { %v414_v1 = vld [vmem:[%s550_s1 + $0x38] sm:$0xff]   ;;  %373 = vmatprep.subr.bf16.mxu0 %v413_v0  ;;  %v416_v3 = vld [vmem:[%s550_s1 + $0x30] sm:$0xff]   ;;  %v418_v5 = vld [vmem:[%s550_s1 + $0x28] sm:$0xff]  }
   0x3   :  { %374 = vmatpush3.bf16.msra.mxu0 %v414_v1  ;;  %v419_v6 = vld [vmem:[%s550_s1 + $0x60] sm:$0xff]   ;;  %v421_v8 = vld [vmem:[%s550_s1 + $0x58] sm:$0xff]   ;;  %v428_v10 = vld [vmem:[%s550_s1 + $0x88] sm:$0xff]  }
   0x4   :  { %375 = vmatprep.subr.bf16.mxu0 %v415_v2  ;;  %v420_v7 = vld [vmem:[%s550_s1 + $0x20] sm:$0xff]   ;;  %v422_v9 = vld [vmem:[%s550_s1 + $0x18] sm:$0xff]   ;;  %v423_v11 = vld [vmem:[%s550_s1 + $0x50] sm:$0xff]   ;;  %405 = vmatprep.subr.bf16.mxu1 %v428_v10 }
   0x5   :  { %v424_v12 = vld [vmem:[%s550_s1 + $0x10] sm:$0xff]   ;;  %v425_v13 = vld [vmem:[%s550_s1 + $0x48] sm:$0xff]   ;;  %406 = vmatpush3.bf16.msra.mxu1 %v428_v10  ;;  %v433_v15 = vld [vmem:[%s550_s1 + $0x80] sm:$0xff]  }
   0x6   :  { %v432_v14 = vld [vmem:[%s551_s0 + $0x4] ss:$12 sps:$4 sm:$0xff]   ;;  %v434_v16 = vld [vmem:[%s551_s0 + $0x8] ss:$12 sps:$4 sm:$0xff]   ;;  %407 = vmatprep.subr.bf16.mxu1 %v433_v15  ;;  %v435_v17 = vld [vmem:[%s551_s0 + $0x20] ss:$12 sps:$4 sm:$0xff]  }
   0x7   :  { %376 = vmatpush3.bf16.msra.mxu0 %v416_v3  ;;  %243 = vmatprep.mubr.bf16.mxu0 %v432_v14  ;;  %v426_v18 = vld [vmem:[%s550_s1 + $0x8] sm:$0xff]   ;;  %v427_v19 = vld [vmem:[%s550_s1 + $0x40] sm:$0xff]  }
   0x8   :  { %377 = vmatprep.subr.bf16.mxu0 %v417_v4  ;;  %409 = vmatprep.mubr.msk.bf16.mxu1 %vm204_vm0, %v434_v16  ;;  %v429_v20 = vld [vmem:[%s550_s1] sm:$0xff]   ;;  %v436_v22 = vld [vmem:[%s551_s0 + $0x1c] ss:$12 sps:$4 sm:$0xff]  }
   0x9   :  { %408 = vmatpush3.bf16.msra.mxu1 %v433_v15  ;;  %v430_v21 = vld [vmem:[%s551_s0] ss:$12 sps:$4 sm:$0xff]   ;;  %v438_v23 = vld [vmem:[%s551_s0 + $0x18] ss:$12 sps:$4 sm:$0xff]  }
   0xa   :  { %v338_v28 = vld [vmem:[%s552_s2] ss:$0 sm:$0xff] }
   0xb   :  { %378 = vmatpush3.bf16.msra.mxu0 %v418_v5 }
   0xc   :  { %379 = vmatprep.subr.bf16.mxu0 %v419_v6  ;;  %410 = vmatmul.mubr.msk.bf16.vlgmr.msra.gmra.mxu1 %vm204_vm0, %v435_v17 }
   0xf   :  { %380 = vmatpush3.bf16.msra.mxu0 %v420_v7 }
  0x10   :  { %381 = vmatprep.subr.bf16.mxu0 %v421_v8 }
  0x13   :  { %382 = vmatpush3.bf16.msra.mxu0 %v422_v9 }
  0x14   :  { %383 = vmatprep.subr.bf16.mxu0 %v423_v11 }
  0x17   :  { %384 = vmatpush3.bf16.msra.mxu0 %v424_v12 }
  0x18   :  { %385 = vmatprep.subr.bf16.mxu0 %v425_v13 }
  0x1b   :  { %386 = vmatpush3.bf16.msra.mxu0 %v426_v18 }
  0x1c   :  { %387 = vmatprep.subr.bf16.mxu0 %v427_v19 }
  0x1f   :  { %388 = vmatpush3.bf16.msra.mxu0 %v429_v20 }
  0x22   :  { %244 = vmatmul.mubr.bf16.vlgmr.msra.gmra.mxu0 %v430_v21 }
  0x23   :  { %251 = vmatprep.mubr.bf16.mxu0 %v436_v22 }
  0x2a   :  { %252 = vmatmul.mubr.bf16.gmra.mxu0 %v438_v23 }
  0xcc   :  { %v411_v24 = vpop.f32.mrf.mxu1 }
  0xce   :  { %v294_v26 = vpop.f32.mrf.mxu1 }
  0xd0   :  { %v412_v31 = vpop.f32.mrf.mxu1 }
  0xd2   :  { %v297_v37 = vpop.f32.mrf.mxu1 }
  0xe2   :  { %v389_v25 = vpop.f32.mrf.mxu0 }
  0xe4   :  { %v390_v27 = vpop.f32.mrf.mxu0 }
  0xe5   :  { %v391_v29 = vadd.f32 %v390_v27, %v389_v25 }
  0xe6   :  { %v392_v30 = vpop.f32.mrf.mxu0 }
  0xe7   :  { %v246_v32 = vadd.f32 %v391_v29, %v338_v28 }
  0xe8   :  { %v393_v33 = vpop.f32.mrf.mxu0 }
  0xe9   :  { %v394_v34 = vadd.f32 %v393_v33, %v392_v30  ;;  %v295_v35 = vadd.f32 %v294_v26, %v246_v32 }
  0xea   :  { %v395_v36 = vpop.f32.mrf.mxu0 }
  0xeb   :  { %v309_v38 = vmax.f32 %v295_v35, 0.0  ;;  %v249_v39 = vadd.f32 %v394_v34, %v338_v28 }
  0xec   :  { %v396_v40 = vpop.f32.mrf.mxu0 }
  0xed   :  { %v369_v41 = vpack.c.bf16 %v309_v38, %v309_v38  ;;  %v397_v42 = vadd.f32 %v396_v40, %v395_v36  ;;  %v298_v43 = vadd.f32 %v297_v37, %v249_v39 }
  0xee   :  { %v398_v44 = vpop.f32.mrf.mxu0 }
  0xef   :  { %330 = vst.msk [vmem:[%s553_s3] sm:$0xf] %vm329_vm1, %v369_v41  ;;  %v254_v45 = vadd.f32 %v397_v42, %v338_v28  ;;  %v310_v46 = vmax.f32 %v298_v43, 0.0 }
  0xf0   :  { %v399_v47 = vpop.f32.mrf.mxu0 }
  0xf1   :  { %v303_v48 = vadd.f32 %v411_v24, %v254_v45  ;;  %v370_v49 = vpack.c.bf16 %v310_v46, %v310_v46  ;;  %v400_v50 = vadd.f32 %v399_v47, %v398_v44 }
  0xf3   :  { %v311_v51 = vmax.f32 %v303_v48, 0.0  ;;  %331 = vst.msk [vmem:[%s553_s3 + $0x4] sm:$0xf] %vm329_vm1, %v370_v49  ;;  %v257_v52 = vadd.f32 %v400_v50, %v338_v28 }
  0xf5   :  { %v371_v53 = vpack.c.bf16 %v311_v51, %v311_v51  ;;  %v306_v54 = vadd.f32 %v412_v31, %v257_v52 }
  0xf7   :  { %332 = vst.msk [vmem:[%s553_s3 + $0x8] sm:$0xf] %vm329_vm1, %v371_v53  ;;  %v312_v55 = vmax.f32 %v306_v54, 0.0 }
  0xf9   :  { %v372_v56 = vpack.c.bf16 %v312_v55, %v312_v55 }
  0xfb   :  { %333 = vst.msk [vmem:[%s553_s3 + $0xc] sm:$0xf] %vm329_vm1, %v372_v56 }

// kernel: _lambda_.43
= control target key start
LH: loop header
LB: loop body
LE: loop exit
PB: predicated region body
PF: predicated region fallthrough
CT: control target
= control target key end

     0   :  { %vm52_vm0 = vcmask 261120   ;;  %vm124_vm1 = vcmask 519168   ;;  %s211_s1 = inlined_call_operand.vmem [shape: bf16[32,64], index: 1, kind: input, shape index: {}]   ;;  %s212_s0 = inlined_call_operand.vmem [shape: bf16[32,32], index: 0, kind: input, shape index: {}]   ;;  %s213_s2 = inlined_call_operand.vmem [shape: f32[1,64], index: 2, kind: input, shape index: {}]   ;;  %s214_s3 = inlined_call_operand.vmem [shape: bf16[32,64], index: 3, kind: output, shape index: {}]  }
   0x1   :  { %v160_v0 = vld [vmem:[%s211_s1 + $0x8] sm:$0xff]   ;;  %v161_v1 = vld [vmem:[%s211_s1] sm:$0xff]  }
   0x2   :  { %152 = vmatprep.subr.bf16.mxu0 %v160_v0  ;;  %v162_v2 = vld [vmem:[%s212_s0] sm:$0xff]   ;;  %v163_v3 = vld [vmem:[%s212_s0 + $0x8] sm:$0xff]  }
   0x3   :  { %153 = vmatpush3.bf16.msra.mxu0 %v160_v0  ;;  %156 = vmatprep.mubr.msk.bf16.mxu0 %vm52_vm0, %v162_v2  ;;  %v133_v4 = vld [vmem:[%s213_s2] ss:$0 sm:$0xff] }
   0x4   :  { %154 = vmatprep.subr.bf16.mxu0 %v161_v1 }
   0x7   :  { %155 = vmatpush3.bf16.msra.mxu0 %v161_v1 }
   0xa   :  { %157 = vmatmul.mubr.msk.bf16.vlgmr.msra.gmra.mxu0 %vm52_vm0, %v163_v3 }
  0xca   :  { %v158_v5 = vpop.f32.mrf.mxu0 }
  0xcb   :  { %v102_v6 = vadd.f32 %v158_v5, %v133_v4 }
  0xcc   :  { %v93_v7 = vpop.f32.mrf.mxu0 }
  0xcd   :  { %v146_v8 = vpack.c.bf16 %v102_v6, %v102_v6  ;;  %v94_v9 = vadd.f32 %v133_v4, %v93_v7 }
  0xce   :  { %v159_v10 = vpop.f32.mrf.mxu0 }
  0xcf   :  { %127 = vst.msk [vmem:[%s214_s3 + $0x8] sm:$0xf] %vm124_vm1, %v146_v8  ;;  %v144_v11 = vpack.c.bf16 %v94_v9, %v94_v9  ;;  %v105_v12 = vadd.f32 %v159_v10, %v133_v4 }
  0xd0   :  { %v96_v13 = vpop.f32.mrf.mxu0 }
  0xd1   :  { %125 = vst.msk [vmem:[%s214_s3] sm:$0xf] %vm124_vm1, %v144_v11  ;;  %v147_v14 = vpack.c.bf16 %v105_v12, %v105_v12  ;;  %v97_v15 = vadd.f32 %v133_v4, %v96_v13 }
  0xd3   :  { %128 = vst.msk [vmem:[%s214_s3 + $0xc] sm:$0xf] %vm124_vm1, %v147_v14  ;;  %v145_v16 = vpack.c.bf16 %v97_v15, %v97_v15 }
  0xd5   :  { %126 = vst.msk [vmem:[%s214_s3 + $0x4] sm:$0xf] %vm124_vm1, %v145_v16 }

// kernel: _lambda_.44
= control target key start
LH: loop header
LB: loop body
LE: loop exit
PB: predicated region body
PF: predicated region fallthrough
CT: control target
= control target key end

     0   :  { %vm383_vm0 = vcmask 523264   ;;  %vm561_vm1 = vcmask 519168   ;;  %s944_s1 = inlined_call_operand.vmem [shape: bf16[576,64], index: 1, kind: input, shape index: {}]   ;;  %s945_s0 = inlined_call_operand.vmem [shape: bf16[32,576], index: 0, kind: input, shape index: {}]   ;;  %s946_s2 = inlined_call_operand.vmem [shape: f32[1,64], index: 2, kind: input, shape index: {}]   ;;  %s947_s3 = inlined_call_operand.vmem [shape: bf16[32,64], index: 3, kind: input, shape index: {}]   ;;  %s948_s4 = inlined_call_operand.vmem [shape: bf16[32,64], index: 4, kind: output, shape index: {}]  }
   0x1   :  { %v710_v0 = vld [vmem:[%s944_s1 + $0x78] sm:$0xff]   ;;  %v714_v4 = vld [vmem:[%s944_s1 + $0x70] sm:$0xff]   ;;  %v718_v8 = vld [vmem:[%s944_s1 + $0x68] sm:$0xff]  }
   0x2   :  { %v711_v1 = vld [vmem:[%s944_s1 + $0xf8] sm:$0xff]   ;;  %636 = vmatprep.subr.bf16.mxu0 %v710_v0  ;;  %v715_v5 = vld [vmem:[%s944_s1 + $0xf0] sm:$0xff]   ;;  %v719_v9 = vld [vmem:[%s944_s1 + $0xe8] sm:$0xff]  }
   0x3   :  { %v712_v2 = vld [vmem:[%s944_s1 + $0x38] sm:$0xff]   ;;  %664 = vmatprep.subr.bf16.mxu1 %v711_v1  ;;  %v716_v6 = vld [vmem:[%s944_s1 + $0x30] sm:$0xff]   ;;  %v720_v10 = vld [vmem:[%s944_s1 + $0x28] sm:$0xff]  }
   0x4   :  { %v713_v3 = vld [vmem:[%s944_s1 + $0xb8] sm:$0xff]   ;;  %637 = vmatpush3.bf16.msra.mxu0 %v712_v2  ;;  %v717_v7 = vld [vmem:[%s944_s1 + $0xb0] sm:$0xff]   ;;  %v721_v11 = vld [vmem:[%s944_s1 + $0xa8] sm:$0xff]  }
   0x5   :  { %665 = vmatpush3.bf16.msra.mxu1 %v713_v3  ;;  %638 = vmatprep.subr.bf16.mxu0 %v714_v4  ;;  %v722_v12 = vld [vmem:[%s944_s1 + $0x60] sm:$0xff]   ;;  %v726_v16 = vld [vmem:[%s944_s1 + $0x58] sm:$0xff]   ;;  %v730_v20 = vld [vmem:[%s944_s1 + $0x50] sm:$0xff]  }
   0x6   :  { %666 = vmatprep.subr.bf16.mxu1 %v715_v5  ;;  %v723_v13 = vld [vmem:[%s944_s1 + $0xe0] sm:$0xff]   ;;  %v727_v17 = vld [vmem:[%s944_s1 + $0xd8] sm:$0xff]   ;;  %v731_v21 = vld [vmem:[%s944_s1 + $0xd0] sm:$0xff]  }
   0x7   :  { %v724_v14 = vld [vmem:[%s944_s1 + $0x20] sm:$0xff]   ;;  %v728_v18 = vld [vmem:[%s944_s1 + $0x18] sm:$0xff]   ;;  %v732_v22 = vld [vmem:[%s944_s1 + $0x10] sm:$0xff]  }
   0x8   :  { %639 = vmatpush3.bf16.msra.mxu0 %v716_v6  ;;  %v725_v15 = vld [vmem:[%s944_s1 + $0xa0] sm:$0xff]   ;;  %v729_v19 = vld [vmem:[%s944_s1 + $0x98] sm:$0xff]   ;;  %v733_v23 = vld [vmem:[%s944_s1 + $0x90] sm:$0xff]  }
   0x9   :  { %667 = vmatpush3.bf16.msra.mxu1 %v717_v7  ;;  %640 = vmatprep.subr.bf16.mxu0 %v718_v8  ;;  %v734_v24 = vld [vmem:[%s944_s1 + $0x48] sm:$0xff]   ;;  %v738_v28 = vld [vmem:[%s944_s1 + $0x40] sm:$0xff]   ;;  %v748_v36 = vld [vmem:[%s944_s1 + $0x118] sm:$0xff]  }
   0xa   :  { %668 = vmatprep.subr.bf16.mxu1 %v719_v9  ;;  %v735_v25 = vld [vmem:[%s944_s1 + $0xc8] sm:$0xff]   ;;  %v739_v29 = vld [vmem:[%s944_s1 + $0xc0] sm:$0xff]   ;;  %v749_v37 = vld [vmem:[%s944_s1 + $0x110] sm:$0xff]  }
   0xb   :  { %v736_v26 = vld [vmem:[%s944_s1 + $0x8] sm:$0xff]   ;;  %v740_v30 = vld [vmem:[%s944_s1] sm:$0xff]  }
   0xc   :  { %641 = vmatpush3.bf16.msra.mxu0 %v720_v10  ;;  %v737_v27 = vld [vmem:[%s944_s1 + $0x88] sm:$0xff]   ;;  %v741_v31 = vld [vmem:[%s944_s1 + $0x80] sm:$0xff]  }
   0xd   :  { %669 = vmatpush3.bf16.msra.mxu1 %v721_v11  ;;  %642 = vmatprep.subr.bf16.mxu0 %v722_v12  ;;  %v742_v32 = vld [vmem:[%s945_s0] ss:$20 sps:$4 sm:$0xff]   ;;  %v744_v33 = vld [vmem:[%s945_s0 + $0x4] ss:$20 sps:$4 sm:$0xff]   ;;  %v745_v34 = vld [vmem:[%s945_s0 + $0x8] ss:$20 sps:$4 sm:$0xff]  }
   0xe   :  { %670 = vmatprep.subr.bf16.mxu1 %v723_v13  ;;  %v747_v35 = vld [vmem:[%s945_s0 + $0xc] ss:$20 sps:$4 sm:$0xff]   ;;  %422 = vmatprep.mubr.bf16.mxu0 %v744_v33  ;;  %v752_v39 = vld [vmem:[%s945_s0 + $0x34] ss:$20 sps:$4 sm:$0xff]   ;;  %v755_v42 = vld [vmem:[%s945_s0 + $0x30] ss:$20 sps:$4 sm:$0xff]  }
   0xf   :  { %471 = vmatprep.mubr.bf16.mxu1 %v747_v35  ;;  %v750_v38 = vld [vmem:[%s945_s0 + $0x2c] ss:$20 sps:$4 sm:$0xff]   ;;  %v754_v40 = vld [vmem:[%s945_s0 + $0x28] ss:$20 sps:$4 sm:$0xff]   ;;  %v758_v43 = vld [vmem:[%s945_s0 + $0x10] ss:$20 sps:$4 sm:$0xff]  }
  0x10   :  { %643 = vmatpush3.bf16.msra.mxu0 %v724_v14  ;;  %v756_v41 = vld [vmem:[%s944_s1 + $0x108] sm:$0xff]   ;;  %v757_v44 = vld [vmem:[%s944_s1 + $0x100] sm:$0xff]  }
  0x11   :  { %671 = vmatpush3.bf16.msra.mxu1 %v725_v15  ;;  %644 = vmatprep.subr.bf16.mxu0 %v726_v16  ;;  %v759_v45 = vld [vmem:[%s945_s0 + $0x38] ss:$20 sps:$4 sm:$0xff]   ;;  %v570_v58 = vld [vmem:[%s946_s2] ss:$0 sm:$0xff] }
  0x12   :  { %672 = vmatprep.subr.bf16.mxu1 %v727_v17  ;;  %v635_v1 = vld [vmem:[%s947_s3 + $0x8] sm:$0xff]   ;;  %v628_v9 = vld [vmem:[%s947_s3] sm:$0xff]  }
  0x13   :  { %v633_v10 = vunpack.c.l.bf16 %v635_v1  ;;  %v629_v16 = vunpack.c.l.bf16 %v628_v9 }
  0x14   :  { %645 = vmatpush3.bf16.msra.mxu0 %v728_v18 }
  0x15   :  { %673 = vmatpush3.bf16.msra.mxu1 %v729_v19  ;;  %646 = vmatprep.subr.bf16.mxu0 %v730_v20 }
  0x16   :  { %674 = vmatprep.subr.bf16.mxu1 %v731_v21 }
  0x18   :  { %647 = vmatpush3.bf16.msra.mxu0 %v732_v22 }
  0x19   :  { %675 = vmatpush3.bf16.msra.mxu1 %v733_v23  ;;  %648 = vmatprep.subr.bf16.mxu0 %v734_v24  ;;  %v634_v23 = vunpack.c.h.bf16 %v635_v1 }
  0x1a   :  { %676 = vmatprep.subr.bf16.mxu1 %v735_v25  ;;  %v630_v25 = vunpack.c.h.bf16 %v628_v9 }
  0x1c   :  { %649 = vmatpush3.bf16.msra.mxu0 %v736_v26 }
  0x1d   :  { %677 = vmatpush3.bf16.msra.mxu1 %v737_v27  ;;  %650 = vmatprep.subr.bf16.mxu0 %v738_v28 }
  0x1e   :  { %678 = vmatprep.subr.bf16.mxu1 %v739_v29 }
  0x20   :  { %651 = vmatpush3.bf16.msra.mxu0 %v740_v30 }
  0x21   :  { %679 = vmatpush3.bf16.msra.mxu1 %v741_v31  ;;  %698 = vmatprep.subr.bf16.mxu0 %v748_v36 }
  0x23   :  { %423 = vmatmul.mubr.bf16.vlgmr.msra.gmra.mxu0 %v742_v32 }
  0x24   :  { %472 = vmatmul.mubr.bf16.vlgmr.msra.gmra.mxu1 %v745_v34  ;;  %699 = vmatpush3.bf16.msra.mxu0 %v748_v36 }
  0x25   :  { %700 = vmatprep.subr.bf16.mxu0 %v749_v37  ;;  %430 = vmatprep.mubr.bf16.mxu0 %v750_v38 }
  0x26   :  { %479 = vmatprep.mubr.bf16.mxu1 %v752_v39 }
  0x28   :  { %701 = vmatpush3.bf16.msra.mxu0 %v749_v37 }
  0x29   :  { %702 = vmatprep.subr.bf16.mxu0 %v756_v41 }
  0x2b   :  { %431 = vmatmul.mubr.bf16.gmra.mxu0 %v754_v40 }
  0x2c   :  { %480 = vmatmul.mubr.bf16.gmra.mxu1 %v755_v42  ;;  %706 = vmatprep.mubr.msk.bf16.mxu0 %vm383_vm0, %v758_v43 }
  0x2d   :  { %703 = vmatpush3.bf16.msra.mxu0 %v756_v41 }
  0x2e   :  { %704 = vmatprep.subr.bf16.mxu0 %v757_v44 }
  0x31   :  { %705 = vmatpush3.bf16.msra.mxu0 %v757_v44 }
  0x34   :  { %707 = vmatmul.mubr.msk.bf16.vlgmr.msra.gmra.mxu0 %vm383_vm0, %v759_v45 }
  0xe3   :  { %v652_v46 = vpop.f32.mrf.mxu0 }
  0xe4   :  { %v680_v47 = vpop.f32.mrf.mxu1 }
  0xe5   :  { %v653_v48 = vpop.f32.mrf.mxu0 }
  0xe6   :  { %v681_v49 = vpop.f32.mrf.mxu1  ;;  %v654_v56 = vadd.f32 %v653_v48, %v652_v46 }
  0xe7   :  { %v655_v50 = vpop.f32.mrf.mxu0  ;;  %v682_v3 = vadd.f32 %v681_v49, %v680_v47 }
  0xe8   :  { %v683_v51 = vpop.f32.mrf.mxu1  ;;  %v425_v2 = vadd.f32 %v654_v56, %v570_v58 }
  0xe9   :  { %v656_v52 = vpop.f32.mrf.mxu0 }
  0xea   :  { %v684_v53 = vpop.f32.mrf.mxu1  ;;  %v657_v4 = vadd.f32 %v656_v52, %v655_v50  ;;  %v474_v17 = vadd.f32 %v682_v3, %v425_v2 }
  0xeb   :  { %v658_v54 = vpop.f32.mrf.mxu0  ;;  %v685_v20 = vadd.f32 %v684_v53, %v683_v51 }
  0xec   :  { %v686_v55 = vpop.f32.mrf.mxu1  ;;  %v428_v14 = vadd.f32 %v657_v4, %v570_v58 }
  0xed   :  { %v659_v57 = vpop.f32.mrf.mxu0 }
  0xee   :  { %v660_v59 = vadd.f32 %v659_v57, %v658_v54  ;;  %v687_v60 = vpop.f32.mrf.mxu1  ;;  %v477_v29 = vadd.f32 %v685_v20, %v428_v14 }
  0xef   :  { %v688_v61 = vadd.f32 %v687_v60, %v686_v55  ;;  %v661_v62 = vpop.f32.mrf.mxu0 }
  0xf0   :  { %v433_v63 = vadd.f32 %v660_v59, %v570_v58  ;;  %v689_v0 = vpop.f32.mrf.mxu1 }
  0xf1   :  { %v662_v5 = vpop.f32.mrf.mxu0 }
  0xf2   :  { %v663_v6 = vadd.f32 %v662_v5, %v661_v62  ;;  %v690_v7 = vpop.f32.mrf.mxu1  ;;  %v482_v8 = vadd.f32 %v688_v61, %v433_v63 }
  0xf3   :  { %v691_v12 = vadd.f32 %v690_v7, %v689_v0 }
  0xf4   :  { %v436_v11 = vadd.f32 %v663_v6, %v570_v58  ;;  %v708_v13 = vpop.f32.mrf.mxu0 }
  0xf5   :  { %v531_v15 = vadd.f32 %v708_v13, %v482_v8 }
  0xf6   :  { %v522_v18 = vpop.f32.mrf.mxu0  ;;  %v485_v19 = vadd.f32 %v691_v12, %v436_v11 }
  0xf7   :  { %v539_v21 = vadd.f32 %v633_v10, %v531_v15  ;;  %v523_v22 = vadd.f32 %v522_v18, %v474_v17 }
  0xf8   :  { %v709_v24 = vpop.f32.mrf.mxu0 }
  0xf9   :  { %v543_v26 = vmax.f32 %v539_v21, 0.0  ;;  %v537_v27 = vadd.f32 %v629_v16, %v523_v22  ;;  %v534_v28 = vadd.f32 %v709_v24, %v485_v19 }
  0xfa   :  { %v525_v30 = vpop.f32.mrf.mxu0 }
  0xfb   :  { %v625_v31 = vpack.c.bf16 %v543_v26, %v543_v26  ;;  %v541_v32 = vmax.f32 %v537_v27, 0.0  ;;  %v540_v33 = vadd.f32 %v634_v23, %v534_v28  ;;  %v526_v34 = vadd.f32 %v525_v30, %v477_v29 }
  0xfd   :  { %564 = vst.msk [vmem:[%s948_s4 + $0x8] sm:$0xf] %vm561_vm1, %v625_v31  ;;  %v623_v35 = vpack.c.bf16 %v541_v32, %v541_v32  ;;  %v544_v36 = vmax.f32 %v540_v33, 0.0  ;;  %v538_v37 = vadd.f32 %v630_v25, %v526_v34 }
  0xff   :  { %562 = vst.msk [vmem:[%s948_s4] sm:$0xf] %vm561_vm1, %v623_v35  ;;  %v626_v38 = vpack.c.bf16 %v544_v36, %v544_v36  ;;  %v542_v39 = vmax.f32 %v538_v37, 0.0 }
 0x101   :  { %565 = vst.msk [vmem:[%s948_s4 + $0xc] sm:$0xf] %vm561_vm1, %v626_v38  ;;  %v624_v40 = vpack.c.bf16 %v542_v39, %v542_v39 }
 0x103   :  { %563 = vst.msk [vmem:[%s948_s4 + $0x4] sm:$0xf] %vm561_vm1, %v624_v40 }

// kernel: _lambda_.45
= control target key start
LH: loop header
LB: loop body
LE: loop exit
PB: predicated region body
PF: predicated region fallthrough
CT: control target
= control target key end

     0   :  { %vm372_vm0 = vcmask 523264   ;;  %vm546_vm1 = vcmask 519168   ;;  %s913_s1 = inlined_call_operand.vmem [shape: bf16[576,64], index: 1, kind: input, shape index: {}]   ;;  %s914_s0 = inlined_call_operand.vmem [shape: bf16[32,576], index: 0, kind: input, shape index: {}]   ;;  %s915_s2 = inlined_call_operand.vmem [shape: f32[1,64], index: 2, kind: input, shape index: {}]   ;;  %s916_s3 = inlined_call_operand.vmem [shape: bf16[32,64], index: 3, kind: output, shape index: {}]  }
   0x1   :  { %v686_v0 = vld [vmem:[%s913_s1 + $0x78] sm:$0xff]   ;;  %v690_v4 = vld [vmem:[%s913_s1 + $0x70] sm:$0xff]   ;;  %v694_v8 = vld [vmem:[%s913_s1 + $0x68] sm:$0xff]  }
   0x2   :  { %v687_v1 = vld [vmem:[%s913_s1 + $0xf8] sm:$0xff]   ;;  %612 = vmatprep.subr.bf16.mxu0 %v686_v0  ;;  %v691_v5 = vld [vmem:[%s913_s1 + $0xf0] sm:$0xff]   ;;  %v695_v9 = vld [vmem:[%s913_s1 + $0xe8] sm:$0xff]  }
   0x3   :  { %v688_v2 = vld [vmem:[%s913_s1 + $0x38] sm:$0xff]   ;;  %640 = vmatprep.subr.bf16.mxu1 %v687_v1  ;;  %v692_v6 = vld [vmem:[%s913_s1 + $0x30] sm:$0xff]   ;;  %v696_v10 = vld [vmem:[%s913_s1 + $0x28] sm:$0xff]  }
   0x4   :  { %v689_v3 = vld [vmem:[%s913_s1 + $0xb8] sm:$0xff]   ;;  %613 = vmatpush3.bf16.msra.mxu0 %v688_v2  ;;  %v693_v7 = vld [vmem:[%s913_s1 + $0xb0] sm:$0xff]   ;;  %v697_v11 = vld [vmem:[%s913_s1 + $0xa8] sm:$0xff]  }
   0x5   :  { %641 = vmatpush3.bf16.msra.mxu1 %v689_v3  ;;  %614 = vmatprep.subr.bf16.mxu0 %v690_v4  ;;  %v698_v12 = vld [vmem:[%s913_s1 + $0x60] sm:$0xff]   ;;  %v702_v16 = vld [vmem:[%s913_s1 + $0x58] sm:$0xff]   ;;  %v706_v20 = vld [vmem:[%s913_s1 + $0x50] sm:$0xff]  }
   0x6   :  { %642 = vmatprep.subr.bf16.mxu1 %v691_v5  ;;  %v699_v13 = vld [vmem:[%s913_s1 + $0xe0] sm:$0xff]   ;;  %v703_v17 = vld [vmem:[%s913_s1 + $0xd8] sm:$0xff]   ;;  %v707_v21 = vld [vmem:[%s913_s1 + $0xd0] sm:$0xff]  }
   0x7   :  { %v700_v14 = vld [vmem:[%s913_s1 + $0x20] sm:$0xff]   ;;  %v704_v18 = vld [vmem:[%s913_s1 + $0x18] sm:$0xff]   ;;  %v708_v22 = vld [vmem:[%s913_s1 + $0x10] sm:$0xff]  }
   0x8   :  { %615 = vmatpush3.bf16.msra.mxu0 %v692_v6  ;;  %v701_v15 = vld [vmem:[%s913_s1 + $0xa0] sm:$0xff]   ;;  %v705_v19 = vld [vmem:[%s913_s1 + $0x98] sm:$0xff]   ;;  %v709_v23 = vld [vmem:[%s913_s1 + $0x90] sm:$0xff]  }
   0x9   :  { %643 = vmatpush3.bf16.msra.mxu1 %v693_v7  ;;  %616 = vmatprep.subr.bf16.mxu0 %v694_v8  ;;  %v710_v24 = vld [vmem:[%s913_s1 + $0x48] sm:$0xff]   ;;  %v714_v28 = vld [vmem:[%s913_s1 + $0x40] sm:$0xff]   ;;  %v724_v36 = vld [vmem:[%s913_s1 + $0x118] sm:$0xff]  }
   0xa   :  { %644 = vmatprep.subr.bf16.mxu1 %v695_v9  ;;  %v711_v25 = vld [vmem:[%s913_s1 + $0xc8] sm:$0xff]   ;;  %v715_v29 = vld [vmem:[%s913_s1 + $0xc0] sm:$0xff]   ;;  %v725_v37 = vld [vmem:[%s913_s1 + $0x110] sm:$0xff]  }
   0xb   :  { %v712_v26 = vld [vmem:[%s913_s1 + $0x8] sm:$0xff]   ;;  %v716_v30 = vld [vmem:[%s913_s1] sm:$0xff]  }
   0xc   :  { %617 = vmatpush3.bf16.msra.mxu0 %v696_v10  ;;  %v713_v27 = vld [vmem:[%s913_s1 + $0x88] sm:$0xff]   ;;  %v717_v31 = vld [vmem:[%s913_s1 + $0x80] sm:$0xff]  }
   0xd   :  { %645 = vmatpush3.bf16.msra.mxu1 %v697_v11  ;;  %618 = vmatprep.subr.bf16.mxu0 %v698_v12  ;;  %v718_v32 = vld [vmem:[%s914_s0] ss:$20 sps:$4 sm:$0xff]   ;;  %v720_v33 = vld [vmem:[%s914_s0 + $0x4] ss:$20 sps:$4 sm:$0xff]   ;;  %v721_v34 = vld [vmem:[%s914_s0 + $0x8] ss:$20 sps:$4 sm:$0xff]  }
   0xe   :  { %646 = vmatprep.subr.bf16.mxu1 %v699_v13  ;;  %v723_v35 = vld [vmem:[%s914_s0 + $0xc] ss:$20 sps:$4 sm:$0xff]   ;;  %411 = vmatprep.mubr.bf16.mxu0 %v720_v33  ;;  %v728_v39 = vld [vmem:[%s914_s0 + $0x34] ss:$20 sps:$4 sm:$0xff]   ;;  %v731_v42 = vld [vmem:[%s914_s0 + $0x30] ss:$20 sps:$4 sm:$0xff]  }
   0xf   :  { %460 = vmatprep.mubr.bf16.mxu1 %v723_v35  ;;  %v726_v38 = vld [vmem:[%s914_s0 + $0x2c] ss:$20 sps:$4 sm:$0xff]   ;;  %v730_v40 = vld [vmem:[%s914_s0 + $0x28] ss:$20 sps:$4 sm:$0xff]   ;;  %v734_v43 = vld [vmem:[%s914_s0 + $0x10] ss:$20 sps:$4 sm:$0xff]  }
  0x10   :  { %619 = vmatpush3.bf16.msra.mxu0 %v700_v14  ;;  %v732_v41 = vld [vmem:[%s913_s1 + $0x108] sm:$0xff]   ;;  %v733_v44 = vld [vmem:[%s913_s1 + $0x100] sm:$0xff]  }
  0x11   :  { %647 = vmatpush3.bf16.msra.mxu1 %v701_v15  ;;  %620 = vmatprep.subr.bf16.mxu0 %v702_v16  ;;  %v735_v45 = vld [vmem:[%s914_s0 + $0x38] ss:$20 sps:$4 sm:$0xff]   ;;  %v555_v58 = vld [vmem:[%s915_s2] ss:$0 sm:$0xff] }
  0x12   :  { %648 = vmatprep.subr.bf16.mxu1 %v703_v17 }
  0x14   :  { %621 = vmatpush3.bf16.msra.mxu0 %v704_v18 }
  0x15   :  { %649 = vmatpush3.bf16.msra.mxu1 %v705_v19  ;;  %622 = vmatprep.subr.bf16.mxu0 %v706_v20 }
  0x16   :  { %650 = vmatprep.subr.bf16.mxu1 %v707_v21 }
  0x18   :  { %623 = vmatpush3.bf16.msra.mxu0 %v708_v22 }
  0x19   :  { %651 = vmatpush3.bf16.msra.mxu1 %v709_v23  ;;  %624 = vmatprep.subr.bf16.mxu0 %v710_v24 }
  0x1a   :  { %652 = vmatprep.subr.bf16.mxu1 %v711_v25 }
  0x1c   :  { %625 = vmatpush3.bf16.msra.mxu0 %v712_v26 }
  0x1d   :  { %653 = vmatpush3.bf16.msra.mxu1 %v713_v27  ;;  %626 = vmatprep.subr.bf16.mxu0 %v714_v28 }
  0x1e   :  { %654 = vmatprep.subr.bf16.mxu1 %v715_v29 }
  0x20   :  { %627 = vmatpush3.bf16.msra.mxu0 %v716_v30 }
  0x21   :  { %655 = vmatpush3.bf16.msra.mxu1 %v717_v31  ;;  %674 = vmatprep.subr.bf16.mxu0 %v724_v36 }
  0x23   :  { %412 = vmatmul.mubr.bf16.vlgmr.msra.gmra.mxu0 %v718_v32 }
  0x24   :  { %461 = vmatmul.mubr.bf16.vlgmr.msra.gmra.mxu1 %v721_v34  ;;  %675 = vmatpush3.bf16.msra.mxu0 %v724_v36 }
  0x25   :  { %676 = vmatprep.subr.bf16.mxu0 %v725_v37  ;;  %419 = vmatprep.mubr.bf16.mxu0 %v726_v38 }
  0x26   :  { %468 = vmatprep.mubr.bf16.mxu1 %v728_v39 }
  0x28   :  { %677 = vmatpush3.bf16.msra.mxu0 %v725_v37 }
  0x29   :  { %678 = vmatprep.subr.bf16.mxu0 %v732_v41 }
  0x2b   :  { %420 = vmatmul.mubr.bf16.gmra.mxu0 %v730_v40 }
  0x2c   :  { %469 = vmatmul.mubr.bf16.gmra.mxu1 %v731_v42  ;;  %682 = vmatprep.mubr.msk.bf16.mxu0 %vm372_vm0, %v734_v43 }
  0x2d   :  { %679 = vmatpush3.bf16.msra.mxu0 %v732_v41 }
  0x2e   :  { %680 = vmatprep.subr.bf16.mxu0 %v733_v44 }
  0x31   :  { %681 = vmatpush3.bf16.msra.mxu0 %v733_v44 }
  0x34   :  { %683 = vmatmul.mubr.msk.bf16.vlgmr.msra.gmra.mxu0 %vm372_vm0, %v735_v45 }
  0xe3   :  { %v628_v46 = vpop.f32.mrf.mxu0 }
  0xe4   :  { %v656_v47 = vpop.f32.mrf.mxu1 }
  0xe5   :  { %v629_v48 = vpop.f32.mrf.mxu0 }
  0xe6   :  { %v657_v49 = vpop.f32.mrf.mxu1  ;;  %v630_v56 = vadd.f32 %v629_v48, %v628_v46 }
  0xe7   :  { %v631_v50 = vpop.f32.mrf.mxu0  ;;  %v658_v2 = vadd.f32 %v657_v49, %v656_v47 }
  0xe8   :  { %v659_v51 = vpop.f32.mrf.mxu1  ;;  %v414_v1 = vadd.f32 %v630_v56, %v555_v58 }
  0xe9   :  { %v632_v52 = vpop.f32.mrf.mxu0 }
  0xea   :  { %v660_v53 = vpop.f32.mrf.mxu1  ;;  %v633_v3 = vadd.f32 %v632_v52, %v631_v50  ;;  %v463_v13 = vadd.f32 %v658_v2, %v414_v1 }
  0xeb   :  { %v634_v54 = vpop.f32.mrf.mxu0  ;;  %v661_v16 = vadd.f32 %v660_v53, %v659_v51 }
  0xec   :  { %v662_v55 = vpop.f32.mrf.mxu1  ;;  %v417_v11 = vadd.f32 %v633_v3, %v555_v58 }
  0xed   :  { %v635_v57 = vpop.f32.mrf.mxu0 }
  0xee   :  { %v636_v59 = vadd.f32 %v635_v57, %v634_v54  ;;  %v663_v60 = vpop.f32.mrf.mxu1  ;;  %v466_v23 = vadd.f32 %v661_v16, %v417_v11 }
  0xef   :  { %v664_v61 = vadd.f32 %v663_v60, %v662_v55  ;;  %v637_v62 = vpop.f32.mrf.mxu0 }
  0xf0   :  { %v422_v63 = vadd.f32 %v636_v59, %v555_v58  ;;  %v665_v0 = vpop.f32.mrf.mxu1 }
  0xf1   :  { %v638_v4 = vpop.f32.mrf.mxu0 }
  0xf2   :  { %v639_v5 = vadd.f32 %v638_v4, %v637_v62  ;;  %v666_v6 = vpop.f32.mrf.mxu1  ;;  %v471_v7 = vadd.f32 %v664_v61, %v422_v63 }
  0xf3   :  { %v667_v9 = vadd.f32 %v666_v6, %v665_v0 }
  0xf4   :  { %v425_v8 = vadd.f32 %v639_v5, %v555_v58  ;;  %v684_v10 = vpop.f32.mrf.mxu0 }
  0xf5   :  { %v520_v12 = vadd.f32 %v684_v10, %v471_v7 }
  0xf6   :  { %v511_v14 = vpop.f32.mrf.mxu0  ;;  %v474_v15 = vadd.f32 %v667_v9, %v425_v8 }
  0xf7   :  { %v528_v17 = vmax.f32 %v520_v12, 0.0  ;;  %v512_v18 = vadd.f32 %v511_v14, %v463_v13 }
  0xf8   :  { %v685_v19 = vpop.f32.mrf.mxu0 }
  0xf9   :  { %v610_v20 = vpack.c.bf16 %v528_v17, %v528_v17  ;;  %v526_v21 = vmax.f32 %v512_v18, 0.0  ;;  %v523_v22 = vadd.f32 %v685_v19, %v474_v15 }
  0xfa   :  { %v514_v24 = vpop.f32.mrf.mxu0 }
  0xfb   :  { %549 = vst.msk [vmem:[%s916_s3 + $0x8] sm:$0xf] %vm546_vm1, %v610_v20  ;;  %v608_v25 = vpack.c.bf16 %v526_v21, %v526_v21  ;;  %v529_v26 = vmax.f32 %v523_v22, 0.0  ;;  %v515_v27 = vadd.f32 %v514_v24, %v466_v23 }
  0xfd   :  { %547 = vst.msk [vmem:[%s916_s3] sm:$0xf] %vm546_vm1, %v608_v25  ;;  %v611_v28 = vpack.c.bf16 %v529_v26, %v529_v26  ;;  %v527_v29 = vmax.f32 %v515_v27, 0.0 }
  0xff   :  { %550 = vst.msk [vmem:[%s916_s3 + $0xc] sm:$0xf] %vm546_vm1, %v611_v28  ;;  %v609_v30 = vpack.c.bf16 %v527_v29, %v527_v29 }
 0x101   :  { %548 = vst.msk [vmem:[%s916_s3 + $0x4] sm:$0xf] %vm546_vm1, %v609_v30 }

// kernel: _lambda_.47
= control target key start
LH: loop header
LB: loop body
LE: loop exit
PB: predicated region body
PF: predicated region fallthrough
CT: control target
= control target key end

     0   :  { %v608_v35 = vmov 0.0   ;;  %vm609_vm0 = vmmov 0   ;;  %vm330_vm1 = vcmask 523264   ;;  %s753_s1 = inlined_call_operand.vmem [shape: bf16[576,128], index: 1, kind: input, shape index: {}]   ;;  %s754_s0 = inlined_call_operand.vmem [shape: bf16[8,576], index: 0, kind: input, shape index: {}]   ;;  %s755_s2 = inlined_call_operand.vmem [shape: f32[1,128], index: 2, kind: input, shape index: {}]   ;;  %s756_s3 = inlined_call_operand.vmem [shape: bf16[8,128], index: 3, kind: output, shape index: {}]  }
   0x1   :  { %v567_v0 = vld [vmem:[%s753_s1 + $0x78] sm:$0xff]   ;;  %v571_v4 = vld [vmem:[%s753_s1 + $0x70] sm:$0xff]   ;;  %v575_v8 = vld [vmem:[%s753_s1 + $0x68] sm:$0xff]  }
   0x2   :  { %v568_v1 = vld [vmem:[%s753_s1 + $0x38] sm:$0xff]   ;;  %504 = vmatprep.subr.bf16.mxu0 %v567_v0  ;;  %v572_v5 = vld [vmem:[%s753_s1 + $0x30] sm:$0xff]   ;;  %v576_v9 = vld [vmem:[%s753_s1 + $0x28] sm:$0xff]  }
   0x3   :  { %v569_v2 = vld [vmem:[%s753_s1 + $0xf8] sm:$0xff]   ;;  %505 = vmatpush3.bf16.msra.mxu0 %v568_v1  ;;  %v573_v6 = vld [vmem:[%s753_s1 + $0xf0] sm:$0xff]   ;;  %v577_v10 = vld [vmem:[%s753_s1 + $0xe8] sm:$0xff]  }
   0x4   :  { %v570_v3 = vld [vmem:[%s753_s1 + $0xb8] sm:$0xff]   ;;  %526 = vmatprep.subr.bf16.mxu1 %v569_v2  ;;  %506 = vmatprep.subr.bf16.mxu0 %v571_v4  ;;  %v574_v7 = vld [vmem:[%s753_s1 + $0xb0] sm:$0xff]   ;;  %v578_v11 = vld [vmem:[%s753_s1 + $0xa8] sm:$0xff]  }
   0x5   :  { %527 = vmatpush3.bf16.msra.mxu1 %v570_v3  ;;  %v579_v12 = vld [vmem:[%s753_s1 + $0x60] sm:$0xff]   ;;  %v583_v16 = vld [vmem:[%s753_s1 + $0x58] sm:$0xff]   ;;  %v587_v20 = vld [vmem:[%s753_s1 + $0x50] sm:$0xff]  }
   0x6   :  { %528 = vmatprep.subr.bf16.mxu1 %v573_v6  ;;  %v580_v13 = vld [vmem:[%s753_s1 + $0x20] sm:$0xff]   ;;  %v584_v17 = vld [vmem:[%s753_s1 + $0x18] sm:$0xff]   ;;  %v588_v21 = vld [vmem:[%s753_s1 + $0x10] sm:$0xff]  }
   0x7   :  { %507 = vmatpush3.bf16.msra.mxu0 %v572_v5  ;;  %v581_v14 = vld [vmem:[%s753_s1 + $0xe0] sm:$0xff]   ;;  %v585_v18 = vld [vmem:[%s753_s1 + $0xd8] sm:$0xff]   ;;  %v589_v22 = vld [vmem:[%s753_s1 + $0xd0] sm:$0xff]  }
   0x8   :  { %508 = vmatprep.subr.bf16.mxu0 %v575_v8  ;;  %v582_v15 = vld [vmem:[%s753_s1 + $0xa0] sm:$0xff]   ;;  %v586_v19 = vld [vmem:[%s753_s1 + $0x98] sm:$0xff]   ;;  %v590_v23 = vld [vmem:[%s753_s1 + $0x90] sm:$0xff]  }
   0x9   :  { %529 = vmatpush3.bf16.msra.mxu1 %v574_v7  ;;  %v591_v24 = vld [vmem:[%s753_s1 + $0x48] sm:$0xff]   ;;  %v595_v28 = vld [vmem:[%s753_s1 + $0x40] sm:$0xff]   ;;  %v604_v39 = vld [vmem:[%s753_s1 + $0x118] sm:$0xff]  }
   0xa   :  { %530 = vmatprep.subr.bf16.mxu1 %v577_v10  ;;  %v592_v25 = vld [vmem:[%s753_s1 + $0x8] sm:$0xff]   ;;  %v596_v29 = vld [vmem:[%s753_s1] sm:$0xff]   ;;  %v605_v40 = vld [vmem:[%s753_s1 + $0x110] sm:$0xff]  }
   0xb   :  { %509 = vmatpush3.bf16.msra.mxu0 %v576_v9  ;;  %v593_v26 = vld [vmem:[%s753_s1 + $0xc8] sm:$0xff]   ;;  %v597_v30 = vld [vmem:[%s753_s1 + $0xc0] sm:$0xff]   ;;  %v600_v43 = vld [vmem:[%s754_s0 + $0x10] ss:$0 sps:$4 sm:$0xff]  }
   0xc   :  { %510 = vmatprep.subr.bf16.mxu0 %v579_v12  ;;  %v594_v27 = vld [vmem:[%s753_s1 + $0x88] sm:$0xff]   ;;  %v15_v31 = vld [vmem:[%s754_s0] sm:$0xff] }
   0xd   :  { %531 = vmatpush3.bf16.msra.mxu1 %v578_v11  ;;  %v462_v32 = vcombine.low %v15_v31, %v15_v31  ;;  %v463_v33 = vcombine.high %v15_v31, %v15_v31  ;;  %v601_v34 = vld [vmem:[%s753_s1 + $0x80] sm:$0xff]   ;;  %v16_v36 = vld [vmem:[%s754_s0 + $0x8] sm:$0xff] }
   0xe   :  { %532 = vmatprep.subr.bf16.mxu1 %v581_v14  ;;  %v464_v37 = vcombine.low %v16_v36, %v16_v36  ;;  %v465_v38 = vcombine.high %v16_v36, %v16_v36  ;;  %v606_v41 = vld [vmem:[%s753_s1 + $0x108] sm:$0xff]   ;;  %v607_v42 = vld [vmem:[%s753_s1 + $0x100] sm:$0xff]  }
   0xf   :  { %511 = vmatpush3.bf16.msra.mxu0 %v580_v13  ;;  %366 = vmatprep.mubr.bf16.mxu0 %v463_v33  ;;  %v461_v52 = vld [vmem:[%s755_s2] ss:$0 sm:$0xff] }
  0x10   :  { %512 = vmatprep.subr.bf16.mxu0 %v583_v16  ;;  %406 = vmatprep.mubr.bf16.mxu1 %v465_v38 }
  0x11   :  { %533 = vmatpush3.bf16.msra.mxu1 %v582_v15 }
  0x12   :  { %534 = vmatprep.subr.bf16.mxu1 %v585_v18 }
  0x13   :  { %513 = vmatpush3.bf16.msra.mxu0 %v584_v17 }
  0x14   :  { %514 = vmatprep.subr.bf16.mxu0 %v587_v20 }
  0x15   :  { %535 = vmatpush3.bf16.msra.mxu1 %v586_v19 }
  0x16   :  { %536 = vmatprep.subr.bf16.mxu1 %v589_v22 }
  0x17   :  { %515 = vmatpush3.bf16.msra.mxu0 %v588_v21 }
  0x18   :  { %516 = vmatprep.subr.bf16.mxu0 %v591_v24 }
  0x19   :  { %537 = vmatpush3.bf16.msra.mxu1 %v590_v23 }
  0x1a   :  { %538 = vmatprep.subr.bf16.mxu1 %v593_v26 }
  0x1b   :  { %517 = vmatpush3.bf16.msra.mxu0 %v592_v25 }
  0x1c   :  { %518 = vmatprep.subr.bf16.mxu0 %v595_v28 }
  0x1d   :  { %539 = vmatpush3.bf16.msra.mxu1 %v594_v27 }
  0x1e   :  { %540 = vmatprep.subr.bf16.mxu1 %v597_v30 }
  0x1f   :  { %519 = vmatpush3.bf16.msra.mxu0 %v596_v29 }
  0x20   :  { %553 = vmatprep.subr.bf16.mxu0 %v608_v35 }
  0x21   :  { %541 = vmatpush3.bf16.msra.mxu1 %v601_v34 }
  0x22   :  { %367 = vmatmul.mubr.bf16.vlgmr.msra.gmra.mxu0 %v462_v32 }
  0x23   :  { %554 = vmatpush3.bf16.msra.mxu0 %v604_v39  ;;  %561 = vmatprep.mubr.msk.bf16.mxu0 %vm609_vm0, %v608_v35 }
  0x24   :  { %407 = vmatmul.mubr.bf16.vlgmr.msra.gmra.mxu1 %v464_v37  ;;  %555 = vmatprep.subr.bf16.mxu0 %v608_v35 }
  0x27   :  { %556 = vmatpush3.bf16.msra.mxu0 %v605_v40 }
  0x28   :  { %557 = vmatprep.subr.bf16.mxu0 %v608_v35 }
  0x2b   :  { %558 = vmatpush3.bf16.msra.mxu0 %v606_v41 }
  0x2c   :  { %559 = vmatprep.subr.bf16.mxu0 %v608_v35 }
  0x2f   :  { %560 = vmatpush3.bf16.msra.mxu0 %v607_v42 }
  0x32   :  { %562 = vmatmul.mubr.msk.bf16.vlgmr.msra.gmra.mxu0 %vm330_vm1, %v600_v43 }
  0xe2   :  { %v520_v44 = vpop.f32.mrf.mxu0 }
  0xe4   :  { %v521_v45 = vpop.f32.mrf.mxu0  ;;  %v542_v46 = vpop.f32.mrf.mxu1 }
  0xe5   :  { %v522_v51 = vadd.f32 %v521_v45, %v520_v44 }
  0xe6   :  { %v523_v47 = vpop.f32.mrf.mxu0  ;;  %v543_v48 = vpop.f32.mrf.mxu1 }
  0xe7   :  { %v369_v54 = vadd.f32 %v522_v51, %v461_v52  ;;  %v544_v55 = vadd.f32 %v543_v48, %v542_v46 }
  0xe8   :  { %v524_v49 = vpop.f32.mrf.mxu0  ;;  %v545_v50 = vpop.f32.mrf.mxu1 }
  0xe9   :  { %v409_v56 = vadd.f32 %v544_v55, %v369_v54 }
  0xea   :  { %v546_v53 = vpop.f32.mrf.mxu1 }
  0xf2   :  { %v448_v57 = vpop.f32.mrf.mxu0 }
  0xf3   :  { %v449_v58 = vadd.f32 %v448_v57, %v409_v56 }
  0xf4   :  { %v563_v59 = vpop.f32.mrf.mxu0 }
  0xf5   :  { %v454_v60 = vmax.f32 %v449_v58, 0.0 }
  0xf6   :  { %v451_v61 = vpop.f32.mrf.mxu0 }
  0xf7   :  { %v455_v62 = vpack.c.bf16 %v454_v60, %v454_v60 }
  0xf8   :  { %v564_v63 = vpop.f32.mrf.mxu0 }
  0xf9   :  { %456 = vst [vmem:[%s756_s3] sm:$0xf] %v455_v62 }

// kernel: _lambda_.48
= control target key start
LH: loop header
LB: loop body
LE: loop exit
PB: predicated region body
PF: predicated region fallthrough
CT: control target
= control target key end

     0   :  { %v134_v0 = vmov 0.0   ;;  %vm135_vm0 = vmmov 0   ;;  %vm55_vm1 = vcmask 523264   ;;  %s177_s1 = inlined_call_operand.vmem [shape: bf16[64,128], index: 1, kind: input, shape index: {}]   ;;  %s178_s0 = inlined_call_operand.vmem [shape: bf16[8,64], index: 0, kind: input, shape index: {}]   ;;  %s179_s2 = inlined_call_operand.vmem [shape: f32[1,128], index: 2, kind: input, shape index: {}]   ;;  %s180_s3 = inlined_call_operand.vmem [shape: bf16[8,128], index: 3, kind: output, shape index: {}]  }
   0x1   :  { %116 = vmatprep.subr.bf16.mxu0 %v134_v0  ;;  %v130_v1 = vld [vmem:[%s177_s1 + $0x18] sm:$0xff]   ;;  %124 = vmatprep.mubr.msk.bf16.mxu0 %vm135_vm0, %v134_v0  ;;  %v131_v2 = vld [vmem:[%s177_s1 + $0x10] sm:$0xff]   ;;  %v132_v3 = vld [vmem:[%s177_s1 + $0x8] sm:$0xff]  }
   0x2   :  { %117 = vmatpush3.bf16.msra.mxu0 %v130_v1  ;;  %v133_v4 = vld [vmem:[%s177_s1] sm:$0xff]  }
   0x3   :  { %118 = vmatprep.subr.bf16.mxu0 %v134_v0  ;;  %v15_v5 = vld [vmem:[%s178_s0] sm:$0xf] }
   0x4   :  { %v105_v6 = vld [vmem:[%s179_s2] ss:$0 sm:$0xff] }
   0x6   :  { %119 = vmatpush3.bf16.msra.mxu0 %v131_v2 }
   0x7   :  { %120 = vmatprep.subr.bf16.mxu0 %v134_v0 }
   0xa   :  { %121 = vmatpush3.bf16.msra.mxu0 %v132_v3 }
   0xb   :  { %122 = vmatprep.subr.bf16.mxu0 %v134_v0 }
   0xe   :  { %123 = vmatpush3.bf16.msra.mxu0 %v133_v4 }
  0x11   :  { %125 = vmatmul.mubr.msk.bf16.vlgmr.msra.gmra.mxu0 %vm55_vm1, %v15_v5 }
  0xd1   :  { %v93_v7 = vpop.f32.mrf.mxu0 }
  0xd2   :  { %v94_v8 = vadd.f32 %v105_v6, %v93_v7 }
  0xd3   :  { %v126_v9 = vpop.f32.mrf.mxu0 }
  0xd4   :  { %v99_v10 = vpack.c.bf16 %v94_v8, %v94_v8 }
  0xd5   :  { %v96_v11 = vpop.f32.mrf.mxu0 }
  0xd6   :  { %100 = vst [vmem:[%s180_s3] sm:$0xf] %v99_v10 }
  0xd7   :  { %v127_v12 = vpop.f32.mrf.mxu0 }

// kernel: _lambda_.50
= control target key start
LH: loop header
LB: loop body
LE: loop exit
PB: predicated region body
PF: predicated region fallthrough
CT: control target
= control target key end

     0   :  { %vm1125_vm0 = vmmov 0   ;;  %s1383_s1 = inlined_call_operand.vmem [shape: bf16[1152,128], index: 1, kind: input, shape index: {}]   ;;  %s1384_s0 = inlined_call_operand.vmem [shape: bf16[8,1152], index: 0, kind: input, shape index: {}]   ;;  %s1385_s2 = inlined_call_operand.vmem [shape: f32[1,128], index: 2, kind: input, shape index: {}]   ;;  %s1386_s3 = inlined_call_operand.vmem [shape: bf16[8,128], index: 3, kind: output, shape index: {}]  }
   0x1   :  { %v1043_v0 = vld [vmem:[%s1383_s1 + $0x78] sm:$0xff]   ;;  %v1047_v4 = vld [vmem:[%s1383_s1 + $0x70] sm:$0xff]   ;;  %v1051_v8 = vld [vmem:[%s1383_s1 + $0x68] sm:$0xff]  }
   0x2   :  { %v1044_v1 = vld [vmem:[%s1383_s1 + $0x38] sm:$0xff]   ;;  %924 = vmatprep.subr.bf16.mxu0 %v1043_v0  ;;  %v1048_v5 = vld [vmem:[%s1383_s1 + $0x30] sm:$0xff]   ;;  %v1052_v9 = vld [vmem:[%s1383_s1 + $0x28] sm:$0xff]  }
   0x3   :  { %v1045_v2 = vld [vmem:[%s1383_s1 + $0xf8] sm:$0xff]   ;;  %925 = vmatpush3.bf16.msra.mxu0 %v1044_v1  ;;  %v1049_v6 = vld [vmem:[%s1383_s1 + $0xf0] sm:$0xff]   ;;  %v1053_v10 = vld [vmem:[%s1383_s1 + $0xe8] sm:$0xff]  }
   0x4   :  { %v1046_v3 = vld [vmem:[%s1383_s1 + $0xb8] sm:$0xff]   ;;  %946 = vmatprep.subr.bf16.mxu1 %v1045_v2  ;;  %926 = vmatprep.subr.bf16.mxu0 %v1047_v4  ;;  %v1050_v7 = vld [vmem:[%s1383_s1 + $0xb0] sm:$0xff]   ;;  %v1054_v11 = vld [vmem:[%s1383_s1 + $0xa8] sm:$0xff]  }
   0x5   :  { %947 = vmatpush3.bf16.msra.mxu1 %v1046_v3  ;;  %v1055_v12 = vld [vmem:[%s1383_s1 + $0x60] sm:$0xff]   ;;  %v1059_v16 = vld [vmem:[%s1383_s1 + $0x58] sm:$0xff]   ;;  %v1063_v20 = vld [vmem:[%s1383_s1 + $0x50] sm:$0xff]  }
   0x6   :  { %948 = vmatprep.subr.bf16.mxu1 %v1049_v6  ;;  %v1056_v13 = vld [vmem:[%s1383_s1 + $0x20] sm:$0xff]   ;;  %v1060_v17 = vld [vmem:[%s1383_s1 + $0x18] sm:$0xff]   ;;  %v1064_v21 = vld [vmem:[%s1383_s1 + $0x10] sm:$0xff]  }
   0x7   :  { %927 = vmatpush3.bf16.msra.mxu0 %v1048_v5  ;;  %v1057_v14 = vld [vmem:[%s1383_s1 + $0xe0] sm:$0xff]   ;;  %v1061_v18 = vld [vmem:[%s1383_s1 + $0xd8] sm:$0xff]   ;;  %v1065_v22 = vld [vmem:[%s1383_s1 + $0xd0] sm:$0xff]  }
   0x8   :  { %928 = vmatprep.subr.bf16.mxu0 %v1051_v8  ;;  %v1058_v15 = vld [vmem:[%s1383_s1 + $0xa0] sm:$0xff]   ;;  %v1062_v19 = vld [vmem:[%s1383_s1 + $0x98] sm:$0xff]   ;;  %v1066_v23 = vld [vmem:[%s1383_s1 + $0x90] sm:$0xff]  }
   0x9   :  { %949 = vmatpush3.bf16.msra.mxu1 %v1050_v7  ;;  %v1067_v24 = vld [vmem:[%s1383_s1 + $0x48] sm:$0xff]   ;;  %v1071_v28 = vld [vmem:[%s1383_s1 + $0x40] sm:$0xff]   ;;  %v1077_v35 = vld [vmem:[%s1383_s1 + $0x178] sm:$0xff]  }
   0xa   :  { %950 = vmatprep.subr.bf16.mxu1 %v1053_v10  ;;  %v1068_v25 = vld [vmem:[%s1383_s1 + $0x8] sm:$0xff]   ;;  %v1072_v29 = vld [vmem:[%s1383_s1] sm:$0xff]   ;;  %v1080_v39 = vld [vmem:[%s1383_s1 + $0x138] sm:$0xff]  }
   0xb   :  { %929 = vmatpush3.bf16.msra.mxu0 %v1052_v9  ;;  %v1069_v26 = vld [vmem:[%s1383_s1 + $0xc8] sm:$0xff]   ;;  %v1073_v30 = vld [vmem:[%s1383_s1 + $0xc0] sm:$0xff]   ;;  %v1081_v40 = vld [vmem:[%s1383_s1 + $0x1f8] sm:$0xff]   ;;  %v1124_v9 = vmov 0.0  }
   0xc   :  { %930 = vmatprep.subr.bf16.mxu0 %v1055_v12  ;;  %v1070_v27 = vld [vmem:[%s1383_s1 + $0x88] sm:$0xff]   ;;  %v15_v31 = vld [vmem:[%s1384_s0] sm:$0xff]  ;;  %v1082_v41 = vld [vmem:[%s1383_s1 + $0x1b8] sm:$0xff]  }
   0xd   :  { %951 = vmatpush3.bf16.msra.mxu1 %v1054_v11  ;;  %v843_v32 = vcombine.low %v15_v31, %v15_v31  ;;  %v844_v33 = vcombine.high %v15_v31, %v15_v31  ;;  %v1076_v34 = vld [vmem:[%s1383_s1 + $0x80] sm:$0xff]   ;;  %v16_v36 = vld [vmem:[%s1384_s0 + $0x8] sm:$0xff]  ;;  %v1083_v42 = vld [vmem:[%s1383_s1 + $0x170] sm:$0xff]  }
   0xe   :  { %952 = vmatprep.subr.bf16.mxu1 %v1057_v14  ;;  %v845_v37 = vcombine.low %v16_v36, %v16_v36  ;;  %v846_v38 = vcombine.high %v16_v36, %v16_v36  ;;  %v1084_v43 = vld [vmem:[%s1383_s1 + $0x130] sm:$0xff]   ;;  %v1087_v46 = vld [vmem:[%s1383_s1 + $0x168] sm:$0xff]   ;;  %v1091_v50 = vld [vmem:[%s1383_s1 + $0x160] sm:$0xff]  }
   0xf   :  { %931 = vmatpush3.bf16.msra.mxu0 %v1056_v13  ;;  %667 = vmatprep.mubr.bf16.mxu0 %v844_v33  ;;  %v1085_v44 = vld [vmem:[%s1383_s1 + $0x1f0] sm:$0xff]   ;;  %v1088_v47 = vld [vmem:[%s1383_s1 + $0x128] sm:$0xff]   ;;  %v1092_v51 = vld [vmem:[%s1383_s1 + $0x120] sm:$0xff]  }
  0x10   :  { %932 = vmatprep.subr.bf16.mxu0 %v1059_v16  ;;  %707 = vmatprep.mubr.bf16.mxu1 %v846_v38  ;;  %v1086_v45 = vld [vmem:[%s1383_s1 + $0x1b0] sm:$0xff]   ;;  %v1089_v48 = vld [vmem:[%s1383_s1 + $0x1e8] sm:$0xff]   ;;  %v1093_v52 = vld [vmem:[%s1383_s1 + $0x1e0] sm:$0xff]  }
  0x11   :  { %953 = vmatpush3.bf16.msra.mxu1 %v1058_v15  ;;  %v1090_v49 = vld [vmem:[%s1383_s1 + $0x1a8] sm:$0xff]   ;;  %v1094_v53 = vld [vmem:[%s1383_s1 + $0x1a0] sm:$0xff]   ;;  %v1095_v54 = vld [vmem:[%s1383_s1 + $0x158] sm:$0xff]  }
  0x12   :  { %954 = vmatprep.subr.bf16.mxu1 %v1061_v18  ;;  %v1096_v55 = vld [vmem:[%s1383_s1 + $0x118] sm:$0xff]   ;;  %v1099_v58 = vld [vmem:[%s1383_s1 + $0x150] sm:$0xff]   ;;  %v1103_v62 = vld [vmem:[%s1383_s1 + $0x148] sm:$0xff]  }
  0x13   :  { %933 = vmatpush3.bf16.msra.mxu0 %v1060_v17  ;;  %v1097_v56 = vld [vmem:[%s1383_s1 + $0x1d8] sm:$0xff]   ;;  %v1100_v59 = vld [vmem:[%s1383_s1 + $0x110] sm:$0xff]   ;;  %v1104_v63 = vld [vmem:[%s1383_s1 + $0x108] sm:$0xff]  }
  0x14   :  { %934 = vmatprep.subr.bf16.mxu0 %v1063_v20  ;;  %v1098_v57 = vld [vmem:[%s1383_s1 + $0x198] sm:$0xff]   ;;  %v1101_v60 = vld [vmem:[%s1383_s1 + $0x1d0] sm:$0xff]   ;;  %v1105_v0 = vld [vmem:[%s1383_s1 + $0x1c8] sm:$0xff]  }
  0x15   :  { %955 = vmatpush3.bf16.msra.mxu1 %v1062_v19  ;;  %v1102_v61 = vld [vmem:[%s1383_s1 + $0x190] sm:$0xff]   ;;  %v1106_v1 = vld [vmem:[%s1383_s1 + $0x188] sm:$0xff]   ;;  %v1107_v2 = vld [vmem:[%s1383_s1 + $0x140] sm:$0xff]  }
  0x16   :  { %956 = vmatprep.subr.bf16.mxu1 %v1065_v22  ;;  %v1108_v3 = vld [vmem:[%s1383_s1 + $0x100] sm:$0xff]   ;;  %v17_v5 = vld [vmem:[%s1384_s0 + $0x10] sm:$0xff]  ;;  %v18_v10 = vld [vmem:[%s1384_s0 + $0x18] sm:$0xff] }
  0x17   :  { %935 = vmatpush3.bf16.msra.mxu0 %v1064_v21  ;;  %v1109_v4 = vld [vmem:[%s1383_s1 + $0x1c0] sm:$0xff]   ;;  %v847_v6 = vcombine.low %v17_v5, %v17_v5  ;;  %v848_v7 = vcombine.high %v17_v5, %v17_v5  ;;  %v849_v11 = vcombine.low %v18_v10, %v18_v10  ;;  %v850_v12 = vcombine.high %v18_v10, %v18_v10  ;;  %v1115_v13 = vld [vmem:[%s1383_s1 + $0x238] sm:$0xff]   ;;  %v1116_v14 = vld [vmem:[%s1383_s1 + $0x230] sm:$0xff]  }
  0x18   :  { %936 = vmatprep.subr.bf16.mxu0 %v1067_v24  ;;  %v1112_v8 = vld [vmem:[%s1383_s1 + $0x180] sm:$0xff]   ;;  %v1117_v15 = vld [vmem:[%s1383_s1 + $0x228] sm:$0xff]   ;;  %v1119_v17 = vld [vmem:[%s1383_s1 + $0x218] sm:$0xff]  }
  0x19   :  { %957 = vmatpush3.bf16.msra.mxu1 %v1066_v23  ;;  %v1118_v16 = vld [vmem:[%s1383_s1 + $0x220] sm:$0xff]   ;;  %v1120_v18 = vld [vmem:[%s1383_s1 + $0x210] sm:$0xff]   ;;  %v1121_v19 = vld [vmem:[%s1383_s1 + $0x208] sm:$0xff]  }
  0x1a   :  { %958 = vmatprep.subr.bf16.mxu1 %v1069_v26  ;;  %v1122_v20 = vld [vmem:[%s1383_s1 + $0x200] sm:$0xff]  }
  0x1b   :  { %937 = vmatpush3.bf16.msra.mxu0 %v1068_v25  ;;  %v1123_v21 = vld [vmem:[%s1384_s0 + $0x20] ss:$0 sps:$4 sm:$0xff]  }
  0x1c   :  { %938 = vmatprep.subr.bf16.mxu0 %v1071_v28 }
  0x1d   :  { %959 = vmatpush3.bf16.msra.mxu1 %v1070_v27 }
  0x1e   :  { %960 = vmatprep.subr.bf16.mxu1 %v1073_v30 }
  0x1f   :  { %939 = vmatpush3.bf16.msra.mxu0 %v1072_v29 }
  0x20   :  { %968 = vmatprep.subr.bf16.mxu0 %v1077_v35 }
  0x21   :  { %961 = vmatpush3.bf16.msra.mxu1 %v1076_v34 }
  0x22   :  { %668 = vmatmul.mubr.bf16.vlgmr.msra.gmra.mxu0 %v843_v32  ;;  %990 = vmatprep.subr.bf16.mxu1 %v1081_v40 }
  0x23   :  { %969 = vmatpush3.bf16.msra.mxu0 %v1080_v39  ;;  %747 = vmatprep.mubr.bf16.mxu0 %v848_v7  ;;  %v842_v39 = vld [vmem:[%s1385_s2] ss:$0 sm:$0xff] }
  0x24   :  { %708 = vmatmul.mubr.bf16.vlgmr.msra.gmra.mxu1 %v845_v37  ;;  %970 = vmatprep.subr.bf16.mxu0 %v1083_v42 }
  0x25   :  { %991 = vmatpush3.bf16.msra.mxu1 %v1082_v41  ;;  %787 = vmatprep.mubr.bf16.mxu1 %v850_v12 }
  0x26   :  { %992 = vmatprep.subr.bf16.mxu1 %v1085_v44 }
  0x27   :  { %971 = vmatpush3.bf16.msra.mxu0 %v1084_v43 }
  0x28   :  { %972 = vmatprep.subr.bf16.mxu0 %v1087_v46 }
  0x29   :  { %993 = vmatpush3.bf16.msra.mxu1 %v1086_v45 }
  0x2a   :  { %994 = vmatprep.subr.bf16.mxu1 %v1089_v48 }
  0x2b   :  { %973 = vmatpush3.bf16.msra.mxu0 %v1088_v47 }
  0x2c   :  { %974 = vmatprep.subr.bf16.mxu0 %v1091_v50 }
  0x2d   :  { %995 = vmatpush3.bf16.msra.mxu1 %v1090_v49 }
  0x2e   :  { %996 = vmatprep.subr.bf16.mxu1 %v1093_v52 }
  0x2f   :  { %975 = vmatpush3.bf16.msra.mxu0 %v1092_v51 }
  0x30   :  { %976 = vmatprep.subr.bf16.mxu0 %v1095_v54 }
  0x31   :  { %997 = vmatpush3.bf16.msra.mxu1 %v1094_v53 }
  0x32   :  { %998 = vmatprep.subr.bf16.mxu1 %v1097_v56 }
  0x33   :  { %977 = vmatpush3.bf16.msra.mxu0 %v1096_v55 }
  0x34   :  { %978 = vmatprep.subr.bf16.mxu0 %v1099_v58 }
  0x35   :  { %999 = vmatpush3.bf16.msra.mxu1 %v1098_v57 }
  0x36   :  { %1000 = vmatprep.subr.bf16.mxu1 %v1101_v60 }
  0x37   :  { %979 = vmatpush3.bf16.msra.mxu0 %v1100_v59 }
  0x38   :  { %980 = vmatprep.subr.bf16.mxu0 %v1103_v62 }
  0x39   :  { %1001 = vmatpush3.bf16.msra.mxu1 %v1102_v61 }
  0x3a   :  { %1002 = vmatprep.subr.bf16.mxu1 %v1105_v0 }
  0x3b   :  { %981 = vmatpush3.bf16.msra.mxu0 %v1104_v63 }
  0x3c   :  { %982 = vmatprep.subr.bf16.mxu0 %v1107_v2 }
  0x3d   :  { %1003 = vmatpush3.bf16.msra.mxu1 %v1106_v1 }
  0x3e   :  { %1004 = vmatprep.subr.bf16.mxu1 %v1109_v4 }
  0x3f   :  { %983 = vmatpush3.bf16.msra.mxu0 %v1108_v3 }
  0x40   :  { %1021 = vmatprep.subr.bf16.mxu0 %v1124_v9 }
  0x41   :  { %1005 = vmatpush3.bf16.msra.mxu1 %v1112_v8 }
  0x42   :  { %748 = vmatmul.mubr.bf16.vlgmr.msra.gmra.mxu0 %v847_v6 }
  0x43   :  { %1022 = vmatpush3.bf16.msra.mxu0 %v1115_v13  ;;  %1037 = vmatprep.mubr.msk.bf16.mxu0 %vm1125_vm0, %v1124_v9 }
  0x44   :  { %788 = vmatmul.mubr.bf16.vlgmr.msra.gmra.mxu1 %v849_v11  ;;  %1023 = vmatprep.subr.bf16.mxu0 %v1124_v9 }
  0x47   :  { %1024 = vmatpush3.bf16.msra.mxu0 %v1116_v14 }
  0x48   :  { %1025 = vmatprep.subr.bf16.mxu0 %v1124_v9 }
  0x4b   :  { %1026 = vmatpush3.bf16.msra.mxu0 %v1117_v15 }
  0x4c   :  { %1027 = vmatprep.subr.bf16.mxu0 %v1124_v9 }
  0x4f   :  { %1028 = vmatpush3.bf16.msra.mxu0 %v1118_v16 }
  0x50   :  { %1029 = vmatprep.subr.bf16.mxu0 %v1124_v9 }
  0x53   :  { %1030 = vmatpush3.bf16.msra.mxu0 %v1119_v17 }
  0x54   :  { %1031 = vmatprep.subr.bf16.mxu0 %v1124_v9 }
  0x57   :  { %1032 = vmatpush3.bf16.msra.mxu0 %v1120_v18 }
  0x58   :  { %1033 = vmatprep.subr.bf16.mxu0 %v1124_v9 }
  0x5b   :  { %1034 = vmatpush3.bf16.msra.mxu0 %v1121_v19 }
  0x5c   :  { %1035 = vmatprep.subr.bf16.mxu0 %v1124_v9 }
  0x5f   :  { %1036 = vmatpush3.bf16.msra.mxu0 %v1122_v20 }
  0x62   :  { %1038 = vmatmul.mubr.bf16.vlgmr.msra.gmra.mxu0 %v1123_v21 }
  0xe2   :  { %v940_v22 = vpop.f32.mrf.mxu0 }
  0xe4   :  { %v941_v23 = vpop.f32.mrf.mxu0  ;;  %v962_v24 = vpop.f32.mrf.mxu1 }
  0xe5   :  { %v942_v38 = vadd.f32 %v941_v23, %v940_v22 }
  0xe6   :  { %v943_v25 = vpop.f32.mrf.mxu0  ;;  %v963_v26 = vpop.f32.mrf.mxu1 }
  0xe7   :  { %v670_v40 = vadd.f32 %v942_v38, %v842_v39  ;;  %v964_v41 = vadd.f32 %v963_v26, %v962_v24 }
  0xe8   :  { %v944_v27 = vpop.f32.mrf.mxu0  ;;  %v965_v28 = vpop.f32.mrf.mxu1 }
  0xe9   :  { %v710_v43 = vadd.f32 %v964_v41, %v670_v40 }
  0xea   :  { %v966_v29 = vpop.f32.mrf.mxu1 }
 0x102   :  { %v984_v30 = vpop.f32.mrf.mxu0 }
 0x104   :  { %v985_v31 = vpop.f32.mrf.mxu0  ;;  %v1006_v32 = vpop.f32.mrf.mxu1 }
 0x105   :  { %v986_v42 = vadd.f32 %v985_v31, %v984_v30 }
 0x106   :  { %v987_v33 = vpop.f32.mrf.mxu0  ;;  %v1007_v34 = vpop.f32.mrf.mxu1 }
 0x107   :  { %v750_v44 = vadd.f32 %v986_v42, %v710_v43  ;;  %v1008_v45 = vadd.f32 %v1007_v34, %v1006_v32 }
 0x108   :  { %v988_v35 = vpop.f32.mrf.mxu0  ;;  %v1009_v36 = vpop.f32.mrf.mxu1 }
 0x109   :  { %v790_v46 = vadd.f32 %v1008_v45, %v750_v44 }
 0x10a   :  { %v1010_v37 = vpop.f32.mrf.mxu1 }
 0x122   :  { %v829_v47 = vpop.f32.mrf.mxu0 }
 0x123   :  { %v830_v48 = vadd.f32 %v829_v47, %v790_v46 }
 0x124   :  { %v1039_v49 = vpop.f32.mrf.mxu0 }
 0x125   :  { %v835_v50 = vmax.f32 %v830_v48, 0.0 }
 0x126   :  { %v832_v51 = vpop.f32.mrf.mxu0 }
 0x127   :  { %v836_v52 = vpack.c.bf16 %v835_v50, %v835_v50 }
 0x128   :  { %v1040_v53 = vpop.f32.mrf.mxu0 }
 0x129   :  { %837 = vst [vmem:[%s1386_s3] sm:$0xf] %v836_v52 }

// kernel: _lambda_.49
= control target key start
LH: loop header
LB: loop body
LE: loop exit
PB: predicated region body
PF: predicated region fallthrough
CT: control target
= control target key end

     0   :  { %vm1131_vm0 = vmmov 0   ;;  %s1397_s1 = inlined_call_operand.vmem [shape: bf16[1152,128], index: 1, kind: input, shape index: {}]   ;;  %s1398_s0 = inlined_call_operand.vmem [shape: bf16[8,1152], index: 0, kind: input, shape index: {}]   ;;  %s1399_s2 = inlined_call_operand.vmem [shape: f32[1,128], index: 2, kind: input, shape index: {}]   ;;  %s1400_s3 = inlined_call_operand.vmem [shape: bf16[8,128], index: 3, kind: input, shape index: {}]   ;;  %s1401_s4 = inlined_call_operand.vmem [shape: bf16[8,128], index: 4, kind: output, shape index: {}]  }
   0x1   :  { %v1049_v0 = vld [vmem:[%s1397_s1 + $0x78] sm:$0xff]   ;;  %v1053_v4 = vld [vmem:[%s1397_s1 + $0x70] sm:$0xff]   ;;  %v1057_v8 = vld [vmem:[%s1397_s1 + $0x68] sm:$0xff]  }
   0x2   :  { %v1050_v1 = vld [vmem:[%s1397_s1 + $0x38] sm:$0xff]   ;;  %930 = vmatprep.subr.bf16.mxu0 %v1049_v0  ;;  %v1054_v5 = vld [vmem:[%s1397_s1 + $0x30] sm:$0xff]   ;;  %v1058_v9 = vld [vmem:[%s1397_s1 + $0x28] sm:$0xff]  }
   0x3   :  { %v1051_v2 = vld [vmem:[%s1397_s1 + $0xf8] sm:$0xff]   ;;  %931 = vmatpush3.bf16.msra.mxu0 %v1050_v1  ;;  %v1055_v6 = vld [vmem:[%s1397_s1 + $0xf0] sm:$0xff]   ;;  %v1059_v10 = vld [vmem:[%s1397_s1 + $0xe8] sm:$0xff]  }
   0x4   :  { %v1052_v3 = vld [vmem:[%s1397_s1 + $0xb8] sm:$0xff]   ;;  %952 = vmatprep.subr.bf16.mxu1 %v1051_v2  ;;  %932 = vmatprep.subr.bf16.mxu0 %v1053_v4  ;;  %v1056_v7 = vld [vmem:[%s1397_s1 + $0xb0] sm:$0xff]   ;;  %v1060_v11 = vld [vmem:[%s1397_s1 + $0xa8] sm:$0xff]  }
   0x5   :  { %953 = vmatpush3.bf16.msra.mxu1 %v1052_v3  ;;  %v1061_v12 = vld [vmem:[%s1397_s1 + $0x60] sm:$0xff]   ;;  %v1065_v16 = vld [vmem:[%s1397_s1 + $0x58] sm:$0xff]   ;;  %v1069_v20 = vld [vmem:[%s1397_s1 + $0x50] sm:$0xff]  }
   0x6   :  { %954 = vmatprep.subr.bf16.mxu1 %v1055_v6  ;;  %v1062_v13 = vld [vmem:[%s1397_s1 + $0x20] sm:$0xff]   ;;  %v1066_v17 = vld [vmem:[%s1397_s1 + $0x18] sm:$0xff]   ;;  %v1070_v21 = vld [vmem:[%s1397_s1 + $0x10] sm:$0xff]  }
   0x7   :  { %933 = vmatpush3.bf16.msra.mxu0 %v1054_v5  ;;  %v1063_v14 = vld [vmem:[%s1397_s1 + $0xe0] sm:$0xff]   ;;  %v1067_v18 = vld [vmem:[%s1397_s1 + $0xd8] sm:$0xff]   ;;  %v1071_v22 = vld [vmem:[%s1397_s1 + $0xd0] sm:$0xff]  }
   0x8   :  { %934 = vmatprep.subr.bf16.mxu0 %v1057_v8  ;;  %v1064_v15 = vld [vmem:[%s1397_s1 + $0xa0] sm:$0xff]   ;;  %v1068_v19 = vld [vmem:[%s1397_s1 + $0x98] sm:$0xff]   ;;  %v1072_v23 = vld [vmem:[%s1397_s1 + $0x90] sm:$0xff]  }
   0x9   :  { %955 = vmatpush3.bf16.msra.mxu1 %v1056_v7  ;;  %v1073_v24 = vld [vmem:[%s1397_s1 + $0x48] sm:$0xff]   ;;  %v1077_v28 = vld [vmem:[%s1397_s1 + $0x40] sm:$0xff]   ;;  %v1083_v35 = vld [vmem:[%s1397_s1 + $0x178] sm:$0xff]  }
   0xa   :  { %956 = vmatprep.subr.bf16.mxu1 %v1059_v10  ;;  %v1074_v25 = vld [vmem:[%s1397_s1 + $0x8] sm:$0xff]   ;;  %v1078_v29 = vld [vmem:[%s1397_s1] sm:$0xff]   ;;  %v1086_v39 = vld [vmem:[%s1397_s1 + $0x138] sm:$0xff]  }
   0xb   :  { %935 = vmatpush3.bf16.msra.mxu0 %v1058_v9  ;;  %v1075_v26 = vld [vmem:[%s1397_s1 + $0xc8] sm:$0xff]   ;;  %v1079_v30 = vld [vmem:[%s1397_s1 + $0xc0] sm:$0xff]   ;;  %v1087_v40 = vld [vmem:[%s1397_s1 + $0x1f8] sm:$0xff]   ;;  %v1130_v9 = vmov 0.0  }
   0xc   :  { %936 = vmatprep.subr.bf16.mxu0 %v1061_v12  ;;  %v1076_v27 = vld [vmem:[%s1397_s1 + $0x88] sm:$0xff]   ;;  %v20_v31 = vld [vmem:[%s1398_s0] sm:$0xff]  ;;  %v1088_v41 = vld [vmem:[%s1397_s1 + $0x1b8] sm:$0xff]  }
   0xd   :  { %957 = vmatpush3.bf16.msra.mxu1 %v1060_v11  ;;  %v849_v32 = vcombine.low %v20_v31, %v20_v31  ;;  %v850_v33 = vcombine.high %v20_v31, %v20_v31  ;;  %v1082_v34 = vld [vmem:[%s1397_s1 + $0x80] sm:$0xff]   ;;  %v21_v36 = vld [vmem:[%s1398_s0 + $0x8] sm:$0xff]  ;;  %v1089_v42 = vld [vmem:[%s1397_s1 + $0x170] sm:$0xff]  }
   0xe   :  { %958 = vmatprep.subr.bf16.mxu1 %v1063_v14  ;;  %v851_v37 = vcombine.low %v21_v36, %v21_v36  ;;  %v852_v38 = vcombine.high %v21_v36, %v21_v36  ;;  %v1090_v43 = vld [vmem:[%s1397_s1 + $0x130] sm:$0xff]   ;;  %v1093_v46 = vld [vmem:[%s1397_s1 + $0x168] sm:$0xff]   ;;  %v1097_v50 = vld [vmem:[%s1397_s1 + $0x160] sm:$0xff]  }
   0xf   :  { %937 = vmatpush3.bf16.msra.mxu0 %v1062_v13  ;;  %672 = vmatprep.mubr.bf16.mxu0 %v850_v33  ;;  %v1091_v44 = vld [vmem:[%s1397_s1 + $0x1f0] sm:$0xff]   ;;  %v1094_v47 = vld [vmem:[%s1397_s1 + $0x128] sm:$0xff]   ;;  %v1098_v51 = vld [vmem:[%s1397_s1 + $0x120] sm:$0xff]  }
  0x10   :  { %938 = vmatprep.subr.bf16.mxu0 %v1065_v16  ;;  %712 = vmatprep.mubr.bf16.mxu1 %v852_v38  ;;  %v1092_v45 = vld [vmem:[%s1397_s1 + $0x1b0] sm:$0xff]   ;;  %v1095_v48 = vld [vmem:[%s1397_s1 + $0x1e8] sm:$0xff]   ;;  %v1099_v52 = vld [vmem:[%s1397_s1 + $0x1e0] sm:$0xff]  }
  0x11   :  { %959 = vmatpush3.bf16.msra.mxu1 %v1064_v15  ;;  %v1096_v49 = vld [vmem:[%s1397_s1 + $0x1a8] sm:$0xff]   ;;  %v1100_v53 = vld [vmem:[%s1397_s1 + $0x1a0] sm:$0xff]   ;;  %v1101_v54 = vld [vmem:[%s1397_s1 + $0x158] sm:$0xff]  }
  0x12   :  { %960 = vmatprep.subr.bf16.mxu1 %v1067_v18  ;;  %v1102_v55 = vld [vmem:[%s1397_s1 + $0x118] sm:$0xff]   ;;  %v1105_v58 = vld [vmem:[%s1397_s1 + $0x150] sm:$0xff]   ;;  %v1109_v62 = vld [vmem:[%s1397_s1 + $0x148] sm:$0xff]  }
  0x13   :  { %939 = vmatpush3.bf16.msra.mxu0 %v1066_v17  ;;  %v1103_v56 = vld [vmem:[%s1397_s1 + $0x1d8] sm:$0xff]   ;;  %v1106_v59 = vld [vmem:[%s1397_s1 + $0x110] sm:$0xff]   ;;  %v1110_v63 = vld [vmem:[%s1397_s1 + $0x108] sm:$0xff]  }
  0x14   :  { %940 = vmatprep.subr.bf16.mxu0 %v1069_v20  ;;  %v1104_v57 = vld [vmem:[%s1397_s1 + $0x198] sm:$0xff]   ;;  %v1107_v60 = vld [vmem:[%s1397_s1 + $0x1d0] sm:$0xff]   ;;  %v1111_v0 = vld [vmem:[%s1397_s1 + $0x1c8] sm:$0xff]  }
  0x15   :  { %961 = vmatpush3.bf16.msra.mxu1 %v1068_v19  ;;  %v1108_v61 = vld [vmem:[%s1397_s1 + $0x190] sm:$0xff]   ;;  %v1112_v1 = vld [vmem:[%s1397_s1 + $0x188] sm:$0xff]   ;;  %v1113_v2 = vld [vmem:[%s1397_s1 + $0x140] sm:$0xff]  }
  0x16   :  { %962 = vmatprep.subr.bf16.mxu1 %v1071_v22  ;;  %v1114_v3 = vld [vmem:[%s1397_s1 + $0x100] sm:$0xff]   ;;  %v22_v5 = vld [vmem:[%s1398_s0 + $0x10] sm:$0xff]  ;;  %v23_v10 = vld [vmem:[%s1398_s0 + $0x18] sm:$0xff] }
  0x17   :  { %941 = vmatpush3.bf16.msra.mxu0 %v1070_v21  ;;  %v1115_v4 = vld [vmem:[%s1397_s1 + $0x1c0] sm:$0xff]   ;;  %v853_v6 = vcombine.low %v22_v5, %v22_v5  ;;  %v854_v7 = vcombine.high %v22_v5, %v22_v5  ;;  %v855_v11 = vcombine.low %v23_v10, %v23_v10  ;;  %v856_v12 = vcombine.high %v23_v10, %v23_v10  ;;  %v1121_v13 = vld [vmem:[%s1397_s1 + $0x238] sm:$0xff]   ;;  %v1122_v14 = vld [vmem:[%s1397_s1 + $0x230] sm:$0xff]  }
  0x18   :  { %942 = vmatprep.subr.bf16.mxu0 %v1073_v24  ;;  %v1118_v8 = vld [vmem:[%s1397_s1 + $0x180] sm:$0xff]   ;;  %v1123_v15 = vld [vmem:[%s1397_s1 + $0x228] sm:$0xff]   ;;  %v1125_v17 = vld [vmem:[%s1397_s1 + $0x218] sm:$0xff]  }
  0x19   :  { %963 = vmatpush3.bf16.msra.mxu1 %v1072_v23  ;;  %v1124_v16 = vld [vmem:[%s1397_s1 + $0x220] sm:$0xff]   ;;  %v1126_v18 = vld [vmem:[%s1397_s1 + $0x210] sm:$0xff]   ;;  %v1127_v19 = vld [vmem:[%s1397_s1 + $0x208] sm:$0xff]  }
  0x1a   :  { %964 = vmatprep.subr.bf16.mxu1 %v1075_v26  ;;  %v1128_v20 = vld [vmem:[%s1397_s1 + $0x200] sm:$0xff]  }
  0x1b   :  { %943 = vmatpush3.bf16.msra.mxu0 %v1074_v25  ;;  %v1129_v21 = vld [vmem:[%s1398_s0 + $0x20] ss:$0 sps:$4 sm:$0xff]  }
  0x1c   :  { %944 = vmatprep.subr.bf16.mxu0 %v1077_v28 }
  0x1d   :  { %965 = vmatpush3.bf16.msra.mxu1 %v1076_v27 }
  0x1e   :  { %966 = vmatprep.subr.bf16.mxu1 %v1079_v30 }
  0x1f   :  { %945 = vmatpush3.bf16.msra.mxu0 %v1078_v29 }
  0x20   :  { %974 = vmatprep.subr.bf16.mxu0 %v1083_v35 }
  0x21   :  { %967 = vmatpush3.bf16.msra.mxu1 %v1082_v34 }
  0x22   :  { %673 = vmatmul.mubr.bf16.vlgmr.msra.gmra.mxu0 %v849_v32  ;;  %996 = vmatprep.subr.bf16.mxu1 %v1087_v40 }
  0x23   :  { %975 = vmatpush3.bf16.msra.mxu0 %v1086_v39  ;;  %752 = vmatprep.mubr.bf16.mxu0 %v854_v7  ;;  %v848_v39 = vld [vmem:[%s1399_s2] ss:$0 sm:$0xff] }
  0x24   :  { %713 = vmatmul.mubr.bf16.vlgmr.msra.gmra.mxu1 %v851_v37  ;;  %976 = vmatprep.subr.bf16.mxu0 %v1089_v42 }
  0x25   :  { %997 = vmatpush3.bf16.msra.mxu1 %v1088_v41  ;;  %792 = vmatprep.mubr.bf16.mxu1 %v856_v12 }
  0x26   :  { %998 = vmatprep.subr.bf16.mxu1 %v1091_v44 }
  0x27   :  { %977 = vmatpush3.bf16.msra.mxu0 %v1090_v43 }
  0x28   :  { %978 = vmatprep.subr.bf16.mxu0 %v1093_v46  ;;  %v18_v46 = vld [vmem:[%s1400_s3] sm:$0xf] }
  0x29   :  { %999 = vmatpush3.bf16.msra.mxu1 %v1092_v45 }
  0x2a   :  { %1000 = vmatprep.subr.bf16.mxu1 %v1095_v48 }
  0x2b   :  { %979 = vmatpush3.bf16.msra.mxu0 %v1094_v47  ;;  %v19_v47 = vunpack.c.l.bf16 %v18_v46 }
  0x2c   :  { %980 = vmatprep.subr.bf16.mxu0 %v1097_v50 }
  0x2d   :  { %1001 = vmatpush3.bf16.msra.mxu1 %v1096_v49 }
  0x2e   :  { %1002 = vmatprep.subr.bf16.mxu1 %v1099_v52 }
  0x2f   :  { %981 = vmatpush3.bf16.msra.mxu0 %v1098_v51 }
  0x30   :  { %982 = vmatprep.subr.bf16.mxu0 %v1101_v54 }
  0x31   :  { %1003 = vmatpush3.bf16.msra.mxu1 %v1100_v53 }
  0x32   :  { %1004 = vmatprep.subr.bf16.mxu1 %v1103_v56 }
  0x33   :  { %983 = vmatpush3.bf16.msra.mxu0 %v1102_v55 }
  0x34   :  { %984 = vmatprep.subr.bf16.mxu0 %v1105_v58 }
  0x35   :  { %1005 = vmatpush3.bf16.msra.mxu1 %v1104_v57 }
  0x36   :  { %1006 = vmatprep.subr.bf16.mxu1 %v1107_v60 }
  0x37   :  { %985 = vmatpush3.bf16.msra.mxu0 %v1106_v59 }
  0x38   :  { %986 = vmatprep.subr.bf16.mxu0 %v1109_v62 }
  0x39   :  { %1007 = vmatpush3.bf16.msra.mxu1 %v1108_v61 }
  0x3a   :  { %1008 = vmatprep.subr.bf16.mxu1 %v1111_v0 }
  0x3b   :  { %987 = vmatpush3.bf16.msra.mxu0 %v1110_v63 }
  0x3c   :  { %988 = vmatprep.subr.bf16.mxu0 %v1113_v2 }
  0x3d   :  { %1009 = vmatpush3.bf16.msra.mxu1 %v1112_v1 }
  0x3e   :  { %1010 = vmatprep.subr.bf16.mxu1 %v1115_v4 }
  0x3f   :  { %989 = vmatpush3.bf16.msra.mxu0 %v1114_v3 }
  0x40   :  { %1027 = vmatprep.subr.bf16.mxu0 %v1130_v9 }
  0x41   :  { %1011 = vmatpush3.bf16.msra.mxu1 %v1118_v8 }
  0x42   :  { %753 = vmatmul.mubr.bf16.vlgmr.msra.gmra.mxu0 %v853_v6 }
  0x43   :  { %1028 = vmatpush3.bf16.msra.mxu0 %v1121_v13  ;;  %1043 = vmatprep.mubr.msk.bf16.mxu0 %vm1131_vm0, %v1130_v9 }
  0x44   :  { %793 = vmatmul.mubr.bf16.vlgmr.msra.gmra.mxu1 %v855_v11  ;;  %1029 = vmatprep.subr.bf16.mxu0 %v1130_v9 }
  0x47   :  { %1030 = vmatpush3.bf16.msra.mxu0 %v1122_v14 }
  0x48   :  { %1031 = vmatprep.subr.bf16.mxu0 %v1130_v9 }
  0x4b   :  { %1032 = vmatpush3.bf16.msra.mxu0 %v1123_v15 }
  0x4c   :  { %1033 = vmatprep.subr.bf16.mxu0 %v1130_v9 }
  0x4f   :  { %1034 = vmatpush3.bf16.msra.mxu0 %v1124_v16 }
  0x50   :  { %1035 = vmatprep.subr.bf16.mxu0 %v1130_v9 }
  0x53   :  { %1036 = vmatpush3.bf16.msra.mxu0 %v1125_v17 }
  0x54   :  { %1037 = vmatprep.subr.bf16.mxu0 %v1130_v9 }
  0x57   :  { %1038 = vmatpush3.bf16.msra.mxu0 %v1126_v18 }
  0x58   :  { %1039 = vmatprep.subr.bf16.mxu0 %v1130_v9 }
  0x5b   :  { %1040 = vmatpush3.bf16.msra.mxu0 %v1127_v19 }
  0x5c   :  { %1041 = vmatprep.subr.bf16.mxu0 %v1130_v9 }
  0x5f   :  { %1042 = vmatpush3.bf16.msra.mxu0 %v1128_v20 }
  0x62   :  { %1044 = vmatmul.mubr.bf16.vlgmr.msra.gmra.mxu0 %v1129_v21 }
  0xe2   :  { %v946_v22 = vpop.f32.mrf.mxu0 }
  0xe4   :  { %v947_v23 = vpop.f32.mrf.mxu0  ;;  %v968_v24 = vpop.f32.mrf.mxu1 }
  0xe5   :  { %v948_v38 = vadd.f32 %v947_v23, %v946_v22 }
  0xe6   :  { %v949_v25 = vpop.f32.mrf.mxu0  ;;  %v969_v26 = vpop.f32.mrf.mxu1 }
  0xe7   :  { %v675_v40 = vadd.f32 %v948_v38, %v848_v39  ;;  %v970_v41 = vadd.f32 %v969_v26, %v968_v24 }
  0xe8   :  { %v950_v27 = vpop.f32.mrf.mxu0  ;;  %v971_v28 = vpop.f32.mrf.mxu1 }
  0xe9   :  { %v715_v43 = vadd.f32 %v970_v41, %v675_v40 }
  0xea   :  { %v972_v29 = vpop.f32.mrf.mxu1 }
 0x102   :  { %v990_v30 = vpop.f32.mrf.mxu0 }
 0x104   :  { %v991_v31 = vpop.f32.mrf.mxu0  ;;  %v1012_v32 = vpop.f32.mrf.mxu1 }
 0x105   :  { %v992_v42 = vadd.f32 %v991_v31, %v990_v30 }
 0x106   :  { %v993_v33 = vpop.f32.mrf.mxu0  ;;  %v1013_v34 = vpop.f32.mrf.mxu1 }
 0x107   :  { %v755_v44 = vadd.f32 %v992_v42, %v715_v43  ;;  %v1014_v45 = vadd.f32 %v1013_v34, %v1012_v32 }
 0x108   :  { %v994_v35 = vpop.f32.mrf.mxu0  ;;  %v1015_v36 = vpop.f32.mrf.mxu1 }
 0x109   :  { %v795_v48 = vadd.f32 %v1014_v45, %v755_v44 }
 0x10a   :  { %v1016_v37 = vpop.f32.mrf.mxu1 }
 0x122   :  { %v834_v49 = vpop.f32.mrf.mxu0 }
 0x123   :  { %v835_v50 = vadd.f32 %v834_v49, %v795_v48 }
 0x124   :  { %v1045_v51 = vpop.f32.mrf.mxu0 }
 0x125   :  { %v840_v52 = vadd.f32 %v835_v50, %v19_v47 }
 0x126   :  { %v837_v53 = vpop.f32.mrf.mxu0 }
 0x127   :  { %v841_v54 = vmax.f32 %v840_v52, 0.0 }
 0x128   :  { %v1046_v55 = vpop.f32.mrf.mxu0 }
 0x129   :  { %v842_v56 = vpack.c.bf16 %v841_v54, %v841_v54 }
 0x12b   :  { %843 = vst [vmem:[%s1401_s4] sm:$0xf] %v842_v56 }

// kernel: _lambda_.52
= control target key start
LH: loop header
LB: loop body
LE: loop exit
PB: predicated region body
PF: predicated region fallthrough
CT: control target
= control target key end

     0   :  { %s976_s12 = smov 0   ;;  %s1140_s0 = inlined_call_operand.vmem [shape: bf16[512,16], index: 0, kind: input, shape index: {}]   ;;  %s1141_s1 = inlined_call_operand.vmem [shape: bf16[16,8], index: 1, kind: input, shape index: {}]   ;;  %s1142_s2 = inlined_call_operand.vmem [shape: f32[1,8], index: 2, kind: input, shape index: {}]   ;;  %s1143_s3 = inlined_call_operand.vmem [shape: bf16[512,8], index: 3, kind: output, shape index: {}]  }
   0x1 LB: > { %s761_s13 = sadd.s32 4294967295, %s954_s12   ;;  %p765_p0 = scmp.ge.s32.totalorder %s954_s12, 1  ;;  %s954_s12 = sphi %s976_s12, %s13_s12  }
   0x2   : > { %p138_p1 = scmp.lt.s32.totalorder %s954_s12, 3 }
   0x4   : > { %p139_p2 = pnand %p765_p0, %p138_p1 }
   0x5   : > { %s766_s16 = sshll.u32 (!%p139_p2), %s761_s13, 5 }
   0x6   : > { %142 = sbr.rel (%p139_p2) target bundleno = 247 (0xf7), region = 32  ;;  %p163_p3 = scmp.lt.s32.totalorder (!%p139_p2), %s766_s16, 63 }
   0xb   : > { %v931_v0 = vld [vmem:[%s1141_s1] sm:$0xff]   ;;  %s1145_s16 = smov (!%p163_p3, %s766_s16), 63  ;;  %vm302_vm0 = vcmask 130048   ;;  %vm672_vm1 = vcmask 60416  }
   0xc   : > { %887 = vmatprep.subr.bf16.mxu0 %v931_v0  ;;  %921 = vmatprep.subr.bf16.mxu1 %v931_v0  ;;  %s767_s17 = sshll.u32 %s1145_s16, 2  ;;  %v1032_v17 = vld [vmem:[%s1142_s2] ss:$0 sm:$0xff] }
   0xd   : > { %888 = vmatpush3.bf16.msra.mxu0 %v931_v0  ;;  %922 = vmatpush3.bf16.msra.mxu1 %v931_v0  ;;  %s995_s20 = scalar_lea.vmem %s1140_s0, %s767_s17  ;;  %s1042_s25 = scalar_lea.vmem %s1143_s3, %s767_s17 }
   0xe   : > { %v932_v1 = vld [vmem:[%s995_s20] sm:$0xff]   ;;  %v934_v3 = vld [vmem:[%s995_s20 + $0x8] sm:$0xff]   ;;  %v936_v5 = vld [vmem:[%s995_s20 + $0x10] sm:$0xff]  }
   0xf   : > { %v933_v2 = vld [vmem:[%s995_s20 + $0x40] sm:$0xff]   ;;  %889 = vmatprep.mubr.msk.bf16.mxu0 %vm302_vm0, %v932_v1  ;;  %v935_v4 = vld [vmem:[%s995_s20 + $0x48] sm:$0xff]   ;;  %v937_v6 = vld [vmem:[%s995_s20 + $0x50] sm:$0xff]  }
  0x10   : > { %905 = vmatprep.mubr.msk.bf16.mxu1 %vm302_vm0, %v933_v2  ;;  %890 = vmatmul.mubr.msk.bf16.vlgmr.msra.gmra.mxu0 %vm302_vm0, %v934_v3  ;;  %v938_v7 = vld [vmem:[%s995_s20 + $0x18] sm:$0xff]   ;;  %v940_v9 = vld [vmem:[%s995_s20 + $0x20] sm:$0xff]   ;;  %v942_v11 = vld [vmem:[%s995_s20 + $0x28] sm:$0xff]  }
  0x11   : > { %906 = vmatmul.mubr.msk.bf16.vlgmr.msra.gmra.mxu1 %vm302_vm0, %v935_v4  ;;  %893 = vmatprep.mubr.msk.bf16.mxu0 %vm302_vm0, %v936_v5  ;;  %v939_v8 = vld [vmem:[%s995_s20 + $0x58] sm:$0xff]   ;;  %v941_v10 = vld [vmem:[%s995_s20 + $0x60] sm:$0xff]   ;;  %v943_v12 = vld [vmem:[%s995_s20 + $0x68] sm:$0xff]  }
  0x12   : > { %909 = vmatprep.mubr.msk.bf16.mxu1 %vm302_vm0, %v937_v6  ;;  %v944_v13 = vld [vmem:[%s995_s20 + $0x30] sm:$0xff]   ;;  %v946_v15 = vld [vmem:[%s995_s20 + $0x38] sm:$0xff]  }
  0x13   : > { %v945_v14 = vld [vmem:[%s995_s20 + $0x70] sm:$0xff]   ;;  %v947_v16 = vld [vmem:[%s995_s20 + $0x78] sm:$0xff]  }
  0x18   : > { %894 = vmatmul.mubr.msk.bf16.gmra.mxu0 %vm302_vm0, %v938_v7 }
  0x19   : > { %910 = vmatmul.mubr.msk.bf16.gmra.mxu1 %vm302_vm0, %v939_v8  ;;  %897 = vmatprep.mubr.msk.bf16.mxu0 %vm302_vm0, %v940_v9 }
  0x1a   : > { %913 = vmatprep.mubr.msk.bf16.mxu1 %vm302_vm0, %v941_v10 }
  0x20   : > { %898 = vmatmul.mubr.msk.bf16.gmra.mxu0 %vm302_vm0, %v942_v11 }
  0x21   : > { %914 = vmatmul.mubr.msk.bf16.gmra.mxu1 %vm302_vm0, %v943_v12  ;;  %901 = vmatprep.mubr.msk.bf16.mxu0 %vm302_vm0, %v944_v13 }
  0x22   : > { %917 = vmatprep.mubr.msk.bf16.mxu1 %vm302_vm0, %v945_v14 }
  0x28   : > { %902 = vmatmul.mubr.msk.bf16.gmra.mxu0 %vm302_vm0, %v946_v15 }
  0x29   : > { %918 = vmatmul.mubr.msk.bf16.gmra.mxu1 %vm302_vm0, %v947_v16 }
  0xd0   : > { %v891_v18 = vpop.f32.mrf.mxu0 }
  0xd1   : > { %v394_v19 = vadd.f32 %v891_v18, %v1032_v17  ;;  %v907_v20 = vpop.f32.mrf.mxu1 }
  0xd2   : > { %v458_v21 = vadd.f32 %v907_v20, %v1032_v17  ;;  %v385_v22 = vpop.f32.mrf.mxu0 }
  0xd3   : > { %v514_v23 = vmax.f32 %v394_v19, 0.0  ;;  %v386_v24 = vadd.f32 %v1032_v17, %v385_v22  ;;  %v449_v25 = vpop.f32.mrf.mxu1 }
  0xd4   : > { %v530_v26 = vmax.f32 %v458_v21, 0.0  ;;  %v450_v27 = vadd.f32 %v1032_v17, %v449_v25  ;;  %v892_v28 = vpop.f32.mrf.mxu0 }
  0xd5   : > { %v840_v29 = vpack.c.bf16 %v514_v23, %v514_v23  ;;  %v512_v30 = vmax.f32 %v386_v24, 0.0  ;;  %v397_v31 = vadd.f32 %v892_v28, %v1032_v17  ;;  %v908_v32 = vpop.f32.mrf.mxu1 }
  0xd6   : > { %v856_v33 = vpack.c.bf16 %v530_v26, %v530_v26  ;;  %v528_v34 = vmax.f32 %v450_v27, 0.0  ;;  %v461_v35 = vadd.f32 %v908_v32, %v1032_v17  ;;  %v388_v36 = vpop.f32.mrf.mxu0 }
  0xd7   : > { %675 = vst.msk [vmem:[%s1042_s25 + $0x8] sm:$0xf] %vm672_vm1, %v840_v29  ;;  %v838_v37 = vpack.c.bf16 %v512_v30, %v512_v30  ;;  %v515_v38 = vmax.f32 %v397_v31, 0.0  ;;  %v389_v39 = vadd.f32 %v1032_v17, %v388_v36  ;;  %v452_v40 = vpop.f32.mrf.mxu1 }
  0xd8   : > { %691 = vst.msk [vmem:[%s1042_s25 + $0x48] sm:$0xf] %vm672_vm1, %v856_v33  ;;  %v854_v41 = vpack.c.bf16 %v528_v34, %v528_v34  ;;  %v531_v42 = vmax.f32 %v461_v35, 0.0  ;;  %v453_v43 = vadd.f32 %v1032_v17, %v452_v40  ;;  %v895_v44 = vpop.f32.mrf.mxu0 }
  0xd9   : > { %673 = vst.msk [vmem:[%s1042_s25] sm:$0xf] %vm672_vm1, %v838_v37  ;;  %v841_v45 = vpack.c.bf16 %v515_v38, %v515_v38  ;;  %v513_v46 = vmax.f32 %v389_v39, 0.0  ;;  %v410_v47 = vadd.f32 %v895_v44, %v1032_v17  ;;  %v911_v48 = vpop.f32.mrf.mxu1 }
  0xda   : > { %689 = vst.msk [vmem:[%s1042_s25 + $0x40] sm:$0xf] %vm672_vm1, %v854_v41  ;;  %v857_v49 = vpack.c.bf16 %v531_v42, %v531_v42  ;;  %v529_v50 = vmax.f32 %v453_v43, 0.0  ;;  %v474_v51 = vadd.f32 %v911_v48, %v1032_v17  ;;  %v401_v52 = vpop.f32.mrf.mxu0 }
  0xdb   : > { %676 = vst.msk [vmem:[%s1042_s25 + $0xc] sm:$0xf] %vm672_vm1, %v841_v45  ;;  %v839_v53 = vpack.c.bf16 %v513_v46, %v513_v46  ;;  %v518_v54 = vmax.f32 %v410_v47, 0.0  ;;  %v402_v55 = vadd.f32 %v1032_v17, %v401_v52  ;;  %v465_v56 = vpop.f32.mrf.mxu1 }
  0xdc   : > { %692 = vst.msk [vmem:[%s1042_s25 + $0x4c] sm:$0xf] %vm672_vm1, %v857_v49  ;;  %v855_v57 = vpack.c.bf16 %v529_v50, %v529_v50  ;;  %v534_v58 = vmax.f32 %v474_v51, 0.0  ;;  %v466_v59 = vadd.f32 %v1032_v17, %v465_v56  ;;  %v896_v60 = vpop.f32.mrf.mxu0 }
  0xdd   : > { %674 = vst.msk [vmem:[%s1042_s25 + $0x4] sm:$0xf] %vm672_vm1, %v839_v53  ;;  %v844_v61 = vpack.c.bf16 %v518_v54, %v518_v54  ;;  %v516_v62 = vmax.f32 %v402_v55, 0.0  ;;  %v413_v63 = vadd.f32 %v896_v60, %v1032_v17  ;;  %v912_v0 = vpop.f32.mrf.mxu1 }
  0xde   : > { %690 = vst.msk [vmem:[%s1042_s25 + $0x44] sm:$0xf] %vm672_vm1, %v855_v57  ;;  %v860_v1 = vpack.c.bf16 %v534_v58, %v534_v58  ;;  %v532_v2 = vmax.f32 %v466_v59, 0.0  ;;  %v477_v3 = vadd.f32 %v912_v0, %v1032_v17  ;;  %v404_v4 = vpop.f32.mrf.mxu0 }
  0xdf   : > { %679 = vst.msk [vmem:[%s1042_s25 + $0x18] sm:$0xf] %vm672_vm1, %v844_v61  ;;  %v842_v5 = vpack.c.bf16 %v516_v62, %v516_v62  ;;  %v519_v6 = vmax.f32 %v413_v63, 0.0  ;;  %v405_v7 = vadd.f32 %v1032_v17, %v404_v4  ;;  %v468_v8 = vpop.f32.mrf.mxu1 }
  0xe0   : > { %695 = vst.msk [vmem:[%s1042_s25 + $0x58] sm:$0xf] %vm672_vm1, %v860_v1  ;;  %v858_v9 = vpack.c.bf16 %v532_v2, %v532_v2  ;;  %v535_v10 = vmax.f32 %v477_v3, 0.0  ;;  %v469_v11 = vadd.f32 %v1032_v17, %v468_v8  ;;  %v899_v12 = vpop.f32.mrf.mxu0 }
  0xe1   : > { %677 = vst.msk [vmem:[%s1042_s25 + $0x10] sm:$0xf] %vm672_vm1, %v842_v5  ;;  %v845_v13 = vpack.c.bf16 %v519_v6, %v519_v6  ;;  %v517_v14 = vmax.f32 %v405_v7, 0.0  ;;  %v426_v15 = vadd.f32 %v899_v12, %v1032_v17  ;;  %v915_v16 = vpop.f32.mrf.mxu1 }
  0xe2   : > { %693 = vst.msk [vmem:[%s1042_s25 + $0x50] sm:$0xf] %vm672_vm1, %v858_v9  ;;  %v861_v18 = vpack.c.bf16 %v535_v10, %v535_v10  ;;  %v533_v19 = vmax.f32 %v469_v11, 0.0  ;;  %v490_v20 = vadd.f32 %v915_v16, %v1032_v17  ;;  %v417_v21 = vpop.f32.mrf.mxu0 }
  0xe3   : > { %680 = vst.msk [vmem:[%s1042_s25 + $0x1c] sm:$0xf] %vm672_vm1, %v845_v13  ;;  %v843_v22 = vpack.c.bf16 %v517_v14, %v517_v14  ;;  %v522_v23 = vmax.f32 %v426_v15, 0.0  ;;  %v418_v24 = vadd.f32 %v1032_v17, %v417_v21  ;;  %v481_v25 = vpop.f32.mrf.mxu1 }
  0xe4   : > { %696 = vst.msk [vmem:[%s1042_s25 + $0x5c] sm:$0xf] %vm672_vm1, %v861_v18  ;;  %v859_v26 = vpack.c.bf16 %v533_v19, %v533_v19  ;;  %v538_v27 = vmax.f32 %v490_v20, 0.0  ;;  %v482_v28 = vadd.f32 %v1032_v17, %v481_v25  ;;  %v900_v29 = vpop.f32.mrf.mxu0 }
  0xe5   : > { %678 = vst.msk [vmem:[%s1042_s25 + $0x14] sm:$0xf] %vm672_vm1, %v843_v22  ;;  %v848_v30 = vpack.c.bf16 %v522_v23, %v522_v23  ;;  %v520_v31 = vmax.f32 %v418_v24, 0.0  ;;  %v429_v32 = vadd.f32 %v900_v29, %v1032_v17  ;;  %v916_v33 = vpop.f32.mrf.mxu1 }
  0xe6   : > { %694 = vst.msk [vmem:[%s1042_s25 + $0x54] sm:$0xf] %vm672_vm1, %v859_v26  ;;  %v864_v34 = vpack.c.bf16 %v538_v27, %v538_v27  ;;  %v536_v35 = vmax.f32 %v482_v28, 0.0  ;;  %v493_v36 = vadd.f32 %v916_v33, %v1032_v17  ;;  %v420_v37 = vpop.f32.mrf.mxu0 }
  0xe7   : > { %683 = vst.msk [vmem:[%s1042_s25 + $0x28] sm:$0xf] %vm672_vm1, %v848_v30  ;;  %v846_v38 = vpack.c.bf16 %v520_v31, %v520_v31  ;;  %v523_v39 = vmax.f32 %v429_v32, 0.0  ;;  %v421_v40 = vadd.f32 %v1032_v17, %v420_v37  ;;  %v484_v41 = vpop.f32.mrf.mxu1 }
  0xe8   : > { %699 = vst.msk [vmem:[%s1042_s25 + $0x68] sm:$0xf] %vm672_vm1, %v864_v34  ;;  %v862_v42 = vpack.c.bf16 %v536_v35, %v536_v35  ;;  %v539_v43 = vmax.f32 %v493_v36, 0.0  ;;  %v485_v44 = vadd.f32 %v1032_v17, %v484_v41  ;;  %v903_v45 = vpop.f32.mrf.mxu0 }
  0xe9   : > { %681 = vst.msk [vmem:[%s1042_s25 + $0x20] sm:$0xf] %vm672_vm1, %v846_v38  ;;  %v849_v46 = vpack.c.bf16 %v523_v39, %v523_v39  ;;  %v521_v47 = vmax.f32 %v421_v40, 0.0  ;;  %v442_v48 = vadd.f32 %v903_v45, %v1032_v17  ;;  %v919_v49 = vpop.f32.mrf.mxu1 }
  0xea   : > { %697 = vst.msk [vmem:[%s1042_s25 + $0x60] sm:$0xf] %vm672_vm1, %v862_v42  ;;  %v865_v50 = vpack.c.bf16 %v539_v43, %v539_v43  ;;  %v537_v51 = vmax.f32 %v485_v44, 0.0  ;;  %v506_v52 = vadd.f32 %v919_v49, %v1032_v17  ;;  %v433_v53 = vpop.f32.mrf.mxu0 }
  0xeb   : > { %684 = vst.msk [vmem:[%s1042_s25 + $0x2c] sm:$0xf] %vm672_vm1, %v849_v46  ;;  %v847_v54 = vpack.c.bf16 %v521_v47, %v521_v47  ;;  %v526_v55 = vmax.f32 %v442_v48, 0.0  ;;  %v434_v56 = vadd.f32 %v1032_v17, %v433_v53  ;;  %v497_v57 = vpop.f32.mrf.mxu1 }
  0xec   : > { %700 = vst.msk [vmem:[%s1042_s25 + $0x6c] sm:$0xf] %vm672_vm1, %v865_v50  ;;  %v863_v58 = vpack.c.bf16 %v537_v51, %v537_v51  ;;  %v542_v59 = vmax.f32 %v506_v52, 0.0  ;;  %v498_v60 = vadd.f32 %v1032_v17, %v497_v57  ;;  %v904_v61 = vpop.f32.mrf.mxu0 }
  0xed   : > { %682 = vst.msk [vmem:[%s1042_s25 + $0x24] sm:$0xf] %vm672_vm1, %v847_v54  ;;  %v852_v62 = vpack.c.bf16 %v526_v55, %v526_v55  ;;  %v524_v63 = vmax.f32 %v434_v56, 0.0  ;;  %v445_v0 = vadd.f32 %v904_v61, %v1032_v17  ;;  %v920_v1 = vpop.f32.mrf.mxu1 }
  0xee   : > { %698 = vst.msk [vmem:[%s1042_s25 + $0x64] sm:$0xf] %vm672_vm1, %v863_v58  ;;  %v868_v2 = vpack.c.bf16 %v542_v59, %v542_v59  ;;  %v540_v3 = vmax.f32 %v498_v60, 0.0  ;;  %v509_v4 = vadd.f32 %v920_v1, %v1032_v17  ;;  %v436_v5 = vpop.f32.mrf.mxu0 }
  0xef   : > { %687 = vst.msk [vmem:[%s1042_s25 + $0x38] sm:$0xf] %vm672_vm1, %v852_v62  ;;  %v850_v6 = vpack.c.bf16 %v524_v63, %v524_v63  ;;  %v527_v7 = vmax.f32 %v445_v0, 0.0  ;;  %v437_v8 = vadd.f32 %v1032_v17, %v436_v5  ;;  %v500_v9 = vpop.f32.mrf.mxu1 }
  0xf0   : > { %703 = vst.msk [vmem:[%s1042_s25 + $0x78] sm:$0xf] %vm672_vm1, %v868_v2  ;;  %v866_v10 = vpack.c.bf16 %v540_v3, %v540_v3  ;;  %v543_v11 = vmax.f32 %v509_v4, 0.0  ;;  %v501_v12 = vadd.f32 %v1032_v17, %v500_v9 }
  0xf1   : > { %685 = vst.msk [vmem:[%s1042_s25 + $0x30] sm:$0xf] %vm672_vm1, %v850_v6  ;;  %v853_v13 = vpack.c.bf16 %v527_v7, %v527_v7  ;;  %v525_v14 = vmax.f32 %v437_v8, 0.0 }
  0xf2   : > { %701 = vst.msk [vmem:[%s1042_s25 + $0x70] sm:$0xf] %vm672_vm1, %v866_v10  ;;  %v869_v15 = vpack.c.bf16 %v543_v11, %v543_v11  ;;  %v541_v16 = vmax.f32 %v501_v12, 0.0 }
  0xf3   : > { %688 = vst.msk [vmem:[%s1042_s25 + $0x3c] sm:$0xf] %vm672_vm1, %v853_v13  ;;  %v851_v18 = vpack.c.bf16 %v525_v14, %v525_v14 }
  0xf4   : > { %704 = vst.msk [vmem:[%s1042_s25 + $0x7c] sm:$0xf] %vm672_vm1, %v869_v15  ;;  %v867_v19 = vpack.c.bf16 %v541_v16, %v541_v16 }
  0xf5   : > { %686 = vst.msk [vmem:[%s1042_s25 + $0x34] sm:$0xf] %vm672_vm1, %v851_v18 }
  0xf6   : > { %702 = vst.msk [vmem:[%s1042_s25 + $0x74] sm:$0xf] %vm672_vm1, %v867_v19 }
  0xf7 PF: > { %s13_s12 = sadd.s32 1, %s954_s12  }
  0xf8   : > { %p10_p4 = scmp.ge.s32.totalorder %s13_s12, 4  }
  0xfa   :  { %12 = sbr.rel (!%p10_p4) target bundleno = 1 (0x1), region = 62 }

// kernel: _lambda_.53
= control target key start
LH: loop header
LB: loop body
LE: loop exit
PB: predicated region body
PF: predicated region fallthrough
CT: control target
= control target key end

     0   :  { %s1601_s15 = smov 0   ;;  %s1863_s0 = inlined_call_operand.vmem [shape: bf16[512,72], index: 0, kind: input, shape index: {}]   ;;  %s1864_s1 = inlined_call_operand.vmem [shape: bf16[72,16], index: 1, kind: input, shape index: {}]   ;;  %s1865_s2 = inlined_call_operand.vmem [shape: f32[1,16], index: 2, kind: input, shape index: {}]   ;;  %s1866_s3 = inlined_call_operand.vmem [shape: bf16[512,16], index: 3, kind: input, shape index: {}]   ;;  %s1867_s4 = inlined_call_operand.vmem [shape: bf16[512,16], index: 4, kind: output, shape index: {}]  }
   0x1 LB: > { %s1110_s16 = sadd.s32 4294967295, %s1574_s15   ;;  %p1114_p0 = scmp.ge.s32.totalorder %s1574_s15, 1  ;;  %s1574_s15 = sphi %s1601_s15, %s14_s15  }
   0x2   : > { %p174_p1 = scmp.lt.s32.totalorder %s1574_s15, 3 }
   0x4   : > { %p175_p2 = pnand %p1114_p0, %p174_p1 }
   0x5   : > { %s1115_s21 = sshll.u32 (!%p175_p2), %s1110_s16, 5 }
   0x6   : > { %178 = sbr.rel (%p175_p2) target bundleno = 311 (0x137), region = 36  ;;  %p206_p3 = scmp.lt.s32.totalorder (!%p175_p2), %s1115_s21, 63 }
   0xb   : > { %v1419_v0 = vld [vmem:[%s1864_s1 + $0x20] ss:$0 sps:$4 sm:$0xff]   ;;  %vm492_vm0 = vcmask 1043456   ;;  %v1420_v1 = vld [vmem:[%s1864_s1 + $0x18] sm:$0xff]   ;;  %v1421_v3 = vld [vmem:[%s1864_s1 + $0x10] sm:$0xff]   ;;  %s1869_s21 = smov (!%p206_p3, %s1115_s21), 63 }
   0xc   : > { %1409 = vmatprep.subr.msk.bf16.mxu0 %vm492_vm0, %v1419_v0  ;;  %1410 = vmatprep.subr.msk.bf16.mxu1 %vm492_vm0, %v1419_v0  ;;  %v494_v2 = vsel %vm492_vm0, %v1419_v0, 0  ;;  %v1422_v4 = vld [vmem:[%s1864_s1 + $0x8] sm:$0xff]   ;;  %s1621_s26 = sshll.u32 %s1869_s21, 2  ;;  %vm443_vm1 = vcmask 588800   ;;  %v1423_v7 = vld [vmem:[%s1864_s1] sm:$0xff]   ;;  %vm1009_vm2 = vcmask 125952  }
   0xd   : > { %1358 = vmatpush3.bf16.msra.mxu0 %v494_v2  ;;  %1404 = vmatpush3.bf16.msra.mxu1 %v494_v2  ;;  %s1627_s29 = scalar_lea.vmem %s1863_s0, %s1621_s26  ;;  %v1667_v22 = vld [vmem:[%s1865_s2] ss:$0 sm:$0xff]  ;;  %s1685_s10 = scalar_lea.vmem %s1866_s3, %s1621_s26 }
   0xe   : > { %1359 = vmatprep.subr.bf16.mxu0 %v1420_v1  ;;  %1400 = vmatprep.subr.bf16.mxu1 %v1420_v1  ;;  %v1424_v5 = vld [vmem:[%s1627_s29] sm:$0xff]   ;;  %v1426_v8 = vld [vmem:[%s1627_s29 + $0x8] sm:$0xff]   ;;  %v1428_v10 = vld [vmem:[%s1627_s29 + $0x10] sm:$0xff]   ;;  %s1751_s13 = scalar_lea.vmem %s1867_s4, %s1621_s26 }
   0xf   : > { %v1425_v6 = vld [vmem:[%s1627_s29 + $0x40] sm:$0xff]   ;;  %1367 = vmatprep.mubr.msk.bf16.mxu0 %vm443_vm1, %v1424_v5  ;;  %v1427_v9 = vld [vmem:[%s1627_s29 + $0x48] sm:$0xff]   ;;  %v1429_v11 = vld [vmem:[%s1627_s29 + $0x50] sm:$0xff]  }
  0x10   : > { %1383 = vmatprep.mubr.msk.bf16.mxu1 %vm443_vm1, %v1425_v6  ;;  %v1430_v12 = vld [vmem:[%s1627_s29 + $0x18] sm:$0xff]   ;;  %v1432_v14 = vld [vmem:[%s1627_s29 + $0x20] sm:$0xff]   ;;  %v1434_v16 = vld [vmem:[%s1627_s29 + $0x28] sm:$0xff]  }
  0x11   : > { %1360 = vmatpush3.bf16.msra.mxu0 %v1420_v1  ;;  %1405 = vmatpush3.bf16.msra.mxu1 %v1420_v1  ;;  %v1431_v13 = vld [vmem:[%s1627_s29 + $0x58] sm:$0xff]   ;;  %v1433_v15 = vld [vmem:[%s1627_s29 + $0x60] sm:$0xff]   ;;  %v1435_v17 = vld [vmem:[%s1627_s29 + $0x68] sm:$0xff]  }
  0x12   : > { %1361 = vmatprep.subr.bf16.mxu0 %v1421_v3  ;;  %1401 = vmatprep.subr.bf16.mxu1 %v1421_v3  ;;  %v1436_v18 = vld [vmem:[%s1627_s29 + $0x30] sm:$0xff]   ;;  %v1438_v20 = vld [vmem:[%s1627_s29 + $0x38] sm:$0xff]   ;;  %v1695_v5 = vld [vmem:[%s1685_s10 + $0x48] sm:$0xff]  }
  0x13   : > { %v1437_v19 = vld [vmem:[%s1627_s29 + $0x70] sm:$0xff]   ;;  %v1439_v21 = vld [vmem:[%s1627_s29 + $0x78] sm:$0xff]  }
  0x15   : > { %1362 = vmatpush3.bf16.msra.mxu0 %v1421_v3  ;;  %1406 = vmatpush3.bf16.msra.mxu1 %v1421_v3 }
  0x16   : > { %1363 = vmatprep.subr.bf16.mxu0 %v1422_v4  ;;  %1402 = vmatprep.subr.bf16.mxu1 %v1422_v4 }
  0x19   : > { %1364 = vmatpush3.bf16.msra.mxu0 %v1422_v4  ;;  %1407 = vmatpush3.bf16.msra.mxu1 %v1422_v4  ;;  %v1692_v4 = vld [vmem:[%s1685_s10 + $0x8] sm:$0xff]  }
  0x1a   : > { %1365 = vmatprep.subr.bf16.mxu0 %v1423_v7  ;;  %1403 = vmatprep.subr.bf16.mxu1 %v1423_v7 }
  0x1d   : > { %1366 = vmatpush3.bf16.msra.mxu0 %v1423_v7  ;;  %1408 = vmatpush3.bf16.msra.mxu1 %v1423_v7 }
  0x20   : > { %1368 = vmatmul.mubr.msk.bf16.vlgmr.msra.gmra.mxu0 %vm443_vm1, %v1426_v8  ;;  %1384 = vmatmul.mubr.msk.bf16.vlgmr.msra.gmra.mxu1 %vm443_vm1, %v1427_v9  ;;  %v1698_v9 = vld [vmem:[%s1685_s10] sm:$0xff]  }
  0x21   : > { %1371 = vmatprep.mubr.msk.bf16.mxu0 %vm443_vm1, %v1428_v10  ;;  %1387 = vmatprep.mubr.msk.bf16.mxu1 %vm443_vm1, %v1429_v11  ;;  %v1701_v10 = vld [vmem:[%s1685_s10 + $0x40] sm:$0xff]  }
  0x28   : > { %1372 = vmatmul.mubr.msk.bf16.gmra.mxu0 %vm443_vm1, %v1430_v12  ;;  %1388 = vmatmul.mubr.msk.bf16.gmra.mxu1 %vm443_vm1, %v1431_v13 }
  0x29   : > { %1375 = vmatprep.mubr.msk.bf16.mxu0 %vm443_vm1, %v1432_v14  ;;  %1391 = vmatprep.mubr.msk.bf16.mxu1 %vm443_vm1, %v1433_v15 }
  0x30   : > { %1376 = vmatmul.mubr.msk.bf16.gmra.mxu0 %vm443_vm1, %v1434_v16  ;;  %1392 = vmatmul.mubr.msk.bf16.gmra.mxu1 %vm443_vm1, %v1435_v17  ;;  %v1263_v17 = vunpack.c.l.bf16 %v1692_v4 }
  0x31   : > { %1379 = vmatprep.mubr.msk.bf16.mxu0 %vm443_vm1, %v1436_v18  ;;  %1395 = vmatprep.mubr.msk.bf16.mxu1 %vm443_vm1, %v1437_v19  ;;  %v1295_v19 = vunpack.c.l.bf16 %v1695_v5 }
  0x38   : > { %1380 = vmatmul.mubr.msk.bf16.gmra.mxu0 %vm443_vm1, %v1438_v20  ;;  %1396 = vmatmul.mubr.msk.bf16.gmra.mxu1 %vm443_vm1, %v1439_v21 }
  0xe0   : > { %v1369_v23 = vpop.f32.mrf.mxu0  ;;  %v1385_v24 = vpop.f32.mrf.mxu1 }
  0xe1   : > { %v539_v25 = vadd.f32 %v1369_v23, %v1667_v22  ;;  %v603_v26 = vadd.f32 %v1385_v24, %v1667_v22  ;;  %v1259_v23 = vunpack.c.l.bf16 %v1698_v9  ;;  %v1291_v24 = vunpack.c.l.bf16 %v1701_v10 }
  0xe2   : > { %v530_v27 = vpop.f32.mrf.mxu0  ;;  %v594_v28 = vpop.f32.mrf.mxu1 }
  0xe3   : > { %v1161_v29 = vmul.f32 -1.442695, %v539_v25  ;;  %v1177_v30 = vmul.f32 -1.442695, %v603_v26  ;;  %v531_v31 = vadd.f32 %v1667_v22, %v530_v27  ;;  %v595_v32 = vadd.f32 %v1667_v22, %v594_v28  ;;  %v1710_v25 = vld [vmem:[%s1685_s10 + $0x18] sm:$0xff]  }
  0xe4   : > { %v1370_v33 = vpop.f32.mrf.mxu0  ;;  %v1386_v34 = vpop.f32.mrf.mxu1  ;;  %v1713_v26 = vld [vmem:[%s1685_s10 + $0x58] sm:$0xff]  }
  0xe5   : > { %1440 = vpow2.f32 %v1161_v29  ;;  %v1159_v35 = vmul.f32 -1.442695, %v531_v31  ;;  %v1175_v36 = vmul.f32 -1.442695, %v595_v32  ;;  %v542_v37 = vadd.f32 %v1370_v33, %v1667_v22  ;;  %v1718_v32 = vld [vmem:[%s1685_s10 + $0x10] sm:$0xff]  }
  0xe6   : > { %1442 = vpow2.f32 %v1177_v30  ;;  %v606_v38 = vadd.f32 %v1386_v34, %v1667_v22  ;;  %v533_v39 = vpop.f32.mrf.mxu0  ;;  %v597_v40 = vpop.f32.mrf.mxu1  ;;  %v1264_v30 = vunpack.c.h.bf16 %v1692_v4  ;;  %v1296_v31 = vunpack.c.h.bf16 %v1695_v5 }
  0xe7   : > { %1444 = vpow2.f32 %v1159_v35  ;;  %v1162_v41 = vmul.f32 -1.442695, %v542_v37  ;;  %v534_v42 = vadd.f32 %v1667_v22, %v533_v39  ;;  %v598_v43 = vadd.f32 %v1667_v22, %v597_v40 }
  0xe8   : > { %1446 = vpow2.f32 %v1175_v36  ;;  %v1178_v44 = vmul.f32 -1.442695, %v606_v38  ;;  %v1373_v45 = vpop.f32.mrf.mxu0  ;;  %v1389_v46 = vpop.f32.mrf.mxu1  ;;  %v1260_v36 = vunpack.c.h.bf16 %v1698_v9  ;;  %v1292_v37 = vunpack.c.h.bf16 %v1701_v10  ;;  %v1723_v38 = vld [vmem:[%s1685_s10 + $0x50] sm:$0xff]  }
  0xe9   : > { %1448 = vpow2.f32 %v1162_v41  ;;  %v1160_v47 = vmul.f32 -1.442695, %v534_v42  ;;  %v1176_v48 = vmul.f32 -1.442695, %v598_v43  ;;  %v555_v49 = vadd.f32 %v1373_v45, %v1667_v22 }
  0xea   : > { %1450 = vpow2.f32 %v1178_v44  ;;  %v619_v50 = vadd.f32 %v1389_v46, %v1667_v22  ;;  %v546_v51 = vpop.f32.mrf.mxu0  ;;  %v610_v52 = vpop.f32.mrf.mxu1  ;;  %v1271_v41 = vunpack.c.l.bf16 %v1710_v25  ;;  %v1303_v42 = vunpack.c.l.bf16 %v1713_v26 }
  0xeb   : > { %1452 = vpow2.f32 %v1160_v47  ;;  %v1165_v53 = vmul.f32 -1.442695, %v555_v49  ;;  %v547_v54 = vadd.f32 %v1667_v22, %v546_v51  ;;  %v611_v55 = vadd.f32 %v1667_v22, %v610_v52 }
  0xec   : > { %1454 = vpow2.f32 %v1176_v48  ;;  %v1181_v56 = vmul.f32 -1.442695, %v619_v50  ;;  %v1374_v57 = vpop.f32.mrf.mxu0  ;;  %v1390_v58 = vpop.f32.mrf.mxu1  ;;  %v1267_v45 = vunpack.c.l.bf16 %v1718_v32  ;;  %v1299_v50 = vunpack.c.l.bf16 %v1723_v38 }
  0xed   : > { %1456 = vpow2.f32 %v1165_v53  ;;  %v1163_v59 = vmul.f32 -1.442695, %v547_v54  ;;  %v1179_v60 = vmul.f32 -1.442695, %v611_v55  ;;  %v558_v61 = vadd.f32 %v1374_v57, %v1667_v22 }
  0xee   : > { %1458 = vpow2.f32 %v1181_v56  ;;  %v622_v62 = vadd.f32 %v1390_v58, %v1667_v22  ;;  %v549_v63 = vpop.f32.mrf.mxu0  ;;  %v613_v0 = vpop.f32.mrf.mxu1  ;;  %v1272_v51 = vunpack.c.h.bf16 %v1710_v25  ;;  %v1304_v55 = vunpack.c.h.bf16 %v1713_v26 }
  0xef   : > { %1460 = vpow2.f32 %v1163_v59  ;;  %v1166_v1 = vmul.f32 -1.442695, %v558_v61  ;;  %v550_v2 = vadd.f32 %v1667_v22, %v549_v63  ;;  %v614_v3 = vadd.f32 %v1667_v22, %v613_v0 }
  0xf0   : > { %1462 = vpow2.f32 %v1179_v60  ;;  %v1182_v6 = vmul.f32 -1.442695, %v622_v62  ;;  %v1377_v7 = vpop.f32.mrf.mxu0  ;;  %v1393_v8 = vpop.f32.mrf.mxu1  ;;  %v1268_v59 = vunpack.c.h.bf16 %v1718_v32  ;;  %v1300_v63 = vunpack.c.h.bf16 %v1723_v38 }
  0xf1   : > { %1464 = vpow2.f32 %v1166_v1  ;;  %v1164_v11 = vmul.f32 -1.442695, %v550_v2  ;;  %v1180_v12 = vmul.f32 -1.442695, %v614_v3  ;;  %v571_v46 = vadd.f32 %v1377_v7, %v1667_v22 }
  0xf2   : > { %v1441_v13 = vpop.eup %1440  ;;  %1466 = vpow2.f32 %v1182_v6  ;;  %v562_v14 = vpop.f32.mrf.mxu0  ;;  %v635_v56 = vadd.f32 %v1393_v8, %v1667_v22 }
  0xf3   : > { %v1703_v15 = vpop.f32.mrf.mxu1  ;;  %v1443_v16 = vpop.eup %1442  ;;  %v755_v18 = vadd.f32 1.0, %v1441_v13  ;;  %1468 = vpow2.f32 %v1164_v11  ;;  %v563_v60 = vadd.f32 %v1667_v22, %v562_v14  ;;  %v1169_v0 = vmul.f32 -1.442695, %v571_v46 }
  0xf4   : > { %v1445_v20 = vpop.eup %1444  ;;  %v771_v21 = vadd.f32 1.0, %v1443_v16  ;;  %1470 = vpow2.f32 %v1180_v12  ;;  %v1378_v27 = vpop.f32.mrf.mxu0  ;;  %v627_v6 = vadd.f32 %v1667_v22, %v1703_v15  ;;  %v1185_v13 = vmul.f32 -1.442695, %v635_v56 }
  0xf5   : > { %v1447_v28 = vpop.eup %1446  ;;  %1472 = vrcp.f32 %v755_v18  ;;  %v753_v29 = vadd.f32 1.0, %v1445_v20  ;;  %v1394_v33 = vpop.f32.mrf.mxu1  ;;  %v574_v7 = vadd.f32 %v1378_v27, %v1667_v22  ;;  %v1167_v20 = vmul.f32 -1.442695, %v563_v60 }
  0xf6   : > { %v1449_v34 = vpop.eup %1448  ;;  %1474 = vrcp.f32 %v771_v21  ;;  %v769_v35 = vadd.f32 1.0, %v1447_v28  ;;  %v565_v47 = vpop.f32.mrf.mxu0  ;;  %v638_v14 = vadd.f32 %v1394_v33, %v1667_v22 }
  0xf7   : > { %v1451_v39 = vpop.eup %1450  ;;  %1476 = vrcp.f32 %v753_v29  ;;  %v756_v40 = vadd.f32 1.0, %v1449_v34  ;;  %v629_v52 = vpop.f32.mrf.mxu1  ;;  %v566_v21 = vadd.f32 %v1667_v22, %v565_v47  ;;  %v1170_v33 = vmul.f32 -1.442695, %v574_v7 }
  0xf8   : > { %v1453_v43 = vpop.eup %1452  ;;  %1478 = vrcp.f32 %v769_v35  ;;  %v772_v44 = vadd.f32 1.0, %v1451_v39  ;;  %v1381_v1 = vpop.f32.mrf.mxu0  ;;  %v630_v15 = vadd.f32 %v1667_v22, %v629_v52 }
  0xf9   : > { %v1455_v48 = vpop.eup %1454  ;;  %1480 = vrcp.f32 %v756_v40  ;;  %v754_v49 = vadd.f32 1.0, %v1453_v43  ;;  %v1397_v8 = vpop.f32.mrf.mxu1  ;;  %v587_v27 = vadd.f32 %v1381_v1, %v1667_v22  ;;  %v1183_v40 = vmul.f32 -1.442695, %v627_v6 }
  0xfa   : > { %v1457_v53 = vpop.eup %1456  ;;  %1482 = vrcp.f32 %v772_v44  ;;  %v770_v54 = vadd.f32 1.0, %v1455_v48  ;;  %v578_v34 = vpop.f32.mrf.mxu0  ;;  %v1186_v48 = vmul.f32 -1.442695, %v638_v14  ;;  %v651_v47 = vadd.f32 %v1397_v8, %v1667_v22 }
  0xfb   : > { %v1459_v57 = vpop.eup %1458  ;;  %1484 = vrcp.f32 %v754_v49  ;;  %v759_v58 = vadd.f32 1.0, %v1457_v53  ;;  %v642_v43 = vpop.f32.mrf.mxu1  ;;  %v1168_v53 = vmul.f32 -1.442695, %v566_v21  ;;  %v1173_v60 = vmul.f32 -1.442695, %v587_v27 }
  0xfc   : > { %v1461_v61 = vpop.eup %1460  ;;  %1486 = vrcp.f32 %v770_v54  ;;  %v775_v62 = vadd.f32 1.0, %v1459_v57  ;;  %v579_v54 = vadd.f32 %v1667_v22, %v578_v34  ;;  %v1189_v8 = vmul.f32 -1.442695, %v651_v47 }
  0xfd   : > { %v1463_v2 = vpop.eup %1462  ;;  %1488 = vrcp.f32 %v759_v58  ;;  %v757_v3 = vadd.f32 1.0, %v1461_v61  ;;  %v1184_v58 = vmul.f32 -1.442695, %v630_v15  ;;  %v1382_v61 = vpop.f32.mrf.mxu0 }
  0xfe   : > { %v1465_v11 = vpop.eup %1464  ;;  %1490 = vrcp.f32 %v775_v62  ;;  %v773_v12 = vadd.f32 1.0, %v1463_v2  ;;  %v643_v2 = vadd.f32 %v1667_v22, %v642_v43 }
  0xff   : > { %v1467_v16 = vpop.eup %1466  ;;  %1492 = vrcp.f32 %v757_v3  ;;  %v760_v18 = vadd.f32 1.0, %v1465_v11  ;;  %v1398_v3 = vpop.f32.mrf.mxu1 }
 0x100   : > { %v1469_v28 = vpop.eup %1468  ;;  %1494 = vrcp.f32 %v773_v12  ;;  %v776_v29 = vadd.f32 1.0, %v1467_v16  ;;  %v654_v15 = vadd.f32 %v1398_v3, %v1667_v22 }
 0x101   : > { %v1471_v35 = vpop.eup %1470  ;;  %1496 = vrcp.f32 %v760_v18  ;;  %v758_v39 = vadd.f32 1.0, %v1469_v28  ;;  %v581_v18 = vpop.f32.mrf.mxu0 }
 0x102   : > { %v1473_v44 = vpop.eup %1472  ;;  %1498 = vrcp.f32 %v776_v29  ;;  %v774_v46 = vadd.f32 1.0, %v1471_v35  ;;  %v645_v28 = vpop.f32.mrf.mxu1  ;;  %v582_v34 = vadd.f32 %v1667_v22, %v581_v18  ;;  %v1333_v18 = vld [vmem:[%s1685_s10 + $0x68] sm:$0xff]  }
 0x103   : > { %v1475_v49 = vpop.eup %1474  ;;  %v851_v52 = vmul.f32 %v1473_v44, %v1263_v17  ;;  %1500 = vrcp.f32 %v758_v39  ;;  %v646_v39 = vadd.f32 %v1667_v22, %v645_v28 }
 0x104   : > { %v1477_v56 = vpop.eup %1476  ;;  %v867_v57 = vmul.f32 %v1475_v49, %v1295_v19  ;;  %1502 = vrcp.f32 %v774_v46  ;;  %v1172_v49 = vmul.f32 -1.442695, %v582_v34 }
 0x105   : > { %v1479_v62 = vpop.eup %1478  ;;  %v1227_v17 = vpack.c.bf16 %v851_v52, %v851_v52  ;;  %v849_v1 = vmul.f32 %v1477_v56, %v1259_v23  ;;  %1504 = vpow2.f32 %v1169_v0  ;;  %v1171_v0 = vmul.f32 -1.442695, %v579_v54 }
 0x106   : > { %v1481_v6 = vpop.eup %1480  ;;  %v1243_v7 = vpack.c.bf16 %v867_v57, %v867_v57  ;;  %v865_v19 = vmul.f32 %v1479_v62, %v1291_v24  ;;  %1506 = vpow2.f32 %v1185_v13  ;;  %v590_v13 = vadd.f32 %v1382_v61, %v1667_v22 }
 0x107   : > { %v1483_v11 = vpop.eup %1482  ;;  %1012 = vst.msk [vmem:[%s1751_s13 + $0x8] sm:$0xf] %vm1009_vm2, %v1227_v17  ;;  %v1225_v12 = vpack.c.bf16 %v849_v1, %v849_v1  ;;  %v852_v23 = vmul.f32 %v1481_v6, %v1264_v30  ;;  %1508 = vpow2.f32 %v1167_v20  ;;  %v1187_v20 = vmul.f32 -1.442695, %v643_v2 }
 0x108   : > { %v1485_v14 = vpop.eup %1484  ;;  %1028 = vst.msk [vmem:[%s1751_s13 + $0x48] sm:$0xf] %vm1009_vm2, %v1243_v7  ;;  %v1241_v16 = vpack.c.bf16 %v865_v19, %v865_v19  ;;  %v868_v24 = vmul.f32 %v1483_v11, %v1296_v31  ;;  %1510 = vpow2.f32 %v1183_v40  ;;  %v1174_v43 = vmul.f32 -1.442695, %v590_v13 }
 0x109   : > { %v1487_v21 = vpop.eup %1486  ;;  %1010 = vst.msk [vmem:[%s1751_s13] sm:$0xf] %vm1009_vm2, %v1225_v12  ;;  %v1228_v4 = vpack.c.bf16 %v852_v23, %v852_v23  ;;  %v850_v30 = vmul.f32 %v1485_v14, %v1260_v36  ;;  %1512 = vpow2.f32 %v1170_v33  ;;  %v1190_v22 = vmul.f32 -1.442695, %v654_v15 }
 0x10a   : > { %v1489_v29 = vpop.eup %1488  ;;  %1026 = vst.msk [vmem:[%s1751_s13 + $0x40] sm:$0xf] %vm1009_vm2, %v1241_v16  ;;  %v1244_v5 = vpack.c.bf16 %v868_v24, %v868_v24  ;;  %v866_v31 = vmul.f32 %v1487_v21, %v1292_v37  ;;  %1514 = vpow2.f32 %v1186_v48  ;;  %v1188_v54 = vmul.f32 -1.442695, %v646_v39  ;;  %v1325_v16 = vld [vmem:[%s1685_s10 + $0x28] sm:$0xff]  }
 0x10b   : > { %v1491_v27 = vpop.eup %1490  ;;  %1013 = vst.msk [vmem:[%s1751_s13 + $0xc] sm:$0xf] %vm1009_vm2, %v1228_v4  ;;  %v1226_v9 = vpack.c.bf16 %v850_v30, %v850_v30  ;;  %v855_v36 = vmul.f32 %v1489_v29, %v1271_v41  ;;  %1516 = vpow2.f32 %v1168_v53  ;;  %v1324_v30 = vld [vmem:[%s1685_s10 + $0x20] sm:$0xff]   ;;  %v1279_v29 = vunpack.c.l.bf16 %v1325_v16 }
 0x10c   : > { %v1493_v35 = vpop.eup %1492  ;;  %1029 = vst.msk [vmem:[%s1751_s13 + $0x4c] sm:$0xf] %vm1009_vm2, %v1244_v5  ;;  %v1242_v10 = vpack.c.bf16 %v866_v31, %v866_v31  ;;  %v871_v37 = vmul.f32 %v1491_v27, %v1303_v42  ;;  %1518 = vpow2.f32 %v1184_v58  ;;  %v1332_v5 = vld [vmem:[%s1685_s10 + $0x60] sm:$0xff]   ;;  %v1311_v27 = vunpack.c.l.bf16 %v1333_v18 }
 0x10d   : > { %v1495_v40 = vpop.eup %1494  ;;  %1011 = vst.msk [vmem:[%s1751_s13 + $0x4] sm:$0xf] %vm1009_vm2, %v1226_v9  ;;  %v1231_v33 = vpack.c.bf16 %v855_v36, %v855_v36  ;;  %v853_v41 = vmul.f32 %v1493_v35, %v1267_v45  ;;  %1520 = vpow2.f32 %v1173_v60  ;;  %v1275_v34 = vunpack.c.l.bf16 %v1324_v30 }
 0x10e   : > { %v1497_v44 = vpop.eup %1496  ;;  %1027 = vst.msk [vmem:[%s1751_s13 + $0x44] sm:$0xf] %vm1009_vm2, %v1242_v10  ;;  %v1247_v46 = vpack.c.bf16 %v871_v37, %v871_v37  ;;  %v869_v42 = vmul.f32 %v1495_v40, %v1299_v50  ;;  %1522 = vpow2.f32 %v1189_v8  ;;  %v1307_v37 = vunpack.c.l.bf16 %v1332_v5 }
 0x10f   : > { %v1499_v48 = vpop.eup %1498  ;;  %1016 = vst.msk [vmem:[%s1751_s13 + $0x18] sm:$0xf] %vm1009_vm2, %v1231_v33  ;;  %v1229_v47 = vpack.c.bf16 %v853_v41, %v853_v41  ;;  %v856_v45 = vmul.f32 %v1497_v44, %v1272_v51  ;;  %1524 = vpow2.f32 %v1171_v0  ;;  %v1280_v41 = vunpack.c.h.bf16 %v1325_v16 }
 0x110   : > { %v1501_v52 = vpop.eup %1500  ;;  %1032 = vst.msk [vmem:[%s1751_s13 + $0x58] sm:$0xf] %vm1009_vm2, %v1247_v46  ;;  %v1245_v53 = vpack.c.bf16 %v869_v42, %v869_v42  ;;  %v872_v50 = vmul.f32 %v1499_v48, %v1304_v55  ;;  %1526 = vpow2.f32 %v1187_v20  ;;  %v1312_v46 = vunpack.c.h.bf16 %v1333_v18  ;;  %v1327_v42 = vld [vmem:[%s1685_s10 + $0x38] sm:$0xff]  }
 0x111   : > { %v1503_v56 = vpop.eup %1502  ;;  %1014 = vst.msk [vmem:[%s1751_s13 + $0x10] sm:$0xf] %vm1009_vm2, %v1229_v47  ;;  %v1232_v57 = vpack.c.bf16 %v856_v45, %v856_v45  ;;  %v854_v25 = vmul.f32 %v1501_v52, %v1268_v59  ;;  %1528 = vpow2.f32 %v1174_v43  ;;  %v1276_v45 = vunpack.c.h.bf16 %v1324_v30 }
 0x112   : > { %v1505_v51 = vpop.eup %1504  ;;  %1030 = vst.msk [vmem:[%s1751_s13 + $0x50] sm:$0xf] %vm1009_vm2, %v1245_v53  ;;  %v1248_v58 = vpack.c.bf16 %v872_v50, %v872_v50  ;;  %v870_v26 = vmul.f32 %v1503_v56, %v1300_v63  ;;  %1530 = vpow2.f32 %v1190_v22  ;;  %v1326_v56 = vld [vmem:[%s1685_s10 + $0x30] sm:$0xff]  }
 0x113   : > { %v1507_v55 = vpop.eup %1506  ;;  %1017 = vst.msk [vmem:[%s1751_s13 + $0x1c] sm:$0xf] %vm1009_vm2, %v1232_v57  ;;  %v1230_v60 = vpack.c.bf16 %v854_v25, %v854_v25  ;;  %v763_v61 = vadd.f32 1.0, %v1505_v51  ;;  %1532 = vpow2.f32 %v1172_v49  ;;  %v1335_v49 = vld [vmem:[%s1685_s10 + $0x78] sm:$0xff]  }
 0x114   : > { %v1509_v62 = vpop.eup %1508  ;;  %1033 = vst.msk [vmem:[%s1751_s13 + $0x5c] sm:$0xf] %vm1009_vm2, %v1248_v58  ;;  %v1246_v32 = vpack.c.bf16 %v870_v26, %v870_v26  ;;  %v779_v59 = vadd.f32 1.0, %v1507_v55  ;;  %1534 = vpow2.f32 %v1188_v54  ;;  %v1308_v54 = vunpack.c.h.bf16 %v1332_v5  ;;  %v1334_v26 = vld [vmem:[%s1685_s10 + $0x70] sm:$0xff]  }
 0x115   : > { %v1511_v17 = vpop.eup %1510  ;;  %1015 = vst.msk [vmem:[%s1751_s13 + $0x14] sm:$0xf] %vm1009_vm2, %v1230_v60  ;;  %1536 = vrcp.f32 %v763_v61  ;;  %v761_v38 = vadd.f32 1.0, %v1509_v62  ;;  %v1287_v58 = vunpack.c.l.bf16 %v1327_v42  ;;  %v1319_v62 = vunpack.c.l.bf16 %v1335_v49 }
 0x116   : > { %v1513_v63 = vpop.eup %1512  ;;  %1031 = vst.msk [vmem:[%s1751_s13 + $0x54] sm:$0xf] %vm1009_vm2, %v1246_v32  ;;  %1538 = vrcp.f32 %v779_v59  ;;  %v777_v1 = vadd.f32 1.0, %v1511_v17  ;;  %v1316_v30 = vunpack.c.h.bf16 %v1334_v26 }
 0x117   : > { %v1515_v2 = vpop.eup %1514  ;;  %1540 = vrcp.f32 %v761_v38  ;;  %v764_v3 = vadd.f32 1.0, %v1513_v63  ;;  %v1283_v38 = vunpack.c.l.bf16 %v1326_v56 }
 0x118   : > { %v1517_v6 = vpop.eup %1516  ;;  %1542 = vrcp.f32 %v777_v1  ;;  %v780_v7 = vadd.f32 1.0, %v1515_v2 }
 0x119   : > { %v1519_v19 = vpop.eup %1518  ;;  %1544 = vrcp.f32 %v764_v3  ;;  %v762_v8 = vadd.f32 1.0, %v1517_v6  ;;  %v1315_v3 = vunpack.c.l.bf16 %v1334_v26 }
 0x11a   : > { %v1521_v11 = vpop.eup %1520  ;;  %1546 = vrcp.f32 %v780_v7  ;;  %v778_v12 = vadd.f32 1.0, %v1519_v19 }
 0x11b   : > { %v1523_v23 = vpop.eup %1522  ;;  %1548 = vrcp.f32 %v762_v8  ;;  %v767_v0 = vadd.f32 1.0, %v1521_v11  ;;  %v1288_v8 = vunpack.c.h.bf16 %v1327_v42 }
 0x11c   : > { %v1525_v14 = vpop.eup %1524  ;;  %1550 = vrcp.f32 %v778_v12  ;;  %v783_v24 = vadd.f32 1.0, %v1523_v23 }
 0x11d   : > { %v1527_v13 = vpop.eup %1526  ;;  %1552 = vrcp.f32 %v767_v0  ;;  %v765_v21 = vadd.f32 1.0, %v1525_v14  ;;  %v1320_v0 = vunpack.c.h.bf16 %v1335_v49 }
 0x11e   : > { %v1529_v4 = vpop.eup %1528  ;;  %1554 = vrcp.f32 %v783_v24  ;;  %v781_v20 = vadd.f32 1.0, %v1527_v13  ;;  %v1284_v13 = vunpack.c.h.bf16 %v1326_v56 }
 0x11f   : > { %v1531_v28 = vpop.eup %1530  ;;  %1556 = vrcp.f32 %v765_v21  ;;  %v768_v31 = vadd.f32 1.0, %v1529_v4 }
 0x120   : > { %v1533_v15 = vpop.eup %1532  ;;  %1558 = vrcp.f32 %v781_v20  ;;  %v784_v9 = vadd.f32 1.0, %v1531_v28 }
 0x121   : > { %v1535_v36 = vpop.eup %1534  ;;  %1560 = vrcp.f32 %v768_v31  ;;  %v766_v35 = vadd.f32 1.0, %v1533_v15 }
 0x122   : > { %v1537_v10 = vpop.eup %1536  ;;  %1562 = vrcp.f32 %v784_v9  ;;  %v782_v39 = vadd.f32 1.0, %v1535_v36 }
 0x123   : > { %v1539_v40 = vpop.eup %1538  ;;  %v859_v33 = vmul.f32 %v1537_v10, %v1279_v29  ;;  %1564 = vrcp.f32 %v766_v35 }
 0x124   : > { %v1541_v43 = vpop.eup %1540  ;;  %v875_v44 = vmul.f32 %v1539_v40, %v1311_v27  ;;  %1566 = vrcp.f32 %v782_v39 }
 0x125   : > { %v1543_v22 = vpop.eup %1542  ;;  %v1235_v48 = vpack.c.bf16 %v859_v33, %v859_v33  ;;  %v857_v47 = vmul.f32 %v1541_v43, %v1275_v34 }
 0x126   : > { %v1545_v52 = vpop.eup %1544  ;;  %v1251_v53 = vpack.c.bf16 %v875_v44, %v875_v44  ;;  %v873_v50 = vmul.f32 %v1543_v22, %v1307_v37 }
 0x127   : > { %v1547_v57 = vpop.eup %1546  ;;  %1020 = vst.msk [vmem:[%s1751_s13 + $0x28] sm:$0xf] %vm1009_vm2, %v1235_v48  ;;  %v1233_v25 = vpack.c.bf16 %v857_v47, %v857_v47  ;;  %v860_v51 = vmul.f32 %v1545_v52, %v1280_v41 }
 0x128   : > { %v1549_v55 = vpop.eup %1548  ;;  %1036 = vst.msk [vmem:[%s1751_s13 + $0x68] sm:$0xf] %vm1009_vm2, %v1251_v53  ;;  %v1249_v60 = vpack.c.bf16 %v873_v50, %v873_v50  ;;  %v876_v61 = vmul.f32 %v1547_v57, %v1312_v46 }
 0x129   : > { %v1551_v32 = vpop.eup %1550  ;;  %1018 = vst.msk [vmem:[%s1751_s13 + $0x20] sm:$0xf] %vm1009_vm2, %v1233_v25  ;;  %v1236_v59 = vpack.c.bf16 %v860_v51, %v860_v51  ;;  %v858_v17 = vmul.f32 %v1549_v55, %v1276_v45 }
 0x12a   : > { %v1553_v63 = vpop.eup %1552  ;;  %1034 = vst.msk [vmem:[%s1751_s13 + $0x60] sm:$0xf] %vm1009_vm2, %v1249_v60  ;;  %v1252_v1 = vpack.c.bf16 %v876_v61, %v876_v61  ;;  %v874_v2 = vmul.f32 %v1551_v32, %v1308_v54 }
 0x12b   : > { %v1555_v6 = vpop.eup %1554  ;;  %1021 = vst.msk [vmem:[%s1751_s13 + $0x2c] sm:$0xf] %vm1009_vm2, %v1236_v59  ;;  %v1234_v7 = vpack.c.bf16 %v858_v17, %v858_v17  ;;  %v863_v19 = vmul.f32 %v1553_v63, %v1287_v58 }
 0x12c   : > { %v1557_v11 = vpop.eup %1556  ;;  %1037 = vst.msk [vmem:[%s1751_s13 + $0x6c] sm:$0xf] %vm1009_vm2, %v1252_v1  ;;  %v1250_v12 = vpack.c.bf16 %v874_v2, %v874_v2  ;;  %v879_v23 = vmul.f32 %v1555_v6, %v1319_v62 }
 0x12d   : > { %v1559_v14 = vpop.eup %1558  ;;  %1019 = vst.msk [vmem:[%s1751_s13 + $0x24] sm:$0xf] %vm1009_vm2, %v1234_v7  ;;  %v1239_v16 = vpack.c.bf16 %v863_v19, %v863_v19  ;;  %v861_v24 = vmul.f32 %v1557_v11, %v1283_v38 }
 0x12e   : > { %v1561_v18 = vpop.eup %1560  ;;  %1035 = vst.msk [vmem:[%s1751_s13 + $0x64] sm:$0xf] %vm1009_vm2, %v1250_v12  ;;  %v1255_v21 = vpack.c.bf16 %v879_v23, %v879_v23  ;;  %v877_v4 = vmul.f32 %v1559_v14, %v1315_v3 }
 0x12f   : > { %v1563_v20 = vpop.eup %1562  ;;  %1024 = vst.msk [vmem:[%s1751_s13 + $0x38] sm:$0xf] %vm1009_vm2, %v1239_v16  ;;  %v1237_v28 = vpack.c.bf16 %v861_v24, %v861_v24  ;;  %v864_v29 = vmul.f32 %v1561_v18, %v1288_v8 }
 0x130   : > { %v1565_v5 = vpop.eup %1564  ;;  %1040 = vst.msk [vmem:[%s1751_s13 + $0x78] sm:$0xf] %vm1009_vm2, %v1255_v21  ;;  %v1253_v31 = vpack.c.bf16 %v877_v4, %v877_v4  ;;  %v880_v15 = vmul.f32 %v1563_v20, %v1320_v0 }
 0x131   : > { %v1567_v27 = vpop.eup %1566  ;;  %1022 = vst.msk [vmem:[%s1751_s13 + $0x30] sm:$0xf] %vm1009_vm2, %v1237_v28  ;;  %v1240_v9 = vpack.c.bf16 %v864_v29, %v864_v29  ;;  %v862_v36 = vmul.f32 %v1565_v5, %v1284_v13 }
 0x132   : > { %1038 = vst.msk [vmem:[%s1751_s13 + $0x70] sm:$0xf] %vm1009_vm2, %v1253_v31  ;;  %v1256_v34 = vpack.c.bf16 %v880_v15, %v880_v15  ;;  %v878_v35 = vmul.f32 %v1567_v27, %v1316_v30 }
 0x133   : > { %1025 = vst.msk [vmem:[%s1751_s13 + $0x3c] sm:$0xf] %vm1009_vm2, %v1240_v9  ;;  %v1238_v10 = vpack.c.bf16 %v862_v36, %v862_v36 }
 0x134   : > { %1041 = vst.msk [vmem:[%s1751_s13 + $0x7c] sm:$0xf] %vm1009_vm2, %v1256_v34  ;;  %v1254_v37 = vpack.c.bf16 %v878_v35, %v878_v35 }
 0x135   : > { %1023 = vst.msk [vmem:[%s1751_s13 + $0x34] sm:$0xf] %vm1009_vm2, %v1238_v10 }
 0x136   : > { %1039 = vst.msk [vmem:[%s1751_s13 + $0x74] sm:$0xf] %vm1009_vm2, %v1254_v37 }
 0x137 PF: > { %s14_s15 = sadd.s32 1, %s1574_s15  }
 0x138   : > { %p11_p4 = scmp.ge.s32.totalorder %s14_s15, 4  }
 0x13a   :  { %13 = sbr.rel (!%p11_p4) target bundleno = 1 (0x1), region = 69 }

// kernel: _lambda_.54
= control target key start
LH: loop header
LB: loop body
LE: loop exit
PB: predicated region body
PF: predicated region fallthrough
CT: control target
= control target key end

     0   :  { %s1140_s12 = smov 0   ;;  %s1341_s0 = inlined_call_operand.vmem [shape: bf16[512,144], index: 0, kind: input, shape index: {}]   ;;  %s1342_s1 = inlined_call_operand.vmem [shape: bf16[144,32], index: 1, kind: input, shape index: {}]   ;;  %s1343_s2 = inlined_call_operand.vmem [shape: f32[1,32], index: 2, kind: input, shape index: {}]   ;;  %s1344_s3 = inlined_call_operand.vmem [shape: bf16[512,32], index: 3, kind: output, shape index: {}]  }
   0x1 LB: > { %s892_s13 = sadd.s32 4294967295, %s1117_s12   ;;  %p896_p0 = scmp.ge.s32.totalorder %s1117_s12, 1  ;;  %s1117_s12 = sphi %s1140_s12, %s13_s12  }
   0x2   : > { %p139_p1 = scmp.lt.s32.totalorder %s1117_s12, 3 }
   0x4   : > { %p140_p2 = pnand %p896_p0, %p139_p1 }
   0x5   : > { %s897_s16 = sshll.u32 (!%p140_p2), %s892_s13, 5 }
   0x6   : > { %143 = sbr.rel (%p140_p2) target bundleno = 308 (0x134), region = 32  ;;  %p165_p3 = scmp.lt.s32.totalorder (!%p140_p2), %s897_s16, 63 }
   0xb   : > { %v1054_v0 = vld [vmem:[%s1342_s1 + $0x38] sm:$0xff]   ;;  %v1119_v1 = vmov 0   ;;  %v1055_v2 = vld [vmem:[%s1342_s1 + $0x30] sm:$0xff]   ;;  %s1346_s16 = smov (!%p165_p3, %s897_s16), 63  ;;  %v1056_v3 = vld [vmem:[%s1342_s1 + $0x28] sm:$0xff]   ;;  %vm433_vm0 = vcmask 130048  }
   0xc   : > { %482 = vmatprep.subr.bf16.mxu0 %v1119_v1  ;;  %1027 = vmatprep.subr.bf16.mxu1 %v1119_v1  ;;  %s994_s21 = sshll.u32 %s1346_s16, 3  ;;  %v1057_v4 = vld [vmem:[%s1342_s1 + $0x20] sm:$0xff]   ;;  %v1058_v7 = vld [vmem:[%s1342_s1 + $0x18] sm:$0xff]   ;;  %v1059_v8 = vld [vmem:[%s1342_s1 + $0x10] sm:$0xff]   ;;  %s901_s13 = sshll.u32 %s1346_s16, 2  ;;  %vm803_vm1 = vcmask 257024  }
   0xd   : > { %483 = vmatpush1.bf16.msra.mxu0 %v1054_v0  ;;  %1036 = vmatpush1.bf16.msra.mxu1 %v1054_v0  ;;  %s1163_s24 = scalar_lea.vmem %s1341_s0, %s994_s21  ;;  %v1060_v9 = vld [vmem:[%s1342_s1 + $0x8] sm:$0xff]   ;;  %v1061_v10 = vld [vmem:[%s1342_s1] sm:$0xff]   ;;  %s1242_s17 = scalar_lea.vmem %s1344_s3, %s901_s13 }
   0xe   : > { %484 = vmatprep.subr.bf16.mxu0 %v1119_v1  ;;  %1028 = vmatprep.subr.bf16.mxu1 %v1119_v1  ;;  %v1065_v5 = vld [vmem:[%s1163_s24 + $0x4] ss:$8 sps:$4 sm:$0xff]   ;;  %v1063_v12 = vld [vmem:[%s1163_s24] ss:$8 sps:$4 sm:$0xff]   ;;  %v1069_v14 = vld [vmem:[%s1163_s24 + $0x14] ss:$8 sps:$4 sm:$0xff]  }
   0xf   : > { %v1068_v6 = vld [vmem:[%s1163_s24 + $0x84] ss:$8 sps:$4 sm:$0xff]   ;;  %944 = vmatprep.mubr.msk.bf16.mxu0 %vm433_vm0, %v1065_v5  ;;  %v1066_v13 = vld [vmem:[%s1163_s24 + $0x80] ss:$8 sps:$4 sm:$0xff]   ;;  %v1071_v15 = vld [vmem:[%s1163_s24 + $0x94] ss:$8 sps:$4 sm:$0xff]  }
  0x10   : > { %952 = vmatprep.mubr.msk.bf16.mxu1 %vm433_vm0, %v1068_v6  ;;  %v1062_v11 = vld [vmem:[%s1342_s1 + $0x40] sm:$0xff]   ;;  %v1073_v16 = vld [vmem:[%s1163_s24 + $0x10] ss:$8 sps:$4 sm:$0xff]   ;;  %v1081_v22 = vld [vmem:[%s1163_s24 + $0x34] ss:$8 sps:$4 sm:$0xff]  }
  0x11   : > { %485 = vmatpush1.bf16.msra.mxu0 %v1055_v2  ;;  %1037 = vmatpush1.bf16.msra.mxu1 %v1055_v2  ;;  %v1074_v17 = vld [vmem:[%s1163_s24 + $0x90] ss:$8 sps:$4 sm:$0xff]   ;;  %v1075_v18 = vld [vmem:[%s1163_s24 + $0x24] ss:$8 sps:$4 sm:$0xff]   ;;  %v1079_v20 = vld [vmem:[%s1163_s24 + $0x20] ss:$8 sps:$4 sm:$0xff]  }
  0x12   : > { %486 = vmatprep.subr.bf16.mxu0 %v1119_v1  ;;  %1029 = vmatprep.subr.bf16.mxu1 %v1119_v1  ;;  %v1077_v19 = vld [vmem:[%s1163_s24 + $0xa4] ss:$8 sps:$4 sm:$0xff]   ;;  %v1080_v21 = vld [vmem:[%s1163_s24 + $0xa0] ss:$8 sps:$4 sm:$0xff]   ;;  %v1083_v23 = vld [vmem:[%s1163_s24 + $0xb4] ss:$8 sps:$4 sm:$0xff]  }
  0x13   : > { %v1085_v24 = vld [vmem:[%s1163_s24 + $0x30] ss:$8 sps:$4 sm:$0xff]   ;;  %v1087_v26 = vld [vmem:[%s1163_s24 + $0x44] ss:$8 sps:$4 sm:$0xff]   ;;  %v1091_v28 = vld [vmem:[%s1163_s24 + $0x40] ss:$8 sps:$4 sm:$0xff]  }
  0x14   : > { %v1086_v25 = vld [vmem:[%s1163_s24 + $0xb0] ss:$8 sps:$4 sm:$0xff]   ;;  %v1089_v27 = vld [vmem:[%s1163_s24 + $0xc4] ss:$8 sps:$4 sm:$0xff]   ;;  %v1092_v29 = vld [vmem:[%s1163_s24 + $0xc0] ss:$8 sps:$4 sm:$0xff]  }
  0x15   : > { %487 = vmatpush1.bf16.msra.mxu0 %v1056_v3  ;;  %1038 = vmatpush1.bf16.msra.mxu1 %v1056_v3  ;;  %v1093_v30 = vld [vmem:[%s1163_s24 + $0x54] ss:$8 sps:$4 sm:$0xff]   ;;  %v1097_v32 = vld [vmem:[%s1163_s24 + $0x50] ss:$8 sps:$4 sm:$0xff]   ;;  %v1099_v34 = vld [vmem:[%s1163_s24 + $0x64] ss:$8 sps:$4 sm:$0xff]  }
  0x16   : > { %488 = vmatprep.subr.bf16.mxu0 %v1119_v1  ;;  %1030 = vmatprep.subr.bf16.mxu1 %v1119_v1  ;;  %v1095_v31 = vld [vmem:[%s1163_s24 + $0xd4] ss:$8 sps:$4 sm:$0xff]   ;;  %v1098_v33 = vld [vmem:[%s1163_s24 + $0xd0] ss:$8 sps:$4 sm:$0xff]   ;;  %v1101_v35 = vld [vmem:[%s1163_s24 + $0xe4] ss:$8 sps:$4 sm:$0xff]  }
  0x17   : > { %v1103_v36 = vld [vmem:[%s1163_s24 + $0x60] ss:$8 sps:$4 sm:$0xff]   ;;  %v1105_v38 = vld [vmem:[%s1163_s24 + $0x74] ss:$8 sps:$4 sm:$0xff]   ;;  %v1109_v40 = vld [vmem:[%s1163_s24 + $0x70] ss:$8 sps:$4 sm:$0xff]  }
  0x18   : > { %v1104_v37 = vld [vmem:[%s1163_s24 + $0xe0] ss:$8 sps:$4 sm:$0xff]   ;;  %v1107_v39 = vld [vmem:[%s1163_s24 + $0xf4] ss:$8 sps:$4 sm:$0xff]   ;;  %v1110_v41 = vld [vmem:[%s1163_s24 + $0xf0] ss:$8 sps:$4 sm:$0xff]  }
  0x19   : > { %489 = vmatpush1.bf16.msra.mxu0 %v1057_v4  ;;  %1039 = vmatpush1.bf16.msra.mxu1 %v1057_v4  ;;  %v1234_v42 = vld [vmem:[%s1343_s2] ss:$0 sm:$0xff] }
  0x1a   : > { %490 = vmatprep.subr.bf16.mxu0 %v1119_v1  ;;  %1031 = vmatprep.subr.bf16.mxu1 %v1119_v1 }
  0x1d   : > { %491 = vmatpush1.bf16.msra.mxu0 %v1058_v7  ;;  %1040 = vmatpush1.bf16.msra.mxu1 %v1058_v7 }
  0x1e   : > { %492 = vmatprep.subr.bf16.mxu0 %v1119_v1  ;;  %1032 = vmatprep.subr.bf16.mxu1 %v1119_v1 }
  0x21   : > { %493 = vmatpush1.bf16.msra.mxu0 %v1059_v8  ;;  %1041 = vmatpush1.bf16.msra.mxu1 %v1059_v8 }
  0x22   : > { %494 = vmatprep.subr.bf16.mxu0 %v1119_v1  ;;  %1033 = vmatprep.subr.bf16.mxu1 %v1119_v1 }
  0x25   : > { %495 = vmatpush1.bf16.msra.mxu0 %v1060_v9  ;;  %1042 = vmatpush1.bf16.msra.mxu1 %v1060_v9 }
  0x26   : > { %496 = vmatprep.subr.bf16.mxu0 %v1119_v1  ;;  %1034 = vmatprep.subr.bf16.mxu1 %v1119_v1 }
  0x29   : > { %497 = vmatpush1.bf16.msra.mxu0 %v1061_v10  ;;  %1043 = vmatpush1.bf16.msra.mxu1 %v1061_v10 }
  0x2a   : > { %512 = vmatprep.subr.bf16.mxu0 %v1119_v1  ;;  %1035 = vmatprep.subr.bf16.mxu1 %v1119_v1 }
  0x2d   : > { %513 = vmatpush2.bf16.msra.mxu0 %v1062_v11  ;;  %1044 = vmatpush2.bf16.msra.mxu1 %v1062_v11 }
  0x30   : > { %515 = vmatmul.mubr.bf16.vlgmr.msra.gmra.mxu0 %v1063_v12  ;;  %579 = vmatmul.mubr.bf16.vlgmr.msra.gmra.mxu1 %v1066_v13 }
  0x31   : > { %945 = vmatprep.mubr.msk.bf16.mxu0 %vm433_vm0, %v1069_v14  ;;  %953 = vmatprep.mubr.msk.bf16.mxu1 %vm433_vm0, %v1071_v15 }
  0x38   : > { %523 = vmatmul.mubr.bf16.gmra.mxu0 %v1073_v16  ;;  %587 = vmatmul.mubr.bf16.gmra.mxu1 %v1074_v17 }
  0x39   : > { %946 = vmatprep.mubr.msk.bf16.mxu0 %vm433_vm0, %v1075_v18  ;;  %954 = vmatprep.mubr.msk.bf16.mxu1 %vm433_vm0, %v1077_v19 }
  0x40   : > { %531 = vmatmul.mubr.bf16.gmra.mxu0 %v1079_v20  ;;  %595 = vmatmul.mubr.bf16.gmra.mxu1 %v1080_v21 }
  0x41   : > { %947 = vmatprep.mubr.msk.bf16.mxu0 %vm433_vm0, %v1081_v22  ;;  %955 = vmatprep.mubr.msk.bf16.mxu1 %vm433_vm0, %v1083_v23 }
  0x48   : > { %539 = vmatmul.mubr.bf16.gmra.mxu0 %v1085_v24  ;;  %603 = vmatmul.mubr.bf16.gmra.mxu1 %v1086_v25 }
  0x49   : > { %948 = vmatprep.mubr.msk.bf16.mxu0 %vm433_vm0, %v1087_v26  ;;  %956 = vmatprep.mubr.msk.bf16.mxu1 %vm433_vm0, %v1089_v27 }
  0x50   : > { %547 = vmatmul.mubr.bf16.gmra.mxu0 %v1091_v28  ;;  %611 = vmatmul.mubr.bf16.gmra.mxu1 %v1092_v29 }
  0x51   : > { %949 = vmatprep.mubr.msk.bf16.mxu0 %vm433_vm0, %v1093_v30  ;;  %957 = vmatprep.mubr.msk.bf16.mxu1 %vm433_vm0, %v1095_v31 }
  0x58   : > { %555 = vmatmul.mubr.bf16.gmra.mxu0 %v1097_v32  ;;  %619 = vmatmul.mubr.bf16.gmra.mxu1 %v1098_v33 }
  0x59   : > { %950 = vmatprep.mubr.msk.bf16.mxu0 %vm433_vm0, %v1099_v34  ;;  %958 = vmatprep.mubr.msk.bf16.mxu1 %vm433_vm0, %v1101_v35 }
  0x60   : > { %563 = vmatmul.mubr.bf16.gmra.mxu0 %v1103_v36  ;;  %627 = vmatmul.mubr.bf16.gmra.mxu1 %v1104_v37 }
  0x61   : > { %951 = vmatprep.mubr.msk.bf16.mxu0 %vm433_vm0, %v1105_v38  ;;  %959 = vmatprep.mubr.msk.bf16.mxu1 %vm433_vm0, %v1107_v39 }
  0x68   : > { %571 = vmatmul.mubr.bf16.gmra.mxu0 %v1109_v40  ;;  %635 = vmatmul.mubr.bf16.gmra.mxu1 %v1110_v41 }
  0xf0   : > { %v516_v43 = vpop.f32.mrf.mxu0  ;;  %v580_v44 = vpop.f32.mrf.mxu1 }
  0xf1   : > { %v517_v45 = vadd.f32 %v1234_v42, %v516_v43  ;;  %v581_v46 = vadd.f32 %v1234_v42, %v580_v44 }
  0xf2   : > { %v518_v47 = vpop.f32.mrf.mxu0  ;;  %v582_v48 = vpop.f32.mrf.mxu1 }
  0xf3   : > { %v643_v49 = vmax.f32 %v517_v45, 0.0  ;;  %v659_v50 = vmax.f32 %v581_v46, 0.0 }
  0xf4   : > { %v519_v51 = vpop.f32.mrf.mxu0  ;;  %v583_v52 = vpop.f32.mrf.mxu1 }
  0xf5   : > { %v995_v53 = vpack.c.bf16 %v643_v49, %v643_v49  ;;  %v1011_v54 = vpack.c.bf16 %v659_v50, %v659_v50  ;;  %v520_v55 = vadd.f32 %v1234_v42, %v519_v51  ;;  %v584_v56 = vadd.f32 %v1234_v42, %v583_v52 }
  0xf6   : > { %v521_v57 = vpop.f32.mrf.mxu0  ;;  %v585_v58 = vpop.f32.mrf.mxu1 }
  0xf7   : > { %804 = vst.msk [vmem:[%s1242_s17] sm:$0xf] %vm803_vm1, %v995_v53  ;;  %820 = vst.msk [vmem:[%s1242_s17 + $0x40] sm:$0xf] %vm803_vm1, %v1011_v54  ;;  %v644_v59 = vmax.f32 %v520_v55, 0.0  ;;  %v660_v60 = vmax.f32 %v584_v56, 0.0 }
  0xf8   : > { %v524_v61 = vpop.f32.mrf.mxu0  ;;  %v588_v62 = vpop.f32.mrf.mxu1 }
  0xf9   : > { %v996_v63 = vpack.c.bf16 %v644_v59, %v644_v59  ;;  %v1012_v0 = vpack.c.bf16 %v660_v60, %v660_v60  ;;  %v525_v1 = vadd.f32 %v1234_v42, %v524_v61  ;;  %v589_v2 = vadd.f32 %v1234_v42, %v588_v62 }
  0xfa   : > { %v526_v3 = vpop.f32.mrf.mxu0  ;;  %v590_v4 = vpop.f32.mrf.mxu1 }
  0xfb   : > { %805 = vst.msk [vmem:[%s1242_s17 + $0x4] sm:$0xf] %vm803_vm1, %v996_v63  ;;  %821 = vst.msk [vmem:[%s1242_s17 + $0x44] sm:$0xf] %vm803_vm1, %v1012_v0  ;;  %v645_v5 = vmax.f32 %v525_v1, 0.0  ;;  %v661_v6 = vmax.f32 %v589_v2, 0.0 }
  0xfc   : > { %v527_v7 = vpop.f32.mrf.mxu0  ;;  %v591_v8 = vpop.f32.mrf.mxu1 }
  0xfd   : > { %v997_v9 = vpack.c.bf16 %v645_v5, %v645_v5  ;;  %v1013_v10 = vpack.c.bf16 %v661_v6, %v661_v6  ;;  %v528_v11 = vadd.f32 %v1234_v42, %v527_v7  ;;  %v592_v12 = vadd.f32 %v1234_v42, %v591_v8 }
  0xfe   : > { %v529_v13 = vpop.f32.mrf.mxu0  ;;  %v593_v14 = vpop.f32.mrf.mxu1 }
  0xff   : > { %806 = vst.msk [vmem:[%s1242_s17 + $0x8] sm:$0xf] %vm803_vm1, %v997_v9  ;;  %822 = vst.msk [vmem:[%s1242_s17 + $0x48] sm:$0xf] %vm803_vm1, %v1013_v10  ;;  %v646_v15 = vmax.f32 %v528_v11, 0.0  ;;  %v662_v16 = vmax.f32 %v592_v12, 0.0 }
 0x100   : > { %v532_v17 = vpop.f32.mrf.mxu0  ;;  %v596_v18 = vpop.f32.mrf.mxu1 }
 0x101   : > { %v998_v19 = vpack.c.bf16 %v646_v15, %v646_v15  ;;  %v1014_v20 = vpack.c.bf16 %v662_v16, %v662_v16  ;;  %v533_v21 = vadd.f32 %v1234_v42, %v532_v17  ;;  %v597_v22 = vadd.f32 %v1234_v42, %v596_v18 }
 0x102   : > { %v534_v23 = vpop.f32.mrf.mxu0  ;;  %v598_v24 = vpop.f32.mrf.mxu1 }
 0x103   : > { %807 = vst.msk [vmem:[%s1242_s17 + $0xc] sm:$0xf] %vm803_vm1, %v998_v19  ;;  %823 = vst.msk [vmem:[%s1242_s17 + $0x4c] sm:$0xf] %vm803_vm1, %v1014_v20  ;;  %v647_v25 = vmax.f32 %v533_v21, 0.0  ;;  %v663_v26 = vmax.f32 %v597_v22, 0.0 }
 0x104   : > { %v535_v27 = vpop.f32.mrf.mxu0  ;;  %v599_v28 = vpop.f32.mrf.mxu1 }
 0x105   : > { %v999_v29 = vpack.c.bf16 %v647_v25, %v647_v25  ;;  %v1015_v30 = vpack.c.bf16 %v663_v26, %v663_v26  ;;  %v536_v31 = vadd.f32 %v1234_v42, %v535_v27  ;;  %v600_v32 = vadd.f32 %v1234_v42, %v599_v28 }
 0x106   : > { %v537_v33 = vpop.f32.mrf.mxu0  ;;  %v601_v34 = vpop.f32.mrf.mxu1 }
 0x107   : > { %808 = vst.msk [vmem:[%s1242_s17 + $0x10] sm:$0xf] %vm803_vm1, %v999_v29  ;;  %824 = vst.msk [vmem:[%s1242_s17 + $0x50] sm:$0xf] %vm803_vm1, %v1015_v30  ;;  %v648_v35 = vmax.f32 %v536_v31, 0.0  ;;  %v664_v36 = vmax.f32 %v600_v32, 0.0 }
 0x108   : > { %v540_v37 = vpop.f32.mrf.mxu0  ;;  %v604_v38 = vpop.f32.mrf.mxu1 }
 0x109   : > { %v1000_v39 = vpack.c.bf16 %v648_v35, %v648_v35  ;;  %v1016_v40 = vpack.c.bf16 %v664_v36, %v664_v36  ;;  %v541_v41 = vadd.f32 %v1234_v42, %v540_v37  ;;  %v605_v43 = vadd.f32 %v1234_v42, %v604_v38 }
 0x10a   : > { %v542_v44 = vpop.f32.mrf.mxu0  ;;  %v606_v45 = vpop.f32.mrf.mxu1 }
 0x10b   : > { %809 = vst.msk [vmem:[%s1242_s17 + $0x14] sm:$0xf] %vm803_vm1, %v1000_v39  ;;  %825 = vst.msk [vmem:[%s1242_s17 + $0x54] sm:$0xf] %vm803_vm1, %v1016_v40  ;;  %v649_v46 = vmax.f32 %v541_v41, 0.0  ;;  %v665_v47 = vmax.f32 %v605_v43, 0.0 }
 0x10c   : > { %v543_v48 = vpop.f32.mrf.mxu0  ;;  %v607_v49 = vpop.f32.mrf.mxu1 }
 0x10d   : > { %v1001_v50 = vpack.c.bf16 %v649_v46, %v649_v46  ;;  %v1017_v51 = vpack.c.bf16 %v665_v47, %v665_v47  ;;  %v544_v52 = vadd.f32 %v1234_v42, %v543_v48  ;;  %v608_v53 = vadd.f32 %v1234_v42, %v607_v49 }
 0x10e   : > { %v545_v54 = vpop.f32.mrf.mxu0  ;;  %v609_v55 = vpop.f32.mrf.mxu1 }
 0x10f   : > { %810 = vst.msk [vmem:[%s1242_s17 + $0x18] sm:$0xf] %vm803_vm1, %v1001_v50  ;;  %826 = vst.msk [vmem:[%s1242_s17 + $0x58] sm:$0xf] %vm803_vm1, %v1017_v51  ;;  %v650_v56 = vmax.f32 %v544_v52, 0.0  ;;  %v666_v57 = vmax.f32 %v608_v53, 0.0 }
 0x110   : > { %v548_v58 = vpop.f32.mrf.mxu0  ;;  %v612_v59 = vpop.f32.mrf.mxu1 }
 0x111   : > { %v1002_v60 = vpack.c.bf16 %v650_v56, %v650_v56  ;;  %v1018_v61 = vpack.c.bf16 %v666_v57, %v666_v57  ;;  %v549_v62 = vadd.f32 %v1234_v42, %v548_v58  ;;  %v613_v63 = vadd.f32 %v1234_v42, %v612_v59 }
 0x112   : > { %v550_v0 = vpop.f32.mrf.mxu0  ;;  %v614_v1 = vpop.f32.mrf.mxu1 }
 0x113   : > { %811 = vst.msk [vmem:[%s1242_s17 + $0x1c] sm:$0xf] %vm803_vm1, %v1002_v60  ;;  %827 = vst.msk [vmem:[%s1242_s17 + $0x5c] sm:$0xf] %vm803_vm1, %v1018_v61  ;;  %v651_v2 = vmax.f32 %v549_v62, 0.0  ;;  %v667_v3 = vmax.f32 %v613_v63, 0.0 }
 0x114   : > { %v551_v4 = vpop.f32.mrf.mxu0  ;;  %v615_v5 = vpop.f32.mrf.mxu1 }
 0x115   : > { %v1003_v6 = vpack.c.bf16 %v651_v2, %v651_v2  ;;  %v1019_v7 = vpack.c.bf16 %v667_v3, %v667_v3  ;;  %v552_v8 = vadd.f32 %v1234_v42, %v551_v4  ;;  %v616_v9 = vadd.f32 %v1234_v42, %v615_v5 }
 0x116   : > { %v553_v10 = vpop.f32.mrf.mxu0  ;;  %v617_v11 = vpop.f32.mrf.mxu1 }
 0x117   : > { %812 = vst.msk [vmem:[%s1242_s17 + $0x20] sm:$0xf] %vm803_vm1, %v1003_v6  ;;  %828 = vst.msk [vmem:[%s1242_s17 + $0x60] sm:$0xf] %vm803_vm1, %v1019_v7  ;;  %v652_v12 = vmax.f32 %v552_v8, 0.0  ;;  %v668_v13 = vmax.f32 %v616_v9, 0.0 }
 0x118   : > { %v556_v14 = vpop.f32.mrf.mxu0  ;;  %v620_v15 = vpop.f32.mrf.mxu1 }
 0x119   : > { %v1004_v16 = vpack.c.bf16 %v652_v12, %v652_v12  ;;  %v1020_v17 = vpack.c.bf16 %v668_v13, %v668_v13  ;;  %v557_v18 = vadd.f32 %v1234_v42, %v556_v14  ;;  %v621_v19 = vadd.f32 %v1234_v42, %v620_v15 }
 0x11a   : > { %v558_v20 = vpop.f32.mrf.mxu0  ;;  %v622_v21 = vpop.f32.mrf.mxu1 }
 0x11b   : > { %813 = vst.msk [vmem:[%s1242_s17 + $0x24] sm:$0xf] %vm803_vm1, %v1004_v16  ;;  %829 = vst.msk [vmem:[%s1242_s17 + $0x64] sm:$0xf] %vm803_vm1, %v1020_v17  ;;  %v653_v22 = vmax.f32 %v557_v18, 0.0  ;;  %v669_v23 = vmax.f32 %v621_v19, 0.0 }
 0x11c   : > { %v559_v24 = vpop.f32.mrf.mxu0  ;;  %v623_v25 = vpop.f32.mrf.mxu1 }
 0x11d   : > { %v1005_v26 = vpack.c.bf16 %v653_v22, %v653_v22  ;;  %v1021_v27 = vpack.c.bf16 %v669_v23, %v669_v23  ;;  %v560_v28 = vadd.f32 %v1234_v42, %v559_v24  ;;  %v624_v29 = vadd.f32 %v1234_v42, %v623_v25 }
 0x11e   : > { %v561_v30 = vpop.f32.mrf.mxu0  ;;  %v625_v31 = vpop.f32.mrf.mxu1 }
 0x11f   : > { %814 = vst.msk [vmem:[%s1242_s17 + $0x28] sm:$0xf] %vm803_vm1, %v1005_v26  ;;  %830 = vst.msk [vmem:[%s1242_s17 + $0x68] sm:$0xf] %vm803_vm1, %v1021_v27  ;;  %v654_v32 = vmax.f32 %v560_v28, 0.0  ;;  %v670_v33 = vmax.f32 %v624_v29, 0.0 }
 0x120   : > { %v564_v34 = vpop.f32.mrf.mxu0  ;;  %v628_v35 = vpop.f32.mrf.mxu1 }
 0x121   : > { %v1006_v36 = vpack.c.bf16 %v654_v32, %v654_v32  ;;  %v1022_v37 = vpack.c.bf16 %v670_v33, %v670_v33  ;;  %v565_v38 = vadd.f32 %v1234_v42, %v564_v34  ;;  %v629_v39 = vadd.f32 %v1234_v42, %v628_v35 }
 0x122   : > { %v566_v40 = vpop.f32.mrf.mxu0  ;;  %v630_v41 = vpop.f32.mrf.mxu1 }
 0x123   : > { %815 = vst.msk [vmem:[%s1242_s17 + $0x2c] sm:$0xf] %vm803_vm1, %v1006_v36  ;;  %831 = vst.msk [vmem:[%s1242_s17 + $0x6c] sm:$0xf] %vm803_vm1, %v1022_v37  ;;  %v655_v43 = vmax.f32 %v565_v38, 0.0  ;;  %v671_v44 = vmax.f32 %v629_v39, 0.0 }
 0x124   : > { %v567_v45 = vpop.f32.mrf.mxu0  ;;  %v631_v46 = vpop.f32.mrf.mxu1 }
 0x125   : > { %v1007_v47 = vpack.c.bf16 %v655_v43, %v655_v43  ;;  %v1023_v48 = vpack.c.bf16 %v671_v44, %v671_v44  ;;  %v568_v49 = vadd.f32 %v1234_v42, %v567_v45  ;;  %v632_v50 = vadd.f32 %v1234_v42, %v631_v46 }
 0x126   : > { %v569_v51 = vpop.f32.mrf.mxu0  ;;  %v633_v52 = vpop.f32.mrf.mxu1 }
 0x127   : > { %816 = vst.msk [vmem:[%s1242_s17 + $0x30] sm:$0xf] %vm803_vm1, %v1007_v47  ;;  %832 = vst.msk [vmem:[%s1242_s17 + $0x70] sm:$0xf] %vm803_vm1, %v1023_v48  ;;  %v656_v53 = vmax.f32 %v568_v49, 0.0  ;;  %v672_v54 = vmax.f32 %v632_v50, 0.0 }
 0x128   : > { %v572_v55 = vpop.f32.mrf.mxu0  ;;  %v636_v56 = vpop.f32.mrf.mxu1 }
 0x129   : > { %v1008_v57 = vpack.c.bf16 %v656_v53, %v656_v53  ;;  %v1024_v58 = vpack.c.bf16 %v672_v54, %v672_v54  ;;  %v573_v59 = vadd.f32 %v1234_v42, %v572_v55  ;;  %v637_v60 = vadd.f32 %v1234_v42, %v636_v56 }
 0x12a   : > { %v574_v61 = vpop.f32.mrf.mxu0  ;;  %v638_v62 = vpop.f32.mrf.mxu1 }
 0x12b   : > { %817 = vst.msk [vmem:[%s1242_s17 + $0x34] sm:$0xf] %vm803_vm1, %v1008_v57  ;;  %833 = vst.msk [vmem:[%s1242_s17 + $0x74] sm:$0xf] %vm803_vm1, %v1024_v58  ;;  %v657_v63 = vmax.f32 %v573_v59, 0.0  ;;  %v673_v0 = vmax.f32 %v637_v60, 0.0 }
 0x12c   : > { %v575_v1 = vpop.f32.mrf.mxu0  ;;  %v639_v2 = vpop.f32.mrf.mxu1 }
 0x12d   : > { %v1009_v3 = vpack.c.bf16 %v657_v63, %v657_v63  ;;  %v1025_v4 = vpack.c.bf16 %v673_v0, %v673_v0  ;;  %v576_v5 = vadd.f32 %v1234_v42, %v575_v1  ;;  %v640_v6 = vadd.f32 %v1234_v42, %v639_v2 }
 0x12e   : > { %v577_v7 = vpop.f32.mrf.mxu0  ;;  %v641_v8 = vpop.f32.mrf.mxu1 }
 0x12f   : > { %818 = vst.msk [vmem:[%s1242_s17 + $0x38] sm:$0xf] %vm803_vm1, %v1009_v3  ;;  %834 = vst.msk [vmem:[%s1242_s17 + $0x78] sm:$0xf] %vm803_vm1, %v1025_v4  ;;  %v658_v9 = vmax.f32 %v576_v5, 0.0  ;;  %v674_v10 = vmax.f32 %v640_v6, 0.0 }
 0x131   : > { %v1010_v11 = vpack.c.bf16 %v658_v9, %v658_v9  ;;  %v1026_v12 = vpack.c.bf16 %v674_v10, %v674_v10 }
 0x133   : > { %819 = vst.msk [vmem:[%s1242_s17 + $0x3c] sm:$0xf] %vm803_vm1, %v1010_v11  ;;  %835 = vst.msk [vmem:[%s1242_s17 + $0x7c] sm:$0xf] %vm803_vm1, %v1026_v12 }
 0x134 PF: > { %s13_s12 = sadd.s32 1, %s1117_s12  }
 0x135   : > { %p10_p4 = scmp.ge.s32.totalorder %s13_s12, 4  }
 0x137   :  { %12 = sbr.rel (!%p10_p4) target bundleno = 1 (0x1), region = 62 }

// kernel: _lambda_.55
= control target key start
LH: loop header
LB: loop body
LE: loop exit
PB: predicated region body
PF: predicated region fallthrough
CT: control target
= control target key end

     0   :  { %vm110_vm0 = vcmask 523264   ;;  %vm312_vm1 = vcmask 125952   ;;  %s591_s1 = inlined_call_operand.vmem [shape: bf16[64,16], index: 1, kind: input, shape index: {}]   ;;  %s592_s0 = inlined_call_operand.vmem [shape: bf16[128,64], index: 0, kind: input, shape index: {}]   ;;  %s593_s2 = inlined_call_operand.vmem [shape: f32[1,16], index: 2, kind: input, shape index: {}]   ;;  %s594_s3 = inlined_call_operand.vmem [shape: bf16[128,16], index: 3, kind: output, shape index: {}]  }
   0x1   :  { %v430_v0 = vld [vmem:[%s591_s1 + $0x18] sm:$0xff]   ;;  %v431_v1 = vld [vmem:[%s591_s1 + $0x10] sm:$0xff]   ;;  %v432_v2 = vld [vmem:[%s591_s1 + $0x8] sm:$0xff]  }
   0x2   :  { %398 = vmatprep.subr.bf16.mxu0 %v430_v0  ;;  %422 = vmatprep.subr.bf16.mxu1 %v430_v0  ;;  %v434_v3 = vld [vmem:[%s592_s0] sm:$0xff]   ;;  %v436_v6 = vld [vmem:[%s592_s0 + $0x8] sm:$0xff]   ;;  %v438_v8 = vld [vmem:[%s592_s0 + $0x10] sm:$0xff]  }
   0x3   :  { %399 = vmatpush3.bf16.msra.mxu0 %v430_v0  ;;  %426 = vmatpush3.bf16.msra.mxu1 %v430_v0  ;;  %v435_v4 = vld [vmem:[%s592_s0 + $0x20] sm:$0xff]   ;;  %v437_v7 = vld [vmem:[%s592_s0 + $0x28] sm:$0xff]   ;;  %v439_v9 = vld [vmem:[%s592_s0 + $0x30] sm:$0xff]  }
   0x4   :  { %400 = vmatprep.subr.bf16.mxu0 %v431_v1  ;;  %423 = vmatprep.subr.bf16.mxu1 %v431_v1  ;;  %v433_v5 = vld [vmem:[%s591_s1] sm:$0xff]   ;;  %v440_v10 = vld [vmem:[%s592_s0 + $0x18] sm:$0xff]  }
   0x5   :  { %406 = vmatprep.mubr.msk.bf16.mxu0 %vm110_vm0, %v434_v3  ;;  %414 = vmatprep.mubr.msk.bf16.mxu1 %vm110_vm0, %v435_v4  ;;  %v441_v11 = vld [vmem:[%s592_s0 + $0x38] sm:$0xff]   ;;  %v509_v12 = vld [vmem:[%s593_s2] ss:$0 sm:$0xff] }
   0x7   :  { %401 = vmatpush3.bf16.msra.mxu0 %v431_v1  ;;  %427 = vmatpush3.bf16.msra.mxu1 %v431_v1 }
   0x8   :  { %402 = vmatprep.subr.bf16.mxu0 %v432_v2  ;;  %424 = vmatprep.subr.bf16.mxu1 %v432_v2 }
   0xb   :  { %403 = vmatpush3.bf16.msra.mxu0 %v432_v2  ;;  %428 = vmatpush3.bf16.msra.mxu1 %v432_v2 }
   0xc   :  { %404 = vmatprep.subr.bf16.mxu0 %v433_v5  ;;  %425 = vmatprep.subr.bf16.mxu1 %v433_v5 }
   0xf   :  { %405 = vmatpush3.bf16.msra.mxu0 %v433_v5  ;;  %429 = vmatpush3.bf16.msra.mxu1 %v433_v5 }
  0x12   :  { %407 = vmatmul.mubr.msk.bf16.vlgmr.msra.gmra.mxu0 %vm110_vm0, %v436_v6  ;;  %415 = vmatmul.mubr.msk.bf16.vlgmr.msra.gmra.mxu1 %vm110_vm0, %v437_v7 }
  0x13   :  { %410 = vmatprep.mubr.msk.bf16.mxu0 %vm110_vm0, %v438_v8  ;;  %418 = vmatprep.mubr.msk.bf16.mxu1 %vm110_vm0, %v439_v9 }
  0x1a   :  { %411 = vmatmul.mubr.msk.bf16.gmra.mxu0 %vm110_vm0, %v440_v10  ;;  %419 = vmatmul.mubr.msk.bf16.gmra.mxu1 %vm110_vm0, %v441_v11 }
  0xd2   :  { %v408_v13 = vpop.f32.mrf.mxu0  ;;  %v416_v14 = vpop.f32.mrf.mxu1 }
  0xd3   :  { %v178_v15 = vadd.f32 %v408_v13, %v509_v12  ;;  %v210_v16 = vadd.f32 %v416_v14, %v509_v12 }
  0xd4   :  { %v169_v17 = vpop.f32.mrf.mxu0  ;;  %v201_v18 = vpop.f32.mrf.mxu1 }
  0xd5   :  { %v234_v19 = vmax.f32 %v178_v15, 0.0  ;;  %v242_v20 = vmax.f32 %v210_v16, 0.0  ;;  %v170_v21 = vadd.f32 %v509_v12, %v169_v17  ;;  %v202_v22 = vadd.f32 %v509_v12, %v201_v18 }
  0xd6   :  { %v409_v23 = vpop.f32.mrf.mxu0  ;;  %v417_v24 = vpop.f32.mrf.mxu1 }
  0xd7   :  { %v372_v25 = vpack.c.bf16 %v234_v19, %v234_v19  ;;  %v380_v26 = vpack.c.bf16 %v242_v20, %v242_v20  ;;  %v232_v27 = vmax.f32 %v170_v21, 0.0  ;;  %v240_v28 = vmax.f32 %v202_v22, 0.0 }
  0xd8   :  { %v181_v29 = vadd.f32 %v409_v23, %v509_v12  ;;  %v213_v30 = vadd.f32 %v417_v24, %v509_v12  ;;  %v172_v31 = vpop.f32.mrf.mxu0  ;;  %v204_v32 = vpop.f32.mrf.mxu1 }
  0xd9   :  { %315 = vst.msk [vmem:[%s594_s3 + $0x8] sm:$0xf] %vm312_vm1, %v372_v25  ;;  %323 = vst.msk [vmem:[%s594_s3 + $0x28] sm:$0xf] %vm312_vm1, %v380_v26  ;;  %v370_v33 = vpack.c.bf16 %v232_v27, %v232_v27  ;;  %v378_v34 = vpack.c.bf16 %v240_v28, %v240_v28  ;;  %v173_v35 = vadd.f32 %v509_v12, %v172_v31 }
  0xda   :  { %v205_v36 = vadd.f32 %v509_v12, %v204_v32  ;;  %v235_v37 = vmax.f32 %v181_v29, 0.0  ;;  %v243_v38 = vmax.f32 %v213_v30, 0.0  ;;  %v412_v39 = vpop.f32.mrf.mxu0  ;;  %v420_v40 = vpop.f32.mrf.mxu1 }
  0xdb   :  { %313 = vst.msk [vmem:[%s594_s3] sm:$0xf] %vm312_vm1, %v370_v33  ;;  %321 = vst.msk [vmem:[%s594_s3 + $0x20] sm:$0xf] %vm312_vm1, %v378_v34  ;;  %v233_v41 = vmax.f32 %v173_v35, 0.0  ;;  %v194_v43 = vadd.f32 %v412_v39, %v509_v12  ;;  %v226_v44 = vadd.f32 %v420_v40, %v509_v12 }
  0xdc   :  { %v241_v42 = vmax.f32 %v205_v36, 0.0  ;;  %v373_v45 = vpack.c.bf16 %v235_v37, %v235_v37  ;;  %v381_v46 = vpack.c.bf16 %v243_v38, %v243_v38  ;;  %v185_v47 = vpop.f32.mrf.mxu0  ;;  %v217_v48 = vpop.f32.mrf.mxu1 }
  0xdd   :  { %v371_v49 = vpack.c.bf16 %v233_v41, %v233_v41  ;;  %v238_v51 = vmax.f32 %v194_v43, 0.0  ;;  %v246_v52 = vmax.f32 %v226_v44, 0.0  ;;  %v186_v53 = vadd.f32 %v509_v12, %v185_v47 }
  0xde   :  { %v379_v50 = vpack.c.bf16 %v241_v42, %v241_v42  ;;  %316 = vst.msk [vmem:[%s594_s3 + $0xc] sm:$0xf] %vm312_vm1, %v373_v45  ;;  %324 = vst.msk [vmem:[%s594_s3 + $0x2c] sm:$0xf] %vm312_vm1, %v381_v46  ;;  %v218_v54 = vadd.f32 %v509_v12, %v217_v48  ;;  %v413_v55 = vpop.f32.mrf.mxu0  ;;  %v421_v56 = vpop.f32.mrf.mxu1 }
  0xdf   :  { %314 = vst.msk [vmem:[%s594_s3 + $0x4] sm:$0xf] %vm312_vm1, %v371_v49  ;;  %v376_v57 = vpack.c.bf16 %v238_v51, %v238_v51  ;;  %v384_v58 = vpack.c.bf16 %v246_v52, %v246_v52  ;;  %v197_v59 = vadd.f32 %v413_v55, %v509_v12  ;;  %v229_v60 = vadd.f32 %v421_v56, %v509_v12 }
  0xe0   :  { %322 = vst.msk [vmem:[%s594_s3 + $0x24] sm:$0xf] %vm312_vm1, %v379_v50  ;;  %v236_v61 = vmax.f32 %v186_v53, 0.0  ;;  %v244_v62 = vmax.f32 %v218_v54, 0.0  ;;  %v188_v63 = vpop.f32.mrf.mxu0  ;;  %v220_v0 = vpop.f32.mrf.mxu1 }
  0xe1   :  { %319 = vst.msk [vmem:[%s594_s3 + $0x18] sm:$0xf] %vm312_vm1, %v376_v57  ;;  %327 = vst.msk [vmem:[%s594_s3 + $0x38] sm:$0xf] %vm312_vm1, %v384_v58  ;;  %v239_v1 = vmax.f32 %v197_v59, 0.0  ;;  %v247_v2 = vmax.f32 %v229_v60, 0.0  ;;  %v189_v3 = vadd.f32 %v509_v12, %v188_v63  ;;  %v221_v4 = vadd.f32 %v509_v12, %v220_v0 }
  0xe2   :  { %v374_v5 = vpack.c.bf16 %v236_v61, %v236_v61  ;;  %v382_v6 = vpack.c.bf16 %v244_v62, %v244_v62 }
  0xe3   :  { %v377_v7 = vpack.c.bf16 %v239_v1, %v239_v1  ;;  %v385_v8 = vpack.c.bf16 %v247_v2, %v247_v2  ;;  %v237_v9 = vmax.f32 %v189_v3, 0.0  ;;  %v245_v10 = vmax.f32 %v221_v4, 0.0 }
  0xe4   :  { %317 = vst.msk [vmem:[%s594_s3 + $0x10] sm:$0xf] %vm312_vm1, %v374_v5  ;;  %325 = vst.msk [vmem:[%s594_s3 + $0x30] sm:$0xf] %vm312_vm1, %v382_v6 }
  0xe5   :  { %320 = vst.msk [vmem:[%s594_s3 + $0x1c] sm:$0xf] %vm312_vm1, %v377_v7  ;;  %328 = vst.msk [vmem:[%s594_s3 + $0x3c] sm:$0xf] %vm312_vm1, %v385_v8  ;;  %v375_v11 = vpack.c.bf16 %v237_v9, %v237_v9  ;;  %v383_v12 = vpack.c.bf16 %v245_v10, %v245_v10 }
  0xe7   :  { %318 = vst.msk [vmem:[%s594_s3 + $0x14] sm:$0xf] %vm312_vm1, %v375_v11  ;;  %326 = vst.msk [vmem:[%s594_s3 + $0x34] sm:$0xf] %vm312_vm1, %v383_v12 }

// kernel: _lambda_.56
= control target key start
LH: loop header
LB: loop body
LE: loop exit
PB: predicated region body
PF: predicated region fallthrough
CT: control target
= control target key end

     0   :  { %v773_v0 = vmov 0   ;;  %vm217_vm0 = vcmask 130048   ;;  %vm515_vm1 = vcmask 257024   ;;  %s991_s1 = inlined_call_operand.vmem [shape: bf16[144,32], index: 1, kind: input, shape index: {}]   ;;  %s992_s0 = inlined_call_operand.vmem [shape: bf16[128,144], index: 0, kind: input, shape index: {}]   ;;  %s993_s2 = inlined_call_operand.vmem [shape: f32[1,32], index: 2, kind: input, shape index: {}]   ;;  %s994_s3 = inlined_call_operand.vmem [shape: bf16[128,32], index: 3, kind: input, shape index: {}]   ;;  %s995_s4 = inlined_call_operand.vmem [shape: bf16[128,32], index: 4, kind: output, shape index: {}]  }
   0x1   :  { %242 = vmatprep.subr.bf16.mxu0 %v773_v0  ;;  %657 = vmatprep.subr.bf16.mxu1 %v773_v0  ;;  %v676_v1 = vld [vmem:[%s991_s1 + $0x38] sm:$0xff]   ;;  %v677_v2 = vld [vmem:[%s991_s1 + $0x30] sm:$0xff]   ;;  %v678_v3 = vld [vmem:[%s991_s1 + $0x28] sm:$0xff]  }
   0x2   :  { %243 = vmatpush1.bf16.msra.mxu0 %v676_v1  ;;  %666 = vmatpush1.bf16.msra.mxu1 %v676_v1  ;;  %v679_v4 = vld [vmem:[%s991_s1 + $0x20] sm:$0xff]   ;;  %v680_v7 = vld [vmem:[%s991_s1 + $0x18] sm:$0xff]   ;;  %v681_v8 = vld [vmem:[%s991_s1 + $0x10] sm:$0xff]  }
   0x3   :  { %244 = vmatprep.subr.bf16.mxu0 %v773_v0  ;;  %658 = vmatprep.subr.bf16.mxu1 %v773_v0  ;;  %v687_v5 = vld [vmem:[%s992_s0 + $0x4] ss:$8 sps:$4 sm:$0xff]   ;;  %v685_v12 = vld [vmem:[%s992_s0] ss:$8 sps:$4 sm:$0xff]   ;;  %v691_v14 = vld [vmem:[%s992_s0 + $0x14] ss:$8 sps:$4 sm:$0xff]  }
   0x4   :  { %v690_v6 = vld [vmem:[%s992_s0 + $0x44] ss:$8 sps:$4 sm:$0xff]   ;;  %562 = vmatprep.mubr.msk.bf16.mxu0 %vm217_vm0, %v687_v5  ;;  %v688_v13 = vld [vmem:[%s992_s0 + $0x40] ss:$8 sps:$4 sm:$0xff]   ;;  %v693_v15 = vld [vmem:[%s992_s0 + $0x54] ss:$8 sps:$4 sm:$0xff]  }
   0x5   :  { %566 = vmatprep.mubr.msk.bf16.mxu1 %vm217_vm0, %v690_v6  ;;  %v682_v9 = vld [vmem:[%s991_s1 + $0x8] sm:$0xff]   ;;  %v683_v10 = vld [vmem:[%s991_s1] sm:$0xff]   ;;  %v695_v16 = vld [vmem:[%s992_s0 + $0x10] ss:$8 sps:$4 sm:$0xff]  }
   0x6   :  { %245 = vmatpush1.bf16.msra.mxu0 %v677_v2  ;;  %667 = vmatpush1.bf16.msra.mxu1 %v677_v2  ;;  %v684_v11 = vld [vmem:[%s991_s1 + $0x40] sm:$0xff]   ;;  %v696_v17 = vld [vmem:[%s992_s0 + $0x50] ss:$8 sps:$4 sm:$0xff]   ;;  %v703_v22 = vld [vmem:[%s992_s0 + $0x34] ss:$8 sps:$4 sm:$0xff]  }
   0x7   :  { %246 = vmatprep.subr.bf16.mxu0 %v773_v0  ;;  %659 = vmatprep.subr.bf16.mxu1 %v773_v0  ;;  %v697_v18 = vld [vmem:[%s992_s0 + $0x24] ss:$8 sps:$4 sm:$0xff]   ;;  %v701_v20 = vld [vmem:[%s992_s0 + $0x20] ss:$8 sps:$4 sm:$0xff]   ;;  %v705_v23 = vld [vmem:[%s992_s0 + $0x74] ss:$8 sps:$4 sm:$0xff]  }
   0x8   :  { %v699_v19 = vld [vmem:[%s992_s0 + $0x64] ss:$8 sps:$4 sm:$0xff]   ;;  %v702_v21 = vld [vmem:[%s992_s0 + $0x60] ss:$8 sps:$4 sm:$0xff]   ;;  %v707_v24 = vld [vmem:[%s992_s0 + $0x30] ss:$8 sps:$4 sm:$0xff]  }
   0x9   :  { %v708_v25 = vld [vmem:[%s992_s0 + $0x70] ss:$8 sps:$4 sm:$0xff]   ;;  %v885_v26 = vld [vmem:[%s993_s2] ss:$0 sm:$0xff] }
   0xa   :  { %247 = vmatpush1.bf16.msra.mxu0 %v678_v3  ;;  %668 = vmatpush1.bf16.msra.mxu1 %v678_v3 }
   0xb   :  { %248 = vmatprep.subr.bf16.mxu0 %v773_v0  ;;  %660 = vmatprep.subr.bf16.mxu1 %v773_v0 }
   0xe   :  { %249 = vmatpush1.bf16.msra.mxu0 %v679_v4  ;;  %669 = vmatpush1.bf16.msra.mxu1 %v679_v4 }
   0xf   :  { %250 = vmatprep.subr.bf16.mxu0 %v773_v0  ;;  %661 = vmatprep.subr.bf16.mxu1 %v773_v0 }
  0x12   :  { %251 = vmatpush1.bf16.msra.mxu0 %v680_v7  ;;  %670 = vmatpush1.bf16.msra.mxu1 %v680_v7 }
  0x13   :  { %252 = vmatprep.subr.bf16.mxu0 %v773_v0  ;;  %662 = vmatprep.subr.bf16.mxu1 %v773_v0 }
  0x16   :  { %253 = vmatpush1.bf16.msra.mxu0 %v681_v8  ;;  %671 = vmatpush1.bf16.msra.mxu1 %v681_v8 }
  0x17   :  { %254 = vmatprep.subr.bf16.mxu0 %v773_v0  ;;  %663 = vmatprep.subr.bf16.mxu1 %v773_v0 }
  0x1a   :  { %255 = vmatpush1.bf16.msra.mxu0 %v682_v9  ;;  %672 = vmatpush1.bf16.msra.mxu1 %v682_v9 }
  0x1b   :  { %256 = vmatprep.subr.bf16.mxu0 %v773_v0  ;;  %664 = vmatprep.subr.bf16.mxu1 %v773_v0 }
  0x1e   :  { %257 = vmatpush1.bf16.msra.mxu0 %v683_v10  ;;  %673 = vmatpush1.bf16.msra.mxu1 %v683_v10 }
  0x1f   :  { %272 = vmatprep.subr.bf16.mxu0 %v773_v0  ;;  %665 = vmatprep.subr.bf16.mxu1 %v773_v0 }
  0x22   :  { %273 = vmatpush2.bf16.msra.mxu0 %v684_v11  ;;  %674 = vmatpush2.bf16.msra.mxu1 %v684_v11 }
  0x25   :  { %275 = vmatmul.mubr.bf16.vlgmr.msra.gmra.mxu0 %v685_v12  ;;  %307 = vmatmul.mubr.bf16.vlgmr.msra.gmra.mxu1 %v688_v13 }
  0x26   :  { %563 = vmatprep.mubr.msk.bf16.mxu0 %vm217_vm0, %v691_v14  ;;  %567 = vmatprep.mubr.msk.bf16.mxu1 %vm217_vm0, %v693_v15 }
  0x2d   :  { %283 = vmatmul.mubr.bf16.gmra.mxu0 %v695_v16  ;;  %315 = vmatmul.mubr.bf16.gmra.mxu1 %v696_v17 }
  0x2e   :  { %564 = vmatprep.mubr.msk.bf16.mxu0 %vm217_vm0, %v697_v18  ;;  %568 = vmatprep.mubr.msk.bf16.mxu1 %vm217_vm0, %v699_v19 }
  0x35   :  { %291 = vmatmul.mubr.bf16.gmra.mxu0 %v701_v20  ;;  %323 = vmatmul.mubr.bf16.gmra.mxu1 %v702_v21 }
  0x36   :  { %565 = vmatprep.mubr.msk.bf16.mxu0 %vm217_vm0, %v703_v22  ;;  %569 = vmatprep.mubr.msk.bf16.mxu1 %vm217_vm0, %v705_v23 }
  0x3d   :  { %299 = vmatmul.mubr.bf16.gmra.mxu0 %v707_v24  ;;  %331 = vmatmul.mubr.bf16.gmra.mxu1 %v708_v25 }
  0xe5   :  { %v276_v27 = vpop.f32.mrf.mxu0  ;;  %v308_v28 = vpop.f32.mrf.mxu1 }
  0xe6   :  { %v277_v29 = vadd.f32 %v885_v26, %v276_v27  ;;  %v309_v30 = vadd.f32 %v885_v26, %v308_v28 }
  0xe7   :  { %v278_v31 = vpop.f32.mrf.mxu0  ;;  %v310_v32 = vpop.f32.mrf.mxu1 }
  0xe8   :  { %v570_v33 = vmul.f32 -1.442695, %v277_v29  ;;  %v578_v34 = vmul.f32 -1.442695, %v309_v30  ;;  %v619_v30 = vld [vmem:[%s994_s3] sm:$0xff]  }
  0xe9   :  { %v279_v35 = vpop.f32.mrf.mxu0  ;;  %v311_v36 = vpop.f32.mrf.mxu1 }
  0xea   :  { %709 = vpow2.f32 %v570_v33  ;;  %v280_v37 = vadd.f32 %v885_v26, %v279_v35  ;;  %v312_v38 = vadd.f32 %v885_v26, %v311_v36  ;;  %v653_v35 = vld [vmem:[%s994_s3 + $0x20] sm:$0xff]  }
  0xeb   :  { %711 = vpow2.f32 %v578_v34  ;;  %v281_v39 = vpop.f32.mrf.mxu0  ;;  %v313_v40 = vpop.f32.mrf.mxu1 }
  0xec   :  { %v571_v41 = vmul.f32 -1.442695, %v280_v37  ;;  %v579_v42 = vmul.f32 -1.442695, %v312_v38 }
  0xed   :  { %v284_v43 = vpop.f32.mrf.mxu0  ;;  %v316_v44 = vpop.f32.mrf.mxu1 }
  0xee   :  { %713 = vpow2.f32 %v571_v41  ;;  %v285_v45 = vadd.f32 %v885_v26, %v284_v43  ;;  %v317_v46 = vadd.f32 %v885_v26, %v316_v44 }
  0xef   :  { %715 = vpow2.f32 %v579_v42  ;;  %v286_v47 = vpop.f32.mrf.mxu0  ;;  %v318_v48 = vpop.f32.mrf.mxu1  ;;  %v620_v42 = vunpack.c.l.bf16 %v619_v30 }
  0xf0   :  { %v572_v49 = vmul.f32 -1.442695, %v285_v45  ;;  %v580_v50 = vmul.f32 -1.442695, %v317_v46  ;;  %v636_v45 = vunpack.c.l.bf16 %v653_v35 }
  0xf1   :  { %v287_v51 = vpop.f32.mrf.mxu0  ;;  %v319_v52 = vpop.f32.mrf.mxu1 }
  0xf2   :  { %717 = vpow2.f32 %v572_v49  ;;  %v288_v53 = vadd.f32 %v885_v26, %v287_v51  ;;  %v320_v54 = vadd.f32 %v885_v26, %v319_v52  ;;  %v621_v51 = vunpack.c.h.bf16 %v619_v30 }
  0xf3   :  { %719 = vpow2.f32 %v580_v50  ;;  %v289_v55 = vpop.f32.mrf.mxu0  ;;  %v321_v56 = vpop.f32.mrf.mxu1 }
  0xf4   :  { %v573_v57 = vmul.f32 -1.442695, %v288_v53  ;;  %v581_v58 = vmul.f32 -1.442695, %v320_v54  ;;  %v637_v53 = vunpack.c.h.bf16 %v653_v35  ;;  %v650_v54 = vld [vmem:[%s994_s3 + $0x8] sm:$0xff]  }
  0xf5   :  { %v292_v59 = vpop.f32.mrf.mxu0  ;;  %v324_v60 = vpop.f32.mrf.mxu1 }
  0xf6   :  { %721 = vpow2.f32 %v573_v57  ;;  %v293_v61 = vadd.f32 %v885_v26, %v292_v59  ;;  %v325_v62 = vadd.f32 %v885_v26, %v324_v60  ;;  %v654_v57 = vld [vmem:[%s994_s3 + $0x28] sm:$0xff]  }
  0xf7   :  { %v710_v63 = vpop.eup %709  ;;  %723 = vpow2.f32 %v581_v58  ;;  %v294_v0 = vpop.f32.mrf.mxu0 }
  0xf8   :  { %v326_v1 = vpop.f32.mrf.mxu1  ;;  %v712_v2 = vpop.eup %711  ;;  %v387_v3 = vadd.f32 1.0, %v710_v63  ;;  %v574_v4 = vmul.f32 -1.442695, %v293_v61  ;;  %v582_v6 = vmul.f32 -1.442695, %v325_v62  ;;  %v624_v0 = vunpack.c.l.bf16 %v650_v54 }
  0xf9   :  { %v395_v5 = vadd.f32 1.0, %v712_v2  ;;  %v295_v7 = vpop.f32.mrf.mxu0 }
  0xfa   :  { %v327_v8 = vpop.f32.mrf.mxu1  ;;  %725 = vrcp.f32 %v387_v3  ;;  %v296_v9 = vadd.f32 %v885_v26, %v295_v7  ;;  %v640_v3 = vunpack.c.l.bf16 %v654_v57 }
  0xfb   :  { %v328_v10 = vadd.f32 %v885_v26, %v327_v8  ;;  %v714_v11 = vpop.eup %713  ;;  %727 = vrcp.f32 %v395_v5  ;;  %v297_v12 = vpop.f32.mrf.mxu0 }
  0xfc   :  { %v329_v13 = vpop.f32.mrf.mxu1  ;;  %v716_v14 = vpop.eup %715  ;;  %v388_v15 = vadd.f32 1.0, %v714_v11  ;;  %729 = vpow2.f32 %v574_v4  ;;  %v575_v16 = vmul.f32 -1.442695, %v296_v9  ;;  %v625_v12 = vunpack.c.h.bf16 %v650_v54 }
  0xfd   :  { %v396_v17 = vadd.f32 1.0, %v716_v14  ;;  %731 = vpow2.f32 %v582_v6  ;;  %v583_v18 = vmul.f32 -1.442695, %v328_v10  ;;  %v300_v19 = vpop.f32.mrf.mxu0 }
  0xfe   :  { %v332_v20 = vpop.f32.mrf.mxu1  ;;  %733 = vrcp.f32 %v388_v15  ;;  %v301_v21 = vadd.f32 %v885_v26, %v300_v19  ;;  %v641_v15 = vunpack.c.h.bf16 %v654_v57 }
  0xff   :  { %v333_v22 = vadd.f32 %v885_v26, %v332_v20  ;;  %v718_v23 = vpop.eup %717  ;;  %735 = vrcp.f32 %v396_v17  ;;  %v302_v24 = vpop.f32.mrf.mxu0 }
 0x100   :  { %v334_v25 = vpop.f32.mrf.mxu1  ;;  %v720_v27 = vpop.eup %719  ;;  %v389_v28 = vadd.f32 1.0, %v718_v23  ;;  %737 = vpow2.f32 %v575_v16  ;;  %v576_v29 = vmul.f32 -1.442695, %v301_v21  ;;  %v651_v21 = vld [vmem:[%s994_s3 + $0x10] sm:$0xff]  }
 0x101   :  { %v397_v31 = vadd.f32 1.0, %v720_v27  ;;  %739 = vpow2.f32 %v583_v18  ;;  %v584_v32 = vmul.f32 -1.442695, %v333_v22  ;;  %v303_v33 = vpop.f32.mrf.mxu0  ;;  %v655_v25 = vld [vmem:[%s994_s3 + $0x30] sm:$0xff]  }
 0x102   :  { %v335_v34 = vpop.f32.mrf.mxu1  ;;  %741 = vrcp.f32 %v389_v28  ;;  %v304_v36 = vadd.f32 %v885_v26, %v303_v33 }
 0x103   :  { %v336_v37 = vadd.f32 %v885_v26, %v335_v34  ;;  %v722_v38 = vpop.eup %721  ;;  %743 = vrcp.f32 %v397_v31  ;;  %v305_v39 = vpop.f32.mrf.mxu0  ;;  %v628_v31 = vunpack.c.l.bf16 %v651_v21  ;;  %v644_v34 = vunpack.c.l.bf16 %v655_v25 }
 0x104   :  { %v337_v40 = vpop.f32.mrf.mxu1  ;;  %v724_v41 = vpop.eup %723  ;;  %v390_v43 = vadd.f32 1.0, %v722_v38  ;;  %745 = vpow2.f32 %v576_v29  ;;  %v577_v44 = vmul.f32 -1.442695, %v304_v36  ;;  %v629_v39 = vunpack.c.h.bf16 %v651_v21 }
 0x105   :  { %v398_v46 = vadd.f32 1.0, %v724_v41  ;;  %747 = vpow2.f32 %v584_v32  ;;  %v585_v47 = vmul.f32 -1.442695, %v336_v37  ;;  %v645_v41 = vunpack.c.h.bf16 %v655_v25 }
 0x106   :  { %749 = vrcp.f32 %v390_v43 }
 0x107   :  { %v726_v48 = vpop.eup %725  ;;  %751 = vrcp.f32 %v398_v46 }
 0x108   :  { %v728_v49 = vpop.eup %727  ;;  %v435_v50 = vmul.f32 %v726_v48, %v620_v42  ;;  %753 = vpow2.f32 %v577_v44  ;;  %v652_v42 = vld [vmem:[%s994_s3 + $0x18] sm:$0xff]  }
 0x109   :  { %v730_v26 = vpop.eup %729  ;;  %v443_v52 = vmul.f32 %v728_v49, %v636_v45  ;;  %755 = vpow2.f32 %v585_v47  ;;  %v656_v44 = vld [vmem:[%s994_s3 + $0x38] sm:$0xff]   ;;  %v632_v49 = vunpack.c.l.bf16 %v652_v42 }
 0x10a   :  { %v732_v55 = vpop.eup %731  ;;  %v602_v56 = vpack.c.bf16 %v435_v50, %v435_v50  ;;  %v391_v58 = vadd.f32 1.0, %v730_v26 }
 0x10b   :  { %v734_v59 = vpop.eup %733  ;;  %v610_v60 = vpack.c.bf16 %v443_v52, %v443_v52  ;;  %v399_v61 = vadd.f32 1.0, %v732_v55 }
 0x10c   :  { %v736_v62 = vpop.eup %735  ;;  %516 = vst.msk [vmem:[%s995_s4] sm:$0xf] %vm515_vm1, %v602_v56  ;;  %v436_v63 = vmul.f32 %v734_v59, %v621_v51  ;;  %757 = vrcp.f32 %v391_v58  ;;  %v648_v51 = vunpack.c.l.bf16 %v656_v44  ;;  %v633_v56 = vunpack.c.h.bf16 %v652_v42 }
 0x10d   :  { %v738_v1 = vpop.eup %737  ;;  %524 = vst.msk [vmem:[%s995_s4 + $0x20] sm:$0xf] %vm515_vm1, %v610_v60  ;;  %v444_v2 = vmul.f32 %v736_v62, %v637_v53  ;;  %759 = vrcp.f32 %v399_v61  ;;  %v649_v58 = vunpack.c.h.bf16 %v656_v44 }
 0x10e   :  { %v740_v4 = vpop.eup %739  ;;  %v603_v5 = vpack.c.bf16 %v436_v63, %v436_v63  ;;  %v392_v6 = vadd.f32 1.0, %v738_v1 }
 0x10f   :  { %v742_v7 = vpop.eup %741  ;;  %v611_v8 = vpack.c.bf16 %v444_v2, %v444_v2  ;;  %v400_v9 = vadd.f32 1.0, %v740_v4 }
 0x110   :  { %v744_v10 = vpop.eup %743  ;;  %517 = vst.msk [vmem:[%s995_s4 + $0x4] sm:$0xf] %vm515_vm1, %v603_v5  ;;  %v437_v11 = vmul.f32 %v742_v7, %v624_v0  ;;  %761 = vrcp.f32 %v392_v6 }
 0x111   :  { %v746_v13 = vpop.eup %745  ;;  %525 = vst.msk [vmem:[%s995_s4 + $0x24] sm:$0xf] %vm515_vm1, %v611_v8  ;;  %v445_v14 = vmul.f32 %v744_v10, %v640_v3  ;;  %763 = vrcp.f32 %v400_v9 }
 0x112   :  { %v748_v16 = vpop.eup %747  ;;  %v604_v17 = vpack.c.bf16 %v437_v11, %v437_v11  ;;  %v393_v18 = vadd.f32 1.0, %v746_v13 }
 0x113   :  { %v750_v19 = vpop.eup %749  ;;  %v612_v20 = vpack.c.bf16 %v445_v14, %v445_v14  ;;  %v401_v22 = vadd.f32 1.0, %v748_v16 }
 0x114   :  { %v752_v23 = vpop.eup %751  ;;  %518 = vst.msk [vmem:[%s995_s4 + $0x8] sm:$0xf] %vm515_vm1, %v604_v17  ;;  %v438_v24 = vmul.f32 %v750_v19, %v625_v12  ;;  %765 = vrcp.f32 %v393_v18 }
 0x115   :  { %v754_v27 = vpop.eup %753  ;;  %526 = vst.msk [vmem:[%s995_s4 + $0x28] sm:$0xf] %vm515_vm1, %v612_v20  ;;  %v446_v28 = vmul.f32 %v752_v23, %v641_v15  ;;  %767 = vrcp.f32 %v401_v22 }
 0x116   :  { %v756_v29 = vpop.eup %755  ;;  %v605_v30 = vpack.c.bf16 %v438_v24, %v438_v24  ;;  %v394_v32 = vadd.f32 1.0, %v754_v27 }
 0x117   :  { %v613_v33 = vpack.c.bf16 %v446_v28, %v446_v28  ;;  %v402_v35 = vadd.f32 1.0, %v756_v29 }
 0x118   :  { %519 = vst.msk [vmem:[%s995_s4 + $0xc] sm:$0xf] %vm515_vm1, %v605_v30  ;;  %769 = vrcp.f32 %v394_v32 }
 0x119   :  { %v758_v36 = vpop.eup %757  ;;  %527 = vst.msk [vmem:[%s995_s4 + $0x2c] sm:$0xf] %vm515_vm1, %v613_v33  ;;  %771 = vrcp.f32 %v402_v35 }
 0x11a   :  { %v760_v37 = vpop.eup %759  ;;  %v439_v38 = vmul.f32 %v758_v36, %v628_v31 }
 0x11b   :  { %v447_v40 = vmul.f32 %v760_v37, %v644_v34 }
 0x11c   :  { %v606_v43 = vpack.c.bf16 %v439_v38, %v439_v38 }
 0x11d   :  { %v762_v45 = vpop.eup %761  ;;  %v614_v46 = vpack.c.bf16 %v447_v40, %v447_v40 }
 0x11e   :  { %v764_v47 = vpop.eup %763  ;;  %520 = vst.msk [vmem:[%s995_s4 + $0x10] sm:$0xf] %vm515_vm1, %v606_v43  ;;  %v440_v48 = vmul.f32 %v762_v45, %v629_v39 }
 0x11f   :  { %528 = vst.msk [vmem:[%s995_s4 + $0x30] sm:$0xf] %vm515_vm1, %v614_v46  ;;  %v448_v50 = vmul.f32 %v764_v47, %v645_v41 }
 0x120   :  { %v607_v26 = vpack.c.bf16 %v440_v48, %v440_v48 }
 0x121   :  { %v766_v52 = vpop.eup %765  ;;  %v615_v53 = vpack.c.bf16 %v448_v50, %v448_v50 }
 0x122   :  { %v768_v54 = vpop.eup %767  ;;  %521 = vst.msk [vmem:[%s995_s4 + $0x14] sm:$0xf] %vm515_vm1, %v607_v26  ;;  %v441_v55 = vmul.f32 %v766_v52, %v632_v49 }
 0x123   :  { %529 = vst.msk [vmem:[%s995_s4 + $0x34] sm:$0xf] %vm515_vm1, %v615_v53  ;;  %v449_v57 = vmul.f32 %v768_v54, %v648_v51 }
 0x124   :  { %v608_v59 = vpack.c.bf16 %v441_v55, %v441_v55 }
 0x125   :  { %v770_v60 = vpop.eup %769  ;;  %v616_v61 = vpack.c.bf16 %v449_v57, %v449_v57 }
 0x126   :  { %v772_v62 = vpop.eup %771  ;;  %522 = vst.msk [vmem:[%s995_s4 + $0x18] sm:$0xf] %vm515_vm1, %v608_v59  ;;  %v442_v63 = vmul.f32 %v770_v60, %v633_v56 }
 0x127   :  { %530 = vst.msk [vmem:[%s995_s4 + $0x38] sm:$0xf] %vm515_vm1, %v616_v61  ;;  %v450_v0 = vmul.f32 %v772_v62, %v649_v58 }
 0x128   :  { %v609_v1 = vpack.c.bf16 %v442_v63, %v442_v63 }
 0x129   :  { %v617_v2 = vpack.c.bf16 %v450_v0, %v450_v0 }
 0x12a   :  { %523 = vst.msk [vmem:[%s995_s4 + $0x1c] sm:$0xf] %vm515_vm1, %v609_v1 }
 0x12b   :  { %531 = vst.msk [vmem:[%s995_s4 + $0x3c] sm:$0xf] %vm515_vm1, %v617_v2 }

// kernel: _lambda_.57
= control target key start
LH: loop header
LB: loop body
LE: loop exit
PB: predicated region body
PF: predicated region fallthrough
CT: control target
= control target key end

     0   :  { %vm318_vm0 = vcmask 261120   ;;  %vm617_vm1 = vcmask 519168   ;;  %s1144_s1 = inlined_call_operand.vmem [shape: bf16[288,64], index: 1, kind: input, shape index: {}]   ;;  %s1145_s0 = inlined_call_operand.vmem [shape: bf16[128,288], index: 0, kind: input, shape index: {}]   ;;  %s1146_s2 = inlined_call_operand.vmem [shape: f32[1,64], index: 2, kind: input, shape index: {}]   ;;  %s1147_s3 = inlined_call_operand.vmem [shape: bf16[128,64], index: 3, kind: output, shape index: {}]  }
   0x1   :  { %v831_v0 = vld [vmem:[%s1144_s1 + $0x78] sm:$0xff]   ;;  %v833_v2 = vld [vmem:[%s1144_s1 + $0x70] sm:$0xff]   ;;  %v835_v4 = vld [vmem:[%s1144_s1 + $0x68] sm:$0xff]  }
   0x2   :  { %v832_v1 = vld [vmem:[%s1144_s1 + $0x38] sm:$0xff]   ;;  %721 = vmatprep.subr.bf16.mxu0 %v831_v0  ;;  %815 = vmatprep.subr.bf16.mxu1 %v831_v0  ;;  %v834_v3 = vld [vmem:[%s1144_s1 + $0x30] sm:$0xff]   ;;  %v836_v5 = vld [vmem:[%s1144_s1 + $0x28] sm:$0xff]  }
   0x3   :  { %722 = vmatpush3.bf16.msra.mxu0 %v832_v1  ;;  %823 = vmatpush3.bf16.msra.mxu1 %v832_v1  ;;  %v837_v6 = vld [vmem:[%s1144_s1 + $0x60] sm:$0xff]   ;;  %v839_v8 = vld [vmem:[%s1144_s1 + $0x58] sm:$0xff]   ;;  %v841_v10 = vld [vmem:[%s1144_s1 + $0x50] sm:$0xff]  }
   0x4   :  { %723 = vmatprep.subr.bf16.mxu0 %v833_v2  ;;  %816 = vmatprep.subr.bf16.mxu1 %v833_v2  ;;  %v838_v7 = vld [vmem:[%s1144_s1 + $0x20] sm:$0xff]   ;;  %v840_v9 = vld [vmem:[%s1144_s1 + $0x18] sm:$0xff]   ;;  %v842_v13 = vld [vmem:[%s1144_s1 + $0x10] sm:$0xff]  }
   0x5   :  { %v849_v11 = vld [vmem:[%s1145_s0 + $0x4] ss:$12 sps:$4 sm:$0xff]   ;;  %v852_v12 = vld [vmem:[%s1145_s0 + $0x94] ss:$12 sps:$4 sm:$0xff]   ;;  %v843_v14 = vld [vmem:[%s1144_s1 + $0x48] sm:$0xff]  }
   0x6   :  { %375 = vmatprep.mubr.bf16.mxu0 %v849_v11  ;;  %423 = vmatprep.mubr.bf16.mxu1 %v852_v12  ;;  %v844_v15 = vld [vmem:[%s1144_s1 + $0x8] sm:$0xff]   ;;  %v845_v16 = vld [vmem:[%s1144_s1 + $0x40] sm:$0xff]   ;;  %v850_v20 = vld [vmem:[%s1145_s0 + $0x90] ss:$12 sps:$4 sm:$0xff]  }
   0x7   :  { %724 = vmatpush3.bf16.msra.mxu0 %v834_v3  ;;  %824 = vmatpush3.bf16.msra.mxu1 %v834_v3  ;;  %v846_v17 = vld [vmem:[%s1144_s1] sm:$0xff]   ;;  %v853_v19 = vld [vmem:[%s1144_s1 + $0x88] sm:$0xff]   ;;  %v864_v28 = vld [vmem:[%s1145_s0 + $0x30] ss:$12 sps:$4 sm:$0xff]  }
   0x8   :  { %725 = vmatprep.subr.bf16.mxu0 %v835_v4  ;;  %817 = vmatprep.subr.bf16.mxu1 %v835_v4  ;;  %v847_v18 = vld [vmem:[%s1145_s0] ss:$12 sps:$4 sm:$0xff]   ;;  %v854_v21 = vld [vmem:[%s1145_s0 + $0x1c] ss:$12 sps:$4 sm:$0xff]   ;;  %v858_v24 = vld [vmem:[%s1145_s0 + $0x18] ss:$12 sps:$4 sm:$0xff]  }
   0x9   :  { %v856_v22 = vld [vmem:[%s1145_s0 + $0xac] ss:$12 sps:$4 sm:$0xff]   ;;  %v860_v23 = vld [vmem:[%s1144_s1 + $0x80] sm:$0xff]   ;;  %v859_v25 = vld [vmem:[%s1145_s0 + $0xa8] ss:$12 sps:$4 sm:$0xff]  }
   0xa   :  { %v861_v26 = vld [vmem:[%s1145_s0 + $0x34] ss:$12 sps:$4 sm:$0xff]   ;;  %v866_v30 = vld [vmem:[%s1145_s0 + $0x4c] ss:$12 sps:$4 sm:$0xff]   ;;  %v870_v33 = vld [vmem:[%s1145_s0 + $0x50] ss:$12 sps:$4 sm:$0xff]  }
   0xb   :  { %726 = vmatpush3.bf16.msra.mxu0 %v836_v5  ;;  %825 = vmatpush3.bf16.msra.mxu1 %v836_v5  ;;  %v863_v27 = vld [vmem:[%s1145_s0 + $0x8] ss:$12 sps:$4 sm:$0xff]   ;;  %v865_v29 = vld [vmem:[%s1145_s0 + $0x20] ss:$12 sps:$4 sm:$0xff]   ;;  %v868_v31 = vld [vmem:[%s1145_s0 + $0x38] ss:$12 sps:$4 sm:$0xff]  }
   0xc   :  { %727 = vmatprep.subr.bf16.mxu0 %v837_v6  ;;  %818 = vmatprep.subr.bf16.mxu1 %v837_v6  ;;  %v869_v32 = vld [vmem:[%s1145_s0 + $0x48] ss:$12 sps:$4 sm:$0xff]   ;;  %v871_v34 = vld [vmem:[%s1145_s0 + $0x64] ss:$12 sps:$4 sm:$0xff]   ;;  %v874_v36 = vld [vmem:[%s1145_s0 + $0x60] ss:$12 sps:$4 sm:$0xff]  }
   0xd   :  { %v873_v35 = vld [vmem:[%s1145_s0 + $0x68] ss:$12 sps:$4 sm:$0xff]   ;;  %v875_v37 = vld [vmem:[%s1145_s0 + $0x80] ss:$12 sps:$4 sm:$0xff]   ;;  %v878_v39 = vld [vmem:[%s1145_s0 + $0x98] ss:$12 sps:$4 sm:$0xff]  }
   0xe   :  { %v876_v38 = vld [vmem:[%s1145_s0 + $0x7c] ss:$12 sps:$4 sm:$0xff]   ;;  %v879_v40 = vld [vmem:[%s1145_s0 + $0x78] ss:$12 sps:$4 sm:$0xff]   ;;  %v1054_v60 = vld [vmem:[%s1146_s2] ss:$0 sm:$0xff] }
   0xf   :  { %728 = vmatpush3.bf16.msra.mxu0 %v838_v7  ;;  %826 = vmatpush3.bf16.msra.mxu1 %v838_v7  ;;  %v880_v41 = vld [vmem:[%s1145_s0 + $0xb0] ss:$12 sps:$4 sm:$0xff]  }
  0x10   :  { %729 = vmatprep.subr.bf16.mxu0 %v839_v8  ;;  %819 = vmatprep.subr.bf16.mxu1 %v839_v8 }
  0x13   :  { %730 = vmatpush3.bf16.msra.mxu0 %v840_v9  ;;  %827 = vmatpush3.bf16.msra.mxu1 %v840_v9 }
  0x14   :  { %731 = vmatprep.subr.bf16.mxu0 %v841_v10  ;;  %820 = vmatprep.subr.bf16.mxu1 %v841_v10 }
  0x17   :  { %732 = vmatpush3.bf16.msra.mxu0 %v842_v13  ;;  %828 = vmatpush3.bf16.msra.mxu1 %v842_v13 }
  0x18   :  { %733 = vmatprep.subr.bf16.mxu0 %v843_v14  ;;  %821 = vmatprep.subr.bf16.mxu1 %v843_v14 }
  0x1b   :  { %734 = vmatpush3.bf16.msra.mxu0 %v844_v15  ;;  %829 = vmatpush3.bf16.msra.mxu1 %v844_v15 }
  0x1c   :  { %735 = vmatprep.subr.bf16.mxu0 %v845_v16  ;;  %822 = vmatprep.subr.bf16.mxu1 %v845_v16 }
  0x1f   :  { %736 = vmatpush3.bf16.msra.mxu0 %v846_v17  ;;  %830 = vmatpush3.bf16.msra.mxu1 %v846_v17 }
  0x20   :  { %795 = vmatprep.subr.bf16.mxu1 %v853_v19 }
  0x22   :  { %376 = vmatmul.mubr.bf16.vlgmr.msra.gmra.mxu0 %v847_v18  ;;  %424 = vmatmul.mubr.bf16.vlgmr.msra.gmra.mxu1 %v850_v20 }
  0x23   :  { %796 = vmatpush3.bf16.msra.mxu1 %v853_v19  ;;  %383 = vmatprep.mubr.bf16.mxu0 %v854_v21 }
  0x24   :  { %431 = vmatprep.mubr.bf16.mxu1 %v856_v22  ;;  %797 = vmatprep.subr.bf16.mxu1 %v860_v23 }
  0x27   :  { %798 = vmatpush3.bf16.msra.mxu1 %v860_v23 }
  0x2a   :  { %384 = vmatmul.mubr.bf16.gmra.mxu0 %v858_v24  ;;  %432 = vmatmul.mubr.bf16.gmra.mxu1 %v859_v25 }
  0x2b   :  { %391 = vmatprep.mubr.bf16.mxu0 %v861_v26  ;;  %799 = vmatprep.mubr.msk.bf16.mxu1 %vm318_vm0, %v863_v27 }
  0x32   :  { %392 = vmatmul.mubr.bf16.gmra.mxu0 %v864_v28  ;;  %800 = vmatmul.mubr.msk.bf16.vlgmr.msra.gmra.mxu1 %vm318_vm0, %v865_v29 }
  0x33   :  { %399 = vmatprep.mubr.bf16.mxu0 %v866_v30  ;;  %803 = vmatprep.mubr.msk.bf16.mxu1 %vm318_vm0, %v868_v31 }
  0x3a   :  { %400 = vmatmul.mubr.bf16.gmra.mxu0 %v869_v32  ;;  %804 = vmatmul.mubr.msk.bf16.gmra.mxu1 %vm318_vm0, %v870_v33 }
  0x3b   :  { %407 = vmatprep.mubr.bf16.mxu0 %v871_v34  ;;  %807 = vmatprep.mubr.msk.bf16.mxu1 %vm318_vm0, %v873_v35 }
  0x42   :  { %408 = vmatmul.mubr.bf16.gmra.mxu0 %v874_v36  ;;  %808 = vmatmul.mubr.msk.bf16.gmra.mxu1 %vm318_vm0, %v875_v37 }
  0x43   :  { %415 = vmatprep.mubr.bf16.mxu0 %v876_v38  ;;  %811 = vmatprep.mubr.msk.bf16.mxu1 %vm318_vm0, %v878_v39 }
  0x4a   :  { %416 = vmatmul.mubr.bf16.gmra.mxu0 %v879_v40  ;;  %812 = vmatmul.mubr.msk.bf16.gmra.mxu1 %vm318_vm0, %v880_v41 }
  0xe2   :  { %v737_v42 = vpop.f32.mrf.mxu0  ;;  %v1035_v43 = vpop.f32.mrf.mxu1 }
  0xe4   :  { %v738_v44 = vpop.f32.mrf.mxu0  ;;  %v1037_v45 = vpop.f32.mrf.mxu1 }
  0xe5   :  { %v739_v57 = vadd.f32 %v738_v44, %v737_v42 }
  0xe6   :  { %v740_v46 = vpop.f32.mrf.mxu0  ;;  %v1039_v47 = vpop.f32.mrf.mxu1 }
  0xe7   :  { %v378_v3 = vadd.f32 %v739_v57, %v1054_v60 }
  0xe8   :  { %v741_v48 = vpop.f32.mrf.mxu0  ;;  %v1041_v49 = vpop.f32.mrf.mxu1 }
  0xe9   :  { %v742_v63 = vadd.f32 %v741_v48, %v740_v46 }
  0xea   :  { %v743_v50 = vpop.f32.mrf.mxu0  ;;  %v1043_v51 = vpop.f32.mrf.mxu1 }
  0xeb   :  { %v381_v11 = vadd.f32 %v742_v63, %v1054_v60 }
  0xec   :  { %v744_v52 = vpop.f32.mrf.mxu0  ;;  %v1045_v53 = vpop.f32.mrf.mxu1 }
  0xed   :  { %v745_v54 = vadd.f32 %v744_v52, %v743_v50 }
  0xee   :  { %v746_v55 = vpop.f32.mrf.mxu0  ;;  %v1047_v56 = vpop.f32.mrf.mxu1 }
  0xef   :  { %v386_v62 = vadd.f32 %v745_v54, %v1054_v60  ;;  %v781_v54 = vadd.f32 %v1045_v53, %v1043_v51  ;;  %v775_v53 = vadd.f32 %v1037_v45, %v1035_v43 }
  0xf0   :  { %v747_v58 = vpop.f32.mrf.mxu0  ;;  %v1049_v59 = vpop.f32.mrf.mxu1 }
  0xf1   :  { %v748_v61 = vadd.f32 %v747_v58, %v746_v55 }
  0xf2   :  { %v749_v0 = vpop.f32.mrf.mxu0  ;;  %v801_v1 = vpop.f32.mrf.mxu1 }
  0xf3   :  { %v483_v2 = vadd.f32 %v801_v1, %v386_v62  ;;  %v389_v8 = vadd.f32 %v748_v61, %v1054_v60 }
  0xf4   :  { %v750_v4 = vpop.f32.mrf.mxu0  ;;  %v474_v5 = vpop.f32.mrf.mxu1 }
  0xf5   :  { %v539_v6 = vmax.f32 %v483_v2, 0.0  ;;  %v475_v7 = vadd.f32 %v474_v5, %v378_v3  ;;  %v751_v13 = vadd.f32 %v750_v4, %v749_v0  ;;  %v784_v3 = vadd.f32 %v1049_v59, %v1047_v56 }
  0xf6   :  { %v752_v9 = vpop.f32.mrf.mxu0  ;;  %v802_v10 = vpop.f32.mrf.mxu1  ;;  %v778_v56 = vadd.f32 %v1041_v49, %v1039_v47 }
  0xf7   :  { %v707_v12 = vpack.c.bf16 %v539_v6, %v539_v6  ;;  %v537_v14 = vmax.f32 %v475_v7, 0.0  ;;  %v486_v15 = vadd.f32 %v802_v10, %v389_v8  ;;  %v394_v26 = vadd.f32 %v751_v13, %v1054_v60 }
  0xf8   :  { %v753_v16 = vpop.f32.mrf.mxu0  ;;  %v477_v17 = vpop.f32.mrf.mxu1  ;;  %v426_v13 = vadd.f32 %v775_v53, %v1054_v60 }
  0xf9   :  { %620 = vst.msk [vmem:[%s1147_s3 + $0x8] sm:$0xf] %vm617_vm1, %v707_v12  ;;  %v705_v18 = vpack.c.bf16 %v537_v14, %v537_v14  ;;  %v540_v19 = vmax.f32 %v486_v15, 0.0  ;;  %v478_v20 = vadd.f32 %v477_v17, %v381_v11  ;;  %v754_v24 = vadd.f32 %v753_v16, %v752_v9 }
  0xfa   :  { %v755_v21 = vpop.f32.mrf.mxu0  ;;  %v805_v22 = vpop.f32.mrf.mxu1  ;;  %v434_v9 = vadd.f32 %v781_v54, %v1054_v60  ;;  %v437_v15 = vadd.f32 %v784_v3, %v1054_v60 }
  0xfb   :  { %618 = vst.msk [vmem:[%s1147_s3] sm:$0xf] %vm617_vm1, %v705_v18  ;;  %v708_v23 = vpack.c.bf16 %v540_v19, %v540_v19  ;;  %v538_v25 = vmax.f32 %v478_v20, 0.0  ;;  %v397_v36 = vadd.f32 %v754_v24, %v1054_v60 }
  0xfc   :  { %v756_v27 = vpop.f32.mrf.mxu0  ;;  %v490_v28 = vpop.f32.mrf.mxu1 }
  0xfd   :  { %621 = vst.msk [vmem:[%s1147_s3 + $0xc] sm:$0xf] %vm617_vm1, %v708_v23  ;;  %v706_v29 = vpack.c.bf16 %v538_v25, %v538_v25  ;;  %v757_v30 = vadd.f32 %v756_v27, %v755_v21  ;;  %v491_v31 = vadd.f32 %v490_v28, %v394_v26  ;;  %v429_v27 = vadd.f32 %v778_v56, %v1054_v60 }
  0xfe   :  { %v758_v32 = vpop.f32.mrf.mxu0  ;;  %v806_v33 = vpop.f32.mrf.mxu1 }
  0xff   :  { %619 = vst.msk [vmem:[%s1147_s3 + $0x4] sm:$0xf] %vm617_vm1, %v706_v29  ;;  %v402_v34 = vadd.f32 %v757_v30, %v1054_v60  ;;  %v541_v35 = vmax.f32 %v491_v31, 0.0 }
 0x100   :  { %v759_v37 = vpop.f32.mrf.mxu0  ;;  %v493_v38 = vpop.f32.mrf.mxu1 }
 0x101   :  { %v499_v39 = vadd.f32 %v805_v22, %v402_v34  ;;  %v709_v40 = vpack.c.bf16 %v541_v35, %v541_v35  ;;  %v760_v41 = vadd.f32 %v759_v37, %v758_v32  ;;  %v494_v42 = vadd.f32 %v493_v38, %v397_v36 }
 0x102   :  { %v761_v44 = vpop.f32.mrf.mxu0  ;;  %v809_v46 = vpop.f32.mrf.mxu1 }
 0x103   :  { %v543_v48 = vmax.f32 %v499_v39, 0.0  ;;  %622 = vst.msk [vmem:[%s1147_s3 + $0x10] sm:$0xf] %vm617_vm1, %v709_v40  ;;  %v405_v50 = vadd.f32 %v760_v41, %v1054_v60  ;;  %v542_v52 = vmax.f32 %v494_v42, 0.0 }
 0x104   :  { %v762_v55 = vpop.f32.mrf.mxu0  ;;  %v506_v57 = vpop.f32.mrf.mxu1 }
 0x105   :  { %v711_v58 = vpack.c.bf16 %v543_v48, %v543_v48  ;;  %v502_v61 = vadd.f32 %v806_v33, %v405_v50  ;;  %v710_v62 = vpack.c.bf16 %v542_v52, %v542_v52  ;;  %v763_v63 = vadd.f32 %v762_v55, %v761_v44 }
 0x106   :  { %v764_v0 = vpop.f32.mrf.mxu0  ;;  %v810_v1 = vpop.f32.mrf.mxu1 }
 0x107   :  { %624 = vst.msk [vmem:[%s1147_s3 + $0x18] sm:$0xf] %vm617_vm1, %v711_v58  ;;  %v544_v2 = vmax.f32 %v502_v61, 0.0  ;;  %623 = vst.msk [vmem:[%s1147_s3 + $0x14] sm:$0xf] %vm617_vm1, %v710_v62  ;;  %v410_v51 = vadd.f32 %v763_v63, %v1054_v60 }
 0x108   :  { %v765_v4 = vpop.f32.mrf.mxu0  ;;  %v509_v5 = vpop.f32.mrf.mxu1 }
 0x109   :  { %v712_v6 = vpack.c.bf16 %v544_v2, %v544_v2  ;;  %v507_v7 = vadd.f32 %v506_v57, %v410_v51  ;;  %v766_v8 = vadd.f32 %v765_v4, %v764_v0 }
 0x10a   :  { %v767_v10 = vpop.f32.mrf.mxu0  ;;  %v813_v11 = vpop.f32.mrf.mxu1 }
 0x10b   :  { %625 = vst.msk [vmem:[%s1147_s3 + $0x1c] sm:$0xf] %vm617_vm1, %v712_v6  ;;  %v545_v12 = vmax.f32 %v507_v7, 0.0  ;;  %v413_v43 = vadd.f32 %v766_v8, %v1054_v60  ;;  %v531_v45 = vadd.f32 %v813_v11, %v434_v9 }
 0x10c   :  { %v768_v59 = vpop.f32.mrf.mxu0  ;;  %v522_v14 = vpop.f32.mrf.mxu1 }
 0x10d   :  { %v713_v16 = vpack.c.bf16 %v545_v12, %v545_v12  ;;  %v510_v17 = vadd.f32 %v509_v5, %v413_v43  ;;  %v551_v18 = vmax.f32 %v531_v45, 0.0  ;;  %v769_v19 = vadd.f32 %v768_v59, %v767_v10 }
 0x10e   :  { %v523_v20 = vadd.f32 %v522_v14, %v426_v13  ;;  %v770_v21 = vpop.f32.mrf.mxu0  ;;  %v814_v22 = vpop.f32.mrf.mxu1 }
 0x10f   :  { %626 = vst.msk [vmem:[%s1147_s3 + $0x20] sm:$0xf] %vm617_vm1, %v713_v16  ;;  %v546_v23 = vmax.f32 %v510_v17, 0.0  ;;  %v719_v47 = vpack.c.bf16 %v551_v18, %v551_v18  ;;  %v418_v49 = vadd.f32 %v769_v19, %v1054_v60  ;;  %v534_v24 = vadd.f32 %v814_v22, %v437_v15 }
 0x110   :  { %v549_v25 = vmax.f32 %v523_v20, 0.0  ;;  %v771_v26 = vpop.f32.mrf.mxu0  ;;  %v525_v28 = vpop.f32.mrf.mxu1 }
 0x111   :  { %v714_v29 = vpack.c.bf16 %v546_v23, %v546_v23  ;;  %632 = vst.msk [vmem:[%s1147_s3 + $0x38] sm:$0xf] %vm617_vm1, %v719_v47  ;;  %v515_v30 = vadd.f32 %v809_v46, %v418_v49  ;;  %v552_v31 = vmax.f32 %v534_v24, 0.0  ;;  %v772_v32 = vadd.f32 %v771_v26, %v770_v21 }
 0x112   :  { %v717_v33 = vpack.c.bf16 %v549_v25, %v549_v25  ;;  %v526_v34 = vadd.f32 %v525_v28, %v429_v27 }
 0x113   :  { %627 = vst.msk [vmem:[%s1147_s3 + $0x24] sm:$0xf] %vm617_vm1, %v714_v29  ;;  %v547_v35 = vmax.f32 %v515_v30, 0.0  ;;  %v720_v36 = vpack.c.bf16 %v552_v31, %v552_v31  ;;  %v421_v37 = vadd.f32 %v772_v32, %v1054_v60 }
 0x114   :  { %630 = vst.msk [vmem:[%s1147_s3 + $0x30] sm:$0xf] %vm617_vm1, %v717_v33  ;;  %v550_v38 = vmax.f32 %v526_v34, 0.0 }
 0x115   :  { %v715_v39 = vpack.c.bf16 %v547_v35, %v547_v35  ;;  %633 = vst.msk [vmem:[%s1147_s3 + $0x3c] sm:$0xf] %vm617_vm1, %v720_v36  ;;  %v518_v40 = vadd.f32 %v810_v1, %v421_v37 }
 0x116   :  { %v718_v41 = vpack.c.bf16 %v550_v38, %v550_v38 }
 0x117   :  { %628 = vst.msk [vmem:[%s1147_s3 + $0x28] sm:$0xf] %vm617_vm1, %v715_v39  ;;  %v548_v60 = vmax.f32 %v518_v40, 0.0 }
 0x118   :  { %631 = vst.msk [vmem:[%s1147_s3 + $0x34] sm:$0xf] %vm617_vm1, %v718_v41 }
 0x119   :  { %v716_v42 = vpack.c.bf16 %v548_v60, %v548_v60 }
 0x11b   :  { %629 = vst.msk [vmem:[%s1147_s3 + $0x2c] sm:$0xf] %vm617_vm1, %v716_v42 }

// kernel: _lambda_.58
= control target key start
LH: loop header
LB: loop body
LE: loop exit
PB: predicated region body
PF: predicated region fallthrough
CT: control target
= control target key end

     0   :  { %vm171_vm0 = vcmask 257024   ;;  %s304_s1 = inlined_call_operand.vmem [shape: bf16[128,32], index: 1, kind: input, shape index: {}]   ;;  %s305_s0 = inlined_call_operand.vmem [shape: bf16[32,128], index: 0, kind: input, shape index: {}]   ;;  %s306_s2 = inlined_call_operand.vmem [shape: f32[1,32], index: 2, kind: input, shape index: {}]   ;;  %s307_s3 = inlined_call_operand.vmem [shape: bf16[32,32], index: 3, kind: output, shape index: {}]  }
   0x1   :  { %v229_v0 = vld [vmem:[%s304_s1 + $0x38] sm:$0xff]   ;;  %v230_v1 = vld [vmem:[%s304_s1 + $0x30] sm:$0xff]   ;;  %v231_v2 = vld [vmem:[%s304_s1 + $0x28] sm:$0xff]  }
   0x2   :  { %209 = vmatprep.subr.bf16.mxu0 %v229_v0  ;;  %v232_v3 = vld [vmem:[%s304_s1 + $0x20] sm:$0xff]   ;;  %v233_v5 = vld [vmem:[%s304_s1 + $0x18] sm:$0xff]   ;;  %v234_v6 = vld [vmem:[%s304_s1 + $0x10] sm:$0xff]  }
   0x3   :  { %210 = vmatpush3.bf16.msra.mxu0 %v229_v0  ;;  %v237_v4 = vld [vmem:[%s305_s0] sm:$0xff]   ;;  %v235_v7 = vld [vmem:[%s304_s1 + $0x8] sm:$0xff]  }
   0x4   :  { %211 = vmatprep.subr.bf16.mxu0 %v230_v1  ;;  %225 = vmatprep.mubr.bf16.mxu0 %v237_v4  ;;  %v236_v8 = vld [vmem:[%s304_s1] sm:$0xff]   ;;  %v238_v9 = vld [vmem:[%s305_s0 + $0x8] sm:$0xff]  }
   0x5   :  { %v180_v10 = vld [vmem:[%s306_s2] ss:$0 sm:$0xff] }
   0x7   :  { %212 = vmatpush3.bf16.msra.mxu0 %v230_v1 }
   0x8   :  { %213 = vmatprep.subr.bf16.mxu0 %v231_v2 }
   0xb   :  { %214 = vmatpush3.bf16.msra.mxu0 %v231_v2 }
   0xc   :  { %215 = vmatprep.subr.bf16.mxu0 %v232_v3 }
   0xf   :  { %216 = vmatpush3.bf16.msra.mxu0 %v232_v3 }
  0x10   :  { %217 = vmatprep.subr.bf16.mxu0 %v233_v5 }
  0x13   :  { %218 = vmatpush3.bf16.msra.mxu0 %v233_v5 }
  0x14   :  { %219 = vmatprep.subr.bf16.mxu0 %v234_v6 }
  0x17   :  { %220 = vmatpush3.bf16.msra.mxu0 %v234_v6 }
  0x18   :  { %221 = vmatprep.subr.bf16.mxu0 %v235_v7 }
  0x1b   :  { %222 = vmatpush3.bf16.msra.mxu0 %v235_v7 }
  0x1c   :  { %223 = vmatprep.subr.bf16.mxu0 %v236_v8 }
  0x1f   :  { %224 = vmatpush3.bf16.msra.mxu0 %v236_v8 }
  0x22   :  { %226 = vmatmul.mubr.bf16.vlgmr.msra.gmra.mxu0 %v238_v9 }
  0xe2   :  { %v227_v11 = vpop.f32.mrf.mxu0 }
  0xe3   :  { %v145_v12 = vadd.f32 %v227_v11, %v180_v10 }
  0xe4   :  { %v136_v13 = vpop.f32.mrf.mxu0 }
  0xe5   :  { %v153_v14 = vmax.f32 %v145_v12, 0.0  ;;  %v137_v15 = vadd.f32 %v180_v10, %v136_v13 }
  0xe6   :  { %v228_v16 = vpop.f32.mrf.mxu0 }
  0xe7   :  { %v197_v17 = vpack.c.bf16 %v153_v14, %v153_v14  ;;  %v151_v18 = vmax.f32 %v137_v15, 0.0  ;;  %v148_v19 = vadd.f32 %v228_v16, %v180_v10 }
  0xe8   :  { %v139_v20 = vpop.f32.mrf.mxu0 }
  0xe9   :  { %174 = vst.msk [vmem:[%s307_s3 + $0x8] sm:$0xf] %vm171_vm0, %v197_v17  ;;  %v195_v21 = vpack.c.bf16 %v151_v18, %v151_v18  ;;  %v154_v22 = vmax.f32 %v148_v19, 0.0  ;;  %v140_v23 = vadd.f32 %v180_v10, %v139_v20 }
  0xeb   :  { %172 = vst.msk [vmem:[%s307_s3] sm:$0xf] %vm171_vm0, %v195_v21  ;;  %v198_v24 = vpack.c.bf16 %v154_v22, %v154_v22  ;;  %v152_v25 = vmax.f32 %v140_v23, 0.0 }
  0xed   :  { %175 = vst.msk [vmem:[%s307_s3 + $0xc] sm:$0xf] %vm171_vm0, %v198_v24  ;;  %v196_v26 = vpack.c.bf16 %v152_v25, %v152_v25 }
  0xef   :  { %173 = vst.msk [vmem:[%s307_s3 + $0x4] sm:$0xf] %vm171_vm0, %v196_v26 }

// kernel: _lambda_.59
= control target key start
LH: loop header
LB: loop body
LE: loop exit
PB: predicated region body
PF: predicated region fallthrough
CT: control target
= control target key end

     0   :  { %vm215_vm0 = vcmask 261120   ;;  %vm364_vm1 = vcmask 519168   ;;  %s625_s1 = inlined_call_operand.vmem [shape: bf16[288,64], index: 1, kind: input, shape index: {}]   ;;  %s626_s0 = inlined_call_operand.vmem [shape: bf16[32,288], index: 0, kind: input, shape index: {}]   ;;  %s627_s2 = inlined_call_operand.vmem [shape: f32[1,64], index: 2, kind: input, shape index: {}]   ;;  %s628_s3 = inlined_call_operand.vmem [shape: bf16[32,64], index: 3, kind: input, shape index: {}]   ;;  %s629_s4 = inlined_call_operand.vmem [shape: bf16[32,64], index: 4, kind: output, shape index: {}]  }
   0x1   :  { %v461_v0 = vld [vmem:[%s625_s1 + $0x78] sm:$0xff]   ;;  %v463_v2 = vld [vmem:[%s625_s1 + $0x70] sm:$0xff]   ;;  %v465_v4 = vld [vmem:[%s625_s1 + $0x68] sm:$0xff]  }
   0x2   :  { %v462_v1 = vld [vmem:[%s625_s1 + $0x38] sm:$0xff]   ;;  %421 = vmatprep.subr.bf16.mxu0 %v461_v0  ;;  %v464_v3 = vld [vmem:[%s625_s1 + $0x30] sm:$0xff]   ;;  %v466_v5 = vld [vmem:[%s625_s1 + $0x28] sm:$0xff]  }
   0x3   :  { %422 = vmatpush3.bf16.msra.mxu0 %v462_v1  ;;  %v467_v6 = vld [vmem:[%s625_s1 + $0x60] sm:$0xff]   ;;  %v469_v8 = vld [vmem:[%s625_s1 + $0x58] sm:$0xff]   ;;  %v476_v10 = vld [vmem:[%s625_s1 + $0x88] sm:$0xff]  }
   0x4   :  { %423 = vmatprep.subr.bf16.mxu0 %v463_v2  ;;  %v468_v7 = vld [vmem:[%s625_s1 + $0x20] sm:$0xff]   ;;  %v470_v9 = vld [vmem:[%s625_s1 + $0x18] sm:$0xff]   ;;  %v471_v11 = vld [vmem:[%s625_s1 + $0x50] sm:$0xff]   ;;  %453 = vmatprep.subr.bf16.mxu1 %v476_v10 }
   0x5   :  { %v472_v12 = vld [vmem:[%s625_s1 + $0x10] sm:$0xff]   ;;  %v473_v13 = vld [vmem:[%s625_s1 + $0x48] sm:$0xff]   ;;  %454 = vmatpush3.bf16.msra.mxu1 %v476_v10  ;;  %v481_v15 = vld [vmem:[%s625_s1 + $0x80] sm:$0xff]  }
   0x6   :  { %v480_v14 = vld [vmem:[%s626_s0 + $0x4] ss:$12 sps:$4 sm:$0xff]   ;;  %v482_v16 = vld [vmem:[%s626_s0 + $0x8] ss:$12 sps:$4 sm:$0xff]   ;;  %455 = vmatprep.subr.bf16.mxu1 %v481_v15  ;;  %v483_v17 = vld [vmem:[%s626_s0 + $0x20] ss:$12 sps:$4 sm:$0xff]  }
   0x7   :  { %424 = vmatpush3.bf16.msra.mxu0 %v464_v3  ;;  %254 = vmatprep.mubr.bf16.mxu0 %v480_v14  ;;  %v474_v18 = vld [vmem:[%s625_s1 + $0x8] sm:$0xff]   ;;  %v475_v19 = vld [vmem:[%s625_s1 + $0x40] sm:$0xff]  }
   0x8   :  { %425 = vmatprep.subr.bf16.mxu0 %v465_v4  ;;  %457 = vmatprep.mubr.msk.bf16.mxu1 %vm215_vm0, %v482_v16  ;;  %v477_v20 = vld [vmem:[%s625_s1] sm:$0xff]   ;;  %v484_v22 = vld [vmem:[%s626_s0 + $0x1c] ss:$12 sps:$4 sm:$0xff]  }
   0x9   :  { %456 = vmatpush3.bf16.msra.mxu1 %v481_v15  ;;  %v478_v21 = vld [vmem:[%s626_s0] ss:$12 sps:$4 sm:$0xff]   ;;  %v486_v23 = vld [vmem:[%s626_s0 + $0x18] ss:$12 sps:$4 sm:$0xff]  }
   0xa   :  { %v373_v28 = vld [vmem:[%s627_s2] ss:$0 sm:$0xff]  ;;  %v420_v2 = vld [vmem:[%s628_s3 + $0x8] sm:$0xff]  }
   0xb   :  { %426 = vmatpush3.bf16.msra.mxu0 %v466_v5  ;;  %v413_v59 = vld [vmem:[%s628_s3] sm:$0xff]   ;;  %v418_v5 = vunpack.c.l.bf16 %v420_v2  ;;  %v419_v10 = vunpack.c.h.bf16 %v420_v2 }
   0xc   :  { %427 = vmatprep.subr.bf16.mxu0 %v467_v6  ;;  %458 = vmatmul.mubr.msk.bf16.vlgmr.msra.gmra.mxu1 %vm215_vm0, %v483_v17  ;;  %v414_v61 = vunpack.c.l.bf16 %v413_v59  ;;  %v415_v1 = vunpack.c.h.bf16 %v413_v59 }
   0xf   :  { %428 = vmatpush3.bf16.msra.mxu0 %v468_v7 }
  0x10   :  { %429 = vmatprep.subr.bf16.mxu0 %v469_v8 }
  0x13   :  { %430 = vmatpush3.bf16.msra.mxu0 %v470_v9 }
  0x14   :  { %431 = vmatprep.subr.bf16.mxu0 %v471_v11 }
  0x17   :  { %432 = vmatpush3.bf16.msra.mxu0 %v472_v12 }
  0x18   :  { %433 = vmatprep.subr.bf16.mxu0 %v473_v13 }
  0x1b   :  { %434 = vmatpush3.bf16.msra.mxu0 %v474_v18 }
  0x1c   :  { %435 = vmatprep.subr.bf16.mxu0 %v475_v19 }
  0x1f   :  { %436 = vmatpush3.bf16.msra.mxu0 %v477_v20 }
  0x22   :  { %255 = vmatmul.mubr.bf16.vlgmr.msra.gmra.mxu0 %v478_v21 }
  0x23   :  { %262 = vmatprep.mubr.bf16.mxu0 %v484_v22 }
  0x2a   :  { %263 = vmatmul.mubr.bf16.gmra.mxu0 %v486_v23 }
  0xcc   :  { %v459_v24 = vpop.f32.mrf.mxu1 }
  0xce   :  { %v305_v26 = vpop.f32.mrf.mxu1 }
  0xd0   :  { %v460_v31 = vpop.f32.mrf.mxu1 }
  0xd2   :  { %v308_v37 = vpop.f32.mrf.mxu1 }
  0xe2   :  { %v437_v25 = vpop.f32.mrf.mxu0 }
  0xe4   :  { %v438_v27 = vpop.f32.mrf.mxu0 }
  0xe5   :  { %v439_v29 = vadd.f32 %v438_v27, %v437_v25 }
  0xe6   :  { %v440_v30 = vpop.f32.mrf.mxu0 }
  0xe7   :  { %v257_v32 = vadd.f32 %v439_v29, %v373_v28 }
  0xe8   :  { %v441_v33 = vpop.f32.mrf.mxu0 }
  0xe9   :  { %v442_v34 = vadd.f32 %v441_v33, %v440_v30  ;;  %v306_v35 = vadd.f32 %v305_v26, %v257_v32 }
  0xea   :  { %v443_v36 = vpop.f32.mrf.mxu0 }
  0xeb   :  { %v400_v38 = vmul.f32 -1.442695, %v306_v35  ;;  %v260_v39 = vadd.f32 %v442_v34, %v373_v28 }
  0xec   :  { %v444_v40 = vpop.f32.mrf.mxu0 }
  0xed   :  { %487 = vpow2.f32 %v400_v38  ;;  %v445_v41 = vadd.f32 %v444_v40, %v443_v36  ;;  %v309_v42 = vadd.f32 %v308_v37, %v260_v39 }
  0xee   :  { %v446_v43 = vpop.f32.mrf.mxu0 }
  0xef   :  { %v265_v44 = vadd.f32 %v445_v41, %v373_v28  ;;  %v401_v45 = vmul.f32 -1.442695, %v309_v42 }
  0xf0   :  { %v447_v46 = vpop.f32.mrf.mxu0 }
  0xf1   :  { %v314_v47 = vadd.f32 %v459_v24, %v265_v44  ;;  %489 = vpow2.f32 %v401_v45  ;;  %v448_v48 = vadd.f32 %v447_v46, %v446_v43 }
  0xf3   :  { %v402_v49 = vmul.f32 -1.442695, %v314_v47  ;;  %v268_v50 = vadd.f32 %v448_v48, %v373_v28 }
  0xf5   :  { %491 = vpow2.f32 %v402_v49  ;;  %v317_v51 = vadd.f32 %v460_v31, %v268_v50 }
  0xf7   :  { %v403_v52 = vmul.f32 -1.442695, %v317_v51 }
  0xf9   :  { %493 = vpow2.f32 %v403_v52 }
  0xfa   :  { %v488_v53 = vpop.eup %487 }
  0xfb   :  { %v332_v54 = vadd.f32 1.0, %v488_v53 }
  0xfd   :  { %495 = vrcp.f32 %v332_v54 }
  0xfe   :  { %v490_v55 = vpop.eup %489 }
  0xff   :  { %v333_v56 = vadd.f32 1.0, %v490_v55 }
 0x101   :  { %497 = vrcp.f32 %v333_v56 }
 0x102   :  { %v492_v57 = vpop.eup %491 }
 0x103   :  { %v334_v58 = vadd.f32 1.0, %v492_v57 }
 0x105   :  { %499 = vrcp.f32 %v334_v58 }
 0x106   :  { %v494_v60 = vpop.eup %493 }
 0x107   :  { %v335_v62 = vadd.f32 1.0, %v494_v60 }
 0x109   :  { %501 = vrcp.f32 %v335_v62 }
 0x10a   :  { %v496_v63 = vpop.eup %495 }
 0x10b   :  { %v344_v0 = vmul.f32 %v496_v63, %v414_v61 }
 0x10d   :  { %v408_v3 = vpack.c.bf16 %v344_v0, %v344_v0 }
 0x10e   :  { %v498_v4 = vpop.eup %497 }
 0x10f   :  { %365 = vst.msk [vmem:[%s629_s4] sm:$0xf] %vm364_vm1, %v408_v3  ;;  %v345_v6 = vmul.f32 %v498_v4, %v415_v1 }
 0x111   :  { %v409_v7 = vpack.c.bf16 %v345_v6, %v345_v6 }
 0x112   :  { %v500_v8 = vpop.eup %499 }
 0x113   :  { %v346_v9 = vmul.f32 %v500_v8, %v418_v5  ;;  %366 = vst.msk [vmem:[%s629_s4 + $0x4] sm:$0xf] %vm364_vm1, %v409_v7 }
 0x115   :  { %v410_v11 = vpack.c.bf16 %v346_v9, %v346_v9 }
 0x116   :  { %v502_v12 = vpop.eup %501 }
 0x117   :  { %367 = vst.msk [vmem:[%s629_s4 + $0x8] sm:$0xf] %vm364_vm1, %v410_v11  ;;  %v347_v13 = vmul.f32 %v502_v12, %v419_v10 }
 0x119   :  { %v411_v14 = vpack.c.bf16 %v347_v13, %v347_v13 }
 0x11b   :  { %368 = vst.msk [vmem:[%s629_s4 + $0xc] sm:$0xf] %vm364_vm1, %v411_v14 }

// kernel: _lambda_.60
= control target key start
LH: loop header
LB: loop body
LE: loop exit
PB: predicated region body
PF: predicated region fallthrough
CT: control target
= control target key end

     0   :  { %vm372_vm0 = vcmask 523264   ;;  %s913_s1 = inlined_call_operand.vmem [shape: bf16[576,128], index: 1, kind: input, shape index: {}]   ;;  %s914_s0 = inlined_call_operand.vmem [shape: bf16[32,576], index: 0, kind: input, shape index: {}]   ;;  %s915_s2 = inlined_call_operand.vmem [shape: f32[1,128], index: 2, kind: input, shape index: {}]   ;;  %s916_s3 = inlined_call_operand.vmem [shape: bf16[32,128], index: 3, kind: output, shape index: {}]  }
   0x1   :  { %v696_v0 = vld [vmem:[%s913_s1 + $0x78] sm:$0xff]   ;;  %v700_v4 = vld [vmem:[%s913_s1 + $0x70] sm:$0xff]   ;;  %v704_v8 = vld [vmem:[%s913_s1 + $0x68] sm:$0xff]  }
   0x2   :  { %v697_v1 = vld [vmem:[%s913_s1 + $0xf8] sm:$0xff]   ;;  %622 = vmatprep.subr.bf16.mxu0 %v696_v0  ;;  %v701_v5 = vld [vmem:[%s913_s1 + $0xf0] sm:$0xff]   ;;  %v705_v9 = vld [vmem:[%s913_s1 + $0xe8] sm:$0xff]  }
   0x3   :  { %v698_v2 = vld [vmem:[%s913_s1 + $0x38] sm:$0xff]   ;;  %650 = vmatprep.subr.bf16.mxu1 %v697_v1  ;;  %v702_v6 = vld [vmem:[%s913_s1 + $0x30] sm:$0xff]   ;;  %v706_v10 = vld [vmem:[%s913_s1 + $0x28] sm:$0xff]  }
   0x4   :  { %v699_v3 = vld [vmem:[%s913_s1 + $0xb8] sm:$0xff]   ;;  %623 = vmatpush3.bf16.msra.mxu0 %v698_v2  ;;  %v703_v7 = vld [vmem:[%s913_s1 + $0xb0] sm:$0xff]   ;;  %v707_v11 = vld [vmem:[%s913_s1 + $0xa8] sm:$0xff]  }
   0x5   :  { %651 = vmatpush3.bf16.msra.mxu1 %v699_v3  ;;  %624 = vmatprep.subr.bf16.mxu0 %v700_v4  ;;  %v708_v12 = vld [vmem:[%s913_s1 + $0x60] sm:$0xff]   ;;  %v712_v16 = vld [vmem:[%s913_s1 + $0x58] sm:$0xff]   ;;  %v716_v20 = vld [vmem:[%s913_s1 + $0x50] sm:$0xff]  }
   0x6   :  { %652 = vmatprep.subr.bf16.mxu1 %v701_v5  ;;  %v709_v13 = vld [vmem:[%s913_s1 + $0xe0] sm:$0xff]   ;;  %v713_v17 = vld [vmem:[%s913_s1 + $0xd8] sm:$0xff]   ;;  %v717_v21 = vld [vmem:[%s913_s1 + $0xd0] sm:$0xff]  }
   0x7   :  { %v710_v14 = vld [vmem:[%s913_s1 + $0x20] sm:$0xff]   ;;  %v714_v18 = vld [vmem:[%s913_s1 + $0x18] sm:$0xff]   ;;  %v718_v22 = vld [vmem:[%s913_s1 + $0x10] sm:$0xff]  }
   0x8   :  { %625 = vmatpush3.bf16.msra.mxu0 %v702_v6  ;;  %v711_v15 = vld [vmem:[%s913_s1 + $0xa0] sm:$0xff]   ;;  %v715_v19 = vld [vmem:[%s913_s1 + $0x98] sm:$0xff]   ;;  %v719_v23 = vld [vmem:[%s913_s1 + $0x90] sm:$0xff]  }
   0x9   :  { %653 = vmatpush3.bf16.msra.mxu1 %v703_v7  ;;  %626 = vmatprep.subr.bf16.mxu0 %v704_v8  ;;  %v720_v24 = vld [vmem:[%s913_s1 + $0x48] sm:$0xff]   ;;  %v724_v28 = vld [vmem:[%s913_s1 + $0x40] sm:$0xff]   ;;  %v734_v36 = vld [vmem:[%s913_s1 + $0x118] sm:$0xff]  }
   0xa   :  { %654 = vmatprep.subr.bf16.mxu1 %v705_v9  ;;  %v721_v25 = vld [vmem:[%s913_s1 + $0xc8] sm:$0xff]   ;;  %v725_v29 = vld [vmem:[%s913_s1 + $0xc0] sm:$0xff]   ;;  %v735_v37 = vld [vmem:[%s913_s1 + $0x110] sm:$0xff]  }
   0xb   :  { %v722_v26 = vld [vmem:[%s913_s1 + $0x8] sm:$0xff]   ;;  %v726_v30 = vld [vmem:[%s913_s1] sm:$0xff]  }
   0xc   :  { %627 = vmatpush3.bf16.msra.mxu0 %v706_v10  ;;  %v723_v27 = vld [vmem:[%s913_s1 + $0x88] sm:$0xff]   ;;  %v727_v31 = vld [vmem:[%s913_s1 + $0x80] sm:$0xff]  }
   0xd   :  { %655 = vmatpush3.bf16.msra.mxu1 %v707_v11  ;;  %628 = vmatprep.subr.bf16.mxu0 %v708_v12  ;;  %v728_v32 = vld [vmem:[%s914_s0] ss:$20 sps:$4 sm:$0xff]   ;;  %v730_v33 = vld [vmem:[%s914_s0 + $0x4] ss:$20 sps:$4 sm:$0xff]   ;;  %v731_v34 = vld [vmem:[%s914_s0 + $0x8] ss:$20 sps:$4 sm:$0xff]  }
   0xe   :  { %656 = vmatprep.subr.bf16.mxu1 %v709_v13  ;;  %v733_v35 = vld [vmem:[%s914_s0 + $0xc] ss:$20 sps:$4 sm:$0xff]   ;;  %411 = vmatprep.mubr.bf16.mxu0 %v730_v33  ;;  %v738_v39 = vld [vmem:[%s914_s0 + $0x34] ss:$20 sps:$4 sm:$0xff]   ;;  %v741_v42 = vld [vmem:[%s914_s0 + $0x30] ss:$20 sps:$4 sm:$0xff]  }
   0xf   :  { %460 = vmatprep.mubr.bf16.mxu1 %v733_v35  ;;  %v736_v38 = vld [vmem:[%s914_s0 + $0x2c] ss:$20 sps:$4 sm:$0xff]   ;;  %v740_v40 = vld [vmem:[%s914_s0 + $0x28] ss:$20 sps:$4 sm:$0xff]   ;;  %v744_v43 = vld [vmem:[%s914_s0 + $0x10] ss:$20 sps:$4 sm:$0xff]  }
  0x10   :  { %629 = vmatpush3.bf16.msra.mxu0 %v710_v14  ;;  %v742_v41 = vld [vmem:[%s913_s1 + $0x108] sm:$0xff]   ;;  %v743_v44 = vld [vmem:[%s913_s1 + $0x100] sm:$0xff]  }
  0x11   :  { %657 = vmatpush3.bf16.msra.mxu1 %v711_v15  ;;  %630 = vmatprep.subr.bf16.mxu0 %v712_v16  ;;  %v745_v45 = vld [vmem:[%s914_s0 + $0x38] ss:$20 sps:$4 sm:$0xff]   ;;  %v554_v59 = vld [vmem:[%s915_s2] ss:$0 sm:$0xff] }
  0x12   :  { %658 = vmatprep.subr.bf16.mxu1 %v713_v17 }
  0x14   :  { %631 = vmatpush3.bf16.msra.mxu0 %v714_v18 }
  0x15   :  { %659 = vmatpush3.bf16.msra.mxu1 %v715_v19  ;;  %632 = vmatprep.subr.bf16.mxu0 %v716_v20 }
  0x16   :  { %660 = vmatprep.subr.bf16.mxu1 %v717_v21 }
  0x18   :  { %633 = vmatpush3.bf16.msra.mxu0 %v718_v22 }
  0x19   :  { %661 = vmatpush3.bf16.msra.mxu1 %v719_v23  ;;  %634 = vmatprep.subr.bf16.mxu0 %v720_v24 }
  0x1a   :  { %662 = vmatprep.subr.bf16.mxu1 %v721_v25 }
  0x1c   :  { %635 = vmatpush3.bf16.msra.mxu0 %v722_v26 }
  0x1d   :  { %663 = vmatpush3.bf16.msra.mxu1 %v723_v27  ;;  %636 = vmatprep.subr.bf16.mxu0 %v724_v28 }
  0x1e   :  { %664 = vmatprep.subr.bf16.mxu1 %v725_v29 }
  0x20   :  { %637 = vmatpush3.bf16.msra.mxu0 %v726_v30 }
  0x21   :  { %665 = vmatpush3.bf16.msra.mxu1 %v727_v31  ;;  %684 = vmatprep.subr.bf16.mxu0 %v734_v36 }
  0x23   :  { %412 = vmatmul.mubr.bf16.vlgmr.msra.gmra.mxu0 %v728_v32 }
  0x24   :  { %461 = vmatmul.mubr.bf16.vlgmr.msra.gmra.mxu1 %v731_v34  ;;  %685 = vmatpush3.bf16.msra.mxu0 %v734_v36 }
  0x25   :  { %686 = vmatprep.subr.bf16.mxu0 %v735_v37  ;;  %419 = vmatprep.mubr.bf16.mxu0 %v736_v38 }
  0x26   :  { %468 = vmatprep.mubr.bf16.mxu1 %v738_v39 }
  0x28   :  { %687 = vmatpush3.bf16.msra.mxu0 %v735_v37 }
  0x29   :  { %688 = vmatprep.subr.bf16.mxu0 %v742_v41 }
  0x2b   :  { %420 = vmatmul.mubr.bf16.gmra.mxu0 %v740_v40 }
  0x2c   :  { %469 = vmatmul.mubr.bf16.gmra.mxu1 %v741_v42  ;;  %692 = vmatprep.mubr.msk.bf16.mxu0 %vm372_vm0, %v744_v43 }
  0x2d   :  { %689 = vmatpush3.bf16.msra.mxu0 %v742_v41 }
  0x2e   :  { %690 = vmatprep.subr.bf16.mxu0 %v743_v44 }
  0x31   :  { %691 = vmatpush3.bf16.msra.mxu0 %v743_v44 }
  0x34   :  { %693 = vmatmul.mubr.msk.bf16.vlgmr.msra.gmra.mxu0 %vm372_vm0, %v745_v45 }
  0xe3   :  { %v638_v46 = vpop.f32.mrf.mxu0 }
  0xe4   :  { %v666_v47 = vpop.f32.mrf.mxu1 }
  0xe5   :  { %v639_v48 = vpop.f32.mrf.mxu0 }
  0xe6   :  { %v667_v49 = vpop.f32.mrf.mxu1  ;;  %v640_v60 = vadd.f32 %v639_v48, %v638_v46 }
  0xe7   :  { %v641_v50 = vpop.f32.mrf.mxu0  ;;  %v668_v6 = vadd.f32 %v667_v49, %v666_v47 }
  0xe8   :  { %v669_v51 = vpop.f32.mrf.mxu1  ;;  %v414_v5 = vadd.f32 %v640_v60, %v554_v59 }
  0xe9   :  { %v642_v52 = vpop.f32.mrf.mxu0 }
  0xea   :  { %v670_v53 = vpop.f32.mrf.mxu1  ;;  %v643_v1 = vadd.f32 %v642_v52, %v641_v50  ;;  %v463_v16 = vadd.f32 %v668_v6, %v414_v5 }
  0xeb   :  { %v644_v54 = vpop.f32.mrf.mxu0  ;;  %v671_v14 = vadd.f32 %v670_v53, %v669_v51 }
  0xec   :  { %v672_v55 = vpop.f32.mrf.mxu1  ;;  %v417_v11 = vadd.f32 %v643_v1, %v554_v59 }
  0xed   :  { %v645_v56 = vpop.f32.mrf.mxu0 }
  0xee   :  { %v646_v57 = vadd.f32 %v645_v56, %v644_v54  ;;  %v673_v58 = vpop.f32.mrf.mxu1  ;;  %v466_v20 = vadd.f32 %v671_v14, %v417_v11 }
  0xef   :  { %v674_v61 = vadd.f32 %v673_v58, %v672_v55  ;;  %v647_v62 = vpop.f32.mrf.mxu0 }
  0xf0   :  { %v422_v63 = vadd.f32 %v646_v57, %v554_v59  ;;  %v675_v0 = vpop.f32.mrf.mxu1 }
  0xf1   :  { %v648_v2 = vpop.f32.mrf.mxu0 }
  0xf2   :  { %v649_v3 = vadd.f32 %v648_v2, %v647_v62  ;;  %v676_v4 = vpop.f32.mrf.mxu1  ;;  %v471_v7 = vadd.f32 %v674_v61, %v422_v63 }
  0xf3   :  { %v677_v9 = vadd.f32 %v676_v4, %v675_v0 }
  0xf4   :  { %v425_v8 = vadd.f32 %v649_v3, %v554_v59  ;;  %v694_v10 = vpop.f32.mrf.mxu0 }
  0xf5   :  { %v520_v15 = vadd.f32 %v694_v10, %v471_v7 }
  0xf6   :  { %v511_v12 = vpop.f32.mrf.mxu0  ;;  %v474_v13 = vadd.f32 %v677_v9, %v425_v8 }
  0xf7   :  { %v512_v18 = vadd.f32 %v511_v12, %v463_v16  ;;  %v528_v22 = vmax.f32 %v520_v15, 0.0 }
  0xf8   :  { %v695_v17 = vpop.f32.mrf.mxu0 }
  0xf9   :  { %v523_v19 = vadd.f32 %v695_v17, %v474_v13  ;;  %v526_v25 = vmax.f32 %v512_v18, 0.0 }
  0xfa   :  { %v514_v21 = vpop.f32.mrf.mxu0 }
  0xfb   :  { %v529_v23 = vmax.f32 %v523_v19, 0.0  ;;  %v515_v24 = vadd.f32 %v514_v21, %v466_v20 }
  0xfd   :  { %v619_v26 = vpack.c.bf16 %v529_v23, %v528_v22  ;;  %v527_v27 = vmax.f32 %v515_v24, 0.0 }
  0xff   :  { %621 = vst [vmem:[%s916_s3 + $0x8] sm:$0xff] %v619_v26   ;;  %v614_v28 = vpack.c.bf16 %v527_v27, %v526_v25 }
 0x101   :  { %615 = vst [vmem:[%s916_s3] sm:$0xff] %v614_v28  }

// kernel: _lambda_.61
= control target key start
LH: loop header
LB: loop body
LE: loop exit
PB: predicated region body
PF: predicated region fallthrough
CT: control target
= control target key end

     0   :  { %vm200_vm0 = vcmask 519168   ;;  %s342_s1 = inlined_call_operand.vmem [shape: bf16[256,64], index: 1, kind: input, shape index: {}]   ;;  %s343_s0 = inlined_call_operand.vmem [shape: bf16[8,256], index: 0, kind: input, shape index: {}]   ;;  %s344_s2 = inlined_call_operand.vmem [shape: f32[1,64], index: 2, kind: input, shape index: {}]   ;;  %s345_s3 = inlined_call_operand.vmem [shape: bf16[8,64], index: 3, kind: output, shape index: {}]  }
   0x1   :  { %v247_v0 = vld [vmem:[%s342_s1 + $0x78] sm:$0xff]   ;;  %v249_v2 = vld [vmem:[%s342_s1 + $0x70] sm:$0xff]   ;;  %v251_v4 = vld [vmem:[%s342_s1 + $0x68] sm:$0xff]  }
   0x2   :  { %v248_v1 = vld [vmem:[%s342_s1 + $0x38] sm:$0xff]   ;;  %225 = vmatprep.subr.bf16.mxu0 %v247_v0  ;;  %v250_v3 = vld [vmem:[%s342_s1 + $0x30] sm:$0xff]   ;;  %v252_v5 = vld [vmem:[%s342_s1 + $0x28] sm:$0xff]  }
   0x3   :  { %226 = vmatpush3.bf16.msra.mxu0 %v248_v1  ;;  %v253_v6 = vld [vmem:[%s342_s1 + $0x60] sm:$0xff]   ;;  %v255_v8 = vld [vmem:[%s342_s1 + $0x58] sm:$0xff]   ;;  %v257_v10 = vld [vmem:[%s342_s1 + $0x50] sm:$0xff]  }
   0x4   :  { %227 = vmatprep.subr.bf16.mxu0 %v249_v2  ;;  %v254_v7 = vld [vmem:[%s342_s1 + $0x20] sm:$0xff]   ;;  %v256_v9 = vld [vmem:[%s342_s1 + $0x18] sm:$0xff]   ;;  %v258_v13 = vld [vmem:[%s342_s1 + $0x10] sm:$0xff]  }
   0x5   :  { %v15_v11 = vld [vmem:[%s343_s0] sm:$0xff]  ;;  %v259_v14 = vld [vmem:[%s342_s1 + $0x48] sm:$0xff]  }
   0x6   :  { %v208_v12 = vcombine.high %v15_v11, %v15_v11  ;;  %v260_v15 = vld [vmem:[%s342_s1 + $0x8] sm:$0xff]   ;;  %v261_v16 = vld [vmem:[%s342_s1 + $0x40] sm:$0xff]   ;;  %v207_v18 = vcombine.low %v15_v11, %v15_v11 }
   0x7   :  { %228 = vmatpush3.bf16.msra.mxu0 %v250_v3  ;;  %v262_v17 = vld [vmem:[%s342_s1] sm:$0xff]  }
   0x8   :  { %229 = vmatprep.subr.bf16.mxu0 %v251_v4  ;;  %190 = vmatprep.mubr.bf16.mxu0 %v208_v12  ;;  %v206_v20 = vld [vmem:[%s344_s2] ss:$0 sm:$0xff] }
   0xb   :  { %230 = vmatpush3.bf16.msra.mxu0 %v252_v5 }
   0xc   :  { %231 = vmatprep.subr.bf16.mxu0 %v253_v6 }
   0xf   :  { %232 = vmatpush3.bf16.msra.mxu0 %v254_v7 }
  0x10   :  { %233 = vmatprep.subr.bf16.mxu0 %v255_v8 }
  0x13   :  { %234 = vmatpush3.bf16.msra.mxu0 %v256_v9 }
  0x14   :  { %235 = vmatprep.subr.bf16.mxu0 %v257_v10 }
  0x17   :  { %236 = vmatpush3.bf16.msra.mxu0 %v258_v13 }
  0x18   :  { %237 = vmatprep.subr.bf16.mxu0 %v259_v14 }
  0x1b   :  { %238 = vmatpush3.bf16.msra.mxu0 %v260_v15 }
  0x1c   :  { %239 = vmatprep.subr.bf16.mxu0 %v261_v16 }
  0x1f   :  { %240 = vmatpush3.bf16.msra.mxu0 %v262_v17 }
  0x22   :  { %191 = vmatmul.mubr.bf16.vlgmr.msra.gmra.mxu0 %v207_v18 }
  0xe2   :  { %v241_v19 = vpop.f32.mrf.mxu0 }
  0xe4   :  { %v242_v21 = vpop.f32.mrf.mxu0 }
  0xe5   :  { %v243_v22 = vadd.f32 %v242_v21, %v241_v19 }
  0xe6   :  { %v244_v23 = vpop.f32.mrf.mxu0 }
  0xe7   :  { %v193_v24 = vadd.f32 %v243_v22, %v206_v20 }
  0xe8   :  { %v245_v25 = vpop.f32.mrf.mxu0 }
  0xe9   :  { %v198_v26 = vmax.f32 %v193_v24, 0.0 }
  0xeb   :  { %v199_v27 = vpack.c.bf16 %v198_v26, %v198_v26 }
  0xed   :  { %201 = vst.msk [vmem:[%s345_s3] sm:$0xf] %vm200_vm0, %v199_v27 }

// kernel: _lambda_.63
= control target key start
LH: loop header
LB: loop body
LE: loop exit
PB: predicated region body
PF: predicated region fallthrough
CT: control target
= control target key end

     0   :  { %v233_v1 = vmov 0.0   ;;  %vm234_vm0 = vmmov 0   ;;  %vm16_vm1 = vcmask 1043456   ;;  %s328_s0 = inlined_call_operand.vmem [shape: bf16[2,4,128], index: 0, kind: input, shape index: {}]   ;;  %s329_s1 = inlined_call_operand.vmem [shape: f32[128,16], index: 1, kind: input, shape index: {}]   ;;  %s330_s2 = inlined_call_operand.hbm [shape: f32[2,16], index: 2, kind: output, shape index: {}]  }
   0x1   :  { %v48_v0 = vld [vmem:[%s329_s1 + $0x78] sm:$0xff]  ;;  %169 = vmatprep.subr.mxu0 %v233_v1  ;;  %v47_v2 = vld [vmem:[%s329_s1 + $0x70] sm:$0xff]  ;;  %201 = vmatprep.mubr.msk.f32.mxu0 %vm234_vm0, %v233_v1  ;;  %v46_v3 = vld [vmem:[%s329_s1 + $0x68] sm:$0xff] }
   0x2   :  { %170 = vmatpush3.msra.mxu0 %v48_v0  ;;  %v45_v4 = vld [vmem:[%s329_s1 + $0x60] sm:$0xff] }
   0x3   :  { %171 = vmatprep.subr.mxu0 %v233_v1  ;;  %v12_v5 = vld [vmem:[%s328_s0] sm:$0x3]  ;;  %v13_v6 = vld [vmem:[%s328_s0 + $0x2] sm:$0x3] }
   0x4   :  { %172 = vmatpush3.msra.mxu0 %v47_v2  ;;  %v14_v7 = vunpack.c.l.bf16 %v12_v5  ;;  %v15_v8 = vunpack.c.l.bf16 %v13_v6 }
   0x5   :  { %173 = vmatprep.subr.mxu0 %v233_v1 }
   0x6   :  { %174 = vmatpush3.msra.mxu0 %v46_v3 }
   0x7   :  { %7 = vsyncpa [#allocation3], 0  ;;  %175 = vmatprep.subr.mxu0 %v233_v1  ;;  %v44_v9 = vld [vmem:[%s329_s1 + $0x58] sm:$0xff]  ;;  %v17_v10 = vsel %vm16_vm1, %v14_v7, 0.0  ;;  %v24_v11 = vsel %vm16_vm1, %v15_v8, 0.0  ;;  %v43_v12 = vld [vmem:[%s329_s1 + $0x50] sm:$0xff] }
   0x8   :  { %176 = vmatpush3.msra.mxu0 %v45_v4  ;;  %v18_v13 = vrot.slane %v17_v10, 4  ;;  %v25_v14 = vrot.slane %v24_v11, 4  ;;  %v42_v15 = vld [vmem:[%s329_s1 + $0x48] sm:$0xff]  ;;  %v41_v18 = vld [vmem:[%s329_s1 + $0x40] sm:$0xff]  ;;  %v40_v21 = vld [vmem:[%s329_s1 + $0x38] sm:$0xff]  ;;  %vm51_vm2 = vcmask 1041409  }
   0x9   :  { %177 = vmatprep.subr.mxu0 %v233_v1  ;;  %v39_v24 = vld [vmem:[%s329_s1 + $0x30] sm:$0xff]  ;;  %v38_v27 = vld [vmem:[%s329_s1 + $0x28] sm:$0xff]  ;;  %v37_v28 = vld [vmem:[%s329_s1 + $0x20] sm:$0xff]  ;;  %vm124_vm3 = vcmask 123904  }
   0xa   :  { %178 = vmatpush3.msra.mxu0 %v44_v9  ;;  %v19_v16 = vadd.f32 %v18_v13, %v17_v10  ;;  %v26_v17 = vadd.f32 %v25_v14, %v24_v11  ;;  %v36_v31 = vld [vmem:[%s329_s1 + $0x18] sm:$0xff]  ;;  %v35_v32 = vld [vmem:[%s329_s1 + $0x10] sm:$0xff]  ;;  %v34_v35 = vld [vmem:[%s329_s1 + $0x8] sm:$0xff] }
   0xb   :  { %179 = vmatprep.subr.mxu0 %v233_v1  ;;  %v33_v36 = vld [vmem:[%s329_s1] sm:$0xff]  ;;  %s235_s1 = smov [#allocation2]  }
   0xc   :  { %180 = vmatpush3.msra.mxu0 %v43_v12  ;;  %v20_v19 = vrot.slane %v19_v16, 2  ;;  %v27_v20 = vrot.slane %v26_v17, 2  ;;  %s144_s16 = sshll.u32 %s235_s1, 4  ;;  %s145_s16 = int_to_ptr.vmem [resolvable:$true] %s144_s16 }
   0xd   :  { %181 = vmatprep.subr.mxu0 %v233_v1  ;;  %s211_s17 = scalar_lea.vmem %s145_s16, 32  ;;  %p216_p1 = scmp.lt.s32.totalorder %s145_s16, %s145_s16 }
   0xe   :  { %182 = vmatpush3.msra.mxu0 %v42_v15  ;;  %v21_v22 = vadd.f32 %v20_v19, %v19_v16  ;;  %v28_v23 = vadd.f32 %v27_v20, %v26_v17  ;;  %p212_p0 = scmp.ne.s32.totalorder %s145_s16, %s211_s17  ;;  %p217_p2 = scmp.lt.s32.totalorder %s211_s17, %s211_s17 }
   0xf   :  { %183 = vmatprep.subr.mxu0 %v233_v1 }
  0x10   :  { %184 = vmatpush3.msra.mxu0 %v41_v18  ;;  %v22_v25 = vrot.slane %v21_v22, 1  ;;  %v29_v26 = vrot.slane %v28_v23, 1  ;;  %p218_p3 = por %p217_p2, %p216_p1 }
  0x11   :  { %185 = vmatprep.subr.mxu0 %v233_v1 }
  0x12   :  { %186 = vmatpush3.msra.mxu0 %v40_v21  ;;  %v23_v29 = vadd.f32 %v22_v25, %v21_v22  ;;  %v30_v30 = vadd.f32 %v29_v26, %v28_v23  ;;  %p219_p4 = pnand %p218_p3, %p212_p0 }
  0x13   :  { %187 = vmatprep.subr.mxu0 %v233_v1 }
  0x14   :  { %188 = vmatpush3.msra.mxu0 %v39_v24  ;;  %v31_v33 = vmul.f32 0.25, %v23_v29  ;;  %v32_v34 = vmul.f32 0.25, %v30_v30 }
  0x15   :  { %189 = vmatprep.subr.mxu0 %v233_v1 }
  0x16   :  { %190 = vmatpush3.msra.mxu0 %v38_v27  ;;  %v52_v37 = vsel %vm51_vm2, %v32_v34, %v31_v33 }
  0x17   :  { %191 = vmatprep.subr.mxu0 %v233_v1 }
  0x18   :  { %192 = vmatpush3.msra.mxu0 %v37_v28 }
  0x19   :  { %193 = vmatprep.subr.mxu0 %v233_v1 }
  0x1a   :  { %194 = vmatpush3.msra.mxu0 %v36_v31 }
  0x1b   :  { %195 = vmatprep.subr.mxu0 %v233_v1 }
  0x1c   :  { %196 = vmatpush3.msra.mxu0 %v35_v32 }
  0x1d   :  { %197 = vmatprep.subr.mxu0 %v233_v1 }
  0x1e   :  { %198 = vmatpush3.msra.mxu0 %v34_v35 }
  0x1f   :  { %199 = vmatprep.subr.mxu0 %v233_v1 }
  0x20   :  { %200 = vmatpush3.msra.mxu0 %v33_v36 }
  0x21   :  { %202 = vmatmul.mubr.f32.vlgmr.msra.gmra.mxu0 %v52_v37 }
  0xe1   :  { %v120_v38 = vpop.f32.mrf.mxu0 }
  0xe2   :  { %v125_v39 = vsel %vm124_vm3, %v120_v38, -inf }
  0xe3   :  { %126 = vmax.xlane.f32.xlu0 %v125_v39  ;;  %v203_v40 = vpop.f32.mrf.mxu0 }
 0x16c   :  { %v127_v41 = vpop.xlane.xlu0 %126 }
 0x16d   :  { %v128_v42 = vsub.f32 %v120_v38, %v127_v41 }
 0x16f   :  { %v129_v43 = vmul.f32 1.442695, %v128_v42 }
 0x171   :  { %207 = vpow2.f32 %v129_v43 }
 0x17e   :  { %v208_v44 = vpop.eup %207 }
 0x17f   :  { %v131_v45 = vsel %vm124_vm3, %v208_v44, 0.0 }
 0x180   :  { %132 = vadd.xlane.f32.xlu0 %v131_v45 }
 0x209   :  { %v133_v46 = vpop.xlane.xlu0 %132 }
 0x20a   :  { %209 = vlog2.f32 %v133_v46 }
 0x217   :  { %v210_v47 = vpop.eup %209 }
 0x218   :  { %v135_v48 = vmul.f32 0.6931472, %v210_v47 }
 0x21a   :  { %v136_v49 = vsub.f32 %v128_v42, %v135_v48 }
 0x21c   :  { %137 = vst.msk [vmem:[#allocation2] sm:$0x3] %vm124_vm3, %v136_v49 }
 0x21d   :  { %222 = shalt.err (!%p219_p4)
}
 0x21e   :  { %147 = dma.vmem_to_hbm [thread:$0]  %s145_s16, 32, %s330_s2, [#allocation3]  }
 0x21f   :  { %231 = dma.done.wait [#allocation3], 32  }
 0x220   :  { %232 = vsyncadd [#allocation3], 4294967264 }
 0x221   :  { %151 = vsyncpa [#allocation3], 1 }

// kernel: _lambda_.62
= control target key start
LH: loop header
LB: loop body
LE: loop exit
PB: predicated region body
PF: predicated region fallthrough
CT: control target
= control target key end

     0   :  { %v624_v35 = vmov 0.0   ;;  %vm625_vm0 = vmmov 0   ;;  %vm335_vm1 = vcmask 523264   ;;  %s777_s1 = inlined_call_operand.vmem [shape: bf16[576,128], index: 1, kind: input, shape index: {}]   ;;  %s778_s0 = inlined_call_operand.vmem [shape: bf16[8,576], index: 0, kind: input, shape index: {}]   ;;  %s779_s2 = inlined_call_operand.vmem [shape: f32[1,128], index: 2, kind: input, shape index: {}]   ;;  %s780_s3 = inlined_call_operand.vmem [shape: bf16[8,128], index: 3, kind: input, shape index: {}]   ;;  %s781_s4 = inlined_call_operand.vmem [shape: bf16[8,128], index: 4, kind: output, shape index: {}]  }
   0x1   :  { %v579_v0 = vld [vmem:[%s777_s1 + $0x78] sm:$0xff]   ;;  %v583_v4 = vld [vmem:[%s777_s1 + $0x70] sm:$0xff]   ;;  %v587_v8 = vld [vmem:[%s777_s1 + $0x68] sm:$0xff]  }
   0x2   :  { %v580_v1 = vld [vmem:[%s777_s1 + $0x38] sm:$0xff]   ;;  %516 = vmatprep.subr.bf16.mxu0 %v579_v0  ;;  %v584_v5 = vld [vmem:[%s777_s1 + $0x30] sm:$0xff]   ;;  %v588_v9 = vld [vmem:[%s777_s1 + $0x28] sm:$0xff]  }
   0x3   :  { %v581_v2 = vld [vmem:[%s777_s1 + $0xf8] sm:$0xff]   ;;  %517 = vmatpush3.bf16.msra.mxu0 %v580_v1  ;;  %v585_v6 = vld [vmem:[%s777_s1 + $0xf0] sm:$0xff]   ;;  %v589_v10 = vld [vmem:[%s777_s1 + $0xe8] sm:$0xff]  }
   0x4   :  { %v582_v3 = vld [vmem:[%s777_s1 + $0xb8] sm:$0xff]   ;;  %538 = vmatprep.subr.bf16.mxu1 %v581_v2  ;;  %518 = vmatprep.subr.bf16.mxu0 %v583_v4  ;;  %v586_v7 = vld [vmem:[%s777_s1 + $0xb0] sm:$0xff]   ;;  %v590_v11 = vld [vmem:[%s777_s1 + $0xa8] sm:$0xff]  }
   0x5   :  { %539 = vmatpush3.bf16.msra.mxu1 %v582_v3  ;;  %v591_v12 = vld [vmem:[%s777_s1 + $0x60] sm:$0xff]   ;;  %v595_v16 = vld [vmem:[%s777_s1 + $0x58] sm:$0xff]   ;;  %v599_v20 = vld [vmem:[%s777_s1 + $0x50] sm:$0xff]  }
   0x6   :  { %540 = vmatprep.subr.bf16.mxu1 %v585_v6  ;;  %v592_v13 = vld [vmem:[%s777_s1 + $0x20] sm:$0xff]   ;;  %v596_v17 = vld [vmem:[%s777_s1 + $0x18] sm:$0xff]   ;;  %v600_v21 = vld [vmem:[%s777_s1 + $0x10] sm:$0xff]  }
   0x7   :  { %519 = vmatpush3.bf16.msra.mxu0 %v584_v5  ;;  %v593_v14 = vld [vmem:[%s777_s1 + $0xe0] sm:$0xff]   ;;  %v597_v18 = vld [vmem:[%s777_s1 + $0xd8] sm:$0xff]   ;;  %v601_v22 = vld [vmem:[%s777_s1 + $0xd0] sm:$0xff]  }
   0x8   :  { %520 = vmatprep.subr.bf16.mxu0 %v587_v8  ;;  %v594_v15 = vld [vmem:[%s777_s1 + $0xa0] sm:$0xff]   ;;  %v598_v19 = vld [vmem:[%s777_s1 + $0x98] sm:$0xff]   ;;  %v602_v23 = vld [vmem:[%s777_s1 + $0x90] sm:$0xff]  }
   0x9   :  { %541 = vmatpush3.bf16.msra.mxu1 %v586_v7  ;;  %v603_v24 = vld [vmem:[%s777_s1 + $0x48] sm:$0xff]   ;;  %v607_v28 = vld [vmem:[%s777_s1 + $0x40] sm:$0xff]   ;;  %v616_v39 = vld [vmem:[%s777_s1 + $0x118] sm:$0xff]  }
   0xa   :  { %542 = vmatprep.subr.bf16.mxu1 %v589_v10  ;;  %v604_v25 = vld [vmem:[%s777_s1 + $0x8] sm:$0xff]   ;;  %v608_v29 = vld [vmem:[%s777_s1] sm:$0xff]   ;;  %v617_v40 = vld [vmem:[%s777_s1 + $0x110] sm:$0xff]  }
   0xb   :  { %521 = vmatpush3.bf16.msra.mxu0 %v588_v9  ;;  %v605_v26 = vld [vmem:[%s777_s1 + $0xc8] sm:$0xff]   ;;  %v609_v30 = vld [vmem:[%s777_s1 + $0xc0] sm:$0xff]   ;;  %v612_v43 = vld [vmem:[%s778_s0 + $0x10] ss:$0 sps:$4 sm:$0xff]  }
   0xc   :  { %522 = vmatprep.subr.bf16.mxu0 %v591_v12  ;;  %v606_v27 = vld [vmem:[%s777_s1 + $0x88] sm:$0xff]   ;;  %v20_v31 = vld [vmem:[%s778_s0] sm:$0xff] }
   0xd   :  { %543 = vmatpush3.bf16.msra.mxu1 %v590_v11  ;;  %v473_v32 = vcombine.low %v20_v31, %v20_v31  ;;  %v474_v33 = vcombine.high %v20_v31, %v20_v31  ;;  %v613_v34 = vld [vmem:[%s777_s1 + $0x80] sm:$0xff]   ;;  %v21_v36 = vld [vmem:[%s778_s0 + $0x8] sm:$0xff] }
   0xe   :  { %544 = vmatprep.subr.bf16.mxu1 %v593_v14  ;;  %v475_v37 = vcombine.low %v21_v36, %v21_v36  ;;  %v476_v38 = vcombine.high %v21_v36, %v21_v36  ;;  %v618_v41 = vld [vmem:[%s777_s1 + $0x108] sm:$0xff]   ;;  %v619_v42 = vld [vmem:[%s777_s1 + $0x100] sm:$0xff]  }
   0xf   :  { %523 = vmatpush3.bf16.msra.mxu0 %v592_v13  ;;  %371 = vmatprep.mubr.bf16.mxu0 %v474_v33  ;;  %v472_v52 = vld [vmem:[%s779_s2] ss:$0 sm:$0xff] }
  0x10   :  { %524 = vmatprep.subr.bf16.mxu0 %v595_v16  ;;  %411 = vmatprep.mubr.bf16.mxu1 %v476_v38  ;;  %v18_v1 = vld [vmem:[%s780_s3] sm:$0xf] }
  0x11   :  { %545 = vmatpush3.bf16.msra.mxu1 %v594_v15  ;;  %v19_v2 = vunpack.c.l.bf16 %v18_v1 }
  0x12   :  { %546 = vmatprep.subr.bf16.mxu1 %v597_v18 }
  0x13   :  { %525 = vmatpush3.bf16.msra.mxu0 %v596_v17 }
  0x14   :  { %526 = vmatprep.subr.bf16.mxu0 %v599_v20 }
  0x15   :  { %547 = vmatpush3.bf16.msra.mxu1 %v598_v19 }
  0x16   :  { %548 = vmatprep.subr.bf16.mxu1 %v601_v22 }
  0x17   :  { %527 = vmatpush3.bf16.msra.mxu0 %v600_v21 }
  0x18   :  { %528 = vmatprep.subr.bf16.mxu0 %v603_v24 }
  0x19   :  { %549 = vmatpush3.bf16.msra.mxu1 %v602_v23 }
  0x1a   :  { %550 = vmatprep.subr.bf16.mxu1 %v605_v26 }
  0x1b   :  { %529 = vmatpush3.bf16.msra.mxu0 %v604_v25 }
  0x1c   :  { %530 = vmatprep.subr.bf16.mxu0 %v607_v28 }
  0x1d   :  { %551 = vmatpush3.bf16.msra.mxu1 %v606_v27 }
  0x1e   :  { %552 = vmatprep.subr.bf16.mxu1 %v609_v30 }
  0x1f   :  { %531 = vmatpush3.bf16.msra.mxu0 %v608_v29 }
  0x20   :  { %565 = vmatprep.subr.bf16.mxu0 %v624_v35 }
  0x21   :  { %553 = vmatpush3.bf16.msra.mxu1 %v613_v34 }
  0x22   :  { %372 = vmatmul.mubr.bf16.vlgmr.msra.gmra.mxu0 %v473_v32 }
  0x23   :  { %566 = vmatpush3.bf16.msra.mxu0 %v616_v39  ;;  %573 = vmatprep.mubr.msk.bf16.mxu0 %vm625_vm0, %v624_v35 }
  0x24   :  { %412 = vmatmul.mubr.bf16.vlgmr.msra.gmra.mxu1 %v475_v37  ;;  %567 = vmatprep.subr.bf16.mxu0 %v624_v35 }
  0x27   :  { %568 = vmatpush3.bf16.msra.mxu0 %v617_v40 }
  0x28   :  { %569 = vmatprep.subr.bf16.mxu0 %v624_v35 }
  0x2b   :  { %570 = vmatpush3.bf16.msra.mxu0 %v618_v41 }
  0x2c   :  { %571 = vmatprep.subr.bf16.mxu0 %v624_v35 }
  0x2f   :  { %572 = vmatpush3.bf16.msra.mxu0 %v619_v42 }
  0x32   :  { %574 = vmatmul.mubr.msk.bf16.vlgmr.msra.gmra.mxu0 %vm335_vm1, %v612_v43 }
  0xe2   :  { %v532_v44 = vpop.f32.mrf.mxu0 }
  0xe4   :  { %v533_v45 = vpop.f32.mrf.mxu0  ;;  %v554_v46 = vpop.f32.mrf.mxu1 }
  0xe5   :  { %v534_v51 = vadd.f32 %v533_v45, %v532_v44 }
  0xe6   :  { %v535_v47 = vpop.f32.mrf.mxu0  ;;  %v555_v48 = vpop.f32.mrf.mxu1 }
  0xe7   :  { %v374_v54 = vadd.f32 %v534_v51, %v472_v52  ;;  %v556_v55 = vadd.f32 %v555_v48, %v554_v46 }
  0xe8   :  { %v536_v49 = vpop.f32.mrf.mxu0  ;;  %v557_v50 = vpop.f32.mrf.mxu1 }
  0xe9   :  { %v414_v56 = vadd.f32 %v556_v55, %v374_v54 }
  0xea   :  { %v558_v53 = vpop.f32.mrf.mxu1 }
  0xf2   :  { %v453_v57 = vpop.f32.mrf.mxu0 }
  0xf3   :  { %v454_v58 = vadd.f32 %v453_v57, %v414_v56 }
  0xf4   :  { %v575_v59 = vpop.f32.mrf.mxu0 }
  0xf5   :  { %v515_v60 = vmul.f32 -1.442695, %v454_v58 }
  0xf6   :  { %v456_v61 = vpop.f32.mrf.mxu0 }
  0xf7   :  { %620 = vpow2.f32 %v515_v60 }
  0xf8   :  { %v576_v62 = vpop.f32.mrf.mxu0 }
 0x104   :  { %v621_v63 = vpop.eup %620 }
 0x105   :  { %v462_v0 = vadd.f32 1.0, %v621_v63 }
 0x107   :  { %622 = vrcp.f32 %v462_v0 }
 0x114   :  { %v623_v3 = vpop.eup %622 }
 0x115   :  { %v465_v4 = vmul.f32 %v623_v3, %v19_v2 }
 0x117   :  { %v466_v5 = vpack.c.bf16 %v465_v4, %v465_v4 }
 0x119   :  { %467 = vst [vmem:[%s781_s4] sm:$0xf] %v466_v5 }

</bundles_post_ra>
